<compile_context>
chip_gen: v6e
topology: v6e:2x2x1
jax: 0.10.0
libtpu: 0.0.40
codegen_flags: <defaults>
</compile_context>

<pallas_src>
import functools
import math

import jax
import jax.numpy as jnp
from jax.experimental import pallas as pl
from jax.experimental.pallas import tpu as pltpu


# ---------------------------------------------------------------------------
# helpers
# ---------------------------------------------------------------------------
def _round_up(x, m):
    return -(-x // m) * m


def _largest_divisor(n, candidates):
    for c in candidates:
        if n >= c and n % c == 0:
            return c
    return n


def _pick_tk(k_pad):
    """K tile: whole K when small, else largest 128-multiple divisor <= 1024."""
    if k_pad <= 1024:
        return k_pad
    for cand in (1024, 896, 768, 640, 512, 384, 256, 128):
        if k_pad % cand == 0:
            return cand
    return 128


# ---------------------------------------------------------------------------
# Pallas kernels
# ---------------------------------------------------------------------------
def _gemm_bias_kernel(x_ref, w_ref, b_ref, o_ref, acc_ref, *, apply_relu):
    """bf16 GEMM (K-tiled, f32 accum) + bias (+ optional ReLU), bf16 output."""
    @pl.when(pl.program_id(2) == 0)
    def _():
        acc_ref[...] = jnp.zeros_like(acc_ref)

    acc_ref[...] += jnp.dot(x_ref[...], w_ref[...],
                            preferred_element_type=jnp.float32)

    @pl.when(pl.program_id(2) == pl.num_programs(2) - 1)
    def _():
        y = acc_ref[...] + b_ref[...]
        if apply_relu:
            y = jnp.maximum(y, 0.0)
        o_ref[...] = y.astype(o_ref.dtype)


def _gemm_bias_res_relu_kernel(x_ref, w_ref, b_ref, r_ref, o_ref, acc_ref):
    """bf16 GEMM (K-tiled, f32 accum) + bias + bf16 residual + ReLU, bf16 out."""
    @pl.when(pl.program_id(2) == 0)
    def _():
        acc_ref[...] = jnp.zeros_like(acc_ref)

    acc_ref[...] += jnp.dot(x_ref[...], w_ref[...],
                            preferred_element_type=jnp.float32)

    @pl.when(pl.program_id(2) == pl.num_programs(2) - 1)
    def _():
        y = acc_ref[...] + b_ref[...] + r_ref[...].astype(jnp.float32)
        o_ref[...] = jnp.maximum(y, 0.0).astype(o_ref.dtype)


# ---------------------------------------------------------------------------
# Glue: im2col, conv+bn wrapper, max-pool
# ---------------------------------------------------------------------------
def _im2col(x, kh, kw, stride, pad):
    """x: NHWC -> (N*Ho*Wo, kh*kw*C) patch matrix (tap-major, channel-minor)."""
    n, h, w, c = x.shape
    xp = jnp.pad(x, ((0, 0), (pad, pad), (pad, pad), (0, 0)))
    ho = (h + 2 * pad - kh) // stride + 1
    wo = (w + 2 * pad - kw) // stride + 1
    taps = []
    for i in range(kh):
        for j in range(kw):
            taps.append(
                xp[:, i:i + stride * (ho - 1) + 1:stride,
                      j:j + stride * (wo - 1) + 1:stride, :])
    cols = jnp.stack(taps, axis=3)                     # (N, Ho, Wo, kh*kw, C)
    return cols.reshape(n * ho * wo, kh * kw * c), ho, wo


def conv_bn_pallas(x, pw, *, cout, kh, kw, stride, pad, relu, residual=None):
    """Conv2d(no bias) + folded BN [+ residual] [+ ReLU] via one Pallas GEMM.

    `x` is bf16 NHWC; `pw` is a pre-processed {'w': (K_pad, Cout_pad) bf16,
    'b': (1, Cout_pad) f32} dict produced once by preprocess_params().
    """
    wmat, bias = pw['w'], pw['b']
    n, _, _, cin = x.shape
    cols, ho, wo = _im2col(x, kh, kw, stride, pad)          # bf16
    m = n * ho * wo
    k = kh * kw * cin
    k_pad, cout_pad = wmat.shape
    m_pad = _round_up(m, 16)                                 # bf16 sublane pack

    cols = jnp.pad(cols, ((0, m_pad - m), (0, k_pad - k)))

    tm = _largest_divisor(m_pad, (256, 128, 64, 32, 16))
    tn = 256 if cout_pad % 256 == 0 else 128
    if tn == 256 and (m_pad // tm) * (cout_pad // tn) < 2:
        tn = 128                                             # N-split for v7x
    tk = _pick_tk(k_pad)
    grid = (m_pad // tm, cout_pad // tn, k_pad // tk)

    x_spec = pl.BlockSpec((tm, tk), lambda i, j, kk: (i, kk))
    w_spec = pl.BlockSpec((tk, tn), lambda i, j, kk: (kk, j))
    b_spec = pl.BlockSpec((1, tn), lambda i, j, kk: (0, j))
    o_spec = pl.BlockSpec((tm, tn), lambda i, j, kk: (i, j))
    out_shape = jax.ShapeDtypeStruct((m_pad, cout_pad), jnp.bfloat16)
    cparams = pltpu.CompilerParams(
        dimension_semantics=("parallel", "parallel", "arbitrary"))

    if residual is None:
        out = pl.pallas_call(
            functools.partial(_gemm_bias_kernel, apply_relu=relu),
            out_shape=out_shape,
            grid_spec=pltpu.PrefetchScalarGridSpec(
                num_scalar_prefetch=0,
                grid=grid,
                in_specs=[x_spec, w_spec, b_spec],
                out_specs=o_spec,
                scratch_shapes=[pltpu.VMEM((tm, tn), jnp.float32)]),
            compiler_params=cparams,
        )(cols, wmat, bias)
    else:
        r = residual.reshape(m, cout).astype(jnp.bfloat16)   # stays bf16
        r = jnp.pad(r, ((0, m_pad - m), (0, cout_pad - cout)))
        r_spec = pl.BlockSpec((tm, tn), lambda i, j, kk: (i, j))
        out = pl.pallas_call(
            _gemm_bias_res_relu_kernel,
            out_shape=out_shape,
            grid_spec=pltpu.PrefetchScalarGridSpec(
                num_scalar_prefetch=0,
                grid=grid,
                in_specs=[x_spec, w_spec, b_spec, r_spec],
                out_specs=o_spec,
                scratch_shapes=[pltpu.VMEM((tm, tn), jnp.float32)]),
            compiler_params=cparams,
        )(cols, wmat, bias, r)

    if m_pad != m or cout_pad != cout:
        out = out[:m, :cout]
    return out.reshape(n, ho, wo, cout)


def maxpool_3x3_s2_p1(x):
    """MaxPool2d(kernel=3, stride=2, padding=1) on NHWC bf16 input.

    Per perf review this is a fused XLA 9-tap max over shifted strided views
    (single read of the padded activation, no (9,M,C) HBM materialization).
    """
    # TODO(synk): could be fused into the stem conv's Pallas epilogue instead.
    n, h, w, c = x.shape
    xp = jnp.pad(x, ((0, 0), (1, 1), (1, 1), (0, 0)),
                 constant_values=-jnp.inf)
    ho = (h + 2 - 3) // 2 + 1
    wo = (w + 2 - 3) // 2 + 1
    out = None
    for i in range(3):
        for j in range(3):
            v = xp[:, i:i + 2 * (ho - 1) + 1:2, j:j + 2 * (wo - 1) + 1:2, :]
            out = v if out is None else jnp.maximum(out, v)
    return out


# ---------------------------------------------------------------------------
# Parameters: init (matches the module's __init__) + one-time preprocessing
# ---------------------------------------------------------------------------
LAYER_CFG = [(64, 2, 1), (128, 2, 2), (256, 2, 2), (512, 2, 2)]  # BasicBlock [2,2,2,2]
_BN_EPS = 1e-5


def _kaiming_fan_out(key, shape):
    # nn.init.kaiming_normal_(mode='fan_out', nonlinearity='relu')
    cout, _, kh, kw = shape
    std = math.sqrt(2.0 / (cout * kh * kw))
    return std * jax.random.normal(key, shape, jnp.float32)


def _bn_fold(c):
    # eval-mode BN with gamma=1, beta=0, running_mean=0, running_var=1
    scale = jnp.full((c,), 1.0 / math.sqrt(1.0 + _BN_EPS), jnp.float32)
    bias = jnp.zeros((c,), jnp.float32)
    return scale, bias


def init_resnet18_params(key):
    keys = iter(jax.random.split(key, 64))
    params = {
        'conv1_w': _kaiming_fan_out(next(keys), (64, 3, 7, 7)),
        'bn1': _bn_fold(64),
    }
    inplanes = 64
    for li, (planes, blocks, stride) in enumerate(LAYER_CFG, start=1):
        blist = []
        for bi in range(blocks):
            st = stride if bi == 0 else 1
            blk = {
                'conv1_w': _kaiming_fan_out(next(keys), (planes, inplanes, 3, 3)),
                'bn1': _bn_fold(planes),
                'conv2_w': _kaiming_fan_out(next(keys), (planes, planes, 3, 3)),
                'bn2': _bn_fold(planes),
            }
            if st != 1 or inplanes != planes:
                blk['down_w'] = _kaiming_fan_out(next(keys), (planes, inplanes, 1, 1))
                blk['down_bn'] = _bn_fold(planes)
            blist.append(blk)
            inplanes = planes
        params[f'layer{li}'] = blist
    return params


def _prep_conv(w_oihw, scale, bias):
    """BN-scale fold + OIHW->(K,Cout) + pad to 128 multiples + bf16 cast."""
    cout, cin, kh, kw = w_oihw.shape
    k = kh * kw * cin
    k_pad = _round_up(k, 128)
    cout_pad = _round_up(cout, 128)
    wmat = jnp.transpose(w_oihw, (2, 3, 1, 0)).reshape(k, cout)
    wmat = wmat * scale.reshape(1, cout)
    wmat = jnp.pad(wmat, ((0, k_pad - k),
                          (0, cout_pad - cout))).astype(jnp.bfloat16)
    b = jnp.pad(bias.astype(jnp.float32), (0, cout_pad - cout)).reshape(1, cout_pad)
    return {'w': wmat, 'b': b}


def preprocess_params(params):
    """One-time weight preparation (hoisted out of the per-forward path)."""
    prep = {'conv1': _prep_conv(params['conv1_w'], *params['bn1'])}
    for li in range(1, 5):
        blist = []
        for blk in params[f'layer{li}']:
            p = {'conv1': _prep_conv(blk['conv1_w'], *blk['bn1']),
                 'conv2': _prep_conv(blk['conv2_w'], *blk['bn2'])}
            if 'down_w' in blk:
                p['down'] = _prep_conv(blk['down_w'], *blk['down_bn'])
            blist.append(p)
        prep[f'layer{li}'] = blist
    return prep


# ---------------------------------------------------------------------------
# Forward pass (matches ResNet.forward: returns [layer1, layer2, layer3, layer4])
# ---------------------------------------------------------------------------
def resnet_forward(prep, x_nchw):
    x = jnp.transpose(x_nchw, (0, 2, 3, 1)).astype(jnp.bfloat16)   # NCHW -> NHWC

    # stem: conv1 -> bn1 -> relu -> maxpool
    x = conv_bn_pallas(x, prep['conv1'], cout=64, kh=7, kw=7,
                       stride=2, pad=3, relu=True)
    x = maxpool_3x3_s2_p1(x)

    features = []
    inplanes = 64
    for li, (planes, blocks, stride) in enumerate(LAYER_CFG, start=1):
        blist = prep[f'layer{li}']
        for bi in range(blocks):
            st = stride if bi == 0 else 1
            blk = blist[bi]
            has_down = 'down' in blk

            out = conv_bn_pallas(x, blk['conv1'], cout=planes, kh=3, kw=3,
                                 stride=st, pad=1, relu=True)
            if has_down:
                identity = conv_bn_pallas(x, blk['down'], cout=planes, kh=1, kw=1,
                                          stride=st, pad=0, relu=False)
            else:
                identity = x
            # conv2 + bn2 + residual add + relu fused in one Pallas kernel
            x = conv_bn_pallas(out, blk['conv2'], cout=planes, kh=3, kw=3,
                               stride=1, pad=1, relu=False, residual=identity)
            inplanes = planes
        features.append(jnp.transpose(x, (0, 3, 1, 2)).astype(jnp.float32))
    return features


# ---------------------------------------------------------------------------
if __name__ == "__main__":
    key = jax.random.PRNGKey(0)
    pkey, xkey = jax.random.split(key)

    params = init_resnet18_params(pkey)
    prep = preprocess_params(params)          # one-time weight prep (not per-forward)

    # small input consistent with the module: batch=2, 3 channels, 32x32
    x = jax.random.normal(xkey, (2, 3, 32, 32), jnp.float32)

    fwd = jax.jit(resnet_forward)
    feats = fwd(prep, x)
    feats = jax.block_until_ready(feats)

    expected = [(2, 64, 8, 8), (2, 128, 4, 4), (2, 256, 2, 2), (2, 512, 1, 1)]
    assert [tuple(f.shape) for f in feats] == expected, \
        [tuple(f.shape) for f in feats]
    assert all(bool(jnp.all(jnp.isfinite(f))) for f in feats)

    print("KERNEL_OK")
</pallas_src>

<mosaic_0001>
module attributes {stable_mosaic.version = 11 : i64} {
  func.func @_gemm_bias_kernel(%arg0: i32, %arg1: i32, %arg2: i32, %arg3: memref<256x256xbf16, #tpu.memory_space<vmem>>, %arg4: memref<256x128xbf16, #tpu.memory_space<vmem>>, %arg5: memref<1x128xf32, #tpu.memory_space<vmem>>, %arg6: memref<256x128xbf16, #tpu.memory_space<vmem>>, %arg7: memref<256x128xf32, #tpu.memory_space<vmem>>) attributes {dimension_semantics = [#tpu.dimension_semantics<parallel>, #tpu.dimension_semantics<parallel>, #tpu.dimension_semantics<arbitrary>], iteration_bounds = array<i64: 2, 1, 1>, scalar_prefetch = 0 : i64, scratch_operands = 1 : i64, tpu.core_type = #tpu.core_type<tc>, window_params = [{transform_indices = @transform_0, window_bounds = array<i64: 256, 256>}, {transform_indices = @transform_1, window_bounds = array<i64: 256, 128>}, {transform_indices = @transform_2, window_bounds = array<i64: 1, 128>}, {transform_indices = @transform_3, window_bounds = array<i64: 256, 128>}]} {
    %c0_i32 = arith.constant 0 : i32
    %0 = arith.cmpi eq, %arg2, %c0_i32 : i32
    %1 = arith.extui %0 : i1 to i32
    %c0_i32_0 = arith.constant 0 : i32
    %2 = arith.cmpi ne, %1, %c0_i32_0 : i32
    scf.if %2 {
      %cst_10 = arith.constant 0.000000e+00 : f32
      %12 = vector.broadcast %cst_10 : f32 to vector<256x128xf32>
      %c0_11 = arith.constant 0 : index
      %c0_12 = arith.constant 0 : index
      %13 = vector.load %arg7[%c0_11, %c0_12] : memref<256x128xf32, #tpu.memory_space<vmem>>, vector<256x128xf32>
      tpu.vector_store %arg7[%c0_11, %c0_12], %12 {strides = array<i32>} : memref<256x128xf32, #tpu.memory_space<vmem>>, vector<256x128xf32>,
    } else {
    }
    %c0 = arith.constant 0 : index
    %c0_1 = arith.constant 0 : index
    %3 = vector.load %arg7[%c0, %c0_1] : memref<256x128xf32, #tpu.memory_space<vmem>>, vector<256x128xf32>
    %c0_2 = arith.constant 0 : index
    %c0_3 = arith.constant 0 : index
    %4 = vector.load %arg3[%c0_2, %c0_3] : memref<256x256xbf16, #tpu.memory_space<vmem>>, vector<256x256xbf16>
    %c0_4 = arith.constant 0 : index
    %c0_5 = arith.constant 0 : index
    %5 = vector.load %arg4[%c0_4, %c0_5] : memref<256x128xbf16, #tpu.memory_space<vmem>>, vector<256x128xbf16>
    %cst = arith.constant dense<0.000000e+00> : vector<256x128xf32>
    %6 = tpu.matmul %4, %5, %cst {dimension_numbers = #tpu.dot_dimension_numbers<[1], [0], [0], [1], [0, 0, 1, 1], [], []>} : vector<256x256xbf16>, vector<256x128xbf16>, vector<256x128xf32> -> vector<256x128xf32>
    %7 = arith.addf %3, %6 : vector<256x128xf32>
    %c0_6 = arith.constant 0 : index
    %c0_7 = arith.constant 0 : index
    %8 = vector.load %arg7[%c0_6, %c0_7] : memref<256x128xf32, #tpu.memory_space<vmem>>, vector<256x128xf32>
    tpu.vector_store %arg7[%c0_6, %c0_7], %7 {strides = array<i32>} : memref<256x128xf32, #tpu.memory_space<vmem>>, vector<256x128xf32>,
    %c0_i32_8 = arith.constant 0 : i32
    %9 = arith.cmpi eq, %arg2, %c0_i32_8 : i32
    %10 = arith.extui %9 : i1 to i32
    %c0_i32_9 = arith.constant 0 : i32
    %11 = arith.cmpi ne, %10, %c0_i32_9 : i32
    scf.if %11 {
      %c0_10 = arith.constant 0 : index
      %c0_11 = arith.constant 0 : index
      %12 = vector.load %arg7[%c0_10, %c0_11] : memref<256x128xf32, #tpu.memory_space<vmem>>, vector<256x128xf32>
      %c0_12 = arith.constant 0 : index
      %c0_13 = arith.constant 0 : index
      %13 = vector.load %arg5[%c0_12, %c0_13] : memref<1x128xf32, #tpu.memory_space<vmem>>, vector<1x128xf32>
      %14 = vector.broadcast %13 : vector<1x128xf32> to vector<256x128xf32>
      %15 = arith.addf %12, %14 : vector<256x128xf32>
      %cst_14 = arith.constant 0.000000e+00 : f32
      %16 = vector.broadcast %cst_14 : f32 to vector<256x128xf32>
      %17 = arith.maximumf %15, %16 : vector<256x128xf32>
      %18 = arith.truncf %17 : vector<256x128xf32> to vector<256x128xbf16>
      %c0_15 = arith.constant 0 : index
      %c0_16 = arith.constant 0 : index
      %19 = vector.load %arg6[%c0_15, %c0_16] : memref<256x128xbf16, #tpu.memory_space<vmem>>, vector<256x128xbf16>
      tpu.vector_store %arg6[%c0_15, %c0_16], %18 {strides = array<i32>} : memref<256x128xbf16, #tpu.memory_space<vmem>>, vector<256x128xbf16>,
    } else {
    }
    return
  }
  func.func @transform_0(%arg0: i32, %arg1: i32, %arg2: i32) -> (i32, i32) {
    %c0_i32 = arith.constant 0 : i32
    return %arg0, %arg2 : i32, i32
  }
  func.func @transform_1(%arg0: i32, %arg1: i32, %arg2: i32) -> (i32, i32) {
    %c0_i32 = arith.constant 0 : i32
    return %arg2, %arg1 : i32, i32
  }
  func.func @transform_2(%arg0: i32, %arg1: i32, %arg2: i32) -> (i32, i32) {
    %c0_i32 = arith.constant 0 : i32
    %c0_i32_0 = arith.constant 0 : i32
    return %c0_i32, %arg1 : i32, i32
  }
  func.func @transform_3(%arg0: i32, %arg1: i32, %arg2: i32) -> (i32, i32) {
    %c0_i32 = arith.constant 0 : i32
    return %arg0, %arg1 : i32, i32
  }
}

module attributes {stable_mosaic.version = 11 : i64} {
  func.func @_gemm_bias_kernel(%arg0: i32, %arg1: i32, %arg2: i32, %arg3: memref<128x640xbf16, #tpu.memory_space<vmem>>, %arg4: memref<640x128xbf16, #tpu.memory_space<vmem>>, %arg5: memref<1x128xf32, #tpu.memory_space<vmem>>, %arg6: memref<128x128xbf16, #tpu.memory_space<vmem>>, %arg7: memref<128x128xf32, #tpu.memory_space<vmem>>) attributes {dimension_semantics = [#tpu.dimension_semantics<parallel>, #tpu.dimension_semantics<parallel>, #tpu.dimension_semantics<arbitrary>], iteration_bounds = array<i64: 1, 1, 1>, scalar_prefetch = 0 : i64, scratch_operands = 1 : i64, tpu.core_type = #tpu.core_type<tc>, window_params = [{transform_indices = @transform_0, window_bounds = array<i64: 128, 640>}, {transform_indices = @transform_1, window_bounds = array<i64: 640, 128>}, {transform_indices = @transform_2, window_bounds = array<i64: 1, 128>}, {transform_indices = @transform_3, window_bounds = array<i64: 128, 128>}]} {
    %c0_i32 = arith.constant 0 : i32
    %0 = arith.cmpi eq, %arg2, %c0_i32 : i32
    %1 = arith.extui %0 : i1 to i32
    %c0_i32_0 = arith.constant 0 : i32
    %2 = arith.cmpi ne, %1, %c0_i32_0 : i32
    scf.if %2 {
      %cst_10 = arith.constant 0.000000e+00 : f32
      %12 = vector.broadcast %cst_10 : f32 to vector<128x128xf32>
      %c0_11 = arith.constant 0 : index
      %c0_12 = arith.constant 0 : index
      %13 = vector.load %arg7[%c0_11, %c0_12] : memref<128x128xf32, #tpu.memory_space<vmem>>, vector<128x128xf32>
      tpu.vector_store %arg7[%c0_11, %c0_12], %12 {strides = array<i32>} : memref<128x128xf32, #tpu.memory_space<vmem>>, vector<128x128xf32>,
    } else {
    }
    %c0 = arith.constant 0 : index
    %c0_1 = arith.constant 0 : index
    %3 = vector.load %arg7[%c0, %c0_1] : memref<128x128xf32, #tpu.memory_space<vmem>>, vector<128x128xf32>
    %c0_2 = arith.constant 0 : index
    %c0_3 = arith.constant 0 : index
    %4 = vector.load %arg3[%c0_2, %c0_3] : memref<128x640xbf16, #tpu.memory_space<vmem>>, vector<128x640xbf16>
    %c0_4 = arith.constant 0 : index
    %c0_5 = arith.constant 0 : index
    %5 = vector.load %arg4[%c0_4, %c0_5] : memref<640x128xbf16, #tpu.memory_space<vmem>>, vector<640x128xbf16>
    %cst = arith.constant dense<0.000000e+00> : vector<128x128xf32>
    %6 = tpu.matmul %4, %5, %cst {dimension_numbers = #tpu.dot_dimension_numbers<[1], [0], [0], [1], [0, 0, 1, 1], [], []>} : vector<128x640xbf16>, vector<640x128xbf16>, vector<128x128xf32> -> vector<128x128xf32>
    %7 = arith.addf %3, %6 : vector<128x128xf32>
    %c0_6 = arith.constant 0 : index
    %c0_7 = arith.constant 0 : index
    %8 = vector.load %arg7[%c0_6, %c0_7] : memref<128x128xf32, #tpu.memory_space<vmem>>, vector<128x128xf32>
    tpu.vector_store %arg7[%c0_6, %c0_7], %7 {strides = array<i32>} : memref<128x128xf32, #tpu.memory_space<vmem>>, vector<128x128xf32>,
    %c0_i32_8 = arith.constant 0 : i32
    %9 = arith.cmpi eq, %arg2, %c0_i32_8 : i32
    %10 = arith.extui %9 : i1 to i32
    %c0_i32_9 = arith.constant 0 : i32
    %11 = arith.cmpi ne, %10, %c0_i32_9 : i32
    scf.if %11 {
      %c0_10 = arith.constant 0 : index
      %c0_11 = arith.constant 0 : index
      %12 = vector.load %arg7[%c0_10, %c0_11] : memref<128x128xf32, #tpu.memory_space<vmem>>, vector<128x128xf32>
      %c0_12 = arith.constant 0 : index
      %c0_13 = arith.constant 0 : index
      %13 = vector.load %arg5[%c0_12, %c0_13] : memref<1x128xf32, #tpu.memory_space<vmem>>, vector<1x128xf32>
      %14 = vector.broadcast %13 : vector<1x128xf32> to vector<128x128xf32>
      %15 = arith.addf %12, %14 : vector<128x128xf32>
      %cst_14 = arith.constant 0.000000e+00 : f32
      %16 = vector.broadcast %cst_14 : f32 to vector<128x128xf32>
      %17 = arith.maximumf %15, %16 : vector<128x128xf32>
      %18 = arith.truncf %17 : vector<128x128xf32> to vector<128x128xbf16>
      %c0_15 = arith.constant 0 : index
      %c0_16 = arith.constant 0 : index
      %19 = vector.load %arg6[%c0_15, %c0_16] : memref<128x128xbf16, #tpu.memory_space<vmem>>, vector<128x128xbf16>
      tpu.vector_store %arg6[%c0_15, %c0_16], %18 {strides = array<i32>} : memref<128x128xbf16, #tpu.memory_space<vmem>>, vector<128x128xbf16>,
    } else {
    }
    return
  }
  func.func @transform_0(%arg0: i32, %arg1: i32, %arg2: i32) -> (i32, i32) {
    %c0_i32 = arith.constant 0 : i32
    return %arg0, %arg2 : i32, i32
  }
  func.func @transform_1(%arg0: i32, %arg1: i32, %arg2: i32) -> (i32, i32) {
    %c0_i32 = arith.constant 0 : i32
    return %arg2, %arg1 : i32, i32
  }
  func.func @transform_2(%arg0: i32, %arg1: i32, %arg2: i32) -> (i32, i32) {
    %c0_i32 = arith.constant 0 : i32
    %c0_i32_0 = arith.constant 0 : i32
    return %c0_i32, %arg1 : i32, i32
  }
  func.func @transform_3(%arg0: i32, %arg1: i32, %arg2: i32) -> (i32, i32) {
    %c0_i32 = arith.constant 0 : i32
    return %arg0, %arg1 : i32, i32
  }
}

module attributes {stable_mosaic.version = 11 : i64} {
  func.func @_gemm_bias_res_relu_kernel(%arg0: i32, %arg1: i32, %arg2: i32, %arg3: memref<128x640xbf16, #tpu.memory_space<vmem>>, %arg4: memref<640x128xbf16, #tpu.memory_space<vmem>>, %arg5: memref<1x128xf32, #tpu.memory_space<vmem>>, %arg6: memref<128x128xbf16, #tpu.memory_space<vmem>>, %arg7: memref<128x128xbf16, #tpu.memory_space<vmem>>, %arg8: memref<128x128xf32, #tpu.memory_space<vmem>>) attributes {dimension_semantics = [#tpu.dimension_semantics<parallel>, #tpu.dimension_semantics<parallel>, #tpu.dimension_semantics<arbitrary>], iteration_bounds = array<i64: 1, 1, 1>, scalar_prefetch = 0 : i64, scratch_operands = 1 : i64, tpu.core_type = #tpu.core_type<tc>, window_params = [{transform_indices = @transform_0, window_bounds = array<i64: 128, 640>}, {transform_indices = @transform_1, window_bounds = array<i64: 640, 128>}, {transform_indices = @transform_2, window_bounds = array<i64: 1, 128>}, {transform_indices = @transform_3, window_bounds = array<i64: 128, 128>}, {transform_indices = @transform_4, window_bounds = array<i64: 128, 128>}]} {
    %c0_i32 = arith.constant 0 : i32
    %0 = arith.cmpi eq, %arg2, %c0_i32 : i32
    %1 = arith.extui %0 : i1 to i32
    %c0_i32_0 = arith.constant 0 : i32
    %2 = arith.cmpi ne, %1, %c0_i32_0 : i32
    scf.if %2 {
      %cst_10 = arith.constant 0.000000e+00 : f32
      %12 = vector.broadcast %cst_10 : f32 to vector<128x128xf32>
      %c0_11 = arith.constant 0 : index
      %c0_12 = arith.constant 0 : index
      %13 = vector.load %arg8[%c0_11, %c0_12] : memref<128x128xf32, #tpu.memory_space<vmem>>, vector<128x128xf32>
      tpu.vector_store %arg8[%c0_11, %c0_12], %12 {strides = array<i32>} : memref<128x128xf32, #tpu.memory_space<vmem>>, vector<128x128xf32>,
    } else {
    }
    %c0 = arith.constant 0 : index
    %c0_1 = arith.constant 0 : index
    %3 = vector.load %arg8[%c0, %c0_1] : memref<128x128xf32, #tpu.memory_space<vmem>>, vector<128x128xf32>
    %c0_2 = arith.constant 0 : index
    %c0_3 = arith.constant 0 : index
    %4 = vector.load %arg3[%c0_2, %c0_3] : memref<128x640xbf16, #tpu.memory_space<vmem>>, vector<128x640xbf16>
    %c0_4 = arith.constant 0 : index
    %c0_5 = arith.constant 0 : index
    %5 = vector.load %arg4[%c0_4, %c0_5] : memref<640x128xbf16, #tpu.memory_space<vmem>>, vector<640x128xbf16>
    %cst = arith.constant dense<0.000000e+00> : vector<128x128xf32>
    %6 = tpu.matmul %4, %5, %cst {dimension_numbers = #tpu.dot_dimension_numbers<[1], [0], [0], [1], [0, 0, 1, 1], [], []>} : vector<128x640xbf16>, vector<640x128xbf16>, vector<128x128xf32> -> vector<128x128xf32>
    %7 = arith.addf %3, %6 : vector<128x128xf32>
    %c0_6 = arith.constant 0 : index
    %c0_7 = arith.constant 0 : index
    %8 = vector.load %arg8[%c0_6, %c0_7] : memref<128x128xf32, #tpu.memory_space<vmem>>, vector<128x128xf32>
    tpu.vector_store %arg8[%c0_6, %c0_7], %7 {strides = array<i32>} : memref<128x128xf32, #tpu.memory_space<vmem>>, vector<128x128xf32>,
    %c0_i32_8 = arith.constant 0 : i32
    %9 = arith.cmpi eq, %arg2, %c0_i32_8 : i32
    %10 = arith.extui %9 : i1 to i32
    %c0_i32_9 = arith.constant 0 : i32
    %11 = arith.cmpi ne, %10, %c0_i32_9 : i32
    scf.if %11 {
      %c0_10 = arith.constant 0 : index
      %c0_11 = arith.constant 0 : index
      %12 = vector.load %arg8[%c0_10, %c0_11] : memref<128x128xf32, #tpu.memory_space<vmem>>, vector<128x128xf32>
      %c0_12 = arith.constant 0 : index
      %c0_13 = arith.constant 0 : index
      %13 = vector.load %arg5[%c0_12, %c0_13] : memref<1x128xf32, #tpu.memory_space<vmem>>, vector<1x128xf32>
      %14 = vector.broadcast %13 : vector<1x128xf32> to vector<128x128xf32>
      %15 = arith.addf %12, %14 : vector<128x128xf32>
      %c0_14 = arith.constant 0 : index
      %c0_15 = arith.constant 0 : index
      %16 = vector.load %arg6[%c0_14, %c0_15] : memref<128x128xbf16, #tpu.memory_space<vmem>>, vector<128x128xbf16>
      %17 = arith.extf %16 : vector<128x128xbf16> to vector<128x128xf32>
      %18 = arith.addf %15, %17 : vector<128x128xf32>
      %cst_16 = arith.constant 0.000000e+00 : f32
      %19 = vector.broadcast %cst_16 : f32 to vector<128x128xf32>
      %20 = arith.maximumf %18, %19 : vector<128x128xf32>
      %21 = arith.truncf %20 : vector<128x128xf32> to vector<128x128xbf16>
      %c0_17 = arith.constant 0 : index
      %c0_18 = arith.constant 0 : index
      %22 = vector.load %arg7[%c0_17, %c0_18] : memref<128x128xbf16, #tpu.memory_space<vmem>>, vector<128x128xbf16>
      tpu.vector_store %arg7[%c0_17, %c0_18], %21 {strides = array<i32>} : memref<128x128xbf16, #tpu.memory_space<vmem>>, vector<128x128xbf16>,
    } else {
    }
    return
  }
  func.func @transform_0(%arg0: i32, %arg1: i32, %arg2: i32) -> (i32, i32) {
    %c0_i32 = arith.constant 0 : i32
    return %arg0, %arg2 : i32, i32
  }
  func.func @transform_1(%arg0: i32, %arg1: i32, %arg2: i32) -> (i32, i32) {
    %c0_i32 = arith.constant 0 : i32
    return %arg2, %arg1 : i32, i32
  }
  func.func @transform_2(%arg0: i32, %arg1: i32, %arg2: i32) -> (i32, i32) {
    %c0_i32 = arith.constant 0 : i32
    %c0_i32_0 = arith.constant 0 : i32
    return %c0_i32, %arg1 : i32, i32
  }
  func.func @transform_3(%arg0: i32, %arg1: i32, %arg2: i32) -> (i32, i32) {
    %c0_i32 = arith.constant 0 : i32
    return %arg0, %arg1 : i32, i32
  }
  func.func @transform_4(%arg0: i32, %arg1: i32, %arg2: i32) -> (i32, i32) {
    %c0_i32 = arith.constant 0 : i32
    return %arg0, %arg1 : i32, i32
  }
}

module attributes {stable_mosaic.version = 11 : i64} {
  func.func @_gemm_bias_kernel(%arg0: i32, %arg1: i32, %arg2: i32, %arg3: memref<32x640xbf16, #tpu.memory_space<vmem>>, %arg4: memref<640x128xbf16, #tpu.memory_space<vmem>>, %arg5: memref<1x128xf32, #tpu.memory_space<vmem>>, %arg6: memref<32x128xbf16, #tpu.memory_space<vmem>>, %arg7: memref<32x128xf32, #tpu.memory_space<vmem>>) attributes {dimension_semantics = [#tpu.dimension_semantics<parallel>, #tpu.dimension_semantics<parallel>, #tpu.dimension_semantics<arbitrary>], iteration_bounds = array<i64: 1, 1, 1>, scalar_prefetch = 0 : i64, scratch_operands = 1 : i64, tpu.core_type = #tpu.core_type<tc>, window_params = [{transform_indices = @transform_0, window_bounds = array<i64: 32, 640>}, {transform_indices = @transform_1, window_bounds = array<i64: 640, 128>}, {transform_indices = @transform_2, window_bounds = array<i64: 1, 128>}, {transform_indices = @transform_3, window_bounds = array<i64: 32, 128>}]} {
    %c0_i32 = arith.constant 0 : i32
    %0 = arith.cmpi eq, %arg2, %c0_i32 : i32
    %1 = arith.extui %0 : i1 to i32
    %c0_i32_0 = arith.constant 0 : i32
    %2 = arith.cmpi ne, %1, %c0_i32_0 : i32
    scf.if %2 {
      %cst_10 = arith.constant 0.000000e+00 : f32
      %12 = vector.broadcast %cst_10 : f32 to vector<32x128xf32>
      %c0_11 = arith.constant 0 : index
      %c0_12 = arith.constant 0 : index
      %13 = vector.load %arg7[%c0_11, %c0_12] : memref<32x128xf32, #tpu.memory_space<vmem>>, vector<32x128xf32>
      tpu.vector_store %arg7[%c0_11, %c0_12], %12 {strides = array<i32>} : memref<32x128xf32, #tpu.memory_space<vmem>>, vector<32x128xf32>,
    } else {
    }
    %c0 = arith.constant 0 : index
    %c0_1 = arith.constant 0 : index
    %3 = vector.load %arg7[%c0, %c0_1] : memref<32x128xf32, #tpu.memory_space<vmem>>, vector<32x128xf32>
    %c0_2 = arith.constant 0 : index
    %c0_3 = arith.constant 0 : index
    %4 = vector.load %arg3[%c0_2, %c0_3] : memref<32x640xbf16, #tpu.memory_space<vmem>>, vector<32x640xbf16>
    %c0_4 = arith.constant 0 : index
    %c0_5 = arith.constant 0 : index
    %5 = vector.load %arg4[%c0_4, %c0_5] : memref<640x128xbf16, #tpu.memory_space<vmem>>, vector<640x128xbf16>
    %cst = arith.constant dense<0.000000e+00> : vector<32x128xf32>
    %6 = tpu.matmul %4, %5, %cst {dimension_numbers = #tpu.dot_dimension_numbers<[1], [0], [0], [1], [0, 0, 1, 1], [], []>} : vector<32x640xbf16>, vector<640x128xbf16>, vector<32x128xf32> -> vector<32x128xf32>
    %7 = arith.addf %3, %6 : vector<32x128xf32>
    %c0_6 = arith.constant 0 : index
    %c0_7 = arith.constant 0 : index
    %8 = vector.load %arg7[%c0_6, %c0_7] : memref<32x128xf32, #tpu.memory_space<vmem>>, vector<32x128xf32>
    tpu.vector_store %arg7[%c0_6, %c0_7], %7 {strides = array<i32>} : memref<32x128xf32, #tpu.memory_space<vmem>>, vector<32x128xf32>,
    %c0_i32_8 = arith.constant 0 : i32
    %9 = arith.cmpi eq, %arg2, %c0_i32_8 : i32
    %10 = arith.extui %9 : i1 to i32
    %c0_i32_9 = arith.constant 0 : i32
    %11 = arith.cmpi ne, %10, %c0_i32_9 : i32
    scf.if %11 {
      %c0_10 = arith.constant 0 : index
      %c0_11 = arith.constant 0 : index
      %12 = vector.load %arg7[%c0_10, %c0_11] : memref<32x128xf32, #tpu.memory_space<vmem>>, vector<32x128xf32>
      %c0_12 = arith.constant 0 : index
      %c0_13 = arith.constant 0 : index
      %13 = vector.load %arg5[%c0_12, %c0_13] : memref<1x128xf32, #tpu.memory_space<vmem>>, vector<1x128xf32>
      %14 = vector.broadcast %13 : vector<1x128xf32> to vector<32x128xf32>
      %15 = arith.addf %12, %14 : vector<32x128xf32>
      %cst_14 = arith.constant 0.000000e+00 : f32
      %16 = vector.broadcast %cst_14 : f32 to vector<32x128xf32>
      %17 = arith.maximumf %15, %16 : vector<32x128xf32>
      %18 = arith.truncf %17 : vector<32x128xf32> to vector<32x128xbf16>
      %c0_15 = arith.constant 0 : index
      %c0_16 = arith.constant 0 : index
      %19 = vector.load %arg6[%c0_15, %c0_16] : memref<32x128xbf16, #tpu.memory_space<vmem>>, vector<32x128xbf16>
      tpu.vector_store %arg6[%c0_15, %c0_16], %18 {strides = array<i32>} : memref<32x128xbf16, #tpu.memory_space<vmem>>, vector<32x128xbf16>,
    } else {
    }
    return
  }
  func.func @transform_0(%arg0: i32, %arg1: i32, %arg2: i32) -> (i32, i32) {
    %c0_i32 = arith.constant 0 : i32
    return %arg0, %arg2 : i32, i32
  }
  func.func @transform_1(%arg0: i32, %arg1: i32, %arg2: i32) -> (i32, i32) {
    %c0_i32 = arith.constant 0 : i32
    return %arg2, %arg1 : i32, i32
  }
  func.func @transform_2(%arg0: i32, %arg1: i32, %arg2: i32) -> (i32, i32) {
    %c0_i32 = arith.constant 0 : i32
    %c0_i32_0 = arith.constant 0 : i32
    return %c0_i32, %arg1 : i32, i32
  }
  func.func @transform_3(%arg0: i32, %arg1: i32, %arg2: i32) -> (i32, i32) {
    %c0_i32 = arith.constant 0 : i32
    return %arg0, %arg1 : i32, i32
  }
}

module attributes {stable_mosaic.version = 11 : i64} {
  func.func @_gemm_bias_kernel(%arg0: i32, %arg1: i32, %arg2: i32, %arg3: memref<32x128xbf16, #tpu.memory_space<vmem>>, %arg4: memref<128x128xbf16, #tpu.memory_space<vmem>>, %arg5: memref<1x128xf32, #tpu.memory_space<vmem>>, %arg6: memref<32x128xbf16, #tpu.memory_space<vmem>>, %arg7: memref<32x128xf32, #tpu.memory_space<vmem>>) attributes {dimension_semantics = [#tpu.dimension_semantics<parallel>, #tpu.dimension_semantics<parallel>, #tpu.dimension_semantics<arbitrary>], iteration_bounds = array<i64: 1, 1, 1>, scalar_prefetch = 0 : i64, scratch_operands = 1 : i64, tpu.core_type = #tpu.core_type<tc>, window_params = [{transform_indices = @transform_0, window_bounds = array<i64: 32, 128>}, {transform_indices = @transform_1, window_bounds = array<i64: 128, 128>}, {transform_indices = @transform_2, window_bounds = array<i64: 1, 128>}, {transform_indices = @transform_3, window_bounds = array<i64: 32, 128>}]} {
    %c0_i32 = arith.constant 0 : i32
    %0 = arith.cmpi eq, %arg2, %c0_i32 : i32
    %1 = arith.extui %0 : i1 to i32
    %c0_i32_0 = arith.constant 0 : i32
    %2 = arith.cmpi ne, %1, %c0_i32_0 : i32
    scf.if %2 {
      %cst_10 = arith.constant 0.000000e+00 : f32
      %12 = vector.broadcast %cst_10 : f32 to vector<32x128xf32>
      %c0_11 = arith.constant 0 : index
      %c0_12 = arith.constant 0 : index
      %13 = vector.load %arg7[%c0_11, %c0_12] : memref<32x128xf32, #tpu.memory_space<vmem>>, vector<32x128xf32>
      tpu.vector_store %arg7[%c0_11, %c0_12], %12 {strides = array<i32>} : memref<32x128xf32, #tpu.memory_space<vmem>>, vector<32x128xf32>,
    } else {
    }
    %c0 = arith.constant 0 : index
    %c0_1 = arith.constant 0 : index
    %3 = vector.load %arg7[%c0, %c0_1] : memref<32x128xf32, #tpu.memory_space<vmem>>, vector<32x128xf32>
    %c0_2 = arith.constant 0 : index
    %c0_3 = arith.constant 0 : index
    %4 = vector.load %arg3[%c0_2, %c0_3] : memref<32x128xbf16, #tpu.memory_space<vmem>>, vector<32x128xbf16>
    %c0_4 = arith.constant 0 : index
    %c0_5 = arith.constant 0 : index
    %5 = vector.load %arg4[%c0_4, %c0_5] : memref<128x128xbf16, #tpu.memory_space<vmem>>, vector<128x128xbf16>
    %cst = arith.constant dense<0.000000e+00> : vector<32x128xf32>
    %6 = tpu.matmul %4, %5, %cst {dimension_numbers = #tpu.dot_dimension_numbers<[1], [0], [0], [1], [0, 0, 1, 1], [], []>} : vector<32x128xbf16>, vector<128x128xbf16>, vector<32x128xf32> -> vector<32x128xf32>
    %7 = arith.addf %3, %6 : vector<32x128xf32>
    %c0_6 = arith.constant 0 : index
    %c0_7 = arith.constant 0 : index
    %8 = vector.load %arg7[%c0_6, %c0_7] : memref<32x128xf32, #tpu.memory_space<vmem>>, vector<32x128xf32>
    tpu.vector_store %arg7[%c0_6, %c0_7], %7 {strides = array<i32>} : memref<32x128xf32, #tpu.memory_space<vmem>>, vector<32x128xf32>,
    %c0_i32_8 = arith.constant 0 : i32
    %9 = arith.cmpi eq, %arg2, %c0_i32_8 : i32
    %10 = arith.extui %9 : i1 to i32
    %c0_i32_9 = arith.constant 0 : i32
    %11 = arith.cmpi ne, %10, %c0_i32_9 : i32
    scf.if %11 {
      %c0_10 = arith.constant 0 : index
      %c0_11 = arith.constant 0 : index
      %12 = vector.load %arg7[%c0_10, %c0_11] : memref<32x128xf32, #tpu.memory_space<vmem>>, vector<32x128xf32>
      %c0_12 = arith.constant 0 : index
      %c0_13 = arith.constant 0 : index
      %13 = vector.load %arg5[%c0_12, %c0_13] : memref<1x128xf32, #tpu.memory_space<vmem>>, vector<1x128xf32>
      %14 = vector.broadcast %13 : vector<1x128xf32> to vector<32x128xf32>
      %15 = arith.addf %12, %14 : vector<32x128xf32>
      %16 = arith.truncf %15 : vector<32x128xf32> to vector<32x128xbf16>
      %c0_14 = arith.constant 0 : index
      %c0_15 = arith.constant 0 : index
      %17 = vector.load %arg6[%c0_14, %c0_15] : memref<32x128xbf16, #tpu.memory_space<vmem>>, vector<32x128xbf16>
      tpu.vector_store %arg6[%c0_14, %c0_15], %16 {strides = array<i32>} : memref<32x128xbf16, #tpu.memory_space<vmem>>, vector<32x128xbf16>,
    } else {
    }
    return
  }
  func.func @transform_0(%arg0: i32, %arg1: i32, %arg2: i32) -> (i32, i32) {
    %c0_i32 = arith.constant 0 : i32
    return %arg0, %arg2 : i32, i32
  }
  func.func @transform_1(%arg0: i32, %arg1: i32, %arg2: i32) -> (i32, i32) {
    %c0_i32 = arith.constant 0 : i32
    return %arg2, %arg1 : i32, i32
  }
  func.func @transform_2(%arg0: i32, %arg1: i32, %arg2: i32) -> (i32, i32) {
    %c0_i32 = arith.constant 0 : i32
    %c0_i32_0 = arith.constant 0 : i32
    return %c0_i32, %arg1 : i32, i32
  }
  func.func @transform_3(%arg0: i32, %arg1: i32, %arg2: i32) -> (i32, i32) {
    %c0_i32 = arith.constant 0 : i32
    return %arg0, %arg1 : i32, i32
  }
}

module attributes {stable_mosaic.version = 11 : i64} {
  func.func @_gemm_bias_kernel(%arg0: i32, %arg1: i32, %arg2: i32, %arg3: memref<32x384xbf16, #tpu.memory_space<vmem>>, %arg4: memref<384x128xbf16, #tpu.memory_space<vmem>>, %arg5: memref<1x128xf32, #tpu.memory_space<vmem>>, %arg6: memref<32x128xbf16, #tpu.memory_space<vmem>>, %arg7: memref<32x128xf32, #tpu.memory_space<vmem>>) attributes {dimension_semantics = [#tpu.dimension_semantics<parallel>, #tpu.dimension_semantics<parallel>, #tpu.dimension_semantics<arbitrary>], iteration_bounds = array<i64: 1, 1, 3>, scalar_prefetch = 0 : i64, scratch_operands = 1 : i64, tpu.core_type = #tpu.core_type<tc>, window_params = [{transform_indices = @transform_0, window_bounds = array<i64: 32, 384>}, {transform_indices = @transform_1, window_bounds = array<i64: 384, 128>}, {transform_indices = @transform_2, window_bounds = array<i64: 1, 128>}, {transform_indices = @transform_3, window_bounds = array<i64: 32, 128>}]} {
    %c0_i32 = arith.constant 0 : i32
    %0 = arith.cmpi eq, %arg2, %c0_i32 : i32
    %1 = arith.extui %0 : i1 to i32
    %c0_i32_0 = arith.constant 0 : i32
    %2 = arith.cmpi ne, %1, %c0_i32_0 : i32
    scf.if %2 {
      %cst_9 = arith.constant 0.000000e+00 : f32
      %12 = vector.broadcast %cst_9 : f32 to vector<32x128xf32>
      %c0_10 = arith.constant 0 : index
      %c0_11 = arith.constant 0 : index
      %13 = vector.load %arg7[%c0_10, %c0_11] : memref<32x128xf32, #tpu.memory_space<vmem>>, vector<32x128xf32>
      tpu.vector_store %arg7[%c0_10, %c0_11], %12 {strides = array<i32>} : memref<32x128xf32, #tpu.memory_space<vmem>>, vector<32x128xf32>,
    } else {
    }
    %c0 = arith.constant 0 : index
    %c0_1 = arith.constant 0 : index
    %3 = vector.load %arg7[%c0, %c0_1] : memref<32x128xf32, #tpu.memory_space<vmem>>, vector<32x128xf32>
    %c0_2 = arith.constant 0 : index
    %c0_3 = arith.constant 0 : index
    %4 = vector.load %arg3[%c0_2, %c0_3] : memref<32x384xbf16, #tpu.memory_space<vmem>>, vector<32x384xbf16>
    %c0_4 = arith.constant 0 : index
    %c0_5 = arith.constant 0 : index
    %5 = vector.load %arg4[%c0_4, %c0_5] : memref<384x128xbf16, #tpu.memory_space<vmem>>, vector<384x128xbf16>
    %cst = arith.constant dense<0.000000e+00> : vector<32x128xf32>
    %6 = tpu.matmul %4, %5, %cst {dimension_numbers = #tpu.dot_dimension_numbers<[1], [0], [0], [1], [0, 0, 1, 1], [], []>} : vector<32x384xbf16>, vector<384x128xbf16>, vector<32x128xf32> -> vector<32x128xf32>
    %7 = arith.addf %3, %6 : vector<32x128xf32>
    %c0_6 = arith.constant 0 : index
    %c0_7 = arith.constant 0 : index
    %8 = vector.load %arg7[%c0_6, %c0_7] : memref<32x128xf32, #tpu.memory_space<vmem>>, vector<32x128xf32>
    tpu.vector_store %arg7[%c0_6, %c0_7], %7 {strides = array<i32>} : memref<32x128xf32, #tpu.memory_space<vmem>>, vector<32x128xf32>,
    %c2_i32 = arith.constant 2 : i32
    %9 = arith.cmpi eq, %arg2, %c2_i32 : i32
    %10 = arith.extui %9 : i1 to i32
    %c0_i32_8 = arith.constant 0 : i32
    %11 = arith.cmpi ne, %10, %c0_i32_8 : i32
    scf.if %11 {
      %c0_9 = arith.constant 0 : index
      %c0_10 = arith.constant 0 : index
      %12 = vector.load %arg7[%c0_9, %c0_10] : memref<32x128xf32, #tpu.memory_space<vmem>>, vector<32x128xf32>
      %c0_11 = arith.constant 0 : index
      %c0_12 = arith.constant 0 : index
      %13 = vector.load %arg5[%c0_11, %c0_12] : memref<1x128xf32, #tpu.memory_space<vmem>>, vector<1x128xf32>
      %14 = vector.broadcast %13 : vector<1x128xf32> to vector<32x128xf32>
      %15 = arith.addf %12, %14 : vector<32x128xf32>
      %cst_13 = arith.constant 0.000000e+00 : f32
      %16 = vector.broadcast %cst_13 : f32 to vector<32x128xf32>
      %17 = arith.maximumf %15, %16 : vector<32x128xf32>
      %18 = arith.truncf %17 : vector<32x128xf32> to vector<32x128xbf16>
      %c0_14 = arith.constant 0 : index
      %c0_15 = arith.constant 0 : index
      %19 = vector.load %arg6[%c0_14, %c0_15] : memref<32x128xbf16, #tpu.memory_space<vmem>>, vector<32x128xbf16>
      tpu.vector_store %arg6[%c0_14, %c0_15], %18 {strides = array<i32>} : memref<32x128xbf16, #tpu.memory_space<vmem>>, vector<32x128xbf16>,
    } else {
    }
    return
  }
  func.func @transform_0(%arg0: i32, %arg1: i32, %arg2: i32) -> (i32, i32) {
    %c0_i32 = arith.constant 0 : i32
    return %arg0, %arg2 : i32, i32
  }
  func.func @transform_1(%arg0: i32, %arg1: i32, %arg2: i32) -> (i32, i32) {
    %c0_i32 = arith.constant 0 : i32
    return %arg2, %arg1 : i32, i32
  }
  func.func @transform_2(%arg0: i32, %arg1: i32, %arg2: i32) -> (i32, i32) {
    %c0_i32 = arith.constant 0 : i32
    %c0_i32_0 = arith.constant 0 : i32
    return %c0_i32, %arg1 : i32, i32
  }
  func.func @transform_3(%arg0: i32, %arg1: i32, %arg2: i32) -> (i32, i32) {
    %c0_i32 = arith.constant 0 : i32
    return %arg0, %arg1 : i32, i32
  }
}

module attributes {stable_mosaic.version = 11 : i64} {
  func.func @_gemm_bias_res_relu_kernel(%arg0: i32, %arg1: i32, %arg2: i32, %arg3: memref<32x384xbf16, #tpu.memory_space<vmem>>, %arg4: memref<384x128xbf16, #tpu.memory_space<vmem>>, %arg5: memref<1x128xf32, #tpu.memory_space<vmem>>, %arg6: memref<32x128xbf16, #tpu.memory_space<vmem>>, %arg7: memref<32x128xbf16, #tpu.memory_space<vmem>>, %arg8: memref<32x128xf32, #tpu.memory_space<vmem>>) attributes {dimension_semantics = [#tpu.dimension_semantics<parallel>, #tpu.dimension_semantics<parallel>, #tpu.dimension_semantics<arbitrary>], iteration_bounds = array<i64: 1, 1, 3>, scalar_prefetch = 0 : i64, scratch_operands = 1 : i64, tpu.core_type = #tpu.core_type<tc>, window_params = [{transform_indices = @transform_0, window_bounds = array<i64: 32, 384>}, {transform_indices = @transform_1, window_bounds = array<i64: 384, 128>}, {transform_indices = @transform_2, window_bounds = array<i64: 1, 128>}, {transform_indices = @transform_3, window_bounds = array<i64: 32, 128>}, {transform_indices = @transform_4, window_bounds = array<i64: 32, 128>}]} {
    %c0_i32 = arith.constant 0 : i32
    %0 = arith.cmpi eq, %arg2, %c0_i32 : i32
    %1 = arith.extui %0 : i1 to i32
    %c0_i32_0 = arith.constant 0 : i32
    %2 = arith.cmpi ne, %1, %c0_i32_0 : i32
    scf.if %2 {
      %cst_9 = arith.constant 0.000000e+00 : f32
      %12 = vector.broadcast %cst_9 : f32 to vector<32x128xf32>
      %c0_10 = arith.constant 0 : index
      %c0_11 = arith.constant 0 : index
      %13 = vector.load %arg8[%c0_10, %c0_11] : memref<32x128xf32, #tpu.memory_space<vmem>>, vector<32x128xf32>
      tpu.vector_store %arg8[%c0_10, %c0_11], %12 {strides = array<i32>} : memref<32x128xf32, #tpu.memory_space<vmem>>, vector<32x128xf32>,
    } else {
    }
    %c0 = arith.constant 0 : index
    %c0_1 = arith.constant 0 : index
    %3 = vector.load %arg8[%c0, %c0_1] : memref<32x128xf32, #tpu.memory_space<vmem>>, vector<32x128xf32>
    %c0_2 = arith.constant 0 : index
    %c0_3 = arith.constant 0 : index
    %4 = vector.load %arg3[%c0_2, %c0_3] : memref<32x384xbf16, #tpu.memory_space<vmem>>, vector<32x384xbf16>
    %c0_4 = arith.constant 0 : index
    %c0_5 = arith.constant 0 : index
    %5 = vector.load %arg4[%c0_4, %c0_5] : memref<384x128xbf16, #tpu.memory_space<vmem>>, vector<384x128xbf16>
    %cst = arith.constant dense<0.000000e+00> : vector<32x128xf32>
    %6 = tpu.matmul %4, %5, %cst {dimension_numbers = #tpu.dot_dimension_numbers<[1], [0], [0], [1], [0, 0, 1, 1], [], []>} : vector<32x384xbf16>, vector<384x128xbf16>, vector<32x128xf32> -> vector<32x128xf32>
    %7 = arith.addf %3, %6 : vector<32x128xf32>
    %c0_6 = arith.constant 0 : index
    %c0_7 = arith.constant 0 : index
    %8 = vector.load %arg8[%c0_6, %c0_7] : memref<32x128xf32, #tpu.memory_space<vmem>>, vector<32x128xf32>
    tpu.vector_store %arg8[%c0_6, %c0_7], %7 {strides = array<i32>} : memref<32x128xf32, #tpu.memory_space<vmem>>, vector<32x128xf32>,
    %c2_i32 = arith.constant 2 : i32
    %9 = arith.cmpi eq, %arg2, %c2_i32 : i32
    %10 = arith.extui %9 : i1 to i32
    %c0_i32_8 = arith.constant 0 : i32
    %11 = arith.cmpi ne, %10, %c0_i32_8 : i32
    scf.if %11 {
      %c0_9 = arith.constant 0 : index
      %c0_10 = arith.constant 0 : index
      %12 = vector.load %arg8[%c0_9, %c0_10] : memref<32x128xf32, #tpu.memory_space<vmem>>, vector<32x128xf32>
      %c0_11 = arith.constant 0 : index
      %c0_12 = arith.constant 0 : index
      %13 = vector.load %arg5[%c0_11, %c0_12] : memref<1x128xf32, #tpu.memory_space<vmem>>, vector<1x128xf32>
      %14 = vector.broadcast %13 : vector<1x128xf32> to vector<32x128xf32>
      %15 = arith.addf %12, %14 : vector<32x128xf32>
      %c0_13 = arith.constant 0 : index
      %c0_14 = arith.constant 0 : index
      %16 = vector.load %arg6[%c0_13, %c0_14] : memref<32x128xbf16, #tpu.memory_space<vmem>>, vector<32x128xbf16>
      %17 = arith.extf %16 : vector<32x128xbf16> to vector<32x128xf32>
      %18 = arith.addf %15, %17 : vector<32x128xf32>
      %cst_15 = arith.constant 0.000000e+00 : f32
      %19 = vector.broadcast %cst_15 : f32 to vector<32x128xf32>
      %20 = arith.maximumf %18, %19 : vector<32x128xf32>
      %21 = arith.truncf %20 : vector<32x128xf32> to vector<32x128xbf16>
      %c0_16 = arith.constant 0 : index
      %c0_17 = arith.constant 0 : index
      %22 = vector.load %arg7[%c0_16, %c0_17] : memref<32x128xbf16, #tpu.memory_space<vmem>>, vector<32x128xbf16>
      tpu.vector_store %arg7[%c0_16, %c0_17], %21 {strides = array<i32>} : memref<32x128xbf16, #tpu.memory_space<vmem>>, vector<32x128xbf16>,
    } else {
    }
    return
  }
  func.func @transform_0(%arg0: i32, %arg1: i32, %arg2: i32) -> (i32, i32) {
    %c0_i32 = arith.constant 0 : i32
    return %arg0, %arg2 : i32, i32
  }
  func.func @transform_1(%arg0: i32, %arg1: i32, %arg2: i32) -> (i32, i32) {
    %c0_i32 = arith.constant 0 : i32
    return %arg2, %arg1 : i32, i32
  }
  func.func @transform_2(%arg0: i32, %arg1: i32, %arg2: i32) -> (i32, i32) {
    %c0_i32 = arith.constant 0 : i32
    %c0_i32_0 = arith.constant 0 : i32
    return %c0_i32, %arg1 : i32, i32
  }
  func.func @transform_3(%arg0: i32, %arg1: i32, %arg2: i32) -> (i32, i32) {
    %c0_i32 = arith.constant 0 : i32
    return %arg0, %arg1 : i32, i32
  }
  func.func @transform_4(%arg0: i32, %arg1: i32, %arg2: i32) -> (i32, i32) {
    %c0_i32 = arith.constant 0 : i32
    return %arg0, %arg1 : i32, i32
  }
}

module attributes {stable_mosaic.version = 11 : i64} {
  func.func @_gemm_bias_kernel(%arg0: i32, %arg1: i32, %arg2: i32, %arg3: memref<16x384xbf16, #tpu.memory_space<vmem>>, %arg4: memref<384x128xbf16, #tpu.memory_space<vmem>>, %arg5: memref<1x128xf32, #tpu.memory_space<vmem>>, %arg6: memref<16x128xbf16, #tpu.memory_space<vmem>>, %arg7: memref<16x128xf32, #tpu.memory_space<vmem>>) attributes {dimension_semantics = [#tpu.dimension_semantics<parallel>, #tpu.dimension_semantics<parallel>, #tpu.dimension_semantics<arbitrary>], iteration_bounds = array<i64: 1, 2, 3>, scalar_prefetch = 0 : i64, scratch_operands = 1 : i64, tpu.core_type = #tpu.core_type<tc>, window_params = [{transform_indices = @transform_0, window_bounds = array<i64: 16, 384>}, {transform_indices = @transform_1, window_bounds = array<i64: 384, 128>}, {transform_indices = @transform_2, window_bounds = array<i64: 1, 128>}, {transform_indices = @transform_3, window_bounds = array<i64: 16, 128>}]} {
    %c0_i32 = arith.constant 0 : i32
    %0 = arith.cmpi eq, %arg2, %c0_i32 : i32
    %1 = arith.extui %0 : i1 to i32
    %c0_i32_0 = arith.constant 0 : i32
    %2 = arith.cmpi ne, %1, %c0_i32_0 : i32
    scf.if %2 {
      %cst_9 = arith.constant 0.000000e+00 : f32
      %12 = vector.broadcast %cst_9 : f32 to vector<16x128xf32>
      %c0_10 = arith.constant 0 : index
      %c0_11 = arith.constant 0 : index
      %13 = vector.load %arg7[%c0_10, %c0_11] : memref<16x128xf32, #tpu.memory_space<vmem>>, vector<16x128xf32>
      tpu.vector_store %arg7[%c0_10, %c0_11], %12 {strides = array<i32>} : memref<16x128xf32, #tpu.memory_space<vmem>>, vector<16x128xf32>,
    } else {
    }
    %c0 = arith.constant 0 : index
    %c0_1 = arith.constant 0 : index
    %3 = vector.load %arg7[%c0, %c0_1] : memref<16x128xf32, #tpu.memory_space<vmem>>, vector<16x128xf32>
    %c0_2 = arith.constant 0 : index
    %c0_3 = arith.constant 0 : index
    %4 = vector.load %arg3[%c0_2, %c0_3] : memref<16x384xbf16, #tpu.memory_space<vmem>>, vector<16x384xbf16>
    %c0_4 = arith.constant 0 : index
    %c0_5 = arith.constant 0 : index
    %5 = vector.load %arg4[%c0_4, %c0_5] : memref<384x128xbf16, #tpu.memory_space<vmem>>, vector<384x128xbf16>
    %cst = arith.constant dense<0.000000e+00> : vector<16x128xf32>
    %6 = tpu.matmul %4, %5, %cst {dimension_numbers = #tpu.dot_dimension_numbers<[1], [0], [0], [1], [0, 0, 1, 1], [], []>} : vector<16x384xbf16>, vector<384x128xbf16>, vector<16x128xf32> -> vector<16x128xf32>
    %7 = arith.addf %3, %6 : vector<16x128xf32>
    %c0_6 = arith.constant 0 : index
    %c0_7 = arith.constant 0 : index
    %8 = vector.load %arg7[%c0_6, %c0_7] : memref<16x128xf32, #tpu.memory_space<vmem>>, vector<16x128xf32>
    tpu.vector_store %arg7[%c0_6, %c0_7], %7 {strides = array<i32>} : memref<16x128xf32, #tpu.memory_space<vmem>>, vector<16x128xf32>,
    %c2_i32 = arith.constant 2 : i32
    %9 = arith.cmpi eq, %arg2, %c2_i32 : i32
    %10 = arith.extui %9 : i1 to i32
    %c0_i32_8 = arith.constant 0 : i32
    %11 = arith.cmpi ne, %10, %c0_i32_8 : i32
    scf.if %11 {
      %c0_9 = arith.constant 0 : index
      %c0_10 = arith.constant 0 : index
      %12 = vector.load %arg7[%c0_9, %c0_10] : memref<16x128xf32, #tpu.memory_space<vmem>>, vector<16x128xf32>
      %c0_11 = arith.constant 0 : index
      %c0_12 = arith.constant 0 : index
      %13 = vector.load %arg5[%c0_11, %c0_12] : memref<1x128xf32, #tpu.memory_space<vmem>>, vector<1x128xf32>
      %14 = vector.broadcast %13 : vector<1x128xf32> to vector<16x128xf32>
      %15 = arith.addf %12, %14 : vector<16x128xf32>
      %cst_13 = arith.constant 0.000000e+00 : f32
      %16 = vector.broadcast %cst_13 : f32 to vector<16x128xf32>
      %17 = arith.maximumf %15, %16 : vector<16x128xf32>
      %18 = arith.truncf %17 : vector<16x128xf32> to vector<16x128xbf16>
      %c0_14 = arith.constant 0 : index
      %c0_15 = arith.constant 0 : index
      %19 = vector.load %arg6[%c0_14, %c0_15] : memref<16x128xbf16, #tpu.memory_space<vmem>>, vector<16x128xbf16>
      tpu.vector_store %arg6[%c0_14, %c0_15], %18 {strides = array<i32>} : memref<16x128xbf16, #tpu.memory_space<vmem>>, vector<16x128xbf16>,
    } else {
    }
    return
  }
  func.func @transform_0(%arg0: i32, %arg1: i32, %arg2: i32) -> (i32, i32) {
    %c0_i32 = arith.constant 0 : i32
    return %arg0, %arg2 : i32, i32
  }
  func.func @transform_1(%arg0: i32, %arg1: i32, %arg2: i32) -> (i32, i32) {
    %c0_i32 = arith.constant 0 : i32
    return %arg2, %arg1 : i32, i32
  }
  func.func @transform_2(%arg0: i32, %arg1: i32, %arg2: i32) -> (i32, i32) {
    %c0_i32 = arith.constant 0 : i32
    %c0_i32_0 = arith.constant 0 : i32
    return %c0_i32, %arg1 : i32, i32
  }
  func.func @transform_3(%arg0: i32, %arg1: i32, %arg2: i32) -> (i32, i32) {
    %c0_i32 = arith.constant 0 : i32
    return %arg0, %arg1 : i32, i32
  }
}

module attributes {stable_mosaic.version = 11 : i64} {
  func.func @_gemm_bias_kernel(%arg0: i32, %arg1: i32, %arg2: i32, %arg3: memref<16x128xbf16, #tpu.memory_space<vmem>>, %arg4: memref<128x128xbf16, #tpu.memory_space<vmem>>, %arg5: memref<1x128xf32, #tpu.memory_space<vmem>>, %arg6: memref<16x128xbf16, #tpu.memory_space<vmem>>, %arg7: memref<16x128xf32, #tpu.memory_space<vmem>>) attributes {dimension_semantics = [#tpu.dimension_semantics<parallel>, #tpu.dimension_semantics<parallel>, #tpu.dimension_semantics<arbitrary>], iteration_bounds = array<i64: 1, 2, 1>, scalar_prefetch = 0 : i64, scratch_operands = 1 : i64, tpu.core_type = #tpu.core_type<tc>, window_params = [{transform_indices = @transform_0, window_bounds = array<i64: 16, 128>}, {transform_indices = @transform_1, window_bounds = array<i64: 128, 128>}, {transform_indices = @transform_2, window_bounds = array<i64: 1, 128>}, {transform_indices = @transform_3, window_bounds = array<i64: 16, 128>}]} {
    %c0_i32 = arith.constant 0 : i32
    %0 = arith.cmpi eq, %arg2, %c0_i32 : i32
    %1 = arith.extui %0 : i1 to i32
    %c0_i32_0 = arith.constant 0 : i32
    %2 = arith.cmpi ne, %1, %c0_i32_0 : i32
    scf.if %2 {
      %cst_10 = arith.constant 0.000000e+00 : f32
      %12 = vector.broadcast %cst_10 : f32 to vector<16x128xf32>
      %c0_11 = arith.constant 0 : index
      %c0_12 = arith.constant 0 : index
      %13 = vector.load %arg7[%c0_11, %c0_12] : memref<16x128xf32, #tpu.memory_space<vmem>>, vector<16x128xf32>
      tpu.vector_store %arg7[%c0_11, %c0_12], %12 {strides = array<i32>} : memref<16x128xf32, #tpu.memory_space<vmem>>, vector<16x128xf32>,
    } else {
    }
    %c0 = arith.constant 0 : index
    %c0_1 = arith.constant 0 : index
    %3 = vector.load %arg7[%c0, %c0_1] : memref<16x128xf32, #tpu.memory_space<vmem>>, vector<16x128xf32>
    %c0_2 = arith.constant 0 : index
    %c0_3 = arith.constant 0 : index
    %4 = vector.load %arg3[%c0_2, %c0_3] : memref<16x128xbf16, #tpu.memory_space<vmem>>, vector<16x128xbf16>
    %c0_4 = arith.constant 0 : index
    %c0_5 = arith.constant 0 : index
    %5 = vector.load %arg4[%c0_4, %c0_5] : memref<128x128xbf16, #tpu.memory_space<vmem>>, vector<128x128xbf16>
    %cst = arith.constant dense<0.000000e+00> : vector<16x128xf32>
    %6 = tpu.matmul %4, %5, %cst {dimension_numbers = #tpu.dot_dimension_numbers<[1], [0], [0], [1], [0, 0, 1, 1], [], []>} : vector<16x128xbf16>, vector<128x128xbf16>, vector<16x128xf32> -> vector<16x128xf32>
    %7 = arith.addf %3, %6 : vector<16x128xf32>
    %c0_6 = arith.constant 0 : index
    %c0_7 = arith.constant 0 : index
    %8 = vector.load %arg7[%c0_6, %c0_7] : memref<16x128xf32, #tpu.memory_space<vmem>>, vector<16x128xf32>
    tpu.vector_store %arg7[%c0_6, %c0_7], %7 {strides = array<i32>} : memref<16x128xf32, #tpu.memory_space<vmem>>, vector<16x128xf32>,
    %c0_i32_8 = arith.constant 0 : i32
    %9 = arith.cmpi eq, %arg2, %c0_i32_8 : i32
    %10 = arith.extui %9 : i1 to i32
    %c0_i32_9 = arith.constant 0 : i32
    %11 = arith.cmpi ne, %10, %c0_i32_9 : i32
    scf.if %11 {
      %c0_10 = arith.constant 0 : index
      %c0_11 = arith.constant 0 : index
      %12 = vector.load %arg7[%c0_10, %c0_11] : memref<16x128xf32, #tpu.memory_space<vmem>>, vector<16x128xf32>
      %c0_12 = arith.constant 0 : index
      %c0_13 = arith.constant 0 : index
      %13 = vector.load %arg5[%c0_12, %c0_13] : memref<1x128xf32, #tpu.memory_space<vmem>>, vector<1x128xf32>
      %14 = vector.broadcast %13 : vector<1x128xf32> to vector<16x128xf32>
      %15 = arith.addf %12, %14 : vector<16x128xf32>
      %16 = arith.truncf %15 : vector<16x128xf32> to vector<16x128xbf16>
      %c0_14 = arith.constant 0 : index
      %c0_15 = arith.constant 0 : index
      %17 = vector.load %arg6[%c0_14, %c0_15] : memref<16x128xbf16, #tpu.memory_space<vmem>>, vector<16x128xbf16>
      tpu.vector_store %arg6[%c0_14, %c0_15], %16 {strides = array<i32>} : memref<16x128xbf16, #tpu.memory_space<vmem>>, vector<16x128xbf16>,
    } else {
    }
    return
  }
  func.func @transform_0(%arg0: i32, %arg1: i32, %arg2: i32) -> (i32, i32) {
    %c0_i32 = arith.constant 0 : i32
    return %arg0, %arg2 : i32, i32
  }
  func.func @transform_1(%arg0: i32, %arg1: i32, %arg2: i32) -> (i32, i32) {
    %c0_i32 = arith.constant 0 : i32
    return %arg2, %arg1 : i32, i32
  }
  func.func @transform_2(%arg0: i32, %arg1: i32, %arg2: i32) -> (i32, i32) {
    %c0_i32 = arith.constant 0 : i32
    %c0_i32_0 = arith.constant 0 : i32
    return %c0_i32, %arg1 : i32, i32
  }
  func.func @transform_3(%arg0: i32, %arg1: i32, %arg2: i32) -> (i32, i32) {
    %c0_i32 = arith.constant 0 : i32
    return %arg0, %arg1 : i32, i32
  }
}

module attributes {stable_mosaic.version = 11 : i64} {
  func.func @_gemm_bias_res_relu_kernel(%arg0: i32, %arg1: i32, %arg2: i32, %arg3: memref<16x768xbf16, #tpu.memory_space<vmem>>, %arg4: memref<768x128xbf16, #tpu.memory_space<vmem>>, %arg5: memref<1x128xf32, #tpu.memory_space<vmem>>, %arg6: memref<16x128xbf16, #tpu.memory_space<vmem>>, %arg7: memref<16x128xbf16, #tpu.memory_space<vmem>>, %arg8: memref<16x128xf32, #tpu.memory_space<vmem>>) attributes {dimension_semantics = [#tpu.dimension_semantics<parallel>, #tpu.dimension_semantics<parallel>, #tpu.dimension_semantics<arbitrary>], iteration_bounds = array<i64: 1, 2, 3>, scalar_prefetch = 0 : i64, scratch_operands = 1 : i64, tpu.core_type = #tpu.core_type<tc>, window_params = [{transform_indices = @transform_0, window_bounds = array<i64: 16, 768>}, {transform_indices = @transform_1, window_bounds = array<i64: 768, 128>}, {transform_indices = @transform_2, window_bounds = array<i64: 1, 128>}, {transform_indices = @transform_3, window_bounds = array<i64: 16, 128>}, {transform_indices = @transform_4, window_bounds = array<i64: 16, 128>}]} {
    %c0_i32 = arith.constant 0 : i32
    %0 = arith.cmpi eq, %arg2, %c0_i32 : i32
    %1 = arith.extui %0 : i1 to i32
    %c0_i32_0 = arith.constant 0 : i32
    %2 = arith.cmpi ne, %1, %c0_i32_0 : i32
    scf.if %2 {
      %cst_9 = arith.constant 0.000000e+00 : f32
      %12 = vector.broadcast %cst_9 : f32 to vector<16x128xf32>
      %c0_10 = arith.constant 0 : index
      %c0_11 = arith.constant 0 : index
      %13 = vector.load %arg8[%c0_10, %c0_11] : memref<16x128xf32, #tpu.memory_space<vmem>>, vector<16x128xf32>
      tpu.vector_store %arg8[%c0_10, %c0_11], %12 {strides = array<i32>} : memref<16x128xf32, #tpu.memory_space<vmem>>, vector<16x128xf32>,
    } else {
    }
    %c0 = arith.constant 0 : index
    %c0_1 = arith.constant 0 : index
    %3 = vector.load %arg8[%c0, %c0_1] : memref<16x128xf32, #tpu.memory_space<vmem>>, vector<16x128xf32>
    %c0_2 = arith.constant 0 : index
    %c0_3 = arith.constant 0 : index
    %4 = vector.load %arg3[%c0_2, %c0_3] : memref<16x768xbf16, #tpu.memory_space<vmem>>, vector<16x768xbf16>
    %c0_4 = arith.constant 0 : index
    %c0_5 = arith.constant 0 : index
    %5 = vector.load %arg4[%c0_4, %c0_5] : memref<768x128xbf16, #tpu.memory_space<vmem>>, vector<768x128xbf16>
    %cst = arith.constant dense<0.000000e+00> : vector<16x128xf32>
    %6 = tpu.matmul %4, %5, %cst {dimension_numbers = #tpu.dot_dimension_numbers<[1], [0], [0], [1], [0, 0, 1, 1], [], []>} : vector<16x768xbf16>, vector<768x128xbf16>, vector<16x128xf32> -> vector<16x128xf32>
    %7 = arith.addf %3, %6 : vector<16x128xf32>
    %c0_6 = arith.constant 0 : index
    %c0_7 = arith.constant 0 : index
    %8 = vector.load %arg8[%c0_6, %c0_7] : memref<16x128xf32, #tpu.memory_space<vmem>>, vector<16x128xf32>
    tpu.vector_store %arg8[%c0_6, %c0_7], %7 {strides = array<i32>} : memref<16x128xf32, #tpu.memory_space<vmem>>, vector<16x128xf32>,
    %c2_i32 = arith.constant 2 : i32
    %9 = arith.cmpi eq, %arg2, %c2_i32 : i32
    %10 = arith.extui %9 : i1 to i32
    %c0_i32_8 = arith.constant 0 : i32
    %11 = arith.cmpi ne, %10, %c0_i32_8 : i32
    scf.if %11 {
      %c0_9 = arith.constant 0 : index
      %c0_10 = arith.constant 0 : index
      %12 = vector.load %arg8[%c0_9, %c0_10] : memref<16x128xf32, #tpu.memory_space<vmem>>, vector<16x128xf32>
      %c0_11 = arith.constant 0 : index
      %c0_12 = arith.constant 0 : index
      %13 = vector.load %arg5[%c0_11, %c0_12] : memref<1x128xf32, #tpu.memory_space<vmem>>, vector<1x128xf32>
      %14 = vector.broadcast %13 : vector<1x128xf32> to vector<16x128xf32>
      %15 = arith.addf %12, %14 : vector<16x128xf32>
      %c0_13 = arith.constant 0 : index
      %c0_14 = arith.constant 0 : index
      %16 = vector.load %arg6[%c0_13, %c0_14] : memref<16x128xbf16, #tpu.memory_space<vmem>>, vector<16x128xbf16>
      %17 = arith.extf %16 : vector<16x128xbf16> to vector<16x128xf32>
      %18 = arith.addf %15, %17 : vector<16x128xf32>
      %cst_15 = arith.constant 0.000000e+00 : f32
      %19 = vector.broadcast %cst_15 : f32 to vector<16x128xf32>
      %20 = arith.maximumf %18, %19 : vector<16x128xf32>
      %21 = arith.truncf %20 : vector<16x128xf32> to vector<16x128xbf16>
      %c0_16 = arith.constant 0 : index
      %c0_17 = arith.constant 0 : index
      %22 = vector.load %arg7[%c0_16, %c0_17] : memref<16x128xbf16, #tpu.memory_space<vmem>>, vector<16x128xbf16>
      tpu.vector_store %arg7[%c0_16, %c0_17], %21 {strides = array<i32>} : memref<16x128xbf16, #tpu.memory_space<vmem>>, vector<16x128xbf16>,
    } else {
    }
    return
  }
  func.func @transform_0(%arg0: i32, %arg1: i32, %arg2: i32) -> (i32, i32) {
    %c0_i32 = arith.constant 0 : i32
    return %arg0, %arg2 : i32, i32
  }
  func.func @transform_1(%arg0: i32, %arg1: i32, %arg2: i32) -> (i32, i32) {
    %c0_i32 = arith.constant 0 : i32
    return %arg2, %arg1 : i32, i32
  }
  func.func @transform_2(%arg0: i32, %arg1: i32, %arg2: i32) -> (i32, i32) {
    %c0_i32 = arith.constant 0 : i32
    %c0_i32_0 = arith.constant 0 : i32
    return %c0_i32, %arg1 : i32, i32
  }
  func.func @transform_3(%arg0: i32, %arg1: i32, %arg2: i32) -> (i32, i32) {
    %c0_i32 = arith.constant 0 : i32
    return %arg0, %arg1 : i32, i32
  }
  func.func @transform_4(%arg0: i32, %arg1: i32, %arg2: i32) -> (i32, i32) {
    %c0_i32 = arith.constant 0 : i32
    return %arg0, %arg1 : i32, i32
  }
}

module attributes {stable_mosaic.version = 11 : i64} {
  func.func @_gemm_bias_kernel(%arg0: i32, %arg1: i32, %arg2: i32, %arg3: memref<16x768xbf16, #tpu.memory_space<vmem>>, %arg4: memref<768x128xbf16, #tpu.memory_space<vmem>>, %arg5: memref<1x128xf32, #tpu.memory_space<vmem>>, %arg6: memref<16x128xbf16, #tpu.memory_space<vmem>>, %arg7: memref<16x128xf32, #tpu.memory_space<vmem>>) attributes {dimension_semantics = [#tpu.dimension_semantics<parallel>, #tpu.dimension_semantics<parallel>, #tpu.dimension_semantics<arbitrary>], iteration_bounds = array<i64: 1, 2, 3>, scalar_prefetch = 0 : i64, scratch_operands = 1 : i64, tpu.core_type = #tpu.core_type<tc>, window_params = [{transform_indices = @transform_0, window_bounds = array<i64: 16, 768>}, {transform_indices = @transform_1, window_bounds = array<i64: 768, 128>}, {transform_indices = @transform_2, window_bounds = array<i64: 1, 128>}, {transform_indices = @transform_3, window_bounds = array<i64: 16, 128>}]} {
    %c0_i32 = arith.constant 0 : i32
    %0 = arith.cmpi eq, %arg2, %c0_i32 : i32
    %1 = arith.extui %0 : i1 to i32
    %c0_i32_0 = arith.constant 0 : i32
    %2 = arith.cmpi ne, %1, %c0_i32_0 : i32
    scf.if %2 {
      %cst_9 = arith.constant 0.000000e+00 : f32
      %12 = vector.broadcast %cst_9 : f32 to vector<16x128xf32>
      %c0_10 = arith.constant 0 : index
      %c0_11 = arith.constant 0 : index
      %13 = vector.load %arg7[%c0_10, %c0_11] : memref<16x128xf32, #tpu.memory_space<vmem>>, vector<16x128xf32>
      tpu.vector_store %arg7[%c0_10, %c0_11], %12 {strides = array<i32>} : memref<16x128xf32, #tpu.memory_space<vmem>>, vector<16x128xf32>,
    } else {
    }
    %c0 = arith.constant 0 : index
    %c0_1 = arith.constant 0 : index
    %3 = vector.load %arg7[%c0, %c0_1] : memref<16x128xf32, #tpu.memory_space<vmem>>, vector<16x128xf32>
    %c0_2 = arith.constant 0 : index
    %c0_3 = arith.constant 0 : index
    %4 = vector.load %arg3[%c0_2, %c0_3] : memref<16x768xbf16, #tpu.memory_space<vmem>>, vector<16x768xbf16>
    %c0_4 = arith.constant 0 : index
    %c0_5 = arith.constant 0 : index
    %5 = vector.load %arg4[%c0_4, %c0_5] : memref<768x128xbf16, #tpu.memory_space<vmem>>, vector<768x128xbf16>
    %cst = arith.constant dense<0.000000e+00> : vector<16x128xf32>
    %6 = tpu.matmul %4, %5, %cst {dimension_numbers = #tpu.dot_dimension_numbers<[1], [0], [0], [1], [0, 0, 1, 1], [], []>} : vector<16x768xbf16>, vector<768x128xbf16>, vector<16x128xf32> -> vector<16x128xf32>
    %7 = arith.addf %3, %6 : vector<16x128xf32>
    %c0_6 = arith.constant 0 : index
    %c0_7 = arith.constant 0 : index
    %8 = vector.load %arg7[%c0_6, %c0_7] : memref<16x128xf32, #tpu.memory_space<vmem>>, vector<16x128xf32>
    tpu.vector_store %arg7[%c0_6, %c0_7], %7 {strides = array<i32>} : memref<16x128xf32, #tpu.memory_space<vmem>>, vector<16x128xf32>,
    %c2_i32 = arith.constant 2 : i32
    %9 = arith.cmpi eq, %arg2, %c2_i32 : i32
    %10 = arith.extui %9 : i1 to i32
    %c0_i32_8 = arith.constant 0 : i32
    %11 = arith.cmpi ne, %10, %c0_i32_8 : i32
    scf.if %11 {
      %c0_9 = arith.constant 0 : index
      %c0_10 = arith.constant 0 : index
      %12 = vector.load %arg7[%c0_9, %c0_10] : memref<16x128xf32, #tpu.memory_space<vmem>>, vector<16x128xf32>
      %c0_11 = arith.constant 0 : index
      %c0_12 = arith.constant 0 : index
      %13 = vector.load %arg5[%c0_11, %c0_12] : memref<1x128xf32, #tpu.memory_space<vmem>>, vector<1x128xf32>
      %14 = vector.broadcast %13 : vector<1x128xf32> to vector<16x128xf32>
      %15 = arith.addf %12, %14 : vector<16x128xf32>
      %cst_13 = arith.constant 0.000000e+00 : f32
      %16 = vector.broadcast %cst_13 : f32 to vector<16x128xf32>
      %17 = arith.maximumf %15, %16 : vector<16x128xf32>
      %18 = arith.truncf %17 : vector<16x128xf32> to vector<16x128xbf16>
      %c0_14 = arith.constant 0 : index
      %c0_15 = arith.constant 0 : index
      %19 = vector.load %arg6[%c0_14, %c0_15] : memref<16x128xbf16, #tpu.memory_space<vmem>>, vector<16x128xbf16>
      tpu.vector_store %arg6[%c0_14, %c0_15], %18 {strides = array<i32>} : memref<16x128xbf16, #tpu.memory_space<vmem>>, vector<16x128xbf16>,
    } else {
    }
    return
  }
  func.func @transform_0(%arg0: i32, %arg1: i32, %arg2: i32) -> (i32, i32) {
    %c0_i32 = arith.constant 0 : i32
    return %arg0, %arg2 : i32, i32
  }
  func.func @transform_1(%arg0: i32, %arg1: i32, %arg2: i32) -> (i32, i32) {
    %c0_i32 = arith.constant 0 : i32
    return %arg2, %arg1 : i32, i32
  }
  func.func @transform_2(%arg0: i32, %arg1: i32, %arg2: i32) -> (i32, i32) {
    %c0_i32 = arith.constant 0 : i32
    %c0_i32_0 = arith.constant 0 : i32
    return %c0_i32, %arg1 : i32, i32
  }
  func.func @transform_3(%arg0: i32, %arg1: i32, %arg2: i32) -> (i32, i32) {
    %c0_i32 = arith.constant 0 : i32
    return %arg0, %arg1 : i32, i32
  }
}

module attributes {stable_mosaic.version = 11 : i64} {
  func.func @_gemm_bias_kernel(%arg0: i32, %arg1: i32, %arg2: i32, %arg3: memref<16x768xbf16, #tpu.memory_space<vmem>>, %arg4: memref<768x256xbf16, #tpu.memory_space<vmem>>, %arg5: memref<1x256xf32, #tpu.memory_space<vmem>>, %arg6: memref<16x256xbf16, #tpu.memory_space<vmem>>, %arg7: memref<16x256xf32, #tpu.memory_space<vmem>>) attributes {dimension_semantics = [#tpu.dimension_semantics<parallel>, #tpu.dimension_semantics<parallel>, #tpu.dimension_semantics<arbitrary>], iteration_bounds = array<i64: 1, 2, 3>, scalar_prefetch = 0 : i64, scratch_operands = 1 : i64, tpu.core_type = #tpu.core_type<tc>, window_params = [{transform_indices = @transform_0, window_bounds = array<i64: 16, 768>}, {transform_indices = @transform_1, window_bounds = array<i64: 768, 256>}, {transform_indices = @transform_2, window_bounds = array<i64: 1, 256>}, {transform_indices = @transform_3, window_bounds = array<i64: 16, 256>}]} {
    %c0_i32 = arith.constant 0 : i32
    %0 = arith.cmpi eq, %arg2, %c0_i32 : i32
    %1 = arith.extui %0 : i1 to i32
    %c0_i32_0 = arith.constant 0 : i32
    %2 = arith.cmpi ne, %1, %c0_i32_0 : i32
    scf.if %2 {
      %cst_9 = arith.constant 0.000000e+00 : f32
      %12 = vector.broadcast %cst_9 : f32 to vector<16x256xf32>
      %c0_10 = arith.constant 0 : index
      %c0_11 = arith.constant 0 : index
      %13 = vector.load %arg7[%c0_10, %c0_11] : memref<16x256xf32, #tpu.memory_space<vmem>>, vector<16x256xf32>
      tpu.vector_store %arg7[%c0_10, %c0_11], %12 {strides = array<i32>} : memref<16x256xf32, #tpu.memory_space<vmem>>, vector<16x256xf32>,
    } else {
    }
    %c0 = arith.constant 0 : index
    %c0_1 = arith.constant 0 : index
    %3 = vector.load %arg7[%c0, %c0_1] : memref<16x256xf32, #tpu.memory_space<vmem>>, vector<16x256xf32>
    %c0_2 = arith.constant 0 : index
    %c0_3 = arith.constant 0 : index
    %4 = vector.load %arg3[%c0_2, %c0_3] : memref<16x768xbf16, #tpu.memory_space<vmem>>, vector<16x768xbf16>
    %c0_4 = arith.constant 0 : index
    %c0_5 = arith.constant 0 : index
    %5 = vector.load %arg4[%c0_4, %c0_5] : memref<768x256xbf16, #tpu.memory_space<vmem>>, vector<768x256xbf16>
    %cst = arith.constant dense<0.000000e+00> : vector<16x256xf32>
    %6 = tpu.matmul %4, %5, %cst {dimension_numbers = #tpu.dot_dimension_numbers<[1], [0], [0], [1], [0, 0, 1, 1], [], []>} : vector<16x768xbf16>, vector<768x256xbf16>, vector<16x256xf32> -> vector<16x256xf32>
    %7 = arith.addf %3, %6 : vector<16x256xf32>
    %c0_6 = arith.constant 0 : index
    %c0_7 = arith.constant 0 : index
    %8 = vector.load %arg7[%c0_6, %c0_7] : memref<16x256xf32, #tpu.memory_space<vmem>>, vector<16x256xf32>
    tpu.vector_store %arg7[%c0_6, %c0_7], %7 {strides = array<i32>} : memref<16x256xf32, #tpu.memory_space<vmem>>, vector<16x256xf32>,
    %c2_i32 = arith.constant 2 : i32
    %9 = arith.cmpi eq, %arg2, %c2_i32 : i32
    %10 = arith.extui %9 : i1 to i32
    %c0_i32_8 = arith.constant 0 : i32
    %11 = arith.cmpi ne, %10, %c0_i32_8 : i32
    scf.if %11 {
      %c0_9 = arith.constant 0 : index
      %c0_10 = arith.constant 0 : index
      %12 = vector.load %arg7[%c0_9, %c0_10] : memref<16x256xf32, #tpu.memory_space<vmem>>, vector<16x256xf32>
      %c0_11 = arith.constant 0 : index
      %c0_12 = arith.constant 0 : index
      %13 = vector.load %arg5[%c0_11, %c0_12] : memref<1x256xf32, #tpu.memory_space<vmem>>, vector<1x256xf32>
      %14 = vector.broadcast %13 : vector<1x256xf32> to vector<16x256xf32>
      %15 = arith.addf %12, %14 : vector<16x256xf32>
      %cst_13 = arith.constant 0.000000e+00 : f32
      %16 = vector.broadcast %cst_13 : f32 to vector<16x256xf32>
      %17 = arith.maximumf %15, %16 : vector<16x256xf32>
      %18 = arith.truncf %17 : vector<16x256xf32> to vector<16x256xbf16>
      %c0_14 = arith.constant 0 : index
      %c0_15 = arith.constant 0 : index
      %19 = vector.load %arg6[%c0_14, %c0_15] : memref<16x256xbf16, #tpu.memory_space<vmem>>, vector<16x256xbf16>
      tpu.vector_store %arg6[%c0_14, %c0_15], %18 {strides = array<i32>} : memref<16x256xbf16, #tpu.memory_space<vmem>>, vector<16x256xbf16>,
    } else {
    }
    return
  }
  func.func @transform_0(%arg0: i32, %arg1: i32, %arg2: i32) -> (i32, i32) {
    %c0_i32 = arith.constant 0 : i32
    return %arg0, %arg2 : i32, i32
  }
  func.func @transform_1(%arg0: i32, %arg1: i32, %arg2: i32) -> (i32, i32) {
    %c0_i32 = arith.constant 0 : i32
    return %arg2, %arg1 : i32, i32
  }
  func.func @transform_2(%arg0: i32, %arg1: i32, %arg2: i32) -> (i32, i32) {
    %c0_i32 = arith.constant 0 : i32
    %c0_i32_0 = arith.constant 0 : i32
    return %c0_i32, %arg1 : i32, i32
  }
  func.func @transform_3(%arg0: i32, %arg1: i32, %arg2: i32) -> (i32, i32) {
    %c0_i32 = arith.constant 0 : i32
    return %arg0, %arg1 : i32, i32
  }
}

module attributes {stable_mosaic.version = 11 : i64} {
  func.func @_gemm_bias_kernel(%arg0: i32, %arg1: i32, %arg2: i32, %arg3: memref<16x256xbf16, #tpu.memory_space<vmem>>, %arg4: memref<256x256xbf16, #tpu.memory_space<vmem>>, %arg5: memref<1x256xf32, #tpu.memory_space<vmem>>, %arg6: memref<16x256xbf16, #tpu.memory_space<vmem>>, %arg7: memref<16x256xf32, #tpu.memory_space<vmem>>) attributes {dimension_semantics = [#tpu.dimension_semantics<parallel>, #tpu.dimension_semantics<parallel>, #tpu.dimension_semantics<arbitrary>], iteration_bounds = array<i64: 1, 2, 1>, scalar_prefetch = 0 : i64, scratch_operands = 1 : i64, tpu.core_type = #tpu.core_type<tc>, window_params = [{transform_indices = @transform_0, window_bounds = array<i64: 16, 256>}, {transform_indices = @transform_1, window_bounds = array<i64: 256, 256>}, {transform_indices = @transform_2, window_bounds = array<i64: 1, 256>}, {transform_indices = @transform_3, window_bounds = array<i64: 16, 256>}]} {
    %c0_i32 = arith.constant 0 : i32
    %0 = arith.cmpi eq, %arg2, %c0_i32 : i32
    %1 = arith.extui %0 : i1 to i32
    %c0_i32_0 = arith.constant 0 : i32
    %2 = arith.cmpi ne, %1, %c0_i32_0 : i32
    scf.if %2 {
      %cst_10 = arith.constant 0.000000e+00 : f32
      %12 = vector.broadcast %cst_10 : f32 to vector<16x256xf32>
      %c0_11 = arith.constant 0 : index
      %c0_12 = arith.constant 0 : index
      %13 = vector.load %arg7[%c0_11, %c0_12] : memref<16x256xf32, #tpu.memory_space<vmem>>, vector<16x256xf32>
      tpu.vector_store %arg7[%c0_11, %c0_12], %12 {strides = array<i32>} : memref<16x256xf32, #tpu.memory_space<vmem>>, vector<16x256xf32>,
    } else {
    }
    %c0 = arith.constant 0 : index
    %c0_1 = arith.constant 0 : index
    %3 = vector.load %arg7[%c0, %c0_1] : memref<16x256xf32, #tpu.memory_space<vmem>>, vector<16x256xf32>
    %c0_2 = arith.constant 0 : index
    %c0_3 = arith.constant 0 : index
    %4 = vector.load %arg3[%c0_2, %c0_3] : memref<16x256xbf16, #tpu.memory_space<vmem>>, vector<16x256xbf16>
    %c0_4 = arith.constant 0 : index
    %c0_5 = arith.constant 0 : index
    %5 = vector.load %arg4[%c0_4, %c0_5] : memref<256x256xbf16, #tpu.memory_space<vmem>>, vector<256x256xbf16>
    %cst = arith.constant dense<0.000000e+00> : vector<16x256xf32>
    %6 = tpu.matmul %4, %5, %cst {dimension_numbers = #tpu.dot_dimension_numbers<[1], [0], [0], [1], [0, 0, 1, 1], [], []>} : vector<16x256xbf16>, vector<256x256xbf16>, vector<16x256xf32> -> vector<16x256xf32>
    %7 = arith.addf %3, %6 : vector<16x256xf32>
    %c0_6 = arith.constant 0 : index
    %c0_7 = arith.constant 0 : index
    %8 = vector.load %arg7[%c0_6, %c0_7] : memref<16x256xf32, #tpu.memory_space<vmem>>, vector<16x256xf32>
    tpu.vector_store %arg7[%c0_6, %c0_7], %7 {strides = array<i32>} : memref<16x256xf32, #tpu.memory_space<vmem>>, vector<16x256xf32>,
    %c0_i32_8 = arith.constant 0 : i32
    %9 = arith.cmpi eq, %arg2, %c0_i32_8 : i32
    %10 = arith.extui %9 : i1 to i32
    %c0_i32_9 = arith.constant 0 : i32
    %11 = arith.cmpi ne, %10, %c0_i32_9 : i32
    scf.if %11 {
      %c0_10 = arith.constant 0 : index
      %c0_11 = arith.constant 0 : index
      %12 = vector.load %arg7[%c0_10, %c0_11] : memref<16x256xf32, #tpu.memory_space<vmem>>, vector<16x256xf32>
      %c0_12 = arith.constant 0 : index
      %c0_13 = arith.constant 0 : index
      %13 = vector.load %arg5[%c0_12, %c0_13] : memref<1x256xf32, #tpu.memory_space<vmem>>, vector<1x256xf32>
      %14 = vector.broadcast %13 : vector<1x256xf32> to vector<16x256xf32>
      %15 = arith.addf %12, %14 : vector<16x256xf32>
      %16 = arith.truncf %15 : vector<16x256xf32> to vector<16x256xbf16>
      %c0_14 = arith.constant 0 : index
      %c0_15 = arith.constant 0 : index
      %17 = vector.load %arg6[%c0_14, %c0_15] : memref<16x256xbf16, #tpu.memory_space<vmem>>, vector<16x256xbf16>
      tpu.vector_store %arg6[%c0_14, %c0_15], %16 {strides = array<i32>} : memref<16x256xbf16, #tpu.memory_space<vmem>>, vector<16x256xbf16>,
    } else {
    }
    return
  }
  func.func @transform_0(%arg0: i32, %arg1: i32, %arg2: i32) -> (i32, i32) {
    %c0_i32 = arith.constant 0 : i32
    return %arg0, %arg2 : i32, i32
  }
  func.func @transform_1(%arg0: i32, %arg1: i32, %arg2: i32) -> (i32, i32) {
    %c0_i32 = arith.constant 0 : i32
    return %arg2, %arg1 : i32, i32
  }
  func.func @transform_2(%arg0: i32, %arg1: i32, %arg2: i32) -> (i32, i32) {
    %c0_i32 = arith.constant 0 : i32
    %c0_i32_0 = arith.constant 0 : i32
    return %c0_i32, %arg1 : i32, i32
  }
  func.func @transform_3(%arg0: i32, %arg1: i32, %arg2: i32) -> (i32, i32) {
    %c0_i32 = arith.constant 0 : i32
    return %arg0, %arg1 : i32, i32
  }
}

module attributes {stable_mosaic.version = 11 : i64} {
  func.func @_gemm_bias_res_relu_kernel(%arg0: i32, %arg1: i32, %arg2: i32, %arg3: memref<16x768xbf16, #tpu.memory_space<vmem>>, %arg4: memref<768x256xbf16, #tpu.memory_space<vmem>>, %arg5: memref<1x256xf32, #tpu.memory_space<vmem>>, %arg6: memref<16x256xbf16, #tpu.memory_space<vmem>>, %arg7: memref<16x256xbf16, #tpu.memory_space<vmem>>, %arg8: memref<16x256xf32, #tpu.memory_space<vmem>>) attributes {dimension_semantics = [#tpu.dimension_semantics<parallel>, #tpu.dimension_semantics<parallel>, #tpu.dimension_semantics<arbitrary>], iteration_bounds = array<i64: 1, 2, 6>, scalar_prefetch = 0 : i64, scratch_operands = 1 : i64, tpu.core_type = #tpu.core_type<tc>, window_params = [{transform_indices = @transform_0, window_bounds = array<i64: 16, 768>}, {transform_indices = @transform_1, window_bounds = array<i64: 768, 256>}, {transform_indices = @transform_2, window_bounds = array<i64: 1, 256>}, {transform_indices = @transform_3, window_bounds = array<i64: 16, 256>}, {transform_indices = @transform_4, window_bounds = array<i64: 16, 256>}]} {
    %c0_i32 = arith.constant 0 : i32
    %0 = arith.cmpi eq, %arg2, %c0_i32 : i32
    %1 = arith.extui %0 : i1 to i32
    %c0_i32_0 = arith.constant 0 : i32
    %2 = arith.cmpi ne, %1, %c0_i32_0 : i32
    scf.if %2 {
      %cst_9 = arith.constant 0.000000e+00 : f32
      %12 = vector.broadcast %cst_9 : f32 to vector<16x256xf32>
      %c0_10 = arith.constant 0 : index
      %c0_11 = arith.constant 0 : index
      %13 = vector.load %arg8[%c0_10, %c0_11] : memref<16x256xf32, #tpu.memory_space<vmem>>, vector<16x256xf32>
      tpu.vector_store %arg8[%c0_10, %c0_11], %12 {strides = array<i32>} : memref<16x256xf32, #tpu.memory_space<vmem>>, vector<16x256xf32>,
    } else {
    }
    %c0 = arith.constant 0 : index
    %c0_1 = arith.constant 0 : index
    %3 = vector.load %arg8[%c0, %c0_1] : memref<16x256xf32, #tpu.memory_space<vmem>>, vector<16x256xf32>
    %c0_2 = arith.constant 0 : index
    %c0_3 = arith.constant 0 : index
    %4 = vector.load %arg3[%c0_2, %c0_3] : memref<16x768xbf16, #tpu.memory_space<vmem>>, vector<16x768xbf16>
    %c0_4 = arith.constant 0 : index
    %c0_5 = arith.constant 0 : index
    %5 = vector.load %arg4[%c0_4, %c0_5] : memref<768x256xbf16, #tpu.memory_space<vmem>>, vector<768x256xbf16>
    %cst = arith.constant dense<0.000000e+00> : vector<16x256xf32>
    %6 = tpu.matmul %4, %5, %cst {dimension_numbers = #tpu.dot_dimension_numbers<[1], [0], [0], [1], [0, 0, 1, 1], [], []>} : vector<16x768xbf16>, vector<768x256xbf16>, vector<16x256xf32> -> vector<16x256xf32>
    %7 = arith.addf %3, %6 : vector<16x256xf32>
    %c0_6 = arith.constant 0 : index
    %c0_7 = arith.constant 0 : index
    %8 = vector.load %arg8[%c0_6, %c0_7] : memref<16x256xf32, #tpu.memory_space<vmem>>, vector<16x256xf32>
    tpu.vector_store %arg8[%c0_6, %c0_7], %7 {strides = array<i32>} : memref<16x256xf32, #tpu.memory_space<vmem>>, vector<16x256xf32>,
    %c5_i32 = arith.constant 5 : i32
    %9 = arith.cmpi eq, %arg2, %c5_i32 : i32
    %10 = arith.extui %9 : i1 to i32
    %c0_i32_8 = arith.constant 0 : i32
    %11 = arith.cmpi ne, %10, %c0_i32_8 : i32
    scf.if %11 {
      %c0_9 = arith.constant 0 : index
      %c0_10 = arith.constant 0 : index
      %12 = vector.load %arg8[%c0_9, %c0_10] : memref<16x256xf32, #tpu.memory_space<vmem>>, vector<16x256xf32>
      %c0_11 = arith.constant 0 : index
      %c0_12 = arith.constant 0 : index
      %13 = vector.load %arg5[%c0_11, %c0_12] : memref<1x256xf32, #tpu.memory_space<vmem>>, vector<1x256xf32>
      %14 = vector.broadcast %13 : vector<1x256xf32> to vector<16x256xf32>
      %15 = arith.addf %12, %14 : vector<16x256xf32>
      %c0_13 = arith.constant 0 : index
      %c0_14 = arith.constant 0 : index
      %16 = vector.load %arg6[%c0_13, %c0_14] : memref<16x256xbf16, #tpu.memory_space<vmem>>, vector<16x256xbf16>
      %17 = arith.extf %16 : vector<16x256xbf16> to vector<16x256xf32>
      %18 = arith.addf %15, %17 : vector<16x256xf32>
      %cst_15 = arith.constant 0.000000e+00 : f32
      %19 = vector.broadcast %cst_15 : f32 to vector<16x256xf32>
      %20 = arith.maximumf %18, %19 : vector<16x256xf32>
      %21 = arith.truncf %20 : vector<16x256xf32> to vector<16x256xbf16>
      %c0_16 = arith.constant 0 : index
      %c0_17 = arith.constant 0 : index
      %22 = vector.load %arg7[%c0_16, %c0_17] : memref<16x256xbf16, #tpu.memory_space<vmem>>, vector<16x256xbf16>
      tpu.vector_store %arg7[%c0_16, %c0_17], %21 {strides = array<i32>} : memref<16x256xbf16, #tpu.memory_space<vmem>>, vector<16x256xbf16>,
    } else {
    }
    return
  }
  func.func @transform_0(%arg0: i32, %arg1: i32, %arg2: i32) -> (i32, i32) {
    %c0_i32 = arith.constant 0 : i32
    return %arg0, %arg2 : i32, i32
  }
  func.func @transform_1(%arg0: i32, %arg1: i32, %arg2: i32) -> (i32, i32) {
    %c0_i32 = arith.constant 0 : i32
    return %arg2, %arg1 : i32, i32
  }
  func.func @transform_2(%arg0: i32, %arg1: i32, %arg2: i32) -> (i32, i32) {
    %c0_i32 = arith.constant 0 : i32
    %c0_i32_0 = arith.constant 0 : i32
    return %c0_i32, %arg1 : i32, i32
  }
  func.func @transform_3(%arg0: i32, %arg1: i32, %arg2: i32) -> (i32, i32) {
    %c0_i32 = arith.constant 0 : i32
    return %arg0, %arg1 : i32, i32
  }
  func.func @transform_4(%arg0: i32, %arg1: i32, %arg2: i32) -> (i32, i32) {
    %c0_i32 = arith.constant 0 : i32
    return %arg0, %arg1 : i32, i32
  }
}

module attributes {stable_mosaic.version = 11 : i64} {
  func.func @_gemm_bias_kernel(%arg0: i32, %arg1: i32, %arg2: i32, %arg3: memref<16x768xbf16, #tpu.memory_space<vmem>>, %arg4: memref<768x256xbf16, #tpu.memory_space<vmem>>, %arg5: memref<1x256xf32, #tpu.memory_space<vmem>>, %arg6: memref<16x256xbf16, #tpu.memory_space<vmem>>, %arg7: memref<16x256xf32, #tpu.memory_space<vmem>>) attributes {dimension_semantics = [#tpu.dimension_semantics<parallel>, #tpu.dimension_semantics<parallel>, #tpu.dimension_semantics<arbitrary>], iteration_bounds = array<i64: 1, 2, 6>, scalar_prefetch = 0 : i64, scratch_operands = 1 : i64, tpu.core_type = #tpu.core_type<tc>, window_params = [{transform_indices = @transform_0, window_bounds = array<i64: 16, 768>}, {transform_indices = @transform_1, window_bounds = array<i64: 768, 256>}, {transform_indices = @transform_2, window_bounds = array<i64: 1, 256>}, {transform_indices = @transform_3, window_bounds = array<i64: 16, 256>}]} {
    %c0_i32 = arith.constant 0 : i32
    %0 = arith.cmpi eq, %arg2, %c0_i32 : i32
    %1 = arith.extui %0 : i1 to i32
    %c0_i32_0 = arith.constant 0 : i32
    %2 = arith.cmpi ne, %1, %c0_i32_0 : i32
    scf.if %2 {
      %cst_9 = arith.constant 0.000000e+00 : f32
      %12 = vector.broadcast %cst_9 : f32 to vector<16x256xf32>
      %c0_10 = arith.constant 0 : index
      %c0_11 = arith.constant 0 : index
      %13 = vector.load %arg7[%c0_10, %c0_11] : memref<16x256xf32, #tpu.memory_space<vmem>>, vector<16x256xf32>
      tpu.vector_store %arg7[%c0_10, %c0_11], %12 {strides = array<i32>} : memref<16x256xf32, #tpu.memory_space<vmem>>, vector<16x256xf32>,
    } else {
    }
    %c0 = arith.constant 0 : index
    %c0_1 = arith.constant 0 : index
    %3 = vector.load %arg7[%c0, %c0_1] : memref<16x256xf32, #tpu.memory_space<vmem>>, vector<16x256xf32>
    %c0_2 = arith.constant 0 : index
    %c0_3 = arith.constant 0 : index
    %4 = vector.load %arg3[%c0_2, %c0_3] : memref<16x768xbf16, #tpu.memory_space<vmem>>, vector<16x768xbf16>
    %c0_4 = arith.constant 0 : index
    %c0_5 = arith.constant 0 : index
    %5 = vector.load %arg4[%c0_4, %c0_5] : memref<768x256xbf16, #tpu.memory_space<vmem>>, vector<768x256xbf16>
    %cst = arith.constant dense<0.000000e+00> : vector<16x256xf32>
    %6 = tpu.matmul %4, %5, %cst {dimension_numbers = #tpu.dot_dimension_numbers<[1], [0], [0], [1], [0, 0, 1, 1], [], []>} : vector<16x768xbf16>, vector<768x256xbf16>, vector<16x256xf32> -> vector<16x256xf32>
    %7 = arith.addf %3, %6 : vector<16x256xf32>
    %c0_6 = arith.constant 0 : index
    %c0_7 = arith.constant 0 : index
    %8 = vector.load %arg7[%c0_6, %c0_7] : memref<16x256xf32, #tpu.memory_space<vmem>>, vector<16x256xf32>
    tpu.vector_store %arg7[%c0_6, %c0_7], %7 {strides = array<i32>} : memref<16x256xf32, #tpu.memory_space<vmem>>, vector<16x256xf32>,
    %c5_i32 = arith.constant 5 : i32
    %9 = arith.cmpi eq, %arg2, %c5_i32 : i32
    %10 = arith.extui %9 : i1 to i32
    %c0_i32_8 = arith.constant 0 : i32
    %11 = arith.cmpi ne, %10, %c0_i32_8 : i32
    scf.if %11 {
      %c0_9 = arith.constant 0 : index
      %c0_10 = arith.constant 0 : index
      %12 = vector.load %arg7[%c0_9, %c0_10] : memref<16x256xf32, #tpu.memory_space<vmem>>, vector<16x256xf32>
      %c0_11 = arith.constant 0 : index
      %c0_12 = arith.constant 0 : index
      %13 = vector.load %arg5[%c0_11, %c0_12] : memref<1x256xf32, #tpu.memory_space<vmem>>, vector<1x256xf32>
      %14 = vector.broadcast %13 : vector<1x256xf32> to vector<16x256xf32>
      %15 = arith.addf %12, %14 : vector<16x256xf32>
      %cst_13 = arith.constant 0.000000e+00 : f32
      %16 = vector.broadcast %cst_13 : f32 to vector<16x256xf32>
      %17 = arith.maximumf %15, %16 : vector<16x256xf32>
      %18 = arith.truncf %17 : vector<16x256xf32> to vector<16x256xbf16>
      %c0_14 = arith.constant 0 : index
      %c0_15 = arith.constant 0 : index
      %19 = vector.load %arg6[%c0_14, %c0_15] : memref<16x256xbf16, #tpu.memory_space<vmem>>, vector<16x256xbf16>
      tpu.vector_store %arg6[%c0_14, %c0_15], %18 {strides = array<i32>} : memref<16x256xbf16, #tpu.memory_space<vmem>>, vector<16x256xbf16>,
    } else {
    }
    return
  }
  func.func @transform_0(%arg0: i32, %arg1: i32, %arg2: i32) -> (i32, i32) {
    %c0_i32 = arith.constant 0 : i32
    return %arg0, %arg2 : i32, i32
  }
  func.func @transform_1(%arg0: i32, %arg1: i32, %arg2: i32) -> (i32, i32) {
    %c0_i32 = arith.constant 0 : i32
    return %arg2, %arg1 : i32, i32
  }
  func.func @transform_2(%arg0: i32, %arg1: i32, %arg2: i32) -> (i32, i32) {
    %c0_i32 = arith.constant 0 : i32
    %c0_i32_0 = arith.constant 0 : i32
    return %c0_i32, %arg1 : i32, i32
  }
  func.func @transform_3(%arg0: i32, %arg1: i32, %arg2: i32) -> (i32, i32) {
    %c0_i32 = arith.constant 0 : i32
    return %arg0, %arg1 : i32, i32
  }
}

</mosaic_0001>

<bundles_post_ra>
// kernel: resnet_forward.20
= control target key start
LH: loop header
LB: loop body
LE: loop exit
PB: predicated region body
PF: predicated region fallthrough
CT: control target
= control target key end

     0   :  { %s1744_s12 = smov 0   ;;  %s1746_s13 = smov 0   ;;  %s1918_s0 = inlined_call_operand.vmem [shape: bf16[512,256], index: 0, kind: input, shape index: {}]   ;;  %s1919_s1 = inlined_call_operand.vmem [shape: bf16[256,128], index: 1, kind: input, shape index: {}]   ;;  %s1920_s2 = inlined_call_operand.vmem [shape: f32[1,128], index: 2, kind: input, shape index: {}]   ;;  %s1921_s3 = inlined_call_operand.vmem [shape: bf16[512,128], index: 3, kind: output, shape index: {}]  }
   0x1   :  { %s1748_s14 = smov 0  }
   0x2 LB: > { %s32_s15 = sadd.s32 1, %s1718_s13  ;;  %p1267_p0 = scmp.ge.s32.totalorder %s1722_s14, 1  ;;  %s1722_s14 = sphi %s1748_s14, %s13_s14   ;;  %s1718_s13 = sphi %s1746_s13, %s1923_s13   ;;  %s1714_s12 = sphi %s1744_s12, %s1922_s12  }
   0x3   : > { %p34_p1 = scmp.ge.s32.totalorder %s32_s15, 2  ;;  %p191_p2 = scmp.lt.s32.totalorder %s1722_s14, 3 }
   0x5   : > { %s1925_s15 = smov (%p34_p1, %s32_s15), 0  ;;  %p192_p3 = pnand %p1267_p0, %p191_p2 }
   0x6   : > { %s1268_s18 = sshll.u32 (!%p192_p3), %s1714_s12, 5 }
   0x7   : > { %195 = sbr.rel (%p192_p3) target bundleno = 309 (0x135), region = 32  ;;  %p236_p4 = scmp.lt.s32.totalorder (!%p192_p3), %s1268_s18, 63 }
   0xc   : > { %v1636_v0 = vld [vmem:[%s1919_s1 + $0x78] sm:$0xff]   ;;  %v1638_v2 = vld [vmem:[%s1919_s1 + $0x70] sm:$0xff]   ;;  %v1640_v4 = vld [vmem:[%s1919_s1 + $0x68] sm:$0xff]   ;;  %s1927_s18 = smov (!%p236_p4, %s1268_s18), 63 }
   0xd   : > { %v1637_v1 = vld [vmem:[%s1919_s1 + $0x38] sm:$0xff]   ;;  %1484 = vmatprep.subr.bf16.mxu0 %v1636_v0  ;;  %1596 = vmatprep.subr.bf16.mxu1 %v1636_v0  ;;  %v1639_v3 = vld [vmem:[%s1919_s1 + $0x30] sm:$0xff]   ;;  %v1641_v5 = vld [vmem:[%s1919_s1 + $0x28] sm:$0xff]   ;;  %s1356_s6 = sshll.u32 %s1927_s18, 3  ;;  %s1272_s5 = sshll.u32 %s1927_s18, 2 }
   0xe   : > { %1485 = vmatpush3.bf16.msra.mxu0 %v1637_v1  ;;  %1604 = vmatpush3.bf16.msra.mxu1 %v1637_v1  ;;  %v1642_v6 = vld [vmem:[%s1919_s1 + $0x60] sm:$0xff]   ;;  %v1644_v8 = vld [vmem:[%s1919_s1 + $0x58] sm:$0xff]   ;;  %s1795_s11 = scalar_lea.vmem %s1918_s0, %s1356_s6  ;;  %v1646_v10 = vld [vmem:[%s1919_s1 + $0x50] sm:$0xff]   ;;  %s1863_s8 = scalar_lea.vmem %s1921_s3, %s1272_s5 }
   0xf   : > { %1486 = vmatprep.subr.bf16.mxu0 %v1638_v2  ;;  %1597 = vmatprep.subr.bf16.mxu1 %v1638_v2  ;;  %v1643_v7 = vld [vmem:[%s1919_s1 + $0x20] sm:$0xff]   ;;  %v1645_v9 = vld [vmem:[%s1919_s1 + $0x18] sm:$0xff]   ;;  %v1647_v13 = vld [vmem:[%s1919_s1 + $0x10] sm:$0xff]  }
  0x10   : > { %v1654_v11 = vld [vmem:[%s1795_s11 + $0x4] ss:$8 sps:$4 sm:$0xff]   ;;  %v1652_v18 = vld [vmem:[%s1795_s11] ss:$8 sps:$4 sm:$0xff]   ;;  %v1658_v20 = vld [vmem:[%s1795_s11 + $0x14] ss:$8 sps:$4 sm:$0xff]  }
  0x11   : > { %v1657_v12 = vld [vmem:[%s1795_s11 + $0x84] ss:$8 sps:$4 sm:$0xff]   ;;  %688 = vmatprep.mubr.bf16.mxu0 %v1654_v11  ;;  %v1655_v19 = vld [vmem:[%s1795_s11 + $0x80] ss:$8 sps:$4 sm:$0xff]   ;;  %v1660_v21 = vld [vmem:[%s1795_s11 + $0x94] ss:$8 sps:$4 sm:$0xff]  }
  0x12   : > { %1487 = vmatpush3.bf16.msra.mxu0 %v1639_v3  ;;  %1605 = vmatpush3.bf16.msra.mxu1 %v1639_v3  ;;  %v1648_v14 = vld [vmem:[%s1919_s1 + $0x48] sm:$0xff]   ;;  %v1650_v16 = vld [vmem:[%s1919_s1 + $0x40] sm:$0xff]   ;;  %v1662_v22 = vld [vmem:[%s1795_s11 + $0x10] ss:$8 sps:$4 sm:$0xff]  }
  0x13   : > { %1488 = vmatprep.subr.bf16.mxu0 %v1640_v4  ;;  %1598 = vmatprep.subr.bf16.mxu1 %v1640_v4  ;;  %v1649_v15 = vld [vmem:[%s1919_s1 + $0x8] sm:$0xff]   ;;  %v1651_v17 = vld [vmem:[%s1919_s1] sm:$0xff]   ;;  %v1663_v23 = vld [vmem:[%s1795_s11 + $0x90] ss:$8 sps:$4 sm:$0xff]  }
  0x14   : > { %752 = vmatprep.mubr.bf16.mxu1 %v1657_v12  ;;  %v1664_v24 = vld [vmem:[%s1795_s11 + $0x24] ss:$8 sps:$4 sm:$0xff]   ;;  %v1668_v26 = vld [vmem:[%s1795_s11 + $0x20] ss:$8 sps:$4 sm:$0xff]   ;;  %v1670_v28 = vld [vmem:[%s1795_s11 + $0x34] ss:$8 sps:$4 sm:$0xff]  }
  0x15   : > { %v1666_v25 = vld [vmem:[%s1795_s11 + $0xa4] ss:$8 sps:$4 sm:$0xff]   ;;  %v1669_v27 = vld [vmem:[%s1795_s11 + $0xa0] ss:$8 sps:$4 sm:$0xff]   ;;  %v1672_v29 = vld [vmem:[%s1795_s11 + $0xb4] ss:$8 sps:$4 sm:$0xff]  }
  0x16   : > { %1489 = vmatpush3.bf16.msra.mxu0 %v1641_v5  ;;  %1606 = vmatpush3.bf16.msra.mxu1 %v1641_v5  ;;  %v1674_v30 = vld [vmem:[%s1795_s11 + $0x30] ss:$8 sps:$4 sm:$0xff]   ;;  %v1676_v32 = vld [vmem:[%s1795_s11 + $0x44] ss:$8 sps:$4 sm:$0xff]   ;;  %v1680_v34 = vld [vmem:[%s1795_s11 + $0x40] ss:$8 sps:$4 sm:$0xff]  }
  0x17   : > { %1490 = vmatprep.subr.bf16.mxu0 %v1642_v6  ;;  %1599 = vmatprep.subr.bf16.mxu1 %v1642_v6  ;;  %v1675_v31 = vld [vmem:[%s1795_s11 + $0xb0] ss:$8 sps:$4 sm:$0xff]   ;;  %v1678_v33 = vld [vmem:[%s1795_s11 + $0xc4] ss:$8 sps:$4 sm:$0xff]   ;;  %v1681_v35 = vld [vmem:[%s1795_s11 + $0xc0] ss:$8 sps:$4 sm:$0xff]  }
  0x18   : > { %v1682_v36 = vld [vmem:[%s1795_s11 + $0x54] ss:$8 sps:$4 sm:$0xff]   ;;  %v1686_v38 = vld [vmem:[%s1795_s11 + $0x50] ss:$8 sps:$4 sm:$0xff]   ;;  %v1688_v40 = vld [vmem:[%s1795_s11 + $0x64] ss:$8 sps:$4 sm:$0xff]  }
  0x19   : > { %v1684_v37 = vld [vmem:[%s1795_s11 + $0xd4] ss:$8 sps:$4 sm:$0xff]   ;;  %v1687_v39 = vld [vmem:[%s1795_s11 + $0xd0] ss:$8 sps:$4 sm:$0xff]   ;;  %v1690_v41 = vld [vmem:[%s1795_s11 + $0xe4] ss:$8 sps:$4 sm:$0xff]  }
  0x1a   : > { %1491 = vmatpush3.bf16.msra.mxu0 %v1643_v7  ;;  %1607 = vmatpush3.bf16.msra.mxu1 %v1643_v7  ;;  %v1692_v42 = vld [vmem:[%s1795_s11 + $0x60] ss:$8 sps:$4 sm:$0xff]   ;;  %v1694_v44 = vld [vmem:[%s1795_s11 + $0x74] ss:$8 sps:$4 sm:$0xff]   ;;  %v1698_v46 = vld [vmem:[%s1795_s11 + $0x70] ss:$8 sps:$4 sm:$0xff]  }
  0x1b   : > { %1492 = vmatprep.subr.bf16.mxu0 %v1644_v8  ;;  %1600 = vmatprep.subr.bf16.mxu1 %v1644_v8  ;;  %v1693_v43 = vld [vmem:[%s1795_s11 + $0xe0] ss:$8 sps:$4 sm:$0xff]   ;;  %v1696_v45 = vld [vmem:[%s1795_s11 + $0xf4] ss:$8 sps:$4 sm:$0xff]   ;;  %v1699_v47 = vld [vmem:[%s1795_s11 + $0xf0] ss:$8 sps:$4 sm:$0xff]  }
  0x1c   : > { %v1853_v53 = vld [vmem:[%s1920_s2] ss:$0 sm:$0xff] }
  0x1e   : > { %1493 = vmatpush3.bf16.msra.mxu0 %v1645_v9  ;;  %1608 = vmatpush3.bf16.msra.mxu1 %v1645_v9 }
  0x1f   : > { %1494 = vmatprep.subr.bf16.mxu0 %v1646_v10  ;;  %1601 = vmatprep.subr.bf16.mxu1 %v1646_v10 }
  0x22   : > { %1495 = vmatpush3.bf16.msra.mxu0 %v1647_v13  ;;  %1609 = vmatpush3.bf16.msra.mxu1 %v1647_v13 }
  0x23   : > { %1496 = vmatprep.subr.bf16.mxu0 %v1648_v14  ;;  %1602 = vmatprep.subr.bf16.mxu1 %v1648_v14 }
  0x26   : > { %1497 = vmatpush3.bf16.msra.mxu0 %v1649_v15  ;;  %1610 = vmatpush3.bf16.msra.mxu1 %v1649_v15 }
  0x27   : > { %1498 = vmatprep.subr.bf16.mxu0 %v1650_v16  ;;  %1603 = vmatprep.subr.bf16.mxu1 %v1650_v16 }
  0x2a   : > { %1499 = vmatpush3.bf16.msra.mxu0 %v1651_v17  ;;  %1611 = vmatpush3.bf16.msra.mxu1 %v1651_v17 }
  0x2d   : > { %689 = vmatmul.mubr.bf16.vlgmr.msra.gmra.mxu0 %v1652_v18  ;;  %753 = vmatmul.mubr.bf16.vlgmr.msra.gmra.mxu1 %v1655_v19 }
  0x2e   : > { %696 = vmatprep.mubr.bf16.mxu0 %v1658_v20  ;;  %760 = vmatprep.mubr.bf16.mxu1 %v1660_v21 }
  0x35   : > { %697 = vmatmul.mubr.bf16.gmra.mxu0 %v1662_v22  ;;  %761 = vmatmul.mubr.bf16.gmra.mxu1 %v1663_v23 }
  0x36   : > { %704 = vmatprep.mubr.bf16.mxu0 %v1664_v24  ;;  %768 = vmatprep.mubr.bf16.mxu1 %v1666_v25 }
  0x3d   : > { %705 = vmatmul.mubr.bf16.gmra.mxu0 %v1668_v26  ;;  %769 = vmatmul.mubr.bf16.gmra.mxu1 %v1669_v27 }
  0x3e   : > { %712 = vmatprep.mubr.bf16.mxu0 %v1670_v28  ;;  %776 = vmatprep.mubr.bf16.mxu1 %v1672_v29 }
  0x45   : > { %713 = vmatmul.mubr.bf16.gmra.mxu0 %v1674_v30  ;;  %777 = vmatmul.mubr.bf16.gmra.mxu1 %v1675_v31 }
  0x46   : > { %720 = vmatprep.mubr.bf16.mxu0 %v1676_v32  ;;  %784 = vmatprep.mubr.bf16.mxu1 %v1678_v33 }
  0x4d   : > { %721 = vmatmul.mubr.bf16.gmra.mxu0 %v1680_v34  ;;  %785 = vmatmul.mubr.bf16.gmra.mxu1 %v1681_v35 }
  0x4e   : > { %728 = vmatprep.mubr.bf16.mxu0 %v1682_v36  ;;  %792 = vmatprep.mubr.bf16.mxu1 %v1684_v37 }
  0x55   : > { %729 = vmatmul.mubr.bf16.gmra.mxu0 %v1686_v38  ;;  %793 = vmatmul.mubr.bf16.gmra.mxu1 %v1687_v39 }
  0x56   : > { %736 = vmatprep.mubr.bf16.mxu0 %v1688_v40  ;;  %800 = vmatprep.mubr.bf16.mxu1 %v1690_v41 }
  0x5d   : > { %737 = vmatmul.mubr.bf16.gmra.mxu0 %v1692_v42  ;;  %801 = vmatmul.mubr.bf16.gmra.mxu1 %v1693_v43 }
  0x5e   : > { %744 = vmatprep.mubr.bf16.mxu0 %v1694_v44  ;;  %808 = vmatprep.mubr.bf16.mxu1 %v1696_v45 }
  0x65   : > { %745 = vmatmul.mubr.bf16.gmra.mxu0 %v1698_v46  ;;  %809 = vmatmul.mubr.bf16.gmra.mxu1 %v1699_v47 }
  0xed   : > { %v1500_v48 = vpop.f32.mrf.mxu0  ;;  %v1548_v49 = vpop.f32.mrf.mxu1 }
  0xef   : > { %v1501_v50 = vpop.f32.mrf.mxu0  ;;  %v1549_v51 = vpop.f32.mrf.mxu1 }
  0xf0   : > { %v1502_v52 = vadd.f32 %v1501_v50, %v1500_v48  ;;  %v1550_v54 = vadd.f32 %v1549_v51, %v1548_v49 }
  0xf1   : > { %v1503_v55 = vpop.f32.mrf.mxu0  ;;  %v1551_v56 = vpop.f32.mrf.mxu1 }
  0xf2   : > { %v923_v57 = vadd.f32 %v1502_v52, %v1853_v53  ;;  %v939_v58 = vadd.f32 %v1550_v54, %v1853_v53 }
  0xf3   : > { %v1504_v59 = vpop.f32.mrf.mxu0  ;;  %v1552_v60 = vpop.f32.mrf.mxu1 }
  0xf4   : > { %v1505_v61 = vadd.f32 %v1504_v59, %v1503_v55  ;;  %v1553_v62 = vadd.f32 %v1552_v60, %v1551_v56  ;;  %v955_v3 = vmax.f32 %v923_v57, 0.0  ;;  %v971_v4 = vmax.f32 %v939_v58, 0.0 }
  0xf5   : > { %v1506_v63 = vpop.f32.mrf.mxu0  ;;  %v1554_v0 = vpop.f32.mrf.mxu1 }
  0xf6   : > { %v924_v1 = vadd.f32 %v1505_v61, %v1853_v53  ;;  %v940_v2 = vadd.f32 %v1553_v62, %v1853_v53 }
  0xf7   : > { %v1507_v5 = vpop.f32.mrf.mxu0  ;;  %v1555_v6 = vpop.f32.mrf.mxu1 }
  0xf8   : > { %v956_v7 = vmax.f32 %v924_v1, 0.0  ;;  %v972_v8 = vmax.f32 %v940_v2, 0.0  ;;  %v1508_v9 = vadd.f32 %v1507_v5, %v1506_v63  ;;  %v1556_v10 = vadd.f32 %v1555_v6, %v1554_v0 }
  0xf9   : > { %v1509_v11 = vpop.f32.mrf.mxu0  ;;  %v1557_v12 = vpop.f32.mrf.mxu1 }
  0xfa   : > { %v1392_v13 = vpack.c.bf16 %v956_v7, %v955_v3  ;;  %v1432_v14 = vpack.c.bf16 %v972_v8, %v971_v4  ;;  %v925_v15 = vadd.f32 %v1508_v9, %v1853_v53  ;;  %v941_v16 = vadd.f32 %v1556_v10, %v1853_v53 }
  0xfb   : > { %v1510_v17 = vpop.f32.mrf.mxu0  ;;  %v1558_v18 = vpop.f32.mrf.mxu1 }
  0xfc   : > { %1393 = vst [vmem:[%s1863_s8] sm:$0xff] %v1392_v13   ;;  %1476 = vst [vmem:[%s1863_s8 + $0x40] sm:$0xff] %v1432_v14   ;;  %v1511_v19 = vadd.f32 %v1510_v17, %v1509_v11  ;;  %v1559_v20 = vadd.f32 %v1558_v18, %v1557_v12  ;;  %v957_v25 = vmax.f32 %v925_v15, 0.0  ;;  %v973_v26 = vmax.f32 %v941_v16, 0.0 }
  0xfd   : > { %v1512_v21 = vpop.f32.mrf.mxu0  ;;  %v1560_v22 = vpop.f32.mrf.mxu1 }
  0xfe   : > { %v926_v23 = vadd.f32 %v1511_v19, %v1853_v53  ;;  %v942_v24 = vadd.f32 %v1559_v20, %v1853_v53 }
  0xff   : > { %v1513_v27 = vpop.f32.mrf.mxu0  ;;  %v1561_v28 = vpop.f32.mrf.mxu1 }
 0x100   : > { %v958_v29 = vmax.f32 %v926_v23, 0.0  ;;  %v974_v30 = vmax.f32 %v942_v24, 0.0  ;;  %v1514_v31 = vadd.f32 %v1513_v27, %v1512_v21  ;;  %v1562_v32 = vadd.f32 %v1561_v28, %v1560_v22 }
 0x101   : > { %v1515_v33 = vpop.f32.mrf.mxu0  ;;  %v1563_v34 = vpop.f32.mrf.mxu1 }
 0x102   : > { %v1397_v35 = vpack.c.bf16 %v958_v29, %v957_v25  ;;  %v1437_v36 = vpack.c.bf16 %v974_v30, %v973_v26  ;;  %v927_v37 = vadd.f32 %v1514_v31, %v1853_v53  ;;  %v943_v38 = vadd.f32 %v1562_v32, %v1853_v53 }
 0x103   : > { %v1516_v39 = vpop.f32.mrf.mxu0  ;;  %v1564_v40 = vpop.f32.mrf.mxu1 }
 0x104   : > { %1469 = vst [vmem:[%s1863_s8 + $0x8] sm:$0xff] %v1397_v35   ;;  %1477 = vst [vmem:[%s1863_s8 + $0x48] sm:$0xff] %v1437_v36   ;;  %v1517_v41 = vadd.f32 %v1516_v39, %v1515_v33  ;;  %v1565_v42 = vadd.f32 %v1564_v40, %v1563_v34  ;;  %v959_v47 = vmax.f32 %v927_v37, 0.0  ;;  %v975_v48 = vmax.f32 %v943_v38, 0.0 }
 0x105   : > { %v1518_v43 = vpop.f32.mrf.mxu0  ;;  %v1566_v44 = vpop.f32.mrf.mxu1 }
 0x106   : > { %v928_v45 = vadd.f32 %v1517_v41, %v1853_v53  ;;  %v944_v46 = vadd.f32 %v1565_v42, %v1853_v53 }
 0x107   : > { %v1519_v49 = vpop.f32.mrf.mxu0  ;;  %v1567_v50 = vpop.f32.mrf.mxu1 }
 0x108   : > { %v960_v51 = vmax.f32 %v928_v45, 0.0  ;;  %v976_v52 = vmax.f32 %v944_v46, 0.0  ;;  %v1520_v54 = vadd.f32 %v1519_v49, %v1518_v43  ;;  %v1568_v55 = vadd.f32 %v1567_v50, %v1566_v44 }
 0x109   : > { %v1521_v56 = vpop.f32.mrf.mxu0  ;;  %v1569_v57 = vpop.f32.mrf.mxu1 }
 0x10a   : > { %v1402_v58 = vpack.c.bf16 %v960_v51, %v959_v47  ;;  %v1442_v59 = vpack.c.bf16 %v976_v52, %v975_v48  ;;  %v929_v60 = vadd.f32 %v1520_v54, %v1853_v53  ;;  %v945_v61 = vadd.f32 %v1568_v55, %v1853_v53 }
 0x10b   : > { %v1522_v62 = vpop.f32.mrf.mxu0  ;;  %v1570_v63 = vpop.f32.mrf.mxu1 }
 0x10c   : > { %1470 = vst [vmem:[%s1863_s8 + $0x10] sm:$0xff] %v1402_v58   ;;  %1478 = vst [vmem:[%s1863_s8 + $0x50] sm:$0xff] %v1442_v59   ;;  %v1523_v0 = vadd.f32 %v1522_v62, %v1521_v56  ;;  %v1571_v1 = vadd.f32 %v1570_v63, %v1569_v57  ;;  %v961_v6 = vmax.f32 %v929_v60, 0.0  ;;  %v977_v7 = vmax.f32 %v945_v61, 0.0 }
 0x10d   : > { %v1524_v2 = vpop.f32.mrf.mxu0  ;;  %v1572_v3 = vpop.f32.mrf.mxu1 }
 0x10e   : > { %v930_v4 = vadd.f32 %v1523_v0, %v1853_v53  ;;  %v946_v5 = vadd.f32 %v1571_v1, %v1853_v53 }
 0x10f   : > { %v1525_v8 = vpop.f32.mrf.mxu0  ;;  %v1573_v9 = vpop.f32.mrf.mxu1 }
 0x110   : > { %v962_v10 = vmax.f32 %v930_v4, 0.0  ;;  %v978_v11 = vmax.f32 %v946_v5, 0.0  ;;  %v1526_v12 = vadd.f32 %v1525_v8, %v1524_v2  ;;  %v1574_v13 = vadd.f32 %v1573_v9, %v1572_v3 }
 0x111   : > { %v1527_v14 = vpop.f32.mrf.mxu0  ;;  %v1575_v15 = vpop.f32.mrf.mxu1 }
 0x112   : > { %v1407_v16 = vpack.c.bf16 %v962_v10, %v961_v6  ;;  %v1447_v17 = vpack.c.bf16 %v978_v11, %v977_v7  ;;  %v931_v18 = vadd.f32 %v1526_v12, %v1853_v53  ;;  %v947_v19 = vadd.f32 %v1574_v13, %v1853_v53 }
 0x113   : > { %v1528_v20 = vpop.f32.mrf.mxu0  ;;  %v1576_v21 = vpop.f32.mrf.mxu1 }
 0x114   : > { %1471 = vst [vmem:[%s1863_s8 + $0x18] sm:$0xff] %v1407_v16   ;;  %1479 = vst [vmem:[%s1863_s8 + $0x58] sm:$0xff] %v1447_v17   ;;  %v1529_v22 = vadd.f32 %v1528_v20, %v1527_v14  ;;  %v1577_v23 = vadd.f32 %v1576_v21, %v1575_v15  ;;  %v963_v28 = vmax.f32 %v931_v18, 0.0  ;;  %v979_v29 = vmax.f32 %v947_v19, 0.0 }
 0x115   : > { %v1530_v24 = vpop.f32.mrf.mxu0  ;;  %v1578_v25 = vpop.f32.mrf.mxu1 }
 0x116   : > { %v932_v26 = vadd.f32 %v1529_v22, %v1853_v53  ;;  %v948_v27 = vadd.f32 %v1577_v23, %v1853_v53 }
 0x117   : > { %v1531_v30 = vpop.f32.mrf.mxu0  ;;  %v1579_v31 = vpop.f32.mrf.mxu1 }
 0x118   : > { %v964_v32 = vmax.f32 %v932_v26, 0.0  ;;  %v980_v33 = vmax.f32 %v948_v27, 0.0  ;;  %v1532_v34 = vadd.f32 %v1531_v30, %v1530_v24  ;;  %v1580_v35 = vadd.f32 %v1579_v31, %v1578_v25 }
 0x119   : > { %v1533_v36 = vpop.f32.mrf.mxu0  ;;  %v1581_v37 = vpop.f32.mrf.mxu1 }
 0x11a   : > { %v1412_v38 = vpack.c.bf16 %v964_v32, %v963_v28  ;;  %v1452_v39 = vpack.c.bf16 %v980_v33, %v979_v29  ;;  %v933_v40 = vadd.f32 %v1532_v34, %v1853_v53  ;;  %v949_v41 = vadd.f32 %v1580_v35, %v1853_v53 }
 0x11b   : > { %v1534_v42 = vpop.f32.mrf.mxu0  ;;  %v1582_v43 = vpop.f32.mrf.mxu1 }
 0x11c   : > { %1472 = vst [vmem:[%s1863_s8 + $0x20] sm:$0xff] %v1412_v38   ;;  %1480 = vst [vmem:[%s1863_s8 + $0x60] sm:$0xff] %v1452_v39   ;;  %v1535_v44 = vadd.f32 %v1534_v42, %v1533_v36  ;;  %v1583_v45 = vadd.f32 %v1582_v43, %v1581_v37  ;;  %v965_v50 = vmax.f32 %v933_v40, 0.0  ;;  %v981_v51 = vmax.f32 %v949_v41, 0.0 }
 0x11d   : > { %v1536_v46 = vpop.f32.mrf.mxu0  ;;  %v1584_v47 = vpop.f32.mrf.mxu1 }
 0x11e   : > { %v934_v48 = vadd.f32 %v1535_v44, %v1853_v53  ;;  %v950_v49 = vadd.f32 %v1583_v45, %v1853_v53 }
 0x11f   : > { %v1537_v52 = vpop.f32.mrf.mxu0  ;;  %v1585_v54 = vpop.f32.mrf.mxu1 }
 0x120   : > { %v966_v55 = vmax.f32 %v934_v48, 0.0  ;;  %v982_v56 = vmax.f32 %v950_v49, 0.0  ;;  %v1538_v57 = vadd.f32 %v1537_v52, %v1536_v46  ;;  %v1586_v58 = vadd.f32 %v1585_v54, %v1584_v47 }
 0x121   : > { %v1539_v59 = vpop.f32.mrf.mxu0  ;;  %v1587_v60 = vpop.f32.mrf.mxu1 }
 0x122   : > { %v1417_v61 = vpack.c.bf16 %v966_v55, %v965_v50  ;;  %v1457_v62 = vpack.c.bf16 %v982_v56, %v981_v51  ;;  %v935_v63 = vadd.f32 %v1538_v57, %v1853_v53  ;;  %v951_v0 = vadd.f32 %v1586_v58, %v1853_v53 }
 0x123   : > { %v1540_v1 = vpop.f32.mrf.mxu0  ;;  %v1588_v2 = vpop.f32.mrf.mxu1 }
 0x124   : > { %1473 = vst [vmem:[%s1863_s8 + $0x28] sm:$0xff] %v1417_v61   ;;  %1481 = vst [vmem:[%s1863_s8 + $0x68] sm:$0xff] %v1457_v62   ;;  %v1541_v3 = vadd.f32 %v1540_v1, %v1539_v59  ;;  %v1589_v4 = vadd.f32 %v1588_v2, %v1587_v60  ;;  %v967_v9 = vmax.f32 %v935_v63, 0.0  ;;  %v983_v10 = vmax.f32 %v951_v0, 0.0 }
 0x125   : > { %v1542_v5 = vpop.f32.mrf.mxu0  ;;  %v1590_v6 = vpop.f32.mrf.mxu1 }
 0x126   : > { %v936_v7 = vadd.f32 %v1541_v3, %v1853_v53  ;;  %v952_v8 = vadd.f32 %v1589_v4, %v1853_v53 }
 0x127   : > { %v1543_v11 = vpop.f32.mrf.mxu0  ;;  %v1591_v12 = vpop.f32.mrf.mxu1 }
 0x128   : > { %v968_v13 = vmax.f32 %v936_v7, 0.0  ;;  %v984_v14 = vmax.f32 %v952_v8, 0.0  ;;  %v1544_v15 = vadd.f32 %v1543_v11, %v1542_v5  ;;  %v1592_v16 = vadd.f32 %v1591_v12, %v1590_v6 }
 0x129   : > { %v1545_v17 = vpop.f32.mrf.mxu0  ;;  %v1593_v18 = vpop.f32.mrf.mxu1 }
 0x12a   : > { %v1422_v19 = vpack.c.bf16 %v968_v13, %v967_v9  ;;  %v1462_v20 = vpack.c.bf16 %v984_v14, %v983_v10  ;;  %v937_v23 = vadd.f32 %v1544_v15, %v1853_v53  ;;  %v953_v24 = vadd.f32 %v1592_v16, %v1853_v53 }
 0x12b   : > { %v1546_v21 = vpop.f32.mrf.mxu0  ;;  %v1594_v22 = vpop.f32.mrf.mxu1 }
 0x12c   : > { %1474 = vst [vmem:[%s1863_s8 + $0x30] sm:$0xff] %v1422_v19   ;;  %1482 = vst [vmem:[%s1863_s8 + $0x70] sm:$0xff] %v1462_v20   ;;  %v1547_v25 = vadd.f32 %v1546_v21, %v1545_v17  ;;  %v1595_v26 = vadd.f32 %v1594_v22, %v1593_v18  ;;  %v969_v29 = vmax.f32 %v937_v23, 0.0  ;;  %v985_v30 = vmax.f32 %v953_v24, 0.0 }
 0x12e   : > { %v938_v27 = vadd.f32 %v1547_v25, %v1853_v53  ;;  %v954_v28 = vadd.f32 %v1595_v26, %v1853_v53 }
 0x130   : > { %v970_v31 = vmax.f32 %v938_v27, 0.0  ;;  %v986_v32 = vmax.f32 %v954_v28, 0.0 }
 0x132   : > { %v1427_v33 = vpack.c.bf16 %v970_v31, %v969_v29  ;;  %v1467_v34 = vpack.c.bf16 %v986_v32, %v985_v30 }
 0x134   : > { %1475 = vst [vmem:[%s1863_s8 + $0x38] sm:$0xff] %v1427_v33   ;;  %1483 = vst [vmem:[%s1863_s8 + $0x78] sm:$0xff] %v1467_v34  }
 0x135 PF: > { %s13_s14 = sadd.s32 1, %s1722_s14   ;;  %s1922_s12 = smov %s1718_s13 }
 0x136   : > { %p10_p5 = scmp.ge.s32.totalorder %s13_s14, 4   ;;  %s1923_s13 = smov %s1925_s15 }
 0x138   :  { %12 = sbr.rel (!%p10_p5) target bundleno = 2 (0x2), region = 76 }

// kernel: resnet_forward.21
= control target key start
LH: loop header
LB: loop body
LE: loop exit
PB: predicated region body
PF: predicated region fallthrough
CT: control target
= control target key end

     0   :  { %s1869_s1 = inlined_call_operand.vmem [shape: bf16[640,128], index: 1, kind: input, shape index: {}]   ;;  %s1870_s0 = inlined_call_operand.vmem [shape: bf16[128,640], index: 0, kind: input, shape index: {}]   ;;  %s1871_s2 = inlined_call_operand.vmem [shape: f32[1,128], index: 2, kind: input, shape index: {}]   ;;  %s1872_s3 = inlined_call_operand.vmem [shape: bf16[128,128], index: 3, kind: output, shape index: {}]  }
   0x1   :  { %v1444_v0 = vld [vmem:[%s1869_s1 + $0x78] sm:$0xff]   ;;  %v1448_v4 = vld [vmem:[%s1869_s1 + $0x70] sm:$0xff]   ;;  %v1452_v8 = vld [vmem:[%s1869_s1 + $0x68] sm:$0xff]  }
   0x2   :  { %v1445_v1 = vld [vmem:[%s1869_s1 + $0xf8] sm:$0xff]   ;;  %1252 = vmatprep.subr.bf16.mxu0 %v1444_v0  ;;  %v1449_v5 = vld [vmem:[%s1869_s1 + $0xf0] sm:$0xff]   ;;  %v1453_v9 = vld [vmem:[%s1869_s1 + $0xe8] sm:$0xff]  }
   0x3   :  { %v1446_v2 = vld [vmem:[%s1869_s1 + $0x38] sm:$0xff]   ;;  %1316 = vmatprep.subr.bf16.mxu1 %v1445_v1  ;;  %v1450_v6 = vld [vmem:[%s1869_s1 + $0x30] sm:$0xff]   ;;  %v1454_v10 = vld [vmem:[%s1869_s1 + $0x28] sm:$0xff]  }
   0x4   :  { %v1447_v3 = vld [vmem:[%s1869_s1 + $0xb8] sm:$0xff]   ;;  %1253 = vmatpush3.bf16.msra.mxu0 %v1446_v2  ;;  %v1451_v7 = vld [vmem:[%s1869_s1 + $0xb0] sm:$0xff]   ;;  %v1455_v11 = vld [vmem:[%s1869_s1 + $0xa8] sm:$0xff]  }
   0x5   :  { %1317 = vmatpush3.bf16.msra.mxu1 %v1447_v3  ;;  %1254 = vmatprep.subr.bf16.mxu0 %v1448_v4  ;;  %v1456_v12 = vld [vmem:[%s1869_s1 + $0x60] sm:$0xff]   ;;  %v1460_v16 = vld [vmem:[%s1869_s1 + $0x58] sm:$0xff]   ;;  %v1464_v20 = vld [vmem:[%s1869_s1 + $0x50] sm:$0xff]  }
   0x6   :  { %1318 = vmatprep.subr.bf16.mxu1 %v1449_v5  ;;  %v1457_v13 = vld [vmem:[%s1869_s1 + $0xe0] sm:$0xff]   ;;  %v1461_v17 = vld [vmem:[%s1869_s1 + $0xd8] sm:$0xff]   ;;  %v1465_v21 = vld [vmem:[%s1869_s1 + $0xd0] sm:$0xff]  }
   0x7   :  { %v1458_v14 = vld [vmem:[%s1869_s1 + $0x20] sm:$0xff]   ;;  %v1462_v18 = vld [vmem:[%s1869_s1 + $0x18] sm:$0xff]   ;;  %v1466_v22 = vld [vmem:[%s1869_s1 + $0x10] sm:$0xff]  }
   0x8   :  { %1255 = vmatpush3.bf16.msra.mxu0 %v1450_v6  ;;  %v1459_v15 = vld [vmem:[%s1869_s1 + $0xa0] sm:$0xff]   ;;  %v1463_v19 = vld [vmem:[%s1869_s1 + $0x98] sm:$0xff]   ;;  %v1467_v23 = vld [vmem:[%s1869_s1 + $0x90] sm:$0xff]  }
   0x9   :  { %1319 = vmatpush3.bf16.msra.mxu1 %v1451_v7  ;;  %1256 = vmatprep.subr.bf16.mxu0 %v1452_v8  ;;  %v1468_v24 = vld [vmem:[%s1869_s1 + $0x48] sm:$0xff]   ;;  %v1472_v28 = vld [vmem:[%s1869_s1 + $0x40] sm:$0xff]   ;;  %v1482_v36 = vld [vmem:[%s1869_s1 + $0x138] sm:$0xff]  }
   0xa   :  { %1320 = vmatprep.subr.bf16.mxu1 %v1453_v9  ;;  %v1469_v25 = vld [vmem:[%s1869_s1 + $0xc8] sm:$0xff]   ;;  %v1473_v29 = vld [vmem:[%s1869_s1 + $0xc0] sm:$0xff]   ;;  %v1489_v39 = vld [vmem:[%s1869_s1 + $0x130] sm:$0xff]  }
   0xb   :  { %v1470_v26 = vld [vmem:[%s1869_s1 + $0x8] sm:$0xff]   ;;  %v1474_v30 = vld [vmem:[%s1869_s1] sm:$0xff]   ;;  %v1492_v43 = vld [vmem:[%s1870_s0 + $0x5c] ss:$20 sps:$4 sm:$0xff]  }
   0xc   :  { %1257 = vmatpush3.bf16.msra.mxu0 %v1454_v10  ;;  %v1471_v27 = vld [vmem:[%s1869_s1 + $0x88] sm:$0xff]   ;;  %v1475_v31 = vld [vmem:[%s1869_s1 + $0x80] sm:$0xff]   ;;  %v1497_v48 = vld [vmem:[%s1870_s0 + $0x7c] ss:$20 sps:$4 sm:$0xff]  }
   0xd   :  { %1321 = vmatpush3.bf16.msra.mxu1 %v1455_v11  ;;  %1258 = vmatprep.subr.bf16.mxu0 %v1456_v12  ;;  %v1476_v32 = vld [vmem:[%s1870_s0] ss:$20 sps:$4 sm:$0xff]   ;;  %v1478_v33 = vld [vmem:[%s1870_s0 + $0x4] ss:$20 sps:$4 sm:$0xff]   ;;  %v1479_v34 = vld [vmem:[%s1870_s0 + $0x8] ss:$20 sps:$4 sm:$0xff]  }
   0xe   :  { %1322 = vmatprep.subr.bf16.mxu1 %v1457_v13  ;;  %v1481_v35 = vld [vmem:[%s1870_s0 + $0xc] ss:$20 sps:$4 sm:$0xff]   ;;  %659 = vmatprep.mubr.bf16.mxu0 %v1478_v33  ;;  %v1485_v38 = vld [vmem:[%s1870_s0 + $0x34] ss:$20 sps:$4 sm:$0xff]   ;;  %v1488_v41 = vld [vmem:[%s1870_s0 + $0x30] ss:$20 sps:$4 sm:$0xff]  }
   0xf   :  { %756 = vmatprep.mubr.bf16.mxu1 %v1481_v35  ;;  %v1483_v37 = vld [vmem:[%s1870_s0 + $0x2c] ss:$20 sps:$4 sm:$0xff]   ;;  %v1487_v40 = vld [vmem:[%s1870_s0 + $0x28] ss:$20 sps:$4 sm:$0xff]   ;;  %v1494_v46 = vld [vmem:[%s1870_s0 + $0x50] ss:$20 sps:$4 sm:$0xff]  }
  0x10   :  { %1259 = vmatpush3.bf16.msra.mxu0 %v1458_v14  ;;  %v1490_v42 = vld [vmem:[%s1870_s0 + $0x54] ss:$20 sps:$4 sm:$0xff]   ;;  %v1503_v45 = vld [vmem:[%s1869_s1 + $0x120] sm:$0xff]   ;;  %v1495_v47 = vld [vmem:[%s1870_s0 + $0x58] ss:$20 sps:$4 sm:$0xff]  }
  0x11   :  { %1323 = vmatpush3.bf16.msra.mxu1 %v1459_v15  ;;  %1260 = vmatprep.subr.bf16.mxu0 %v1460_v16  ;;  %v1496_v44 = vld [vmem:[%s1869_s1 + $0x128] sm:$0xff]   ;;  %v1499_v49 = vld [vmem:[%s1870_s0 + $0x84] ss:$20 sps:$4 sm:$0xff]   ;;  %v1517_v51 = vld [vmem:[%s1869_s1 + $0x110] sm:$0xff]  }
  0x12   :  { %1324 = vmatprep.subr.bf16.mxu1 %v1461_v17  ;;  %v1510_v50 = vld [vmem:[%s1869_s1 + $0x118] sm:$0xff]   ;;  %v1502_v53 = vld [vmem:[%s1870_s0 + $0x80] ss:$20 sps:$4 sm:$0xff]   ;;  %v1524_v55 = vld [vmem:[%s1869_s1 + $0x108] sm:$0xff]  }
  0x13   :  { %v1501_v52 = vld [vmem:[%s1870_s0 + $0x78] ss:$20 sps:$4 sm:$0xff]   ;;  %v1531_v57 = vld [vmem:[%s1869_s1 + $0x100] sm:$0xff]   ;;  %v1509_v59 = vld [vmem:[%s1870_s0 + $0xa8] ss:$20 sps:$4 sm:$0xff]  }
  0x14   :  { %1261 = vmatpush3.bf16.msra.mxu0 %v1462_v18  ;;  %v1504_v54 = vld [vmem:[%s1870_s0 + $0xa4] ss:$20 sps:$4 sm:$0xff]   ;;  %v1506_v56 = vld [vmem:[%s1870_s0 + $0xac] ss:$20 sps:$4 sm:$0xff]   ;;  %v1513_v61 = vld [vmem:[%s1870_s0 + $0xd4] ss:$20 sps:$4 sm:$0xff]  }
  0x15   :  { %1325 = vmatpush3.bf16.msra.mxu1 %v1463_v19  ;;  %1262 = vmatprep.subr.bf16.mxu0 %v1464_v20  ;;  %v1508_v58 = vld [vmem:[%s1870_s0 + $0xa0] ss:$20 sps:$4 sm:$0xff]   ;;  %v1515_v62 = vld [vmem:[%s1870_s0 + $0xc8] ss:$20 sps:$4 sm:$0xff]   ;;  %v1516_v63 = vld [vmem:[%s1870_s0 + $0xd0] ss:$20 sps:$4 sm:$0xff]  }
  0x16   :  { %1326 = vmatprep.subr.bf16.mxu1 %v1465_v21  ;;  %v1511_v60 = vld [vmem:[%s1870_s0 + $0xcc] ss:$20 sps:$4 sm:$0xff]   ;;  %v1518_v0 = vld [vmem:[%s1870_s0 + $0xf4] ss:$20 sps:$4 sm:$0xff]   ;;  %v1520_v1 = vld [vmem:[%s1870_s0 + $0xfc] ss:$20 sps:$4 sm:$0xff]  }
  0x17   :  { %v1522_v2 = vld [vmem:[%s1870_s0 + $0xf0] ss:$20 sps:$4 sm:$0xff]   ;;  %v1523_v3 = vld [vmem:[%s1870_s0 + $0xf8] ss:$20 sps:$4 sm:$0xff]   ;;  %v1530_v7 = vld [vmem:[%s1870_s0 + $0x120] ss:$20 sps:$4 sm:$0xff]  }
  0x18   :  { %1263 = vmatpush3.bf16.msra.mxu0 %v1466_v22  ;;  %v1525_v4 = vld [vmem:[%s1870_s0 + $0x11c] ss:$20 sps:$4 sm:$0xff]   ;;  %v1527_v5 = vld [vmem:[%s1870_s0 + $0x124] ss:$20 sps:$4 sm:$0xff]   ;;  %v1536_v12 = vld [vmem:[%s1870_s0 + $0x60] ss:$20 sps:$4 sm:$0xff]  }
  0x19   :  { %1327 = vmatpush3.bf16.msra.mxu1 %v1467_v23  ;;  %1264 = vmatprep.subr.bf16.mxu0 %v1468_v24  ;;  %v1529_v6 = vld [vmem:[%s1870_s0 + $0x118] ss:$20 sps:$4 sm:$0xff]   ;;  %v1532_v8 = vld [vmem:[%s1870_s0 + $0x10] ss:$20 sps:$4 sm:$0xff]   ;;  %v1537_v13 = vld [vmem:[%s1870_s0 + $0x100] ss:$20 sps:$4 sm:$0xff]  }
  0x1a   :  { %1328 = vmatprep.subr.bf16.mxu1 %v1469_v25  ;;  %v1533_v9 = vld [vmem:[%s1870_s0 + $0xb0] ss:$20 sps:$4 sm:$0xff]   ;;  %v1534_v10 = vld [vmem:[%s1870_s0 + $0x38] ss:$20 sps:$4 sm:$0xff]   ;;  %v1538_v14 = vld [vmem:[%s1870_s0 + $0x88] ss:$20 sps:$4 sm:$0xff]  }
  0x1b   :  { %v1535_v11 = vld [vmem:[%s1870_s0 + $0xd8] ss:$20 sps:$4 sm:$0xff]   ;;  %v1539_v15 = vld [vmem:[%s1870_s0 + $0x128] ss:$20 sps:$4 sm:$0xff]  }
  0x1c   :  { %1265 = vmatpush3.bf16.msra.mxu0 %v1470_v26 }
  0x1d   :  { %1329 = vmatpush3.bf16.msra.mxu1 %v1471_v27  ;;  %1266 = vmatprep.subr.bf16.mxu0 %v1472_v28 }
  0x1e   :  { %1330 = vmatprep.subr.bf16.mxu1 %v1473_v29 }
  0x20   :  { %1267 = vmatpush3.bf16.msra.mxu0 %v1474_v30 }
  0x21   :  { %1331 = vmatpush3.bf16.msra.mxu1 %v1475_v31  ;;  %1396 = vmatprep.subr.bf16.mxu0 %v1482_v36 }
  0x22   :  { %1428 = vmatprep.subr.bf16.mxu1 %v1482_v36 }
  0x23   :  { %660 = vmatmul.mubr.bf16.vlgmr.msra.gmra.mxu0 %v1476_v32 }
  0x24   :  { %757 = vmatmul.mubr.bf16.vlgmr.msra.gmra.mxu1 %v1479_v34  ;;  %1397 = vmatpush3.bf16.msra.mxu0 %v1482_v36 }
  0x25   :  { %1436 = vmatpush3.bf16.msra.mxu1 %v1482_v36  ;;  %667 = vmatprep.mubr.bf16.mxu0 %v1483_v37 }
  0x26   :  { %764 = vmatprep.mubr.bf16.mxu1 %v1485_v38  ;;  %1398 = vmatprep.subr.bf16.mxu0 %v1489_v39 }
  0x27   :  { %1429 = vmatprep.subr.bf16.mxu1 %v1489_v39 }
  0x28   :  { %1399 = vmatpush3.bf16.msra.mxu0 %v1489_v39 }
  0x29   :  { %1437 = vmatpush3.bf16.msra.mxu1 %v1489_v39  ;;  %1400 = vmatprep.subr.bf16.mxu0 %v1496_v44 }
  0x2a   :  { %1430 = vmatprep.subr.bf16.mxu1 %v1496_v44 }
  0x2b   :  { %668 = vmatmul.mubr.bf16.gmra.mxu0 %v1487_v40 }
  0x2c   :  { %765 = vmatmul.mubr.bf16.gmra.mxu1 %v1488_v41  ;;  %675 = vmatprep.mubr.bf16.mxu0 %v1490_v42 }
  0x2d   :  { %772 = vmatprep.mubr.bf16.mxu1 %v1492_v43  ;;  %1401 = vmatpush3.bf16.msra.mxu0 %v1496_v44 }
  0x2e   :  { %1438 = vmatpush3.bf16.msra.mxu1 %v1496_v44  ;;  %1402 = vmatprep.subr.bf16.mxu0 %v1503_v45 }
  0x2f   :  { %1431 = vmatprep.subr.bf16.mxu1 %v1503_v45 }
  0x31   :  { %1403 = vmatpush3.bf16.msra.mxu0 %v1503_v45 }
  0x32   :  { %1439 = vmatpush3.bf16.msra.mxu1 %v1503_v45  ;;  %1404 = vmatprep.subr.bf16.mxu0 %v1510_v50 }
  0x33   :  { %676 = vmatmul.mubr.bf16.gmra.mxu0 %v1494_v46  ;;  %1432 = vmatprep.subr.bf16.mxu1 %v1510_v50 }
  0x34   :  { %773 = vmatmul.mubr.bf16.gmra.mxu1 %v1495_v47  ;;  %683 = vmatprep.mubr.bf16.mxu0 %v1497_v48 }
  0x35   :  { %780 = vmatprep.mubr.bf16.mxu1 %v1499_v49  ;;  %1405 = vmatpush3.bf16.msra.mxu0 %v1510_v50 }
  0x36   :  { %1440 = vmatpush3.bf16.msra.mxu1 %v1510_v50  ;;  %1406 = vmatprep.subr.bf16.mxu0 %v1517_v51 }
  0x37   :  { %1433 = vmatprep.subr.bf16.mxu1 %v1517_v51 }
  0x39   :  { %1407 = vmatpush3.bf16.msra.mxu0 %v1517_v51 }
  0x3a   :  { %1441 = vmatpush3.bf16.msra.mxu1 %v1517_v51  ;;  %1408 = vmatprep.subr.bf16.mxu0 %v1524_v55 }
  0x3b   :  { %684 = vmatmul.mubr.bf16.gmra.mxu0 %v1501_v52  ;;  %1434 = vmatprep.subr.bf16.mxu1 %v1524_v55 }
  0x3c   :  { %781 = vmatmul.mubr.bf16.gmra.mxu1 %v1502_v53  ;;  %691 = vmatprep.mubr.bf16.mxu0 %v1504_v54 }
  0x3d   :  { %788 = vmatprep.mubr.bf16.mxu1 %v1506_v56  ;;  %1409 = vmatpush3.bf16.msra.mxu0 %v1524_v55 }
  0x3e   :  { %1442 = vmatpush3.bf16.msra.mxu1 %v1524_v55  ;;  %1410 = vmatprep.subr.bf16.mxu0 %v1531_v57 }
  0x3f   :  { %1435 = vmatprep.subr.bf16.mxu1 %v1531_v57 }
  0x41   :  { %1411 = vmatpush3.bf16.msra.mxu0 %v1531_v57 }
  0x42   :  { %1443 = vmatpush3.bf16.msra.mxu1 %v1531_v57 }
  0x43   :  { %692 = vmatmul.mubr.bf16.gmra.mxu0 %v1508_v58 }
  0x44   :  { %789 = vmatmul.mubr.bf16.gmra.mxu1 %v1509_v59  ;;  %699 = vmatprep.mubr.bf16.mxu0 %v1511_v60 }
  0x45   :  { %796 = vmatprep.mubr.bf16.mxu1 %v1513_v61 }
  0x4b   :  { %700 = vmatmul.mubr.bf16.gmra.mxu0 %v1515_v62 }
  0x4c   :  { %797 = vmatmul.mubr.bf16.gmra.mxu1 %v1516_v63  ;;  %707 = vmatprep.mubr.bf16.mxu0 %v1518_v0 }
  0x4d   :  { %804 = vmatprep.mubr.bf16.mxu1 %v1520_v1 }
  0x53   :  { %708 = vmatmul.mubr.bf16.gmra.mxu0 %v1522_v2 }
  0x54   :  { %805 = vmatmul.mubr.bf16.gmra.mxu1 %v1523_v3  ;;  %715 = vmatprep.mubr.bf16.mxu0 %v1525_v4 }
  0x55   :  { %812 = vmatprep.mubr.bf16.mxu1 %v1527_v5 }
  0x5b   :  { %716 = vmatmul.mubr.bf16.gmra.mxu0 %v1529_v6 }
  0x5c   :  { %813 = vmatmul.mubr.bf16.gmra.mxu1 %v1530_v7  ;;  %1412 = vmatprep.mubr.bf16.mxu0 %v1532_v8 }
  0x5d   :  { %1420 = vmatprep.mubr.bf16.mxu1 %v1533_v9 }
  0x63   :  { %1413 = vmatmul.mubr.bf16.vlgmr.msra.gmra.mxu0 %v1534_v10 }
  0x64   :  { %1421 = vmatmul.mubr.bf16.vlgmr.msra.gmra.mxu1 %v1535_v11  ;;  %1416 = vmatprep.mubr.bf16.mxu0 %v1536_v12 }
  0x65   :  { %1424 = vmatprep.mubr.bf16.mxu1 %v1537_v13 }
  0x6b   :  { %1417 = vmatmul.mubr.bf16.gmra.mxu0 %v1538_v14 }
  0x6c   :  { %1425 = vmatmul.mubr.bf16.gmra.mxu1 %v1539_v15 }
  0xe3   :  { %v1268_v16 = vpop.f32.mrf.mxu0 }
  0xe4   :  { %v1332_v17 = vpop.f32.mrf.mxu1 }
  0xe5   :  { %v1269_v18 = vpop.f32.mrf.mxu0 }
  0xe6   :  { %v1270_v19 = vadd.f32 %v1269_v18, %v1268_v16  ;;  %v1333_v20 = vpop.f32.mrf.mxu1 }
  0xe7   :  { %v1334_v21 = vadd.f32 %v1333_v20, %v1332_v17  ;;  %v1271_v22 = vpop.f32.mrf.mxu0 }
  0xe8   :  { %v1335_v23 = vpop.f32.mrf.mxu1 }
  0xe9   :  { %v1272_v24 = vpop.f32.mrf.mxu0  ;;  %v1800_v25 = vadd.f32 %v1334_v21, %v1270_v19 }
  0xea   :  { %v1336_v26 = vpop.f32.mrf.mxu1  ;;  %v1273_v11 = vadd.f32 %v1272_v24, %v1271_v22 }
  0xeb   :  { %1873 = vst [vmem:[#allocation3_spill] sm:$0xff] %v1800_v25  ;;  %v1274_v27 = vpop.f32.mrf.mxu0  ;;  %v1337_v12 = vadd.f32 %v1336_v26, %v1335_v23 }
  0xec   :  { %v1338_v28 = vpop.f32.mrf.mxu1 }
  0xed   :  { %v1275_v29 = vpop.f32.mrf.mxu0  ;;  %v762_v22 = vadd.f32 %v1337_v12, %v1273_v11 }
  0xee   :  { %v1339_v30 = vpop.f32.mrf.mxu1  ;;  %v1276_v14 = vadd.f32 %v1275_v29, %v1274_v27 }
  0xef   :  { %v1277_v31 = vpop.f32.mrf.mxu0  ;;  %v1340_v15 = vadd.f32 %v1339_v30, %v1338_v28 }
  0xf0   :  { %v1341_v32 = vpop.f32.mrf.mxu1 }
  0xf1   :  { %v1278_v33 = vpop.f32.mrf.mxu0 }
  0xf2   :  { %v1342_v34 = vpop.f32.mrf.mxu1  ;;  %v1279_v16 = vadd.f32 %v1278_v33, %v1277_v31 }
  0xf3   :  { %v1280_v35 = vpop.f32.mrf.mxu0  ;;  %v1343_v17 = vadd.f32 %v1342_v34, %v1341_v32 }
  0xf4   :  { %v1344_v36 = vpop.f32.mrf.mxu1 }
  0xf5   :  { %v1281_v37 = vpop.f32.mrf.mxu0 }
  0xf6   :  { %v1345_v38 = vpop.f32.mrf.mxu1  ;;  %v1282_v20 = vadd.f32 %v1281_v37, %v1280_v35 }
  0xf7   :  { %v1283_v39 = vpop.f32.mrf.mxu0  ;;  %v1346_v21 = vadd.f32 %v1345_v38, %v1344_v36 }
  0xf8   :  { %v1802_v40 = vpop.f32.mrf.mxu1 }
  0xf9   :  { %1874 = vst [vmem:[#allocation4_spill] sm:$0xff] %v1802_v40  ;;  %v1284_v41 = vpop.f32.mrf.mxu0  ;;  %v775_v33 = vadd.f32 %v1346_v21, %v1282_v20 }
  0xfa   :  { %v1804_v42 = vpop.f32.mrf.mxu1  ;;  %v1814_v28 = vadd.f32 %v1284_v41, %v1283_v39  ;;  %v1821_v39 = vld [vmem:[%s1871_s2] ss:$0 sm:$0xff] }
  0xfb   :  { %1875 = vst [vmem:[#allocation5_spill] sm:$0xff] %v1804_v42  ;;  %v1286_v43 = vpop.f32.mrf.mxu0 }
  0xfc   :  { %v1350_v44 = vpop.f32.mrf.mxu1 }
  0xfd   :  { %v1287_v45 = vpop.f32.mrf.mxu0 }
  0xfe   :  { %v1351_v46 = vpop.f32.mrf.mxu1  ;;  %v1288_v24 = vadd.f32 %v1287_v45, %v1286_v43 }
  0xff   :  { %v1289_v47 = vpop.f32.mrf.mxu0  ;;  %v1352_v23 = vadd.f32 %v1351_v46, %v1350_v44 }
 0x100   :  { %v1353_v48 = vpop.f32.mrf.mxu1  ;;  %v1880_v44 = vld [vmem:[#allocation4_spill] sm:$0xff] }
 0x101   :  { %v1290_v49 = vpop.f32.mrf.mxu0 }
 0x102   :  { %v1354_v50 = vpop.f32.mrf.mxu1  ;;  %v1291_v30 = vadd.f32 %v1290_v49, %v1289_v47  ;;  %v1881_v45 = vld [vmem:[#allocation5_spill] sm:$0xff]  ;;  %v783_v49 = vadd.f32 %v1352_v23, %v1288_v24 }
 0x103   :  { %v1292_v51 = vpop.f32.mrf.mxu0  ;;  %v1355_v31 = vadd.f32 %v1354_v50, %v1353_v48  ;;  %v1349_v46 = vadd.f32 %v1881_v45, %v1880_v44 }
 0x104   :  { %v1356_v52 = vpop.f32.mrf.mxu1 }
 0x105   :  { %v1293_v53 = vpop.f32.mrf.mxu0 }
 0x106   :  { %v1357_v54 = vpop.f32.mrf.mxu1  ;;  %v1294_v26 = vadd.f32 %v1293_v53, %v1292_v51 }
 0x107   :  { %v1295_v55 = vpop.f32.mrf.mxu0  ;;  %v1358_v27 = vadd.f32 %v1357_v54, %v1356_v52  ;;  %v786_v54 = vadd.f32 %v1355_v31, %v1291_v30 }
 0x108   :  { %v1359_v56 = vpop.f32.mrf.mxu1 }
 0x109   :  { %v1296_v57 = vpop.f32.mrf.mxu0  ;;  %v791_v48 = vadd.f32 %v1358_v27, %v1294_v26 }
 0x10a   :  { %v1360_v58 = vpop.f32.mrf.mxu1  ;;  %v1297_v34 = vadd.f32 %v1296_v57, %v1295_v55 }
 0x10b   :  { %v1298_v59 = vpop.f32.mrf.mxu0 }
 0x10c   :  { %v1362_v60 = vpop.f32.mrf.mxu1 }
 0x10d   :  { %v1299_v61 = vpop.f32.mrf.mxu0 }
 0x10e   :  { %v1363_v62 = vpop.f32.mrf.mxu1  ;;  %v1300_v42 = vadd.f32 %v1299_v61, %v1298_v59  ;;  %v1361_v59 = vadd.f32 %v1360_v58, %v1359_v56 }
 0x10f   :  { %v1301_v63 = vpop.f32.mrf.mxu0 }
 0x110   :  { %v1365_v0 = vpop.f32.mrf.mxu1 }
 0x111   :  { %v1302_v1 = vpop.f32.mrf.mxu0 }
 0x112   :  { %v1366_v2 = vpop.f32.mrf.mxu1  ;;  %v1303_v35 = vadd.f32 %v1302_v1, %v1301_v63 }
 0x113   :  { %v1304_v3 = vpop.f32.mrf.mxu0  ;;  %v1367_v36 = vadd.f32 %v1366_v2, %v1365_v0 }
 0x114   :  { %v1368_v4 = vpop.f32.mrf.mxu1 }
 0x115   :  { %v1305_v5 = vpop.f32.mrf.mxu0  ;;  %v802_v63 = vadd.f32 %v1367_v36, %v1303_v35 }
 0x116   :  { %v1369_v6 = vpop.f32.mrf.mxu1 }
 0x117   :  { %v1806_v7 = vpop.f32.mrf.mxu0  ;;  %v1370_v61 = vadd.f32 %v1369_v6, %v1368_v4 }
 0x118   :  { %1876 = vst [vmem:[#allocation6_spill] sm:$0xff] %v1806_v7  ;;  %v1808_v8 = vpop.f32.mrf.mxu1  ;;  %v1364_v7 = vadd.f32 %v1363_v62, %v1362_v60  ;;  %v1306_v60 = vadd.f32 %v1305_v5, %v1304_v3  ;;  %v794_v3 = vadd.f32 %v1361_v59, %v1297_v34 }
 0x119   :  { %1877 = vst [vmem:[#allocation7_spill] sm:$0xff] %v1808_v8  ;;  %v1810_v9 = vpop.f32.mrf.mxu0 }
 0x11a   :  { %1878 = vst [vmem:[#allocation8_spill] sm:$0xff] %v1810_v9  ;;  %v1812_v10 = vpop.f32.mrf.mxu1  ;;  %v767_v9 = vadd.f32 %v1340_v15, %v1276_v14  ;;  %v799_v38 = vadd.f32 %v1364_v7, %v1300_v42  ;;  %v1882_v42 = vld [vmem:[#allocation3_spill] sm:$0xff]  ;;  %v807_v4 = vadd.f32 %v1370_v61, %v1306_v60 }
 0x11b   :  { %1879 = vst [vmem:[#allocation9_spill] sm:$0xff] %v1812_v10  ;;  %v1310_v13 = vpop.f32.mrf.mxu0  ;;  %v770_v10 = vadd.f32 %v1343_v17, %v1279_v16 }
 0x11c   :  { %v1374_v18 = vpop.f32.mrf.mxu1 }
 0x11d   :  { %v1311_v19 = vpop.f32.mrf.mxu0 }
 0x11e   :  { %v1375_v25 = vpop.f32.mrf.mxu1  ;;  %v1312_v50 = vadd.f32 %v1311_v19, %v1310_v13 }
 0x11f   :  { %v1313_v40 = vpop.f32.mrf.mxu0  ;;  %v1376_v51 = vadd.f32 %v1375_v25, %v1374_v18  ;;  %v1883_v5 = vld [vmem:[#allocation6_spill] sm:$0xff] }
 0x120   :  { %v1377_v8 = vpop.f32.mrf.mxu1 }
 0x121   :  { %v1314_v29 = vpop.f32.mrf.mxu0  ;;  %v1884_v6 = vld [vmem:[#allocation8_spill] sm:$0xff] }
 0x122   :  { %v1378_v32 = vpop.f32.mrf.mxu1  ;;  %v1315_v55 = vadd.f32 %v1314_v29, %v1313_v40  ;;  %v1309_v7 = vadd.f32 %v1884_v6, %v1883_v5  ;;  %v1886_v25 = vld [vmem:[#allocation9_spill] sm:$0xff] }
 0x123   :  { %v1414_v37 = vpop.f32.mrf.mxu0  ;;  %v1379_v56 = vadd.f32 %v1378_v32, %v1377_v8 }
 0x124   :  { %v864_v62 = vadd.f32 %v1414_v37, %v767_v9  ;;  %v1422_v43 = vpop.f32.mrf.mxu1  ;;  %v1885_v9 = vld [vmem:[#allocation7_spill] sm:$0xff] }
 0x125   :  { %v896_v41 = vadd.f32 %v1422_v43, %v799_v38  ;;  %v855_v47 = vpop.f32.mrf.mxu0  ;;  %v1373_v11 = vadd.f32 %v1886_v25, %v1885_v9  ;;  %v818_v21 = vadd.f32 %v1379_v56, %v1315_v55 }
 0x126   :  { %v856_v52 = vadd.f32 %v855_v47, %v1882_v42  ;;  %v887_v53 = vpop.f32.mrf.mxu1  ;;  %v978_v0 = vadd.f32 %v1821_v39, %v864_v62 }
 0x127   :  { %v888_v57 = vadd.f32 %v887_v53, %v791_v48  ;;  %v1415_v58 = vpop.f32.mrf.mxu0  ;;  %v986_v12 = vadd.f32 %v1821_v39, %v896_v41 }
 0x128   :  { %v867_v1 = vadd.f32 %v1415_v58, %v770_v10  ;;  %v1423_v2 = vpop.f32.mrf.mxu1  ;;  %v976_v8 = vadd.f32 %v1821_v39, %v856_v52  ;;  %v815_v10 = vadd.f32 %v1376_v51, %v1312_v50  ;;  %v994_v24 = vmax.f32 %v978_v0, 0.0 }
 0x129   :  { %v899_v13 = vadd.f32 %v1423_v2, %v802_v63  ;;  %v858_v40 = vpop.f32.mrf.mxu0  ;;  %v984_v17 = vadd.f32 %v1821_v39, %v888_v57  ;;  %v1002_v30 = vmax.f32 %v986_v12, 0.0  ;;  %v810_v52 = vadd.f32 %v1373_v11, %v1309_v7 }
 0x12a   :  { %v979_v14 = vadd.f32 %v1821_v39, %v867_v1  ;;  %v859_v15 = vadd.f32 %v858_v40, %v762_v22  ;;  %v890_v16 = vpop.f32.mrf.mxu1  ;;  %v992_v35 = vmax.f32 %v976_v8, 0.0 }
 0x12b   :  { %v987_v18 = vadd.f32 %v1821_v39, %v899_v13  ;;  %v891_v19 = vadd.f32 %v890_v16, %v794_v3  ;;  %v1418_v20 = vpop.f32.mrf.mxu0  ;;  %v1000_v60 = vmax.f32 %v984_v17, 0.0 }
 0x12c   :  { %v995_v23 = vmax.f32 %v979_v14, 0.0  ;;  %v977_v26 = vadd.f32 %v1821_v39, %v859_v15  ;;  %v880_v27 = vadd.f32 %v1418_v20, %v783_v49  ;;  %v1426_v29 = vpop.f32.mrf.mxu1  ;;  %v778_v49 = vadd.f32 %v1349_v46, %v1814_v28 }
 0x12d   :  { %v1003_v31 = vmax.f32 %v987_v18, 0.0  ;;  %v985_v32 = vadd.f32 %v1821_v39, %v891_v19  ;;  %v912_v22 = vadd.f32 %v1426_v29, %v815_v10  ;;  %v871_v34 = vpop.f32.mrf.mxu0 }
 0x12e   :  { %v1213_v36 = vpack.c.bf16 %v995_v23, %v994_v24  ;;  %v993_v37 = vmax.f32 %v977_v26, 0.0  ;;  %v872_v38 = vadd.f32 %v871_v34, %v775_v33  ;;  %v903_v59 = vpop.f32.mrf.mxu1  ;;  %v982_v41 = vadd.f32 %v1821_v39, %v880_v27 }
 0x12f   :  { %v1233_v61 = vpack.c.bf16 %v1003_v31, %v1002_v30  ;;  %v1001_v62 = vmax.f32 %v985_v32, 0.0  ;;  %v904_v43 = vadd.f32 %v903_v59, %v807_v4  ;;  %v1419_v44 = vpop.f32.mrf.mxu0  ;;  %v990_v50 = vadd.f32 %v1821_v39, %v912_v22 }
 0x130   :  { %1245 = vst [vmem:[%s1872_s3 + $0x8] sm:$0xff] %v1213_v36   ;;  %v1208_v45 = vpack.c.bf16 %v993_v37, %v992_v35  ;;  %v883_v47 = vadd.f32 %v1419_v44, %v786_v54  ;;  %v1427_v48 = vpop.f32.mrf.mxu1  ;;  %v980_v53 = vadd.f32 %v1821_v39, %v872_v38  ;;  %v998_v58 = vmax.f32 %v982_v41, 0.0 }
 0x131   :  { %1249 = vst [vmem:[%s1872_s3 + $0x28] sm:$0xff] %v1233_v61   ;;  %v1228_v33 = vpack.c.bf16 %v1001_v62, %v1000_v60  ;;  %v915_v51 = vadd.f32 %v1427_v48, %v818_v21  ;;  %v874_v42 = vpop.f32.mrf.mxu0  ;;  %v988_v46 = vadd.f32 %v1821_v39, %v904_v43  ;;  %v1006_v1 = vmax.f32 %v990_v50, 0.0 }
 0x132   :  { %1209 = vst [vmem:[%s1872_s3] sm:$0xff] %v1208_v45   ;;  %v983_v54 = vadd.f32 %v1821_v39, %v883_v47  ;;  %v875_v55 = vadd.f32 %v874_v42, %v778_v49  ;;  %v906_v28 = vpop.f32.mrf.mxu1  ;;  %v996_v4 = vmax.f32 %v980_v53, 0.0 }
 0x133   :  { %1248 = vst [vmem:[%s1872_s3 + $0x20] sm:$0xff] %v1228_v33   ;;  %v991_v56 = vadd.f32 %v1821_v39, %v915_v51  ;;  %v907_v57 = vadd.f32 %v906_v28, %v810_v52  ;;  %v1004_v7 = vmax.f32 %v988_v46, 0.0 }
 0x134   :  { %v999_v63 = vmax.f32 %v983_v54, 0.0  ;;  %v981_v0 = vadd.f32 %v1821_v39, %v875_v55 }
 0x135   :  { %v1007_v2 = vmax.f32 %v991_v56, 0.0  ;;  %v989_v3 = vadd.f32 %v1821_v39, %v907_v57 }
 0x136   :  { %v1223_v5 = vpack.c.bf16 %v999_v63, %v998_v58  ;;  %v997_v6 = vmax.f32 %v981_v0, 0.0 }
 0x137   :  { %v1243_v9 = vpack.c.bf16 %v1007_v2, %v1006_v1  ;;  %v1005_v25 = vmax.f32 %v989_v3, 0.0 }
 0x138   :  { %1247 = vst [vmem:[%s1872_s3 + $0x18] sm:$0xff] %v1223_v5   ;;  %v1218_v11 = vpack.c.bf16 %v997_v6, %v996_v4 }
 0x139   :  { %1251 = vst [vmem:[%s1872_s3 + $0x38] sm:$0xff] %v1243_v9   ;;  %v1238_v12 = vpack.c.bf16 %v1005_v25, %v1004_v7 }
 0x13a   :  { %1246 = vst [vmem:[%s1872_s3 + $0x10] sm:$0xff] %v1218_v11  }
 0x13b   :  { %1250 = vst [vmem:[%s1872_s3 + $0x30] sm:$0xff] %v1238_v12  }

// kernel: resnet_forward.22
= control target key start
LH: loop header
LB: loop body
LE: loop exit
PB: predicated region body
PF: predicated region fallthrough
CT: control target
= control target key end

     0   :  { %s2165_s1 = inlined_call_operand.vmem [shape: bf16[640,128], index: 1, kind: input, shape index: {}]   ;;  %s2166_s0 = inlined_call_operand.vmem [shape: bf16[128,640], index: 0, kind: input, shape index: {}]   ;;  %s2167_s3 = inlined_call_operand.vmem [shape: bf16[128,128], index: 3, kind: input, shape index: {}]   ;;  %s2168_s2 = inlined_call_operand.vmem [shape: f32[1,128], index: 2, kind: input, shape index: {}]   ;;  %s2169_s4 = inlined_call_operand.vmem [shape: bf16[128,128], index: 4, kind: output, shape index: {}]  }
   0x1   :  { %v1534_v0 = vld [vmem:[%s2165_s1 + $0x78] sm:$0xff]   ;;  %v1538_v4 = vld [vmem:[%s2165_s1 + $0x70] sm:$0xff]   ;;  %v1542_v8 = vld [vmem:[%s2165_s1 + $0x68] sm:$0xff]  }
   0x2   :  { %v1535_v1 = vld [vmem:[%s2165_s1 + $0xf8] sm:$0xff]   ;;  %1342 = vmatprep.subr.bf16.mxu0 %v1534_v0  ;;  %v1539_v5 = vld [vmem:[%s2165_s1 + $0xf0] sm:$0xff]   ;;  %v1543_v9 = vld [vmem:[%s2165_s1 + $0xe8] sm:$0xff]  }
   0x3   :  { %v1536_v2 = vld [vmem:[%s2165_s1 + $0x38] sm:$0xff]   ;;  %1406 = vmatprep.subr.bf16.mxu1 %v1535_v1  ;;  %v1540_v6 = vld [vmem:[%s2165_s1 + $0x30] sm:$0xff]   ;;  %v1544_v10 = vld [vmem:[%s2165_s1 + $0x28] sm:$0xff]  }
   0x4   :  { %v1537_v3 = vld [vmem:[%s2165_s1 + $0xb8] sm:$0xff]   ;;  %1343 = vmatpush3.bf16.msra.mxu0 %v1536_v2  ;;  %v1541_v7 = vld [vmem:[%s2165_s1 + $0xb0] sm:$0xff]   ;;  %v1545_v11 = vld [vmem:[%s2165_s1 + $0xa8] sm:$0xff]  }
   0x5   :  { %1407 = vmatpush3.bf16.msra.mxu1 %v1537_v3  ;;  %1344 = vmatprep.subr.bf16.mxu0 %v1538_v4  ;;  %v1546_v12 = vld [vmem:[%s2165_s1 + $0x60] sm:$0xff]   ;;  %v1550_v16 = vld [vmem:[%s2165_s1 + $0x58] sm:$0xff]   ;;  %v1554_v20 = vld [vmem:[%s2165_s1 + $0x50] sm:$0xff]  }
   0x6   :  { %1408 = vmatprep.subr.bf16.mxu1 %v1539_v5  ;;  %v1547_v13 = vld [vmem:[%s2165_s1 + $0xe0] sm:$0xff]   ;;  %v1551_v17 = vld [vmem:[%s2165_s1 + $0xd8] sm:$0xff]   ;;  %v1555_v21 = vld [vmem:[%s2165_s1 + $0xd0] sm:$0xff]  }
   0x7   :  { %v1548_v14 = vld [vmem:[%s2165_s1 + $0x20] sm:$0xff]   ;;  %v1552_v18 = vld [vmem:[%s2165_s1 + $0x18] sm:$0xff]   ;;  %v1556_v22 = vld [vmem:[%s2165_s1 + $0x10] sm:$0xff]  }
   0x8   :  { %1345 = vmatpush3.bf16.msra.mxu0 %v1540_v6  ;;  %v1549_v15 = vld [vmem:[%s2165_s1 + $0xa0] sm:$0xff]   ;;  %v1553_v19 = vld [vmem:[%s2165_s1 + $0x98] sm:$0xff]   ;;  %v1557_v23 = vld [vmem:[%s2165_s1 + $0x90] sm:$0xff]  }
   0x9   :  { %1409 = vmatpush3.bf16.msra.mxu1 %v1541_v7  ;;  %1346 = vmatprep.subr.bf16.mxu0 %v1542_v8  ;;  %v1558_v24 = vld [vmem:[%s2165_s1 + $0x48] sm:$0xff]   ;;  %v1562_v28 = vld [vmem:[%s2165_s1 + $0x40] sm:$0xff]   ;;  %v1572_v36 = vld [vmem:[%s2165_s1 + $0x138] sm:$0xff]  }
   0xa   :  { %1410 = vmatprep.subr.bf16.mxu1 %v1543_v9  ;;  %v1559_v25 = vld [vmem:[%s2165_s1 + $0xc8] sm:$0xff]   ;;  %v1563_v29 = vld [vmem:[%s2165_s1 + $0xc0] sm:$0xff]   ;;  %v1579_v39 = vld [vmem:[%s2165_s1 + $0x130] sm:$0xff]  }
   0xb   :  { %v1560_v26 = vld [vmem:[%s2165_s1 + $0x8] sm:$0xff]   ;;  %v1564_v30 = vld [vmem:[%s2165_s1] sm:$0xff]   ;;  %v1582_v43 = vld [vmem:[%s2166_s0 + $0x5c] ss:$20 sps:$4 sm:$0xff]  }
   0xc   :  { %1347 = vmatpush3.bf16.msra.mxu0 %v1544_v10  ;;  %v1561_v27 = vld [vmem:[%s2165_s1 + $0x88] sm:$0xff]   ;;  %v1565_v31 = vld [vmem:[%s2165_s1 + $0x80] sm:$0xff]   ;;  %v1587_v48 = vld [vmem:[%s2166_s0 + $0x7c] ss:$20 sps:$4 sm:$0xff]  }
   0xd   :  { %1411 = vmatpush3.bf16.msra.mxu1 %v1545_v11  ;;  %1348 = vmatprep.subr.bf16.mxu0 %v1546_v12  ;;  %v1566_v32 = vld [vmem:[%s2166_s0] ss:$20 sps:$4 sm:$0xff]   ;;  %v1568_v33 = vld [vmem:[%s2166_s0 + $0x4] ss:$20 sps:$4 sm:$0xff]   ;;  %v1569_v34 = vld [vmem:[%s2166_s0 + $0x8] ss:$20 sps:$4 sm:$0xff]  }
   0xe   :  { %1412 = vmatprep.subr.bf16.mxu1 %v1547_v13  ;;  %v1571_v35 = vld [vmem:[%s2166_s0 + $0xc] ss:$20 sps:$4 sm:$0xff]   ;;  %662 = vmatprep.mubr.bf16.mxu0 %v1568_v33  ;;  %v1575_v38 = vld [vmem:[%s2166_s0 + $0x34] ss:$20 sps:$4 sm:$0xff]   ;;  %v1578_v41 = vld [vmem:[%s2166_s0 + $0x30] ss:$20 sps:$4 sm:$0xff]  }
   0xf   :  { %759 = vmatprep.mubr.bf16.mxu1 %v1571_v35  ;;  %v1573_v37 = vld [vmem:[%s2166_s0 + $0x2c] ss:$20 sps:$4 sm:$0xff]   ;;  %v1577_v40 = vld [vmem:[%s2166_s0 + $0x28] ss:$20 sps:$4 sm:$0xff]   ;;  %v1584_v46 = vld [vmem:[%s2166_s0 + $0x50] ss:$20 sps:$4 sm:$0xff]  }
  0x10   :  { %1349 = vmatpush3.bf16.msra.mxu0 %v1548_v14  ;;  %v1580_v42 = vld [vmem:[%s2166_s0 + $0x54] ss:$20 sps:$4 sm:$0xff]   ;;  %v1593_v45 = vld [vmem:[%s2165_s1 + $0x120] sm:$0xff]   ;;  %v1585_v47 = vld [vmem:[%s2166_s0 + $0x58] ss:$20 sps:$4 sm:$0xff]  }
  0x11   :  { %1413 = vmatpush3.bf16.msra.mxu1 %v1549_v15  ;;  %1350 = vmatprep.subr.bf16.mxu0 %v1550_v16  ;;  %v1586_v44 = vld [vmem:[%s2165_s1 + $0x128] sm:$0xff]   ;;  %v1589_v49 = vld [vmem:[%s2166_s0 + $0x84] ss:$20 sps:$4 sm:$0xff]   ;;  %v1607_v51 = vld [vmem:[%s2165_s1 + $0x110] sm:$0xff]  }
  0x12   :  { %1414 = vmatprep.subr.bf16.mxu1 %v1551_v17  ;;  %v1600_v50 = vld [vmem:[%s2165_s1 + $0x118] sm:$0xff]   ;;  %v1592_v53 = vld [vmem:[%s2166_s0 + $0x80] ss:$20 sps:$4 sm:$0xff]   ;;  %v1614_v55 = vld [vmem:[%s2165_s1 + $0x108] sm:$0xff]  }
  0x13   :  { %v1591_v52 = vld [vmem:[%s2166_s0 + $0x78] ss:$20 sps:$4 sm:$0xff]   ;;  %v1621_v57 = vld [vmem:[%s2165_s1 + $0x100] sm:$0xff]   ;;  %v1599_v59 = vld [vmem:[%s2166_s0 + $0xa8] ss:$20 sps:$4 sm:$0xff]  }
  0x14   :  { %1351 = vmatpush3.bf16.msra.mxu0 %v1552_v18  ;;  %v1594_v54 = vld [vmem:[%s2166_s0 + $0xa4] ss:$20 sps:$4 sm:$0xff]   ;;  %v1596_v56 = vld [vmem:[%s2166_s0 + $0xac] ss:$20 sps:$4 sm:$0xff]   ;;  %v1603_v61 = vld [vmem:[%s2166_s0 + $0xd4] ss:$20 sps:$4 sm:$0xff]  }
  0x15   :  { %1415 = vmatpush3.bf16.msra.mxu1 %v1553_v19  ;;  %1352 = vmatprep.subr.bf16.mxu0 %v1554_v20  ;;  %v1598_v58 = vld [vmem:[%s2166_s0 + $0xa0] ss:$20 sps:$4 sm:$0xff]   ;;  %v1605_v62 = vld [vmem:[%s2166_s0 + $0xc8] ss:$20 sps:$4 sm:$0xff]   ;;  %v1606_v63 = vld [vmem:[%s2166_s0 + $0xd0] ss:$20 sps:$4 sm:$0xff]  }
  0x16   :  { %1416 = vmatprep.subr.bf16.mxu1 %v1555_v21  ;;  %v1601_v60 = vld [vmem:[%s2166_s0 + $0xcc] ss:$20 sps:$4 sm:$0xff]   ;;  %v1608_v0 = vld [vmem:[%s2166_s0 + $0xf4] ss:$20 sps:$4 sm:$0xff]   ;;  %v1610_v1 = vld [vmem:[%s2166_s0 + $0xfc] ss:$20 sps:$4 sm:$0xff]  }
  0x17   :  { %v1612_v2 = vld [vmem:[%s2166_s0 + $0xf0] ss:$20 sps:$4 sm:$0xff]   ;;  %v1613_v3 = vld [vmem:[%s2166_s0 + $0xf8] ss:$20 sps:$4 sm:$0xff]   ;;  %v1620_v7 = vld [vmem:[%s2166_s0 + $0x120] ss:$20 sps:$4 sm:$0xff]  }
  0x18   :  { %1353 = vmatpush3.bf16.msra.mxu0 %v1556_v22  ;;  %v1615_v4 = vld [vmem:[%s2166_s0 + $0x11c] ss:$20 sps:$4 sm:$0xff]   ;;  %v1617_v5 = vld [vmem:[%s2166_s0 + $0x124] ss:$20 sps:$4 sm:$0xff]   ;;  %v1626_v12 = vld [vmem:[%s2166_s0 + $0x60] ss:$20 sps:$4 sm:$0xff]  }
  0x19   :  { %1417 = vmatpush3.bf16.msra.mxu1 %v1557_v23  ;;  %1354 = vmatprep.subr.bf16.mxu0 %v1558_v24  ;;  %v1619_v6 = vld [vmem:[%s2166_s0 + $0x118] ss:$20 sps:$4 sm:$0xff]   ;;  %v1622_v8 = vld [vmem:[%s2166_s0 + $0x10] ss:$20 sps:$4 sm:$0xff]   ;;  %v1627_v13 = vld [vmem:[%s2166_s0 + $0x100] ss:$20 sps:$4 sm:$0xff]  }
  0x1a   :  { %1418 = vmatprep.subr.bf16.mxu1 %v1559_v25  ;;  %v1623_v9 = vld [vmem:[%s2166_s0 + $0xb0] ss:$20 sps:$4 sm:$0xff]   ;;  %v1624_v10 = vld [vmem:[%s2166_s0 + $0x38] ss:$20 sps:$4 sm:$0xff]   ;;  %v1628_v14 = vld [vmem:[%s2166_s0 + $0x88] ss:$20 sps:$4 sm:$0xff]  }
  0x1b   :  { %v1625_v11 = vld [vmem:[%s2166_s0 + $0xd8] ss:$20 sps:$4 sm:$0xff]   ;;  %v1629_v15 = vld [vmem:[%s2166_s0 + $0x128] ss:$20 sps:$4 sm:$0xff]  }
  0x1c   :  { %1355 = vmatpush3.bf16.msra.mxu0 %v1560_v26 }
  0x1d   :  { %1419 = vmatpush3.bf16.msra.mxu1 %v1561_v27  ;;  %1356 = vmatprep.subr.bf16.mxu0 %v1562_v28 }
  0x1e   :  { %1420 = vmatprep.subr.bf16.mxu1 %v1563_v29 }
  0x20   :  { %1357 = vmatpush3.bf16.msra.mxu0 %v1564_v30 }
  0x21   :  { %1421 = vmatpush3.bf16.msra.mxu1 %v1565_v31  ;;  %1486 = vmatprep.subr.bf16.mxu0 %v1572_v36 }
  0x22   :  { %1518 = vmatprep.subr.bf16.mxu1 %v1572_v36 }
  0x23   :  { %663 = vmatmul.mubr.bf16.vlgmr.msra.gmra.mxu0 %v1566_v32 }
  0x24   :  { %760 = vmatmul.mubr.bf16.vlgmr.msra.gmra.mxu1 %v1569_v34  ;;  %1487 = vmatpush3.bf16.msra.mxu0 %v1572_v36 }
  0x25   :  { %1526 = vmatpush3.bf16.msra.mxu1 %v1572_v36  ;;  %670 = vmatprep.mubr.bf16.mxu0 %v1573_v37 }
  0x26   :  { %767 = vmatprep.mubr.bf16.mxu1 %v1575_v38  ;;  %1488 = vmatprep.subr.bf16.mxu0 %v1579_v39 }
  0x27   :  { %1519 = vmatprep.subr.bf16.mxu1 %v1579_v39 }
  0x28   :  { %1489 = vmatpush3.bf16.msra.mxu0 %v1579_v39 }
  0x29   :  { %1527 = vmatpush3.bf16.msra.mxu1 %v1579_v39  ;;  %1490 = vmatprep.subr.bf16.mxu0 %v1586_v44 }
  0x2a   :  { %1520 = vmatprep.subr.bf16.mxu1 %v1586_v44 }
  0x2b   :  { %671 = vmatmul.mubr.bf16.gmra.mxu0 %v1577_v40 }
  0x2c   :  { %768 = vmatmul.mubr.bf16.gmra.mxu1 %v1578_v41  ;;  %678 = vmatprep.mubr.bf16.mxu0 %v1580_v42 }
  0x2d   :  { %775 = vmatprep.mubr.bf16.mxu1 %v1582_v43  ;;  %1491 = vmatpush3.bf16.msra.mxu0 %v1586_v44 }
  0x2e   :  { %1528 = vmatpush3.bf16.msra.mxu1 %v1586_v44  ;;  %1492 = vmatprep.subr.bf16.mxu0 %v1593_v45 }
  0x2f   :  { %1521 = vmatprep.subr.bf16.mxu1 %v1593_v45 }
  0x31   :  { %1493 = vmatpush3.bf16.msra.mxu0 %v1593_v45 }
  0x32   :  { %1529 = vmatpush3.bf16.msra.mxu1 %v1593_v45  ;;  %1494 = vmatprep.subr.bf16.mxu0 %v1600_v50 }
  0x33   :  { %679 = vmatmul.mubr.bf16.gmra.mxu0 %v1584_v46  ;;  %1522 = vmatprep.subr.bf16.mxu1 %v1600_v50 }
  0x34   :  { %776 = vmatmul.mubr.bf16.gmra.mxu1 %v1585_v47  ;;  %686 = vmatprep.mubr.bf16.mxu0 %v1587_v48 }
  0x35   :  { %783 = vmatprep.mubr.bf16.mxu1 %v1589_v49  ;;  %1495 = vmatpush3.bf16.msra.mxu0 %v1600_v50 }
  0x36   :  { %1530 = vmatpush3.bf16.msra.mxu1 %v1600_v50  ;;  %1496 = vmatprep.subr.bf16.mxu0 %v1607_v51 }
  0x37   :  { %1523 = vmatprep.subr.bf16.mxu1 %v1607_v51 }
  0x39   :  { %1497 = vmatpush3.bf16.msra.mxu0 %v1607_v51 }
  0x3a   :  { %1531 = vmatpush3.bf16.msra.mxu1 %v1607_v51  ;;  %1498 = vmatprep.subr.bf16.mxu0 %v1614_v55 }
  0x3b   :  { %687 = vmatmul.mubr.bf16.gmra.mxu0 %v1591_v52  ;;  %1524 = vmatprep.subr.bf16.mxu1 %v1614_v55 }
  0x3c   :  { %784 = vmatmul.mubr.bf16.gmra.mxu1 %v1592_v53  ;;  %694 = vmatprep.mubr.bf16.mxu0 %v1594_v54 }
  0x3d   :  { %791 = vmatprep.mubr.bf16.mxu1 %v1596_v56  ;;  %1499 = vmatpush3.bf16.msra.mxu0 %v1614_v55 }
  0x3e   :  { %1532 = vmatpush3.bf16.msra.mxu1 %v1614_v55  ;;  %1500 = vmatprep.subr.bf16.mxu0 %v1621_v57 }
  0x3f   :  { %1525 = vmatprep.subr.bf16.mxu1 %v1621_v57 }
  0x41   :  { %1501 = vmatpush3.bf16.msra.mxu0 %v1621_v57 }
  0x42   :  { %1533 = vmatpush3.bf16.msra.mxu1 %v1621_v57 }
  0x43   :  { %695 = vmatmul.mubr.bf16.gmra.mxu0 %v1598_v58 }
  0x44   :  { %792 = vmatmul.mubr.bf16.gmra.mxu1 %v1599_v59  ;;  %702 = vmatprep.mubr.bf16.mxu0 %v1601_v60 }
  0x45   :  { %799 = vmatprep.mubr.bf16.mxu1 %v1603_v61 }
  0x4b   :  { %703 = vmatmul.mubr.bf16.gmra.mxu0 %v1605_v62 }
  0x4c   :  { %800 = vmatmul.mubr.bf16.gmra.mxu1 %v1606_v63  ;;  %710 = vmatprep.mubr.bf16.mxu0 %v1608_v0 }
  0x4d   :  { %807 = vmatprep.mubr.bf16.mxu1 %v1610_v1 }
  0x53   :  { %711 = vmatmul.mubr.bf16.gmra.mxu0 %v1612_v2 }
  0x54   :  { %808 = vmatmul.mubr.bf16.gmra.mxu1 %v1613_v3  ;;  %718 = vmatprep.mubr.bf16.mxu0 %v1615_v4 }
  0x55   :  { %815 = vmatprep.mubr.bf16.mxu1 %v1617_v5 }
  0x5b   :  { %719 = vmatmul.mubr.bf16.gmra.mxu0 %v1619_v6 }
  0x5c   :  { %816 = vmatmul.mubr.bf16.gmra.mxu1 %v1620_v7  ;;  %1502 = vmatprep.mubr.bf16.mxu0 %v1622_v8  ;;  %v1980_v7 = vld [vmem:[%s2167_s3 + $0x8] sm:$0xff]  }
  0x5d   :  { %1510 = vmatprep.mubr.bf16.mxu1 %v1623_v9  ;;  %v1985_v8 = vld [vmem:[%s2167_s3 + $0x28] sm:$0xff]   ;;  %v1990_v9 = vld [vmem:[%s2167_s3] sm:$0xff]  }
  0x63   :  { %1503 = vmatmul.mubr.bf16.vlgmr.msra.gmra.mxu0 %v1624_v10 }
  0x64   :  { %1511 = vmatmul.mubr.bf16.vlgmr.msra.gmra.mxu1 %v1625_v11  ;;  %1506 = vmatprep.mubr.bf16.mxu0 %v1626_v12  ;;  %v1997_v11 = vld [vmem:[%s2167_s3 + $0x20] sm:$0xff]  }
  0x65   :  { %1514 = vmatprep.mubr.bf16.mxu1 %v1627_v13  ;;  %v2004_v13 = vld [vmem:[%s2167_s3 + $0x18] sm:$0xff]  }
  0x6b   :  { %1507 = vmatmul.mubr.bf16.gmra.mxu0 %v1628_v14  ;;  %v2009_v14 = vld [vmem:[%s2167_s3 + $0x38] sm:$0xff]  }
  0x6c   :  { %1515 = vmatmul.mubr.bf16.gmra.mxu1 %v1629_v15  ;;  %v2014_v15 = vld [vmem:[%s2167_s3 + $0x10] sm:$0xff]  }
  0xe3   :  { %v1358_v16 = vpop.f32.mrf.mxu0 }
  0xe4   :  { %v1422_v17 = vpop.f32.mrf.mxu1 }
  0xe5   :  { %v1359_v18 = vpop.f32.mrf.mxu0 }
  0xe6   :  { %v1360_v19 = vadd.f32 %v1359_v18, %v1358_v16  ;;  %v1423_v20 = vpop.f32.mrf.mxu1 }
  0xe7   :  { %v1424_v21 = vadd.f32 %v1423_v20, %v1422_v17  ;;  %v1895_v22 = vpop.f32.mrf.mxu0  ;;  %v2024_v20 = vld [vmem:[%s2167_s3 + $0x30] sm:$0xff]  }
  0xe8   :  { %v1897_v23 = vpop.f32.mrf.mxu1 }
  0xe9   :  { %v1899_v24 = vpop.f32.mrf.mxu0  ;;  %v1901_v25 = vadd.f32 %v1424_v21, %v1360_v19 }
  0xea   :  { %v1903_v26 = vpop.f32.mrf.mxu1 }
  0xeb   :  { %2170 = vst [vmem:[#allocation3_spill] sm:$0xff] %v1901_v25  ;;  %v1905_v27 = vpop.f32.mrf.mxu0  ;;  %v1282_v25 = vunpack.c.l.bf16 %v2024_v20 }
  0xec   :  { %v1907_v28 = vpop.f32.mrf.mxu1 }
  0xed   :  { %v1909_v29 = vpop.f32.mrf.mxu0 }
  0xee   :  { %v1911_v30 = vpop.f32.mrf.mxu1  ;;  %v1366_v18 = vadd.f32 %v1909_v29, %v1905_v27 }
  0xef   :  { %v1913_v31 = vpop.f32.mrf.mxu0  ;;  %v1430_v19 = vadd.f32 %v1911_v30, %v1907_v28 }
  0xf0   :  { %v1915_v32 = vpop.f32.mrf.mxu1 }
  0xf1   :  { %v1917_v33 = vpop.f32.mrf.mxu0 }
  0xf2   :  { %v1919_v34 = vpop.f32.mrf.mxu1 }
  0xf3   :  { %v1921_v35 = vpop.f32.mrf.mxu0 }
  0xf4   :  { %v1923_v36 = vpop.f32.mrf.mxu1 }
  0xf5   :  { %v1925_v37 = vpop.f32.mrf.mxu0 }
  0xf6   :  { %v1927_v38 = vpop.f32.mrf.mxu1 }
  0xf7   :  { %v1929_v39 = vpop.f32.mrf.mxu0 }
  0xf8   :  { %v1931_v40 = vpop.f32.mrf.mxu1 }
  0xf9   :  { %v1933_v41 = vpop.f32.mrf.mxu0 }
  0xfa   :  { %v1935_v42 = vpop.f32.mrf.mxu1 }
  0xfb   :  { %v1937_v43 = vpop.f32.mrf.mxu0  ;;  %v1439_v27 = vadd.f32 %v1935_v42, %v1931_v40 }
  0xfc   :  { %v1939_v44 = vpop.f32.mrf.mxu1 }
  0xfd   :  { %v1941_v45 = vpop.f32.mrf.mxu0 }
  0xfe   :  { %v1943_v46 = vpop.f32.mrf.mxu1  ;;  %v1378_v29 = vadd.f32 %v1941_v45, %v1937_v43  ;;  %v770_v45 = vadd.f32 %v1430_v19, %v1366_v18  ;;  %v2179_v18 = vld [vmem:[#allocation3_spill] sm:$0xff] }
  0xff   :  { %v1945_v47 = vpop.f32.mrf.mxu0  ;;  %v1442_v30 = vadd.f32 %v1943_v46, %v1939_v44 }
 0x100   :  { %v1947_v48 = vpop.f32.mrf.mxu1 }
 0x101   :  { %v1949_v49 = vpop.f32.mrf.mxu0 }
 0x102   :  { %v1951_v50 = vpop.f32.mrf.mxu1 }
 0x103   :  { %v1953_v51 = vpop.f32.mrf.mxu0 }
 0x104   :  { %v1955_v52 = vpop.f32.mrf.mxu1 }
 0x105   :  { %v1957_v53 = vpop.f32.mrf.mxu0 }
 0x106   :  { %v1959_v54 = vpop.f32.mrf.mxu1 }
 0x107   :  { %v1961_v55 = vpop.f32.mrf.mxu0 }
 0x108   :  { %v1963_v56 = vpop.f32.mrf.mxu1 }
 0x109   :  { %v1965_v57 = vpop.f32.mrf.mxu0 }
 0x10a   :  { %v1967_v58 = vpop.f32.mrf.mxu1 }
 0x10b   :  { %v1388_v59 = vpop.f32.mrf.mxu0  ;;  %v1451_v40 = vadd.f32 %v1967_v58, %v1963_v56 }
 0x10c   :  { %v1452_v60 = vpop.f32.mrf.mxu1 }
 0x10d   :  { %v1389_v61 = vpop.f32.mrf.mxu0 }
 0x10e   :  { %v1453_v62 = vpop.f32.mrf.mxu1 }
 0x10f   :  { %v1391_v63 = vpop.f32.mrf.mxu0 }
 0x110   :  { %v1455_v0 = vpop.f32.mrf.mxu1 }
 0x111   :  { %v1392_v1 = vpop.f32.mrf.mxu0 }
 0x112   :  { %v1456_v2 = vpop.f32.mrf.mxu1 }
 0x113   :  { %v1969_v3 = vpop.f32.mrf.mxu0  ;;  %v1457_v42 = vadd.f32 %v1456_v2, %v1455_v0 }
 0x114   :  { %v1971_v4 = vpop.f32.mrf.mxu1 }
 0x115   :  { %2171 = vst [vmem:[#allocation4_spill] sm:$0xff] %v1971_v4  ;;  %v1973_v5 = vpop.f32.mrf.mxu0  ;;  %v1369_v4 = vadd.f32 %v1917_v33, %v1913_v31  ;;  %v1390_v31 = vadd.f32 %v1389_v61, %v1388_v59 }
 0x116   :  { %v1975_v6 = vpop.f32.mrf.mxu1 }
 0x117   :  { %2172 = vst [vmem:[#allocation5_spill] sm:$0xff] %v1975_v6  ;;  %v1992_v10 = vpop.f32.mrf.mxu0  ;;  %v1286_v6 = vunpack.c.l.bf16 %v2009_v14 }
 0x118   :  { %2173 = vst [vmem:[#allocation6_spill] sm:$0xff] %v1992_v10  ;;  %v1999_v12 = vpop.f32.mrf.mxu1 }
 0x119   :  { %2174 = vst [vmem:[#allocation7_spill] sm:$0xff] %v1999_v12  ;;  %v2016_v16 = vpop.f32.mrf.mxu0  ;;  %v1427_v12 = vadd.f32 %v1903_v26, %v1897_v23  ;;  %v1372_v23 = vadd.f32 %v1925_v37, %v1921_v35  ;;  %v1436_v26 = vadd.f32 %v1927_v38, %v1923_v36  ;;  %v1445_v35 = vadd.f32 %v1951_v50, %v1947_v48  ;;  %v2078_v50 = vld [vmem:[%s2168_s2] ss:$0 sm:$0xff] }
 0x11a   :  { %2175 = vst [vmem:[#allocation8_spill] sm:$0xff] %v2016_v16  ;;  %v2026_v21 = vpop.f32.mrf.mxu1  ;;  %v1375_v16 = vadd.f32 %v1933_v41, %v1929_v39  ;;  %v1384_v36 = vadd.f32 %v1957_v53, %v1953_v51  ;;  %v1448_v37 = vadd.f32 %v1959_v54, %v1955_v52  ;;  %v1387_v39 = vadd.f32 %v1965_v57, %v1961_v55 }
 0x11b   :  { %2176 = vst [vmem:[#allocation9_spill] sm:$0xff] %v2026_v21  ;;  %v1400_v17 = vpop.f32.mrf.mxu0  ;;  %v1363_v21 = vadd.f32 %v1899_v24, %v1895_v22  ;;  %v1433_v22 = vadd.f32 %v1919_v34, %v1915_v32  ;;  %v1454_v32 = vadd.f32 %v1453_v62, %v1452_v60  ;;  %v1381_v34 = vadd.f32 %v1949_v49, %v1945_v47 }
 0x11c   :  { %v1464_v10 = vpop.f32.mrf.mxu1  ;;  %v1393_v41 = vadd.f32 %v1392_v1, %v1391_v63  ;;  %v1287_v48 = vunpack.c.h.bf16 %v2009_v14  ;;  %v786_v52 = vadd.f32 %v1442_v30, %v1378_v29  ;;  %v778_v53 = vadd.f32 %v1436_v26, %v1372_v23  ;;  %v2177_v56 = vld [vmem:[#allocation4_spill] sm:$0xff] }
 0x11d   :  { %v1401_v24 = vpop.f32.mrf.mxu0  ;;  %v773_v46 = vadd.f32 %v1433_v22, %v1369_v4  ;;  %v765_v47 = vadd.f32 %v1427_v12, %v1363_v21  ;;  %v802_v51 = vadd.f32 %v1454_v32, %v1390_v31  ;;  %v2080_v54 = vadd.f32 %v1439_v27, %v1375_v16 }
 0x11e   :  { %v1465_v28 = vpop.f32.mrf.mxu1  ;;  %v1396_v55 = vadd.f32 %v1973_v5, %v1969_v3  ;;  %v2178_v57 = vld [vmem:[#allocation5_spill] sm:$0xff]  ;;  %v2086_v61 = vadd.f32 %v1445_v35, %v1381_v34  ;;  %v794_v0 = vadd.f32 %v1448_v37, %v1384_v36  ;;  %v805_v1 = vadd.f32 %v1457_v42, %v1393_v41 }
 0x11f   :  { %v1403_v33 = vpop.f32.mrf.mxu0  ;;  %v1460_v58 = vadd.f32 %v2178_v57, %v2177_v56  ;;  %v797_v2 = vadd.f32 %v1451_v40, %v1387_v39  ;;  %v1402_v4 = vadd.f32 %v1401_v24, %v1400_v17  ;;  %v1466_v12 = vadd.f32 %v1465_v28, %v1464_v10  ;;  %v2180_v27 = vld [vmem:[#allocation6_spill] sm:$0xff] }
 0x120   :  { %v1467_v38 = vpop.f32.mrf.mxu1  ;;  %v2182_v10 = vld [vmem:[#allocation7_spill] sm:$0xff]  ;;  %v2184_v35 = vunpack.c.l.bf16 %v1980_v7  ;;  %v2185_v39 = vunpack.c.l.bf16 %v1985_v8  ;;  %v2187_v57 = vunpack.c.l.bf16 %v1997_v11 }
 0x121   :  { %v1404_v43 = vpop.f32.mrf.mxu0  ;;  %v2181_v29 = vld [vmem:[#allocation8_spill] sm:$0xff]  ;;  %v810_v17 = vadd.f32 %v1460_v58, %v1396_v55 }
 0x122   :  { %v1468_v44 = vpop.f32.mrf.mxu1  ;;  %v1405_v3 = vadd.f32 %v1404_v43, %v1403_v33  ;;  %v1399_v30 = vadd.f32 %v2181_v29, %v2180_v27  ;;  %v2183_v24 = vld [vmem:[#allocation9_spill] sm:$0xff] }
 0x123   :  { %v1504_v49 = vpop.f32.mrf.mxu0  ;;  %v1469_v5 = vadd.f32 %v1468_v44, %v1467_v38  ;;  %v1463_v28 = vadd.f32 %v2183_v24, %v2182_v10  ;;  %v818_v44 = vadd.f32 %v1466_v12, %v1402_v4 }
 0x124   :  { %v867_v59 = vadd.f32 %v1504_v49, %v770_v45  ;;  %v1512_v60 = vpop.f32.mrf.mxu1  ;;  %v2186_v45 = vunpack.c.l.bf16 %v1990_v9 }
 0x125   :  { %v899_v62 = vadd.f32 %v1512_v60, %v802_v51  ;;  %v858_v63 = vpop.f32.mrf.mxu0  ;;  %v821_v56 = vadd.f32 %v1469_v5, %v1405_v3 }
 0x126   :  { %v981_v16 = vadd.f32 %v2078_v50, %v867_v59  ;;  %v859_v19 = vadd.f32 %v858_v63, %v2179_v18  ;;  %v890_v21 = vpop.f32.mrf.mxu1  ;;  %v2188_v59 = vunpack.c.h.bf16 %v1980_v7 }
 0x127   :  { %v989_v22 = vadd.f32 %v2078_v50, %v899_v62  ;;  %v891_v23 = vadd.f32 %v890_v21, %v794_v0  ;;  %v1505_v26 = vpop.f32.mrf.mxu0  ;;  %v2190_v21 = vunpack.c.h.bf16 %v1990_v9 }
 0x128   :  { %v979_v31 = vadd.f32 %v2078_v50, %v859_v19  ;;  %v870_v32 = vadd.f32 %v1505_v26, %v773_v46  ;;  %v1513_v34 = vpop.f32.mrf.mxu1  ;;  %v1029_v36 = vadd.f32 %v2184_v35, %v981_v16 }
 0x129   :  { %v987_v33 = vadd.f32 %v2078_v50, %v891_v23  ;;  %v902_v37 = vadd.f32 %v1513_v34, %v805_v1  ;;  %v861_v38 = vpop.f32.mrf.mxu0  ;;  %v1037_v40 = vadd.f32 %v2185_v39, %v989_v22  ;;  %v2189_v1 = vunpack.c.h.bf16 %v1985_v8 }
 0x12a   :  { %v982_v41 = vadd.f32 %v2078_v50, %v870_v32  ;;  %v862_v42 = vadd.f32 %v861_v38, %v765_v47  ;;  %v893_v43 = vpop.f32.mrf.mxu1  ;;  %v1027_v46 = vadd.f32 %v2186_v45, %v979_v31  ;;  %v1045_v0 = vmax.f32 %v1029_v36, 0.0 }
 0x12b   :  { %v990_v49 = vadd.f32 %v2078_v50, %v902_v37  ;;  %v894_v51 = vadd.f32 %v893_v43, %v797_v2  ;;  %v1508_v55 = vpop.f32.mrf.mxu0  ;;  %v1035_v58 = vadd.f32 %v2187_v57, %v987_v33  ;;  %v1053_v18 = vmax.f32 %v1037_v40, 0.0 }
 0x12c   :  { %v1030_v60 = vadd.f32 %v2188_v59, %v982_v41  ;;  %v980_v62 = vadd.f32 %v2078_v50, %v862_v42  ;;  %v883_v63 = vadd.f32 %v1508_v55, %v786_v52  ;;  %v1516_v47 = vpop.f32.mrf.mxu1  ;;  %v1043_v22 = vmax.f32 %v1027_v46, 0.0 }
 0x12d   :  { %v1038_v4 = vadd.f32 %v2189_v1, %v990_v49  ;;  %v988_v12 = vadd.f32 %v2078_v50, %v894_v51  ;;  %v915_v16 = vadd.f32 %v1516_v47, %v818_v44  ;;  %v874_v2 = vpop.f32.mrf.mxu0  ;;  %v2191_v52 = vunpack.c.h.bf16 %v1997_v11 }
 0x12e   :  { %v1046_v19 = vmax.f32 %v1030_v60, 0.0  ;;  %v1028_v3 = vadd.f32 %v2190_v21, %v980_v62  ;;  %v875_v5 = vadd.f32 %v874_v2, %v778_v53  ;;  %v906_v7 = vpop.f32.mrf.mxu1  ;;  %v1051_v8 = vmax.f32 %v1035_v58, 0.0 }
 0x12f   :  { %v1054_v23 = vmax.f32 %v1038_v4, 0.0  ;;  %v1036_v26 = vadd.f32 %v2191_v52, %v988_v12  ;;  %v907_v27 = vadd.f32 %v906_v7, %v810_v17  ;;  %v1509_v29 = vpop.f32.mrf.mxu0  ;;  %v985_v34 = vadd.f32 %v2078_v50, %v883_v63 }
 0x130   :  { %v1296_v31 = vpack.c.bf16 %v1046_v19, %v1045_v0  ;;  %v1044_v32 = vmax.f32 %v1028_v3, 0.0  ;;  %v1517_v10 = vpop.f32.mrf.mxu1  ;;  %v993_v9 = vadd.f32 %v2078_v50, %v915_v16  ;;  %v983_v53 = vadd.f32 %v2078_v50, %v875_v5 }
 0x131   :  { %v1316_v24 = vpack.c.bf16 %v1054_v23, %v1053_v18  ;;  %v1052_v35 = vmax.f32 %v1036_v26, 0.0  ;;  %v877_v36 = vpop.f32.mrf.mxu0  ;;  %v991_v17 = vadd.f32 %v2078_v50, %v907_v27  ;;  %v886_v33 = vadd.f32 %v1509_v29, %v2086_v61 }
 0x132   :  { %1335 = vst [vmem:[%s2169_s4 + $0x8] sm:$0xff] %v1296_v31   ;;  %v1291_v11 = vpack.c.bf16 %v1044_v32, %v1043_v22  ;;  %v813_v37 = vadd.f32 %v1463_v28, %v1399_v30  ;;  %v909_v38 = vpop.f32.mrf.mxu1  ;;  %v918_v40 = vadd.f32 %v1517_v10, %v821_v56  ;;  %v1267_v41 = vunpack.c.h.bf16 %v2014_v15 }
 0x133   :  { %1339 = vst [vmem:[%s2169_s4 + $0x28] sm:$0xff] %v1316_v24   ;;  %v1311_v39 = vpack.c.bf16 %v1052_v35, %v1051_v8  ;;  %v1283_v42 = vunpack.c.h.bf16 %v2024_v20  ;;  %v2192_v43 = vunpack.c.l.bf16 %v2004_v13  ;;  %v986_v61 = vadd.f32 %v2078_v50, %v886_v33 }
 0x134   :  { %1292 = vst [vmem:[%s2169_s4] sm:$0xff] %v1291_v11   ;;  %v878_v30 = vadd.f32 %v877_v36, %v2080_v54  ;;  %v910_v28 = vadd.f32 %v909_v38, %v813_v37  ;;  %v1041_v45 = vadd.f32 %v1286_v6, %v993_v9  ;;  %v2193_v46 = vunpack.c.l.bf16 %v2014_v15 }
 0x135   :  { %v1033_v44 = vadd.f32 %v2192_v43, %v985_v34  ;;  %1338 = vst [vmem:[%s2169_s4 + $0x20] sm:$0xff] %v1311_v39   ;;  %v994_v51 = vadd.f32 %v2078_v50, %v918_v40  ;;  %v1039_v55 = vadd.f32 %v1282_v25, %v991_v17  ;;  %v2194_v56 = vunpack.c.h.bf16 %v2004_v13 }
 0x136   :  { %v1031_v49 = vadd.f32 %v2193_v46, %v983_v53  ;;  %v984_v54 = vadd.f32 %v2078_v50, %v878_v30  ;;  %v992_v58 = vadd.f32 %v2078_v50, %v910_v28  ;;  %v1057_v63 = vmax.f32 %v1041_v45, 0.0 }
 0x137   :  { %v1034_v57 = vadd.f32 %v2194_v56, %v986_v61  ;;  %v1042_v59 = vadd.f32 %v1287_v48, %v994_v51  ;;  %v1049_v60 = vmax.f32 %v1033_v44, 0.0  ;;  %v1055_v1 = vmax.f32 %v1039_v55, 0.0 }
 0x138   :  { %v1032_v62 = vadd.f32 %v1267_v41, %v984_v54  ;;  %v1040_v15 = vadd.f32 %v1283_v42, %v992_v58  ;;  %v1047_v47 = vmax.f32 %v1031_v49, 0.0 }
 0x139   :  { %v1050_v6 = vmax.f32 %v1034_v57, 0.0  ;;  %v1058_v0 = vmax.f32 %v1042_v59, 0.0 }
 0x13a   :  { %v1048_v25 = vmax.f32 %v1032_v62, 0.0  ;;  %v1056_v4 = vmax.f32 %v1040_v15, 0.0 }
 0x13b   :  { %v1306_v20 = vpack.c.bf16 %v1050_v6, %v1049_v60  ;;  %v1326_v13 = vpack.c.bf16 %v1058_v0, %v1057_v63 }
 0x13c   :  { %v1301_v50 = vpack.c.bf16 %v1048_v25, %v1047_v47  ;;  %v1321_v12 = vpack.c.bf16 %v1056_v4, %v1055_v1 }
 0x13d   :  { %1337 = vst [vmem:[%s2169_s4 + $0x18] sm:$0xff] %v1306_v20   ;;  %1341 = vst [vmem:[%s2169_s4 + $0x38] sm:$0xff] %v1326_v13  }
 0x13e   :  { %1336 = vst [vmem:[%s2169_s4 + $0x10] sm:$0xff] %v1301_v50   ;;  %1340 = vst [vmem:[%s2169_s4 + $0x30] sm:$0xff] %v1321_v12  }

// kernel: resnet_forward.25
= control target key start
LH: loop header
LB: loop body
LE: loop exit
PB: predicated region body
PF: predicated region fallthrough
CT: control target
= control target key end

     0   :  { %s1001_s1 = inlined_call_operand.vmem [shape: bf16[640,128], index: 1, kind: input, shape index: {}]   ;;  %s1002_s0 = inlined_call_operand.vmem [shape: bf16[32,640], index: 0, kind: input, shape index: {}]   ;;  %s1003_s2 = inlined_call_operand.vmem [shape: f32[1,128], index: 2, kind: input, shape index: {}]   ;;  %s1004_s3 = inlined_call_operand.vmem [shape: bf16[32,128], index: 3, kind: output, shape index: {}]  }
   0x1   :  { %v768_v0 = vld [vmem:[%s1001_s1 + $0x78] sm:$0xff]   ;;  %v772_v4 = vld [vmem:[%s1001_s1 + $0x70] sm:$0xff]   ;;  %v776_v8 = vld [vmem:[%s1001_s1 + $0x68] sm:$0xff]  }
   0x2   :  { %v769_v1 = vld [vmem:[%s1001_s1 + $0xf8] sm:$0xff]   ;;  %682 = vmatprep.subr.bf16.mxu0 %v768_v0  ;;  %v773_v5 = vld [vmem:[%s1001_s1 + $0xf0] sm:$0xff]   ;;  %v777_v9 = vld [vmem:[%s1001_s1 + $0xe8] sm:$0xff]  }
   0x3   :  { %v770_v2 = vld [vmem:[%s1001_s1 + $0x38] sm:$0xff]   ;;  %710 = vmatprep.subr.bf16.mxu1 %v769_v1  ;;  %v774_v6 = vld [vmem:[%s1001_s1 + $0x30] sm:$0xff]   ;;  %v778_v10 = vld [vmem:[%s1001_s1 + $0x28] sm:$0xff]  }
   0x4   :  { %v771_v3 = vld [vmem:[%s1001_s1 + $0xb8] sm:$0xff]   ;;  %683 = vmatpush3.bf16.msra.mxu0 %v770_v2  ;;  %v775_v7 = vld [vmem:[%s1001_s1 + $0xb0] sm:$0xff]   ;;  %v779_v11 = vld [vmem:[%s1001_s1 + $0xa8] sm:$0xff]  }
   0x5   :  { %711 = vmatpush3.bf16.msra.mxu1 %v771_v3  ;;  %684 = vmatprep.subr.bf16.mxu0 %v772_v4  ;;  %v780_v12 = vld [vmem:[%s1001_s1 + $0x60] sm:$0xff]   ;;  %v784_v16 = vld [vmem:[%s1001_s1 + $0x58] sm:$0xff]   ;;  %v788_v20 = vld [vmem:[%s1001_s1 + $0x50] sm:$0xff]  }
   0x6   :  { %712 = vmatprep.subr.bf16.mxu1 %v773_v5  ;;  %v781_v13 = vld [vmem:[%s1001_s1 + $0xe0] sm:$0xff]   ;;  %v785_v17 = vld [vmem:[%s1001_s1 + $0xd8] sm:$0xff]   ;;  %v789_v21 = vld [vmem:[%s1001_s1 + $0xd0] sm:$0xff]  }
   0x7   :  { %v782_v14 = vld [vmem:[%s1001_s1 + $0x20] sm:$0xff]   ;;  %v786_v18 = vld [vmem:[%s1001_s1 + $0x18] sm:$0xff]   ;;  %v790_v22 = vld [vmem:[%s1001_s1 + $0x10] sm:$0xff]  }
   0x8   :  { %685 = vmatpush3.bf16.msra.mxu0 %v774_v6  ;;  %v783_v15 = vld [vmem:[%s1001_s1 + $0xa0] sm:$0xff]   ;;  %v787_v19 = vld [vmem:[%s1001_s1 + $0x98] sm:$0xff]   ;;  %v791_v23 = vld [vmem:[%s1001_s1 + $0x90] sm:$0xff]  }
   0x9   :  { %713 = vmatpush3.bf16.msra.mxu1 %v775_v7  ;;  %686 = vmatprep.subr.bf16.mxu0 %v776_v8  ;;  %v792_v24 = vld [vmem:[%s1001_s1 + $0x48] sm:$0xff]   ;;  %v796_v28 = vld [vmem:[%s1001_s1 + $0x40] sm:$0xff]   ;;  %v806_v36 = vld [vmem:[%s1001_s1 + $0x138] sm:$0xff]  }
   0xa   :  { %714 = vmatprep.subr.bf16.mxu1 %v777_v9  ;;  %v793_v25 = vld [vmem:[%s1001_s1 + $0xc8] sm:$0xff]   ;;  %v797_v29 = vld [vmem:[%s1001_s1 + $0xc0] sm:$0xff]   ;;  %v807_v37 = vld [vmem:[%s1001_s1 + $0x130] sm:$0xff]  }
   0xb   :  { %v794_v26 = vld [vmem:[%s1001_s1 + $0x8] sm:$0xff]   ;;  %v798_v30 = vld [vmem:[%s1001_s1] sm:$0xff]   ;;  %v810_v45 = vld [vmem:[%s1001_s1 + $0x118] sm:$0xff]  }
   0xc   :  { %687 = vmatpush3.bf16.msra.mxu0 %v778_v10  ;;  %v795_v27 = vld [vmem:[%s1001_s1 + $0x88] sm:$0xff]   ;;  %v799_v31 = vld [vmem:[%s1001_s1 + $0x80] sm:$0xff]   ;;  %v817_v46 = vld [vmem:[%s1001_s1 + $0x110] sm:$0xff]  }
   0xd   :  { %715 = vmatpush3.bf16.msra.mxu1 %v779_v11  ;;  %688 = vmatprep.subr.bf16.mxu0 %v780_v12  ;;  %v800_v32 = vld [vmem:[%s1002_s0] ss:$20 sps:$4 sm:$0xff]   ;;  %v802_v33 = vld [vmem:[%s1002_s0 + $0x4] ss:$20 sps:$4 sm:$0xff]   ;;  %v803_v34 = vld [vmem:[%s1002_s0 + $0x8] ss:$20 sps:$4 sm:$0xff]  }
   0xe   :  { %716 = vmatprep.subr.bf16.mxu1 %v781_v13  ;;  %v805_v35 = vld [vmem:[%s1002_s0 + $0xc] ss:$20 sps:$4 sm:$0xff]   ;;  %443 = vmatprep.mubr.bf16.mxu0 %v802_v33  ;;  %v813_v40 = vld [vmem:[%s1002_s0 + $0x34] ss:$20 sps:$4 sm:$0xff]   ;;  %v816_v42 = vld [vmem:[%s1002_s0 + $0x30] ss:$20 sps:$4 sm:$0xff]  }
   0xf   :  { %492 = vmatprep.mubr.bf16.mxu1 %v805_v35  ;;  %v808_v38 = vld [vmem:[%s1001_s1 + $0x128] sm:$0xff]   ;;  %v809_v43 = vld [vmem:[%s1001_s1 + $0x120] sm:$0xff]  }
  0x10   :  { %689 = vmatpush3.bf16.msra.mxu0 %v782_v14  ;;  %v811_v39 = vld [vmem:[%s1002_s0 + $0x2c] ss:$20 sps:$4 sm:$0xff]   ;;  %v815_v41 = vld [vmem:[%s1002_s0 + $0x28] ss:$20 sps:$4 sm:$0xff]   ;;  %v820_v44 = vld [vmem:[%s1002_s0 + $0x10] ss:$20 sps:$4 sm:$0xff]  }
  0x11   :  { %717 = vmatpush3.bf16.msra.mxu1 %v783_v15  ;;  %690 = vmatprep.subr.bf16.mxu0 %v784_v16  ;;  %v818_v47 = vld [vmem:[%s1001_s1 + $0x108] sm:$0xff]   ;;  %v819_v48 = vld [vmem:[%s1001_s1 + $0x100] sm:$0xff]  }
  0x12   :  { %718 = vmatprep.subr.bf16.mxu1 %v785_v17  ;;  %v821_v49 = vld [vmem:[%s1002_s0 + $0x38] ss:$20 sps:$4 sm:$0xff]   ;;  %v662_v14 = vld [vmem:[%s1003_s2] ss:$0 sm:$0xff] }
  0x14   :  { %691 = vmatpush3.bf16.msra.mxu0 %v786_v18 }
  0x15   :  { %719 = vmatpush3.bf16.msra.mxu1 %v787_v19  ;;  %692 = vmatprep.subr.bf16.mxu0 %v788_v20 }
  0x16   :  { %720 = vmatprep.subr.bf16.mxu1 %v789_v21 }
  0x18   :  { %693 = vmatpush3.bf16.msra.mxu0 %v790_v22 }
  0x19   :  { %721 = vmatpush3.bf16.msra.mxu1 %v791_v23  ;;  %694 = vmatprep.subr.bf16.mxu0 %v792_v24 }
  0x1a   :  { %722 = vmatprep.subr.bf16.mxu1 %v793_v25 }
  0x1c   :  { %695 = vmatpush3.bf16.msra.mxu0 %v794_v26 }
  0x1d   :  { %723 = vmatpush3.bf16.msra.mxu1 %v795_v27  ;;  %696 = vmatprep.subr.bf16.mxu0 %v796_v28 }
  0x1e   :  { %724 = vmatprep.subr.bf16.mxu1 %v797_v29 }
  0x20   :  { %697 = vmatpush3.bf16.msra.mxu0 %v798_v30 }
  0x21   :  { %725 = vmatpush3.bf16.msra.mxu1 %v799_v31  ;;  %748 = vmatprep.subr.bf16.mxu0 %v806_v36 }
  0x23   :  { %444 = vmatmul.mubr.bf16.vlgmr.msra.gmra.mxu0 %v800_v32 }
  0x24   :  { %493 = vmatmul.mubr.bf16.vlgmr.msra.gmra.mxu1 %v803_v34  ;;  %749 = vmatpush3.bf16.msra.mxu0 %v806_v36 }
  0x25   :  { %750 = vmatprep.subr.bf16.mxu0 %v807_v37  ;;  %451 = vmatprep.mubr.bf16.mxu0 %v811_v39 }
  0x26   :  { %500 = vmatprep.mubr.bf16.mxu1 %v813_v40 }
  0x28   :  { %751 = vmatpush3.bf16.msra.mxu0 %v807_v37 }
  0x29   :  { %752 = vmatprep.subr.bf16.mxu0 %v808_v38 }
  0x2b   :  { %452 = vmatmul.mubr.bf16.gmra.mxu0 %v815_v41 }
  0x2c   :  { %501 = vmatmul.mubr.bf16.gmra.mxu1 %v816_v42  ;;  %753 = vmatpush3.bf16.msra.mxu0 %v808_v38 }
  0x2d   :  { %754 = vmatprep.subr.bf16.mxu0 %v809_v43  ;;  %764 = vmatprep.mubr.bf16.mxu0 %v820_v44 }
  0x30   :  { %755 = vmatpush3.bf16.msra.mxu0 %v809_v43 }
  0x31   :  { %756 = vmatprep.subr.bf16.mxu0 %v810_v45 }
  0x34   :  { %757 = vmatpush3.bf16.msra.mxu0 %v810_v45 }
  0x35   :  { %758 = vmatprep.subr.bf16.mxu0 %v817_v46 }
  0x38   :  { %759 = vmatpush3.bf16.msra.mxu0 %v817_v46 }
  0x39   :  { %760 = vmatprep.subr.bf16.mxu0 %v818_v47 }
  0x3c   :  { %761 = vmatpush3.bf16.msra.mxu0 %v818_v47 }
  0x3d   :  { %762 = vmatprep.subr.bf16.mxu0 %v819_v48 }
  0x40   :  { %763 = vmatpush3.bf16.msra.mxu0 %v819_v48 }
  0x43   :  { %765 = vmatmul.mubr.bf16.vlgmr.msra.gmra.mxu0 %v821_v49 }
  0xe3   :  { %v698_v50 = vpop.f32.mrf.mxu0 }
  0xe4   :  { %v726_v51 = vpop.f32.mrf.mxu1 }
  0xe5   :  { %v699_v52 = vpop.f32.mrf.mxu0 }
  0xe6   :  { %v727_v53 = vpop.f32.mrf.mxu1  ;;  %v700_v4 = vadd.f32 %v699_v52, %v698_v50 }
  0xe7   :  { %v701_v54 = vpop.f32.mrf.mxu0  ;;  %v728_v5 = vadd.f32 %v727_v53, %v726_v51 }
  0xe8   :  { %v729_v55 = vpop.f32.mrf.mxu1 }
  0xe9   :  { %v702_v56 = vpop.f32.mrf.mxu0  ;;  %v495_v13 = vadd.f32 %v728_v5, %v700_v4 }
  0xea   :  { %v730_v57 = vpop.f32.mrf.mxu1  ;;  %v703_v10 = vadd.f32 %v702_v56, %v701_v54 }
  0xeb   :  { %v704_v58 = vpop.f32.mrf.mxu0  ;;  %v731_v11 = vadd.f32 %v730_v57, %v729_v55 }
  0xec   :  { %v732_v59 = vpop.f32.mrf.mxu1 }
  0xed   :  { %v705_v60 = vpop.f32.mrf.mxu0  ;;  %v498_v21 = vadd.f32 %v731_v11, %v703_v10 }
  0xee   :  { %v733_v61 = vpop.f32.mrf.mxu1  ;;  %v706_v0 = vadd.f32 %v705_v60, %v704_v58 }
  0xef   :  { %v707_v62 = vpop.f32.mrf.mxu0  ;;  %v734_v1 = vadd.f32 %v733_v61, %v732_v59 }
  0xf0   :  { %v735_v63 = vpop.f32.mrf.mxu1 }
  0xf1   :  { %v708_v2 = vpop.f32.mrf.mxu0  ;;  %v503_v8 = vadd.f32 %v734_v1, %v706_v0 }
  0xf2   :  { %v736_v3 = vpop.f32.mrf.mxu1  ;;  %v709_v6 = vadd.f32 %v708_v2, %v707_v62 }
  0xf3   :  { %v737_v7 = vadd.f32 %v736_v3, %v735_v63 }
  0xf5   :  { %v506_v17 = vadd.f32 %v737_v7, %v709_v6 }
 0x103   :  { %v766_v9 = vpop.f32.mrf.mxu0 }
 0x104   :  { %v552_v12 = vadd.f32 %v766_v9, %v503_v8 }
 0x105   :  { %v543_v15 = vpop.f32.mrf.mxu0 }
 0x106   :  { %v544_v16 = vadd.f32 %v543_v15, %v495_v13  ;;  %v582_v19 = vadd.f32 %v662_v14, %v552_v12 }
 0x107   :  { %v767_v18 = vpop.f32.mrf.mxu0 }
 0x108   :  { %v555_v20 = vadd.f32 %v767_v18, %v506_v17  ;;  %v580_v23 = vadd.f32 %v662_v14, %v544_v16  ;;  %v586_v26 = vmax.f32 %v582_v19, 0.0 }
 0x109   :  { %v546_v22 = vpop.f32.mrf.mxu0 }
 0x10a   :  { %v583_v24 = vadd.f32 %v662_v14, %v555_v20  ;;  %v547_v25 = vadd.f32 %v546_v22, %v498_v21  ;;  %v584_v29 = vmax.f32 %v580_v23, 0.0 }
 0x10c   :  { %v587_v27 = vmax.f32 %v583_v24, 0.0  ;;  %v581_v28 = vadd.f32 %v662_v14, %v547_v25 }
 0x10e   :  { %v679_v30 = vpack.c.bf16 %v587_v27, %v586_v26  ;;  %v585_v31 = vmax.f32 %v581_v28, 0.0 }
 0x110   :  { %681 = vst [vmem:[%s1004_s3 + $0x8] sm:$0xff] %v679_v30   ;;  %v674_v32 = vpack.c.bf16 %v585_v31, %v584_v29 }
 0x112   :  { %675 = vst [vmem:[%s1004_s3] sm:$0xff] %v674_v32  }

// kernel: resnet_forward.26
= control target key start
LH: loop header
LB: loop body
LE: loop exit
PB: predicated region body
PF: predicated region fallthrough
CT: control target
= control target key end

     0   :  { %s335_s1 = inlined_call_operand.vmem [shape: bf16[128,128], index: 1, kind: input, shape index: {}]   ;;  %s336_s0 = inlined_call_operand.vmem [shape: bf16[32,128], index: 0, kind: input, shape index: {}]   ;;  %s337_s2 = inlined_call_operand.vmem [shape: f32[1,128], index: 2, kind: input, shape index: {}]   ;;  %s338_s3 = inlined_call_operand.vmem [shape: bf16[32,128], index: 3, kind: output, shape index: {}]  }
   0x1   :  { %v266_v0 = vld [vmem:[%s335_s1 + $0x38] sm:$0xff]   ;;  %v267_v1 = vld [vmem:[%s335_s1 + $0x30] sm:$0xff]   ;;  %v268_v2 = vld [vmem:[%s335_s1 + $0x28] sm:$0xff]  }
   0x2   :  { %246 = vmatprep.subr.bf16.mxu0 %v266_v0  ;;  %v269_v3 = vld [vmem:[%s335_s1 + $0x20] sm:$0xff]   ;;  %v270_v5 = vld [vmem:[%s335_s1 + $0x18] sm:$0xff]   ;;  %v271_v6 = vld [vmem:[%s335_s1 + $0x10] sm:$0xff]  }
   0x3   :  { %247 = vmatpush3.bf16.msra.mxu0 %v266_v0  ;;  %v274_v4 = vld [vmem:[%s336_s0] sm:$0xff]   ;;  %v272_v7 = vld [vmem:[%s335_s1 + $0x8] sm:$0xff]  }
   0x4   :  { %248 = vmatprep.subr.bf16.mxu0 %v267_v1  ;;  %262 = vmatprep.mubr.bf16.mxu0 %v274_v4  ;;  %v273_v8 = vld [vmem:[%s335_s1] sm:$0xff]   ;;  %v275_v9 = vld [vmem:[%s336_s0 + $0x8] sm:$0xff]  }
   0x5   :  { %v216_v11 = vld [vmem:[%s337_s2] ss:$0 sm:$0xff] }
   0x7   :  { %249 = vmatpush3.bf16.msra.mxu0 %v267_v1 }
   0x8   :  { %250 = vmatprep.subr.bf16.mxu0 %v268_v2 }
   0xb   :  { %251 = vmatpush3.bf16.msra.mxu0 %v268_v2 }
   0xc   :  { %252 = vmatprep.subr.bf16.mxu0 %v269_v3 }
   0xf   :  { %253 = vmatpush3.bf16.msra.mxu0 %v269_v3 }
  0x10   :  { %254 = vmatprep.subr.bf16.mxu0 %v270_v5 }
  0x13   :  { %255 = vmatpush3.bf16.msra.mxu0 %v270_v5 }
  0x14   :  { %256 = vmatprep.subr.bf16.mxu0 %v271_v6 }
  0x17   :  { %257 = vmatpush3.bf16.msra.mxu0 %v271_v6 }
  0x18   :  { %258 = vmatprep.subr.bf16.mxu0 %v272_v7 }
  0x1b   :  { %259 = vmatpush3.bf16.msra.mxu0 %v272_v7 }
  0x1c   :  { %260 = vmatprep.subr.bf16.mxu0 %v273_v8 }
  0x1f   :  { %261 = vmatpush3.bf16.msra.mxu0 %v273_v8 }
  0x22   :  { %263 = vmatmul.mubr.bf16.vlgmr.msra.gmra.mxu0 %v275_v9 }
  0xe2   :  { %v264_v10 = vpop.f32.mrf.mxu0 }
  0xe3   :  { %v180_v14 = vadd.f32 %v264_v10, %v216_v11 }
  0xe4   :  { %v141_v12 = vpop.f32.mrf.mxu0 }
  0xe5   :  { %v178_v17 = vadd.f32 %v216_v11, %v141_v12 }
  0xe6   :  { %v265_v13 = vpop.f32.mrf.mxu0 }
  0xe7   :  { %v181_v15 = vadd.f32 %v265_v13, %v216_v11 }
  0xe8   :  { %v144_v16 = vpop.f32.mrf.mxu0 }
  0xe9   :  { %v233_v18 = vpack.c.bf16 %v181_v15, %v180_v14  ;;  %v179_v19 = vadd.f32 %v216_v11, %v144_v16 }
  0xeb   :  { %235 = vst [vmem:[%s338_s3 + $0x8] sm:$0xff] %v233_v18   ;;  %v228_v20 = vpack.c.bf16 %v179_v19, %v178_v17 }
  0xed   :  { %229 = vst [vmem:[%s338_s3] sm:$0xff] %v228_v20  }

// kernel: resnet_forward.28
= control target key start
LH: loop header
LB: loop body
LE: loop exit
PB: predicated region body
PF: predicated region fallthrough
CT: control target
= control target key end

     0   :  { %s1072_s12 = smov 0   ;;  %s1074_s13 = smov 0   ;;  %s1182_s0 = inlined_call_operand.vmem [shape: bf16[32,1152], index: 0, kind: input, shape index: {}]   ;;  %s1183_s1 = inlined_call_operand.vmem [shape: bf16[1152,128], index: 1, kind: input, shape index: {}]   ;;  %s1184_s2 = inlined_call_operand.vmem [shape: f32[1,128], index: 2, kind: input, shape index: {}]   ;;  %s1185_s3 = inlined_call_operand.vmem [shape: bf16[32,128], index: 3, kind: output, shape index: {}]  }
   0x1   :  { %s1076_s14 = smov 0   ;;  %s1078_s15 = smov 0  }
   0x2   :  { %s1080_s16 = smov 0  }
   0x3 LB: > { %s25_s17 = sadd.s32 1, %s1045_s15  ;;  %p48_p1 = scmp.ne.s32.totalorder %s1037_s13, %s1033_s12  ;;  %s1049_s16 = sphi %s1080_s16, %s13_s16   ;;  %s1045_s15 = sphi %s1078_s15, %s1189_s15   ;;  %s1041_s14 = sphi %s1076_s14, %s1188_s14   ;;  %s1037_s13 = sphi %s1074_s13, %s1187_s13   ;;  %s1033_s12 = sphi %s1072_s12, %s1186_s12  }
   0x4   : > { %p26_p0 = scmp.ge.s32.totalorder %s25_s17, 3  ;;  %p49_p2 = scmp.eq.s32.totalorder %s1049_s16, 0 }
   0x5   : > { %s41_s19 = sadd.s32 1, %s1037_s13  ;;  %p809_p5 = scmp.ge.s32.totalorder %s1049_s16, 3 }
   0x6   : > { %s1191_s17 = smov (%p26_p0, %s25_s17), 0  ;;  %p50_p3 = por %p49_p2, %p48_p1 }
   0x7   : > { %s37_s18 = ssub.s32 %s1045_s15, %s1191_s17  ;;  %162 = sbr.rel (%p809_p5) target bundleno = 21 (0x15), region = 20 }
   0x8   : > { %p39_p4 = scmp.eq.s32.totalorder %s37_s18, 0 }
   0xa   : > { %s1107_s20 = scalar_select %p39_p4, %s1037_s13, %s41_s19  }
   0xc   : > { %165 = sbr.rel (!%p50_p3) target bundleno = 21 (0x15), region = 24  ;;  %s167_s21 = sand.u32 (%p50_p3), 1, %s1037_s13  }
   0xd   : > { %s862_s22 = smul.u32 (%p50_p3), 12, %s1045_s15 }
   0xe   : > { %s936_s23 = smul.u32 (%p50_p3), 48, %s167_s21 }
   0xf   : > { %s175_s26 = scalar_lea.vmem (%p50_p3), %s1182_s0, %s862_s22 }
  0x10   : > { %v190_v0 = vld [vmem:[%s175_s26] sm:$0xff] (%p50_p3)  ;;  %v194_v2 = vld [vmem:[%s175_s26 + $0x48] sm:$0xff] (%p50_p3)  ;;  %s169_s27 = scalar_lea.vmem (%p50_p3), [#allocation3], %s936_s23  ;;  %v815_v6 = vld [vmem:[%s175_s26 + $0x50] sm:$0xf] (%p50_p3) }
  0x11   : > { %v192_v1 = vld [vmem:[%s175_s26 + $0x24] sm:$0xff]  ;;  %191 = vst [vmem:[%s169_s27] sm:$0xff] %v190_v0  ;;  %195 = vst [vmem:[%s169_s27 + $0x18] sm:$0xff] %v194_v2  ;;  %v196_v3 = vld [vmem:[%s175_s26 + $0x6c] sm:$0xff] }
  0x12   : > { %193 = vst [vmem:[%s169_s27 + $0xc] sm:$0xff] %v192_v1  ;;  %v811_v4 = vld [vmem:[%s175_s26 + $0x8] sm:$0xf]  ;;  %v813_v5 = vld [vmem:[%s175_s26 + $0x2c] sm:$0xf]  ;;  %197 = vst [vmem:[%s169_s27 + $0x24] sm:$0xff] %v196_v3 }
  0x13   : > { %812 = vst [vmem:[%s169_s27 + $0x8] sm:$0xf] %v811_v4  ;;  %814 = vst [vmem:[%s169_s27 + $0x14] sm:$0xf] %v813_v5  ;;  %v817_v7 = vld [vmem:[%s175_s26 + $0x74] sm:$0xf] }
  0x14   : > { %816 = vst [vmem:[%s169_s27 + $0x20] sm:$0xf] %v815_v6  ;;  %818 = vst [vmem:[%s169_s27 + $0x2c] sm:$0xf] %v817_v7 }
  0x15 PF: > { %p819_p6 = scmp.ge.s32.totalorder %s1049_s16, 1  ;;  %p230_p7 = scmp.lt.s32.totalorder %s1049_s16, 4 }
  0x17   : > { %p231_p8 = pnand %p819_p6, %p230_p7 }
  0x18   : > { %s237_s28 = sand.u32 (!%p231_p8), 1, %s1033_s12   ;;  %s276_s29 = smul.u32 (!%p231_p8), 48, %s1041_s14 }
  0x19   : > { %234 = sbr.rel (%p231_p8) target bundleno = 299 (0x12b), region = 54  ;;  %p821_p10 = scmp.ne.s32.totalorder (!%p231_p8), %s1041_s14, 0 }
  0x1a   : > { %s937_s30 = smul.u32 (!%p231_p8), 48, %s237_s28  ;;  %p277_p9 = scmp.lt.s32.totalorder (!%p231_p8), %s276_s29, 143 }
  0x1c   : > { %s1124_s8 = scalar_lea.vmem (!%p231_p8), [#allocation3], %s937_s30 }
  0x1e   : > { %s1193_s29 = smov (!%p277_p9, %s276_s29), 143  ;;  %301 = sbr.rel (%p821_p10) target bundleno = 38 (0x26), region = 62 }
  0x1f   : > { %s820_s4 = sshll.u32 %s1193_s29, 2 }
  0x20   : > { %s1122_s7 = scalar_lea.vmem %s1183_s1, %s820_s4 }
  0x23   : > { %v1051_v8 = vmov 0.0  }
  0x24   : > { %302 = vst [vmem:[#allocation2 + $0x10] sm:$0xff] %v1051_v8  ;;  %303 = vst [vmem:[#allocation2] sm:$0xff] %v1051_v8 }
  0x25   : > { %304 = vst [vmem:[#allocation2 + $0x18] sm:$0xff] %v1051_v8  ;;  %305 = vst [vmem:[#allocation2 + $0x8] sm:$0xff] %v1051_v8 }
  0x26 PF: > { %v979_v9 = vld [vmem:[%s1122_s7 + $0x78] sm:$0xff]   ;;  %v982_v12 = vld [vmem:[%s1122_s7 + $0x70] sm:$0xff]   ;;  %v985_v15 = vld [vmem:[%s1122_s7 + $0x68] sm:$0xff]   ;;  %p852_p11 = scmp.ne.s32.totalorder %s1041_s14, 2 }
  0x27   : > { %v980_v10 = vld [vmem:[%s1122_s7 + $0x38] sm:$0xff]   ;;  %878 = vmatprep.subr.bf16.mxu0 %v979_v9  ;;  %v983_v13 = vld [vmem:[%s1122_s7 + $0x30] sm:$0xff]   ;;  %v986_v16 = vld [vmem:[%s1122_s7 + $0x28] sm:$0xff]  }
  0x28   : > { %v981_v11 = vld [vmem:[%s1122_s7 + $0xb8] sm:$0xff]   ;;  %879 = vmatpush3.bf16.msra.mxu0 %v980_v10  ;;  %v984_v14 = vld [vmem:[%s1122_s7 + $0xb0] sm:$0xff]   ;;  %v987_v17 = vld [vmem:[%s1122_s7 + $0xa8] sm:$0xff]  }
  0x29   : > { %916 = vmatprep.subr.bf16.mxu1 %v981_v11  ;;  %880 = vmatprep.subr.bf16.mxu0 %v982_v12  ;;  %v988_v18 = vld [vmem:[%s1122_s7 + $0x60] sm:$0xff]   ;;  %v991_v21 = vld [vmem:[%s1122_s7 + $0x58] sm:$0xff]   ;;  %v994_v24 = vld [vmem:[%s1122_s7 + $0x50] sm:$0xff]  }
  0x2a   : > { %917 = vmatpush3.bf16.msra.mxu1 %v981_v11  ;;  %v989_v19 = vld [vmem:[%s1122_s7 + $0x20] sm:$0xff]   ;;  %v993_v22 = vld [vmem:[%s1122_s7 + $0x98] sm:$0xff]   ;;  %v996_v25 = vld [vmem:[%s1122_s7 + $0x90] sm:$0xff]  }
  0x2b   : > { %918 = vmatprep.subr.bf16.mxu1 %v984_v14  ;;  %v990_v20 = vld [vmem:[%s1122_s7 + $0xa0] sm:$0xff]   ;;  %v992_v23 = vld [vmem:[%s1122_s7 + $0x18] sm:$0xff]   ;;  %v995_v26 = vld [vmem:[%s1122_s7 + $0x10] sm:$0xff]  }
  0x2c   : > { %881 = vmatpush3.bf16.msra.mxu0 %v983_v13  ;;  %v997_v27 = vld [vmem:[%s1122_s7 + $0x48] sm:$0xff]   ;;  %v1000_v30 = vld [vmem:[%s1122_s7 + $0x40] sm:$0xff]   ;;  %v306_v44 = vld [vmem:[#allocation2 + $0x10] sm:$0xff] }
  0x2d   : > { %882 = vmatprep.subr.bf16.mxu0 %v985_v15  ;;  %v998_v28 = vld [vmem:[%s1122_s7 + $0x8] sm:$0xff]   ;;  %v1002_v31 = vld [vmem:[%s1122_s7 + $0x80] sm:$0xff]   ;;  %v308_v58 = vld [vmem:[#allocation2 + $0x18] sm:$0xff] }
  0x2e   : > { %919 = vmatpush3.bf16.msra.mxu1 %v984_v14  ;;  %v999_v29 = vld [vmem:[%s1122_s7 + $0x88] sm:$0xff]   ;;  %v1005_v32 = vld [vmem:[%s1124_s8 + $0x4] ss:$12 sps:$4 sm:$0xff]  }
  0x2f   : > { %920 = vmatprep.subr.bf16.mxu1 %v987_v17  ;;  %v1006_v33 = vld [vmem:[%s1124_s8 + $0x8] ss:$12 sps:$4 sm:$0xff]   ;;  %574 = vmatprep.mubr.bf16.mxu0 %v1005_v32  ;;  %v1003_v35 = vld [vmem:[%s1124_s8] ss:$12 sps:$4 sm:$0xff]   ;;  %v1010_v38 = vld [vmem:[%s1124_s8 + $0x18] ss:$12 sps:$4 sm:$0xff]  }
  0x30   : > { %883 = vmatpush3.bf16.msra.mxu0 %v986_v16  ;;  %v1001_v34 = vld [vmem:[%s1122_s7] sm:$0xff]   ;;  %932 = vmatprep.mubr.bf16.mxu1 %v1006_v33  ;;  %v1008_v36 = vld [vmem:[%s1124_s8 + $0x1c] ss:$12 sps:$4 sm:$0xff]  }
  0x31   : > { %884 = vmatprep.subr.bf16.mxu0 %v988_v18  ;;  %v1007_v37 = vld [vmem:[%s1124_s8 + $0x20] ss:$12 sps:$4 sm:$0xff]  }
  0x32   : > { %921 = vmatpush3.bf16.msra.mxu1 %v987_v17  ;;  %v307_v52 = vld [vmem:[#allocation2] sm:$0xff]  ;;  %v309_v0 = vld [vmem:[#allocation2 + $0x8] sm:$0xff] }
  0x33   : > { %922 = vmatprep.subr.bf16.mxu1 %v990_v20 }
  0x34   : > { %885 = vmatpush3.bf16.msra.mxu0 %v989_v19 }
  0x35   : > { %886 = vmatprep.subr.bf16.mxu0 %v991_v21 }
  0x36   : > { %923 = vmatpush3.bf16.msra.mxu1 %v990_v20 }
  0x37   : > { %924 = vmatprep.subr.bf16.mxu1 %v993_v22 }
  0x38   : > { %887 = vmatpush3.bf16.msra.mxu0 %v992_v23 }
  0x39   : > { %888 = vmatprep.subr.bf16.mxu0 %v994_v24 }
  0x3a   : > { %925 = vmatpush3.bf16.msra.mxu1 %v993_v22 }
  0x3b   : > { %926 = vmatprep.subr.bf16.mxu1 %v996_v25 }
  0x3c   : > { %889 = vmatpush3.bf16.msra.mxu0 %v995_v26 }
  0x3d   : > { %890 = vmatprep.subr.bf16.mxu0 %v997_v27 }
  0x3e   : > { %927 = vmatpush3.bf16.msra.mxu1 %v996_v25 }
  0x3f   : > { %928 = vmatprep.subr.bf16.mxu1 %v999_v29 }
  0x40   : > { %891 = vmatpush3.bf16.msra.mxu0 %v998_v28 }
  0x41   : > { %892 = vmatprep.subr.bf16.mxu0 %v1000_v30 }
  0x42   : > { %929 = vmatpush3.bf16.msra.mxu1 %v999_v29 }
  0x43   : > { %930 = vmatprep.subr.bf16.mxu1 %v1002_v31 }
  0x44   : > { %893 = vmatpush3.bf16.msra.mxu0 %v1001_v34 }
  0x46   : > { %931 = vmatpush3.bf16.msra.mxu1 %v1002_v31 }
  0x47   : > { %575 = vmatmul.mubr.bf16.vlgmr.msra.gmra.mxu0 %v1003_v35 }
  0x48   : > { %582 = vmatprep.mubr.bf16.mxu0 %v1008_v36 }
  0x49   : > { %933 = vmatmul.mubr.bf16.vlgmr.msra.gmra.mxu1 %v1007_v37 }
  0x4f   : > { %583 = vmatmul.mubr.bf16.gmra.mxu0 %v1010_v38 }
 0x107   : > { %v894_v39 = vpop.f32.mrf.mxu0 }
 0x109   : > { %v895_v40 = vpop.f32.mrf.mxu0  ;;  %v934_v41 = vpop.f32.mrf.mxu1 }
 0x10a   : > { %v896_v42 = vadd.f32 %v895_v40, %v894_v39 }
 0x10b   : > { %v897_v43 = vpop.f32.mrf.mxu0  ;;  %v625_v45 = vpop.f32.mrf.mxu1 }
 0x10c   : > { %v626_v46 = vadd.f32 %v896_v42, %v625_v45 }
 0x10d   : > { %v898_v47 = vpop.f32.mrf.mxu0  ;;  %v935_v48 = vpop.f32.mrf.mxu1 }
 0x10e   : > { %v640_v49 = vadd.f32 %v626_v46, %v306_v44  ;;  %v899_v50 = vadd.f32 %v898_v47, %v897_v43 }
 0x10f   : > { %v900_v51 = vpop.f32.mrf.mxu0  ;;  %v628_v53 = vpop.f32.mrf.mxu1 }
 0x110   : > { %644 = vst [vmem:[#allocation2 + $0x10] sm:$0xff] %v640_v49  ;;  %v629_v54 = vadd.f32 %v899_v50, %v628_v53 }
 0x111   : > { %v901_v55 = vpop.f32.mrf.mxu0 }
 0x112   : > { %v641_v56 = vadd.f32 %v629_v54, %v307_v52  ;;  %v902_v57 = vadd.f32 %v901_v55, %v900_v51 }
 0x113   : > { %v903_v59 = vpop.f32.mrf.mxu0 }
 0x114   : > { %645 = vst [vmem:[#allocation2] sm:$0xff] %v641_v56  ;;  %v634_v60 = vadd.f32 %v934_v41, %v902_v57 }
 0x115   : > { %v904_v61 = vpop.f32.mrf.mxu0 }
 0x116   : > { %v642_v62 = vadd.f32 %v634_v60, %v308_v58  ;;  %v905_v63 = vadd.f32 %v904_v61, %v903_v59 }
 0x118   : > { %646 = vst [vmem:[#allocation2 + $0x18] sm:$0xff] %v642_v62  ;;  %v637_v1 = vadd.f32 %v935_v48, %v905_v63  ;;  %651 = sbr.rel (%p852_p11) target bundleno = 299 (0x12b), region = 66 }
 0x11a   : > { %v643_v2 = vadd.f32 %v637_v1, %v309_v0 }
 0x11c   : > { %647 = vst [vmem:[#allocation2 + $0x8] sm:$0xff] %v643_v2 }
 0x11d   : > { %v652_v3 = vld [vmem:[#allocation2 + $0x10] sm:$0xff]  ;;  %v653_v4 = vld [vmem:[#allocation2] sm:$0xff] }
 0x11e   : > { %v853_v5 = vld [vmem:[%s1184_s2] ss:$0 sm:$0xff] }
 0x11f   : > { %v663_v6 = vadd.f32 %v853_v5, %v652_v3  ;;  %v664_v7 = vadd.f32 %v853_v5, %v653_v4  ;;  %v654_v8 = vld [vmem:[#allocation2 + $0x18] sm:$0xff] }
 0x120   : > { %v665_v10 = vadd.f32 %v853_v5, %v654_v8 }
 0x121   : > { %v667_v12 = vmax.f32 %v663_v6, 0.0  ;;  %v668_v13 = vmax.f32 %v664_v7, 0.0 }
 0x122   : > { %v669_v14 = vmax.f32 %v665_v10, 0.0 }
 0x123   : > { %v655_v9 = vld [vmem:[#allocation2 + $0x8] sm:$0xff]  ;;  %v870_v16 = vpack.c.bf16 %v668_v13, %v667_v12 }
 0x124   : > { %v666_v11 = vadd.f32 %v853_v5, %v655_v9 }
 0x125   : > { %871 = vst [vmem:[%s1185_s3] sm:$0xff] %v870_v16  }
 0x126   : > { %v670_v15 = vmax.f32 %v666_v11, 0.0 }
 0x128   : > { %v875_v17 = vpack.c.bf16 %v670_v15, %v669_v14 }
 0x12a   : > { %877 = vst [vmem:[%s1185_s3 + $0x8] sm:$0xff] %v875_v17  }
 0x12b PF: > { %s13_s16 = sadd.s32 1, %s1049_s16   ;;  %s1186_s12 = smov %s1037_s13 }
 0x12c   : > { %p10_p12 = scmp.ge.s32.totalorder %s13_s16, 5   ;;  %s1187_s13 = smov %s1107_s20 }
 0x12d   : > { %s1188_s14 = smov %s1045_s15  ;;  %s1189_s15 = smov %s1191_s17 }
 0x12e   :  { %12 = sbr.rel (!%p10_p12) target bundleno = 3 (0x3), region = 113 }

// kernel: resnet_forward.27
= control target key start
LH: loop header
LB: loop body
LE: loop exit
PB: predicated region body
PF: predicated region fallthrough
CT: control target
= control target key end

     0   :  { %s1177_s15 = smov 0   ;;  %s1179_s16 = smov 0   ;;  %s1293_s0 = inlined_call_operand.vmem [shape: bf16[32,1152], index: 0, kind: input, shape index: {}]   ;;  %s1294_s1 = inlined_call_operand.vmem [shape: bf16[1152,128], index: 1, kind: input, shape index: {}]   ;;  %s1295_s2 = inlined_call_operand.vmem [shape: f32[1,128], index: 2, kind: input, shape index: {}]   ;;  %s1296_s3 = inlined_call_operand.vmem [shape: bf16[32,128], index: 3, kind: input, shape index: {}]   ;;  %s1297_s4 = inlined_call_operand.vmem [shape: bf16[32,128], index: 4, kind: output, shape index: {}]  }
   0x1   :  { %s1181_s17 = smov 0   ;;  %s1183_s18 = smov 0  }
   0x2   :  { %s1185_s19 = smov 0  }
   0x3 LB: > { %s26_s20 = sadd.s32 1, %s1145_s18  ;;  %p49_p1 = scmp.ne.s32.totalorder %s1137_s16, %s1133_s15  ;;  %s1149_s19 = sphi %s1185_s19, %s14_s19   ;;  %s1145_s18 = sphi %s1183_s18, %s1301_s18   ;;  %s1141_s17 = sphi %s1181_s17, %s1300_s17   ;;  %s1137_s16 = sphi %s1179_s16, %s1299_s16   ;;  %s1133_s15 = sphi %s1177_s15, %s1298_s15  }
   0x4   : > { %p27_p0 = scmp.ge.s32.totalorder %s26_s20, 3  ;;  %p50_p2 = scmp.eq.s32.totalorder %s1149_s19, 0 }
   0x5   : > { %s42_s22 = sadd.s32 1, %s1137_s16  ;;  %p900_p5 = scmp.ge.s32.totalorder %s1149_s19, 3 }
   0x6   : > { %s1303_s20 = smov (%p27_p0, %s26_s20), 0  ;;  %p51_p3 = por %p50_p2, %p49_p1 }
   0x7   : > { %s38_s21 = ssub.s32 %s1145_s18, %s1303_s20  ;;  %203 = sbr.rel (%p900_p5) target bundleno = 21 (0x15), region = 24 }
   0x8   : > { %p40_p4 = scmp.eq.s32.totalorder %s38_s21, 0 }
   0xa   : > { %s1212_s23 = scalar_select %p40_p4, %s1137_s16, %s42_s22  }
   0xc   : > { %206 = sbr.rel (!%p51_p3) target bundleno = 21 (0x15), region = 28  ;;  %s208_s24 = sand.u32 (%p51_p3), 1, %s1137_s16  }
   0xd   : > { %s953_s25 = smul.u32 (%p51_p3), 12, %s1145_s18 }
   0xe   : > { %s1036_s26 = smul.u32 (%p51_p3), 48, %s208_s24 }
   0xf   : > { %s216_s29 = scalar_lea.vmem (%p51_p3), %s1293_s0, %s953_s25 }
  0x10   : > { %v231_v0 = vld [vmem:[%s216_s29] sm:$0xff] (%p51_p3)  ;;  %v235_v2 = vld [vmem:[%s216_s29 + $0x48] sm:$0xff] (%p51_p3)  ;;  %s210_s30 = scalar_lea.vmem (%p51_p3), [#allocation3], %s1036_s26  ;;  %v906_v6 = vld [vmem:[%s216_s29 + $0x50] sm:$0xf] (%p51_p3) }
  0x11   : > { %v233_v1 = vld [vmem:[%s216_s29 + $0x24] sm:$0xff]  ;;  %232 = vst [vmem:[%s210_s30] sm:$0xff] %v231_v0  ;;  %236 = vst [vmem:[%s210_s30 + $0x18] sm:$0xff] %v235_v2  ;;  %v237_v3 = vld [vmem:[%s216_s29 + $0x6c] sm:$0xff] }
  0x12   : > { %234 = vst [vmem:[%s210_s30 + $0xc] sm:$0xff] %v233_v1  ;;  %v902_v4 = vld [vmem:[%s216_s29 + $0x8] sm:$0xf]  ;;  %v904_v5 = vld [vmem:[%s216_s29 + $0x2c] sm:$0xf]  ;;  %238 = vst [vmem:[%s210_s30 + $0x24] sm:$0xff] %v237_v3 }
  0x13   : > { %903 = vst [vmem:[%s210_s30 + $0x8] sm:$0xf] %v902_v4  ;;  %905 = vst [vmem:[%s210_s30 + $0x14] sm:$0xf] %v904_v5  ;;  %v908_v7 = vld [vmem:[%s216_s29 + $0x74] sm:$0xf] }
  0x14   : > { %907 = vst [vmem:[%s210_s30 + $0x20] sm:$0xf] %v906_v6  ;;  %909 = vst [vmem:[%s210_s30 + $0x2c] sm:$0xf] %v908_v7 }
  0x15 PF: > { %p910_p6 = scmp.ge.s32.totalorder %s1149_s19, 1  ;;  %p271_p7 = scmp.lt.s32.totalorder %s1149_s19, 4 }
  0x17   : > { %p272_p8 = pnand %p910_p6, %p271_p7 }
  0x18   : > { %s278_s5 = sand.u32 (!%p272_p8), 1, %s1133_s15   ;;  %s327_s6 = smul.u32 (!%p272_p8), 48, %s1141_s17 }
  0x19   : > { %275 = sbr.rel (%p272_p8) target bundleno = 301 (0x12d), region = 58  ;;  %p912_p10 = scmp.ne.s32.totalorder (!%p272_p8), %s1141_s17, 0 }
  0x1a   : > { %s1037_s7 = smul.u32 (!%p272_p8), 48, %s278_s5  ;;  %p328_p9 = scmp.lt.s32.totalorder (!%p272_p8), %s327_s6, 143 }
  0x1c   : > { %s1229_s12 = scalar_lea.vmem (!%p272_p8), [#allocation3], %s1037_s7 }
  0x1e   : > { %s1305_s6 = smov (!%p328_p9, %s327_s6), 143  ;;  %361 = sbr.rel (%p912_p10) target bundleno = 38 (0x26), region = 66 }
  0x1f   : > { %s911_s8 = sshll.u32 %s1305_s6, 2 }
  0x20   : > { %s1227_s11 = scalar_lea.vmem %s1294_s1, %s911_s8 }
  0x23   : > { %v1151_v8 = vmov 0.0  }
  0x24   : > { %362 = vst [vmem:[#allocation2 + $0x10] sm:$0xff] %v1151_v8  ;;  %363 = vst [vmem:[#allocation2] sm:$0xff] %v1151_v8 }
  0x25   : > { %364 = vst [vmem:[#allocation2 + $0x18] sm:$0xff] %v1151_v8  ;;  %365 = vst [vmem:[#allocation2 + $0x8] sm:$0xff] %v1151_v8 }
  0x26 PF: > { %v1079_v9 = vld [vmem:[%s1227_s11 + $0x78] sm:$0xff]   ;;  %v1082_v12 = vld [vmem:[%s1227_s11 + $0x70] sm:$0xff]   ;;  %v1085_v15 = vld [vmem:[%s1227_s11 + $0x68] sm:$0xff]   ;;  %p943_p11 = scmp.ne.s32.totalorder %s1141_s17, 2 }
  0x27   : > { %v1080_v10 = vld [vmem:[%s1227_s11 + $0x38] sm:$0xff]   ;;  %978 = vmatprep.subr.bf16.mxu0 %v1079_v9  ;;  %v1083_v13 = vld [vmem:[%s1227_s11 + $0x30] sm:$0xff]   ;;  %v1086_v16 = vld [vmem:[%s1227_s11 + $0x28] sm:$0xff]  }
  0x28   : > { %v1081_v11 = vld [vmem:[%s1227_s11 + $0xb8] sm:$0xff]   ;;  %979 = vmatpush3.bf16.msra.mxu0 %v1080_v10  ;;  %v1084_v14 = vld [vmem:[%s1227_s11 + $0xb0] sm:$0xff]   ;;  %v1087_v17 = vld [vmem:[%s1227_s11 + $0xa8] sm:$0xff]  }
  0x29   : > { %1016 = vmatprep.subr.bf16.mxu1 %v1081_v11  ;;  %980 = vmatprep.subr.bf16.mxu0 %v1082_v12  ;;  %v1088_v18 = vld [vmem:[%s1227_s11 + $0x60] sm:$0xff]   ;;  %v1091_v21 = vld [vmem:[%s1227_s11 + $0x58] sm:$0xff]   ;;  %v1094_v24 = vld [vmem:[%s1227_s11 + $0x50] sm:$0xff]  }
  0x2a   : > { %1017 = vmatpush3.bf16.msra.mxu1 %v1081_v11  ;;  %v1089_v19 = vld [vmem:[%s1227_s11 + $0x20] sm:$0xff]   ;;  %v1093_v22 = vld [vmem:[%s1227_s11 + $0x98] sm:$0xff]   ;;  %v1096_v25 = vld [vmem:[%s1227_s11 + $0x90] sm:$0xff]  }
  0x2b   : > { %1018 = vmatprep.subr.bf16.mxu1 %v1084_v14  ;;  %v1090_v20 = vld [vmem:[%s1227_s11 + $0xa0] sm:$0xff]   ;;  %v1092_v23 = vld [vmem:[%s1227_s11 + $0x18] sm:$0xff]   ;;  %v1095_v26 = vld [vmem:[%s1227_s11 + $0x10] sm:$0xff]  }
  0x2c   : > { %981 = vmatpush3.bf16.msra.mxu0 %v1083_v13  ;;  %v1097_v27 = vld [vmem:[%s1227_s11 + $0x48] sm:$0xff]   ;;  %v1100_v30 = vld [vmem:[%s1227_s11 + $0x40] sm:$0xff]   ;;  %v366_v44 = vld [vmem:[#allocation2 + $0x10] sm:$0xff] }
  0x2d   : > { %982 = vmatprep.subr.bf16.mxu0 %v1085_v15  ;;  %v1098_v28 = vld [vmem:[%s1227_s11 + $0x8] sm:$0xff]   ;;  %v1102_v31 = vld [vmem:[%s1227_s11 + $0x80] sm:$0xff]   ;;  %v368_v58 = vld [vmem:[#allocation2 + $0x18] sm:$0xff] }
  0x2e   : > { %1019 = vmatpush3.bf16.msra.mxu1 %v1084_v14  ;;  %v1099_v29 = vld [vmem:[%s1227_s11 + $0x88] sm:$0xff]   ;;  %v1105_v32 = vld [vmem:[%s1229_s12 + $0x4] ss:$12 sps:$4 sm:$0xff]  }
  0x2f   : > { %1020 = vmatprep.subr.bf16.mxu1 %v1087_v17  ;;  %v1106_v33 = vld [vmem:[%s1229_s12 + $0x8] ss:$12 sps:$4 sm:$0xff]   ;;  %634 = vmatprep.mubr.bf16.mxu0 %v1105_v32  ;;  %v1103_v35 = vld [vmem:[%s1229_s12] ss:$12 sps:$4 sm:$0xff]   ;;  %v1110_v38 = vld [vmem:[%s1229_s12 + $0x18] ss:$12 sps:$4 sm:$0xff]  }
  0x30   : > { %983 = vmatpush3.bf16.msra.mxu0 %v1086_v16  ;;  %v1101_v34 = vld [vmem:[%s1227_s11] sm:$0xff]   ;;  %1032 = vmatprep.mubr.bf16.mxu1 %v1106_v33  ;;  %v1108_v36 = vld [vmem:[%s1229_s12 + $0x1c] ss:$12 sps:$4 sm:$0xff]  }
  0x31   : > { %984 = vmatprep.subr.bf16.mxu0 %v1088_v18  ;;  %v1107_v37 = vld [vmem:[%s1229_s12 + $0x20] ss:$12 sps:$4 sm:$0xff]  }
  0x32   : > { %1021 = vmatpush3.bf16.msra.mxu1 %v1087_v17  ;;  %v367_v52 = vld [vmem:[#allocation2] sm:$0xff]  ;;  %v369_v0 = vld [vmem:[#allocation2 + $0x8] sm:$0xff] }
  0x33   : > { %1022 = vmatprep.subr.bf16.mxu1 %v1090_v20 }
  0x34   : > { %985 = vmatpush3.bf16.msra.mxu0 %v1089_v19 }
  0x35   : > { %986 = vmatprep.subr.bf16.mxu0 %v1091_v21 }
  0x36   : > { %1023 = vmatpush3.bf16.msra.mxu1 %v1090_v20 }
  0x37   : > { %1024 = vmatprep.subr.bf16.mxu1 %v1093_v22 }
  0x38   : > { %987 = vmatpush3.bf16.msra.mxu0 %v1092_v23 }
  0x39   : > { %988 = vmatprep.subr.bf16.mxu0 %v1094_v24 }
  0x3a   : > { %1025 = vmatpush3.bf16.msra.mxu1 %v1093_v22 }
  0x3b   : > { %1026 = vmatprep.subr.bf16.mxu1 %v1096_v25 }
  0x3c   : > { %989 = vmatpush3.bf16.msra.mxu0 %v1095_v26 }
  0x3d   : > { %990 = vmatprep.subr.bf16.mxu0 %v1097_v27 }
  0x3e   : > { %1027 = vmatpush3.bf16.msra.mxu1 %v1096_v25 }
  0x3f   : > { %1028 = vmatprep.subr.bf16.mxu1 %v1099_v29 }
  0x40   : > { %991 = vmatpush3.bf16.msra.mxu0 %v1098_v28 }
  0x41   : > { %992 = vmatprep.subr.bf16.mxu0 %v1100_v30 }
  0x42   : > { %1029 = vmatpush3.bf16.msra.mxu1 %v1099_v29 }
  0x43   : > { %1030 = vmatprep.subr.bf16.mxu1 %v1102_v31 }
  0x44   : > { %993 = vmatpush3.bf16.msra.mxu0 %v1101_v34 }
  0x46   : > { %1031 = vmatpush3.bf16.msra.mxu1 %v1102_v31 }
  0x47   : > { %635 = vmatmul.mubr.bf16.vlgmr.msra.gmra.mxu0 %v1103_v35 }
  0x48   : > { %642 = vmatprep.mubr.bf16.mxu0 %v1108_v36 }
  0x49   : > { %1033 = vmatmul.mubr.bf16.vlgmr.msra.gmra.mxu1 %v1107_v37 }
  0x4f   : > { %643 = vmatmul.mubr.bf16.gmra.mxu0 %v1110_v38 }
 0x107   : > { %v994_v39 = vpop.f32.mrf.mxu0 }
 0x109   : > { %v995_v40 = vpop.f32.mrf.mxu0  ;;  %v1034_v41 = vpop.f32.mrf.mxu1 }
 0x10a   : > { %v996_v42 = vadd.f32 %v995_v40, %v994_v39 }
 0x10b   : > { %v997_v43 = vpop.f32.mrf.mxu0  ;;  %v685_v45 = vpop.f32.mrf.mxu1 }
 0x10c   : > { %v686_v46 = vadd.f32 %v996_v42, %v685_v45 }
 0x10d   : > { %v998_v47 = vpop.f32.mrf.mxu0  ;;  %v1035_v48 = vpop.f32.mrf.mxu1 }
 0x10e   : > { %v700_v49 = vadd.f32 %v686_v46, %v366_v44  ;;  %v999_v50 = vadd.f32 %v998_v47, %v997_v43 }
 0x10f   : > { %v1000_v51 = vpop.f32.mrf.mxu0  ;;  %v688_v53 = vpop.f32.mrf.mxu1 }
 0x110   : > { %704 = vst [vmem:[#allocation2 + $0x10] sm:$0xff] %v700_v49  ;;  %v689_v54 = vadd.f32 %v999_v50, %v688_v53 }
 0x111   : > { %v1001_v55 = vpop.f32.mrf.mxu0 }
 0x112   : > { %v701_v56 = vadd.f32 %v689_v54, %v367_v52  ;;  %v1002_v57 = vadd.f32 %v1001_v55, %v1000_v51 }
 0x113   : > { %v1003_v59 = vpop.f32.mrf.mxu0 }
 0x114   : > { %705 = vst [vmem:[#allocation2] sm:$0xff] %v701_v56  ;;  %v694_v60 = vadd.f32 %v1034_v41, %v1002_v57 }
 0x115   : > { %v1004_v61 = vpop.f32.mrf.mxu0 }
 0x116   : > { %v702_v62 = vadd.f32 %v694_v60, %v368_v58  ;;  %v1005_v63 = vadd.f32 %v1004_v61, %v1003_v59 }
 0x118   : > { %706 = vst [vmem:[#allocation2 + $0x18] sm:$0xff] %v702_v62  ;;  %v697_v1 = vadd.f32 %v1035_v48, %v1005_v63  ;;  %711 = sbr.rel (%p943_p11) target bundleno = 301 (0x12d), region = 70 }
 0x11a   : > { %v703_v2 = vadd.f32 %v697_v1, %v369_v0 }
 0x11c   : > { %707 = vst [vmem:[#allocation2 + $0x8] sm:$0xff] %v703_v2 }
 0x11d   : > { %v712_v3 = vld [vmem:[#allocation2 + $0x10] sm:$0xff]  ;;  %v713_v4 = vld [vmem:[#allocation2] sm:$0xff]  ;;  %v976_v15 = vld [vmem:[%s1296_s3 + $0x8] sm:$0xff]  }
 0x11e   : > { %v944_v5 = vld [vmem:[%s1295_s2] ss:$0 sm:$0xff]  ;;  %v964_v16 = vunpack.c.l.bf16 %v976_v15  ;;  %v965_v17 = vunpack.c.h.bf16 %v976_v15 }
 0x11f   : > { %v723_v6 = vadd.f32 %v944_v5, %v712_v3  ;;  %v724_v7 = vadd.f32 %v944_v5, %v713_v4  ;;  %v959_v8 = vld [vmem:[%s1296_s3] sm:$0xff]   ;;  %v714_v9 = vld [vmem:[#allocation2 + $0x18] sm:$0xff] }
 0x120   : > { %v960_v11 = vunpack.c.l.bf16 %v959_v8  ;;  %v961_v12 = vunpack.c.h.bf16 %v959_v8  ;;  %v725_v13 = vadd.f32 %v944_v5, %v714_v9 }
 0x122   : > { %v735_v18 = vadd.f32 %v960_v11, %v723_v6  ;;  %v736_v19 = vadd.f32 %v961_v12, %v724_v7  ;;  %v737_v20 = vadd.f32 %v964_v16, %v725_v13 }
 0x123   : > { %v715_v10 = vld [vmem:[#allocation2 + $0x8] sm:$0xff] }
 0x124   : > { %v726_v14 = vadd.f32 %v944_v5, %v715_v10  ;;  %v739_v22 = vmax.f32 %v735_v18, 0.0  ;;  %v740_v23 = vmax.f32 %v736_v19, 0.0  ;;  %v741_v24 = vmax.f32 %v737_v20, 0.0 }
 0x126   : > { %v738_v21 = vadd.f32 %v965_v17, %v726_v14  ;;  %v969_v26 = vpack.c.bf16 %v740_v23, %v739_v22 }
 0x128   : > { %v742_v25 = vmax.f32 %v738_v21, 0.0  ;;  %970 = vst [vmem:[%s1297_s4] sm:$0xff] %v969_v26  }
 0x12a   : > { %v974_v27 = vpack.c.bf16 %v742_v25, %v741_v24 }
 0x12c   : > { %977 = vst [vmem:[%s1297_s4 + $0x8] sm:$0xff] %v974_v27  }
 0x12d PF: > { %s14_s19 = sadd.s32 1, %s1149_s19   ;;  %s1298_s15 = smov %s1137_s16 }
 0x12e   : > { %p11_p12 = scmp.ge.s32.totalorder %s14_s19, 5   ;;  %s1299_s16 = smov %s1212_s23 }
 0x12f   : > { %s1300_s17 = smov %s1145_s18  ;;  %s1301_s18 = smov %s1303_s20 }
 0x130   :  { %13 = sbr.rel (!%p11_p12) target bundleno = 3 (0x3), region = 120 }

// kernel: resnet_forward.30
= control target key start
LH: loop header
LB: loop body
LE: loop exit
PB: predicated region body
PF: predicated region fallthrough
CT: control target
= control target key end

     0   :  { %s1653_s0 = inlined_call_operand.vmem [shape: bf16[16,1152], index: 0, kind: input, shape index: {}]   ;;  %s1654_s1 = inlined_call_operand.vmem [shape: bf16[1152,256], index: 1, kind: input, shape index: {}]   ;;  %s1655_s2 = inlined_call_operand.vmem [shape: f32[1,256], index: 2, kind: input, shape index: {}]   ;;  %s1656_s3 = inlined_call_operand.vmem [shape: bf16[16,256], index: 3, kind: output, shape index: {}]  }
   0x1   :  { %1658 = sst [smem:[#allocation7_spill]] %s1653_s0 }
   0x2   :  { %1659 = sst [smem:[#allocation8_spill]] %s1654_s1 }
   0x3   :  { %s1344_s12 = smov 0   ;;  %s1346_s13 = smov 0  }
   0x4   :  { %s1348_s14 = smov 0   ;;  %s1350_s15 = smov 0  }
   0x5   :  { %s1352_s16 = smov 0   ;;  %s1354_s17 = smov 0  }
   0x6   :  { %s1356_s18 = smov 0   ;;  %s1358_s19 = smov 0  }
   0x7   :  { %s1360_s20 = smov 0   ;;  %s1362_s21 = smov 0  }
   0x8   :  { %s1364_s22 = smov 0  }
   0x9 LB: > { %s1001_s23 = sadd.s32 4294967295, %s1319_s22   ;;  %s25_s24 = sadd.s32 1, %s1311_s20  ;;  %s1319_s22 = sphi %s1364_s22, %s13_s22   ;;  %s1315_s21 = sphi %s1362_s21, %s1676_s21   ;;  %s1311_s20 = sphi %s1360_s20, %s1675_s20   ;;  %s1307_s19 = sphi %s1358_s19, %s1674_s19   ;;  %s1303_s18 = sphi %s1356_s18, %s1673_s18   ;;  %s1299_s17 = sphi %s1354_s17, %s1672_s17   ;;  %s1295_s16 = sphi %s1352_s16, %s1671_s16   ;;  %s1291_s15 = sphi %s1350_s15, %s1670_s15   ;;  %s1287_s14 = sphi %s1348_s14, %s1669_s14   ;;  %s1283_s13 = sphi %s1346_s13, %s1668_s13   ;;  %s1279_s12 = sphi %s1344_s12, %s1667_s12  }
   0xa   : > { %p26_p0 = scmp.ge.s32.totalorder %s25_s24, 3  ;;  %s28_s25 = sadd.s32 1, %s1315_s21 }
   0xb   : > { %s41_s26 = sadd.s32 1, %s1299_s17  ;;  %p48_p1 = scmp.ne.s32.totalorder %s1299_s17, %s1295_s16 }
   0xc   : > { %s1678_s24 = smov (%p26_p0, %s25_s24), 0  ;;  %s1680_s25 = smov (!%p26_p0, %s28_s25), %s1315_s21 }
   0xd   : > { %s37_s27 = ssub.s32 %s1311_s20, %s1678_s24  ;;  %p49_p2 = scmp.eq.s32.totalorder %s1319_s22, 0 }
   0xe   : > { %p30_p3 = scmp.ge.s32.totalorder %s1680_s25, 2  ;;  %p39_p4 = scmp.eq.s32.totalorder %s37_s27, 0 }
   0xf   : > { %p1411_p5 = por %p49_p2, %p48_p1  ;;  %s69_s29 = sadd.s32 1, %s1291_s15 }
  0x10   : > { %s1682_s25 = smov (%p30_p3, %s1680_s25), 0  ;;  %p76_p6 = scmp.ne.s32.totalorder %s1291_s15, %s1287_s14 }
  0x11   : > { %1661 = sst [smem:[#allocation6_spill]] %s1682_s25  ;;  %s65_s4 = ssub.s32 %s1315_s21, %s1682_s25 }
  0x12   : > { %s1419_s30 = scalar_select %p39_p4, %s1299_s17, %s41_s26  }
  0x13   : > { %s66_s5 = sor.u32 %s65_s4, %s37_s27  ;;  %p121_p7 = scmp.eq.s32.totalorder %s65_s4, 0 }
  0x14   : > { %p67_p8 = scmp.eq.s32.totalorder %s66_s5, 0  ;;  %p1425_p9 = por %p76_p6, %p49_p2 }
  0x15   : > { %s123_s7 = sadd.s32 1, %s1283_s13  ;;  %p133_p10 = scmp.ne.s32.totalorder %s1283_s13, %s1279_s12 }
  0x16   : > { %s1433_s8 = scalar_select %p67_p8, %s1291_s15, %s69_s29  }
  0x17   : > { %s1436_s9 = scalar_select %p121_p7, %s1283_s13, %s123_s7  }
  0x18   : > { %p134_p11 = scmp.eq.s32.totalorder %s1001_s23, 5  ;;  %p1004_p13 = scmp.ge.s32.totalorder %s1319_s22, 6 }
  0x1a   : > { %p1438_p12 = por %p134_p11, %p133_p10  ;;  %156 = sbr.rel (%p1004_p13) target bundleno = 83 (0x53), region = 16 }
  0x1f   : > { %159 = sbr.rel (!%p1411_p5) target bundleno = 42 (0x2a), region = 20  ;;  %s161_s11 = sand.u32 (%p1411_p5), 1, %s1299_s17  }
  0x20   : > { %s1050_s26 = smul.u32 (%p1411_p5), 12, %s1311_s20  ;;  %s1664_s0 = sld [smem:[#allocation7_spill]] (%p1411_p5) }
  0x21   : > { %s1110_s27 = smul.u32 (%p1411_p5), 24, %s161_s11 }
  0x23   : > { %s163_s23 = scalar_lea.vmem (%p1411_p5), [#allocation3], %s1110_s27 }
  0x26   : > { %s169_s5 = scalar_lea.vmem %s1664_s0, %s1050_s26 }
  0x27   : > { %v184_v0 = vld [vmem:[%s169_s5] sm:$0xff]  ;;  %v1006_v2 = vld [vmem:[%s169_s5 + $0x8] sm:$0xf]  ;;  %v1008_v3 = vld [vmem:[%s169_s5 + $0x2c] sm:$0xf] }
  0x28   : > { %v186_v1 = vld [vmem:[%s169_s5 + $0x24] sm:$0xff]  ;;  %185 = vst [vmem:[%s163_s23] sm:$0xff] %v184_v0  ;;  %1007 = vst [vmem:[%s163_s23 + $0x8] sm:$0xf] %v1006_v2 }
  0x29   : > { %187 = vst [vmem:[%s163_s23 + $0xc] sm:$0xff] %v186_v1  ;;  %1009 = vst [vmem:[%s163_s23 + $0x14] sm:$0xf] %v1008_v3 }
  0x2a PF: > { %205 = sbr.rel (!%p1425_p9) target bundleno = 83 (0x53), region = 46  ;;  %s207_s28 = sand.u32 (%p1425_p9), 1, %s1291_s15  }
  0x2b   : > { %s1051_s7 = smul.u32 (%p1425_p9), 96, %s1311_s20  ;;  %s1665_s1 = sld [smem:[#allocation8_spill]] (%p1425_p9) }
  0x2c   : > { %s1111_s11 = smul.u32 (%p1425_p9), 192, %s207_s28 }
  0x2d   : > { %s212_s26 = sadd.s32 (%p1425_p9), %s1315_s21, %s1051_s7 }
  0x2e   : > { %s1011_s29 = sshll.u32 (%p1425_p9), %s212_s26, 2  ;;  %s1463_s6 = scalar_lea.vmem (%p1425_p9), [#allocation4], %s1111_s11 }
  0x31   : > { %s1458_s27 = scalar_lea.vmem %s1665_s1, %s1011_s29 }
  0x32   : > { %v231_v4 = vld [vmem:[%s1458_s27] sm:$0xf]  ;;  %v233_v5 = vld [vmem:[%s1458_s27 + $0x8] sm:$0xf]  ;;  %v235_v6 = vld [vmem:[%s1458_s27 + $0x10] sm:$0xf] }
  0x33   : > { %232 = vst [vmem:[%s1463_s6] sm:$0xf] %v231_v4  ;;  %234 = vst [vmem:[%s1463_s6 + $0x4] sm:$0xf] %v233_v5  ;;  %v237_v7 = vld [vmem:[%s1458_s27 + $0x18] sm:$0xf] }
  0x34   : > { %236 = vst [vmem:[%s1463_s6 + $0x8] sm:$0xf] %v235_v6  ;;  %v239_v8 = vld [vmem:[%s1458_s27 + $0x20] sm:$0xf]  ;;  %v241_v9 = vld [vmem:[%s1458_s27 + $0x28] sm:$0xf] }
  0x35   : > { %238 = vst [vmem:[%s1463_s6 + $0xc] sm:$0xf] %v237_v7  ;;  %240 = vst [vmem:[%s1463_s6 + $0x10] sm:$0xf] %v239_v8  ;;  %v243_v10 = vld [vmem:[%s1458_s27 + $0x30] sm:$0xf] }
  0x36   : > { %242 = vst [vmem:[%s1463_s6 + $0x14] sm:$0xf] %v241_v9  ;;  %v245_v11 = vld [vmem:[%s1458_s27 + $0x38] sm:$0xf]  ;;  %v247_v12 = vld [vmem:[%s1458_s27 + $0x40] sm:$0xf] }
  0x37   : > { %244 = vst [vmem:[%s1463_s6 + $0x18] sm:$0xf] %v243_v10  ;;  %246 = vst [vmem:[%s1463_s6 + $0x1c] sm:$0xf] %v245_v11  ;;  %v249_v13 = vld [vmem:[%s1458_s27 + $0x48] sm:$0xf] }
  0x38   : > { %248 = vst [vmem:[%s1463_s6 + $0x20] sm:$0xf] %v247_v12  ;;  %v251_v14 = vld [vmem:[%s1458_s27 + $0x50] sm:$0xf]  ;;  %v253_v15 = vld [vmem:[%s1458_s27 + $0x58] sm:$0xf] }
  0x39   : > { %250 = vst [vmem:[%s1463_s6 + $0x24] sm:$0xf] %v249_v13  ;;  %252 = vst [vmem:[%s1463_s6 + $0x28] sm:$0xf] %v251_v14  ;;  %v255_v16 = vld [vmem:[%s1458_s27 + $0x60] sm:$0xf] }
  0x3a   : > { %254 = vst [vmem:[%s1463_s6 + $0x2c] sm:$0xf] %v253_v15  ;;  %v257_v17 = vld [vmem:[%s1458_s27 + $0x68] sm:$0xf]  ;;  %v259_v18 = vld [vmem:[%s1458_s27 + $0x70] sm:$0xf] }
  0x3b   : > { %256 = vst [vmem:[%s1463_s6 + $0x30] sm:$0xf] %v255_v16  ;;  %258 = vst [vmem:[%s1463_s6 + $0x34] sm:$0xf] %v257_v17  ;;  %v261_v19 = vld [vmem:[%s1458_s27 + $0x78] sm:$0xf] }
  0x3c   : > { %260 = vst [vmem:[%s1463_s6 + $0x38] sm:$0xf] %v259_v18  ;;  %v263_v20 = vld [vmem:[%s1458_s27 + $0x80] sm:$0xf]  ;;  %v265_v21 = vld [vmem:[%s1458_s27 + $0x88] sm:$0xf] }
  0x3d   : > { %262 = vst [vmem:[%s1463_s6 + $0x3c] sm:$0xf] %v261_v19  ;;  %264 = vst [vmem:[%s1463_s6 + $0x40] sm:$0xf] %v263_v20  ;;  %v267_v22 = vld [vmem:[%s1458_s27 + $0x90] sm:$0xf] }
  0x3e   : > { %266 = vst [vmem:[%s1463_s6 + $0x44] sm:$0xf] %v265_v21  ;;  %v269_v23 = vld [vmem:[%s1458_s27 + $0x98] sm:$0xf]  ;;  %v271_v24 = vld [vmem:[%s1458_s27 + $0xa0] sm:$0xf] }
  0x3f   : > { %268 = vst [vmem:[%s1463_s6 + $0x48] sm:$0xf] %v267_v22  ;;  %270 = vst [vmem:[%s1463_s6 + $0x4c] sm:$0xf] %v269_v23  ;;  %v273_v25 = vld [vmem:[%s1458_s27 + $0xa8] sm:$0xf] }
  0x40   : > { %272 = vst [vmem:[%s1463_s6 + $0x50] sm:$0xf] %v271_v24  ;;  %v275_v26 = vld [vmem:[%s1458_s27 + $0xb0] sm:$0xf]  ;;  %v277_v27 = vld [vmem:[%s1458_s27 + $0xb8] sm:$0xf] }
  0x41   : > { %274 = vst [vmem:[%s1463_s6 + $0x54] sm:$0xf] %v273_v25  ;;  %276 = vst [vmem:[%s1463_s6 + $0x58] sm:$0xf] %v275_v26  ;;  %v279_v28 = vld [vmem:[%s1458_s27 + $0xc0] sm:$0xf] }
  0x42   : > { %278 = vst [vmem:[%s1463_s6 + $0x5c] sm:$0xf] %v277_v27  ;;  %v281_v29 = vld [vmem:[%s1458_s27 + $0xc8] sm:$0xf]  ;;  %v283_v30 = vld [vmem:[%s1458_s27 + $0xd0] sm:$0xf] }
  0x43   : > { %280 = vst [vmem:[%s1463_s6 + $0x60] sm:$0xf] %v279_v28  ;;  %282 = vst [vmem:[%s1463_s6 + $0x64] sm:$0xf] %v281_v29  ;;  %v285_v31 = vld [vmem:[%s1458_s27 + $0xd8] sm:$0xf] }
  0x44   : > { %284 = vst [vmem:[%s1463_s6 + $0x68] sm:$0xf] %v283_v30  ;;  %v287_v32 = vld [vmem:[%s1458_s27 + $0xe0] sm:$0xf]  ;;  %v289_v33 = vld [vmem:[%s1458_s27 + $0xe8] sm:$0xf] }
  0x45   : > { %286 = vst [vmem:[%s1463_s6 + $0x6c] sm:$0xf] %v285_v31  ;;  %288 = vst [vmem:[%s1463_s6 + $0x70] sm:$0xf] %v287_v32  ;;  %v291_v34 = vld [vmem:[%s1458_s27 + $0xf0] sm:$0xf] }
  0x46   : > { %290 = vst [vmem:[%s1463_s6 + $0x74] sm:$0xf] %v289_v33  ;;  %v293_v35 = vld [vmem:[%s1458_s27 + $0xf8] sm:$0xf]  ;;  %v295_v36 = vld [vmem:[%s1458_s27 + $0x100] sm:$0xf] }
  0x47   : > { %292 = vst [vmem:[%s1463_s6 + $0x78] sm:$0xf] %v291_v34  ;;  %294 = vst [vmem:[%s1463_s6 + $0x7c] sm:$0xf] %v293_v35  ;;  %v297_v37 = vld [vmem:[%s1458_s27 + $0x108] sm:$0xf] }
  0x48   : > { %296 = vst [vmem:[%s1463_s6 + $0x80] sm:$0xf] %v295_v36  ;;  %v299_v38 = vld [vmem:[%s1458_s27 + $0x110] sm:$0xf]  ;;  %v301_v39 = vld [vmem:[%s1458_s27 + $0x118] sm:$0xf] }
  0x49   : > { %298 = vst [vmem:[%s1463_s6 + $0x84] sm:$0xf] %v297_v37  ;;  %300 = vst [vmem:[%s1463_s6 + $0x88] sm:$0xf] %v299_v38  ;;  %v303_v40 = vld [vmem:[%s1458_s27 + $0x120] sm:$0xf] }
  0x4a   : > { %302 = vst [vmem:[%s1463_s6 + $0x8c] sm:$0xf] %v301_v39  ;;  %v305_v41 = vld [vmem:[%s1458_s27 + $0x128] sm:$0xf]  ;;  %v307_v42 = vld [vmem:[%s1458_s27 + $0x130] sm:$0xf] }
  0x4b   : > { %304 = vst [vmem:[%s1463_s6 + $0x90] sm:$0xf] %v303_v40  ;;  %306 = vst [vmem:[%s1463_s6 + $0x94] sm:$0xf] %v305_v41  ;;  %v309_v43 = vld [vmem:[%s1458_s27 + $0x138] sm:$0xf] }
  0x4c   : > { %308 = vst [vmem:[%s1463_s6 + $0x98] sm:$0xf] %v307_v42  ;;  %v311_v44 = vld [vmem:[%s1458_s27 + $0x140] sm:$0xf]  ;;  %v313_v45 = vld [vmem:[%s1458_s27 + $0x148] sm:$0xf] }
  0x4d   : > { %310 = vst [vmem:[%s1463_s6 + $0x9c] sm:$0xf] %v309_v43  ;;  %312 = vst [vmem:[%s1463_s6 + $0xa0] sm:$0xf] %v311_v44  ;;  %v315_v46 = vld [vmem:[%s1458_s27 + $0x150] sm:$0xf] }
  0x4e   : > { %314 = vst [vmem:[%s1463_s6 + $0xa4] sm:$0xf] %v313_v45  ;;  %v317_v47 = vld [vmem:[%s1458_s27 + $0x158] sm:$0xf]  ;;  %v319_v48 = vld [vmem:[%s1458_s27 + $0x160] sm:$0xf] }
  0x4f   : > { %316 = vst [vmem:[%s1463_s6 + $0xa8] sm:$0xf] %v315_v46  ;;  %318 = vst [vmem:[%s1463_s6 + $0xac] sm:$0xf] %v317_v47  ;;  %v321_v49 = vld [vmem:[%s1458_s27 + $0x168] sm:$0xf] }
  0x50   : > { %320 = vst [vmem:[%s1463_s6 + $0xb0] sm:$0xf] %v319_v48  ;;  %v323_v50 = vld [vmem:[%s1458_s27 + $0x170] sm:$0xf]  ;;  %v325_v51 = vld [vmem:[%s1458_s27 + $0x178] sm:$0xf] }
  0x51   : > { %322 = vst [vmem:[%s1463_s6 + $0xb4] sm:$0xf] %v321_v49  ;;  %324 = vst [vmem:[%s1463_s6 + $0xb8] sm:$0xf] %v323_v50 }
  0x52   : > { %326 = vst [vmem:[%s1463_s6 + $0xbc] sm:$0xf] %v325_v51 }
  0x53 PF: > { %p1012_p0 = scmp.ge.s32.totalorder %s1319_s22, 1  ;;  %p451_p1 = scmp.lt.s32.totalorder %s1319_s22, 7 }
  0x55   : > { %p452_p2 = pnand %p1012_p0, %p451_p1 }
  0x56   : > { %s458_s0 = sand.u32 (!%p452_p2), 1, %s1295_s16   ;;  %s465_s5 = sand.u32 (!%p452_p2), 1, %s1287_s14  }
  0x57   : > { %455 = sbr.rel (%p452_p2) target bundleno = 362 (0x16a), region = 91  ;;  %s491_s28 = sand.u32 (!%p452_p2), 1, %s1279_s12  }
  0x58   : > { %s1112_s23 = smul.u32 (!%p452_p2), 24, %s458_s0  ;;  %s1013_s11 = sshll.u32 (!%p452_p2), %s491_s28, 3 }
  0x59   : > { %s1113_s7 = smul.u32 (!%p452_p2), 192, %s465_s5  ;;  %p497_p3 = scmp.lt.s32.totalorder (!%p452_p2), %s1307_s19, 1 }
  0x5a   : > { %s1571_s6 = scalar_lea.vmem (!%p452_p2), [#allocation3], %s1112_s23  ;;  %s1575_s25 = scalar_lea.vmem (!%p452_p2), [#allocation5], %s1013_s11 }
  0x5b   : > { %s1573_s1 = scalar_lea.vmem (!%p452_p2), [#allocation4], %s1113_s7  ;;  %p1014_p4 = scmp.ne.s32.totalorder (!%p452_p2), %s1303_s18, 0 }
  0x5c   : > { %s1565_s26 = scalar_select %p497_p3, %s1307_s19, 1 }
  0x5d   : > { %505 = sbr.rel (%p1014_p4) target bundleno = 100 (0x64), region = 103 }
  0x5e   : > { %s499_s27 = scalar_lea.vmem %s1655_s2, %s1565_s26 }
  0x62   : > { %v1321_v52 = vmov 0.0  }
  0x63   : > { %506 = vst [vmem:[#allocation2] sm:$0xff] %v1321_v52  ;;  %507 = vst [vmem:[#allocation2 + $0x8] sm:$0xff] %v1321_v52 }
  0x64 PF: > { %v1205_v53 = vld [vmem:[%s1573_s1 + $0x78] sm:$0xff]   ;;  %v1322_v54 = vmov 0.0   ;;  %vm1323_vm0 = vmmov 0   ;;  %v1208_v57 = vld [vmem:[%s1573_s1 + $0x70] sm:$0xff]   ;;  %v1211_v60 = vld [vmem:[%s1573_s1 + $0x68] sm:$0xff]   ;;  %p1042_p5 = scmp.ne.s32.totalorder %s1303_s18, 2 }
  0x65   : > { %1090 = vmatprep.subr.bf16.mxu1 %v1322_v54  ;;  %v1206_v55 = vld [vmem:[%s1573_s1 + $0xb8] sm:$0xff]   ;;  %1059 = vmatprep.subr.bf16.mxu0 %v1205_v53  ;;  %v1209_v58 = vld [vmem:[%s1573_s1 + $0xb0] sm:$0xff]   ;;  %v1212_v61 = vld [vmem:[%s1573_s1 + $0xa8] sm:$0xff]  }
  0x66   : > { %v1207_v56 = vld [vmem:[%s1573_s1 + $0x38] sm:$0xff]   ;;  %1106 = vmatprep.mubr.msk.bf16.mxu1 %vm1323_vm0, %v1322_v54  ;;  %1091 = vmatpush3.bf16.msra.mxu1 %v1206_v55  ;;  %v1210_v59 = vld [vmem:[%s1573_s1 + $0x30] sm:$0xff]   ;;  %v1213_v62 = vld [vmem:[%s1573_s1 + $0x28] sm:$0xff]  }
  0x67   : > { %1060 = vmatpush3.bf16.msra.mxu0 %v1207_v56  ;;  %1092 = vmatprep.subr.bf16.mxu1 %v1322_v54  ;;  %v1214_v63 = vld [vmem:[%s1573_s1 + $0x60] sm:$0xff]   ;;  %v1217_v2 = vld [vmem:[%s1573_s1 + $0x58] sm:$0xff]   ;;  %v1220_v5 = vld [vmem:[%s1573_s1 + $0x50] sm:$0xff]  }
  0x68   : > { %1061 = vmatprep.subr.bf16.mxu0 %v1208_v57  ;;  %v1215_v0 = vld [vmem:[%s1573_s1 + $0xa0] sm:$0xff]   ;;  %v1218_v3 = vld [vmem:[%s1573_s1 + $0x98] sm:$0xff]   ;;  %v1221_v6 = vld [vmem:[%s1573_s1 + $0x90] sm:$0xff]  }
  0x69   : > { %v1216_v1 = vld [vmem:[%s1573_s1 + $0x20] sm:$0xff]   ;;  %v1219_v4 = vld [vmem:[%s1573_s1 + $0x18] sm:$0xff]   ;;  %v1222_v7 = vld [vmem:[%s1573_s1 + $0x10] sm:$0xff]  }
  0x6a   : > { %1093 = vmatpush3.bf16.msra.mxu1 %v1209_v58  ;;  %v1223_v8 = vld [vmem:[%s1573_s1 + $0x48] sm:$0xff]   ;;  %v1226_v11 = vld [vmem:[%s1573_s1 + $0x40] sm:$0xff]  }
  0x6b   : > { %1062 = vmatpush3.bf16.msra.mxu0 %v1210_v59  ;;  %1094 = vmatprep.subr.bf16.mxu1 %v1322_v54  ;;  %v1224_v9 = vld [vmem:[%s1573_s1 + $0x88] sm:$0xff]   ;;  %v1227_v13 = vld [vmem:[%s1573_s1 + $0x80] sm:$0xff]  }
  0x6c   : > { %1063 = vmatprep.subr.bf16.mxu0 %v1211_v60  ;;  %v1225_v10 = vld [vmem:[%s1573_s1 + $0x8] sm:$0xff]   ;;  %v1228_v14 = vld [vmem:[%s1573_s1] sm:$0xff]  }
  0x6d   : > { %v1231_v12 = vld [vmem:[%s1571_s6 + $0x4] ss:$12 sps:$4 sm:$0xff]   ;;  %v1232_v15 = vld [vmem:[%s1571_s6 + $0x8] ss:$12 sps:$4 sm:$0xff]   ;;  %v1229_v16 = vld [vmem:[%s1571_s6] ss:$12 sps:$4 sm:$0xff]  }
  0x6e   : > { %1095 = vmatpush3.bf16.msra.mxu1 %v1212_v61  ;;  %754 = vmatprep.mubr.bf16.mxu0 %v1231_v12  ;;  %v508_v23 = vld [vmem:[#allocation2] sm:$0xff]  ;;  %v509_v30 = vld [vmem:[#allocation2 + $0x8] sm:$0xff] }
  0x6f   : > { %1064 = vmatpush3.bf16.msra.mxu0 %v1213_v62  ;;  %1096 = vmatprep.subr.bf16.mxu1 %v1322_v54 }
  0x70   : > { %1065 = vmatprep.subr.bf16.mxu0 %v1214_v63 }
  0x72   : > { %1097 = vmatpush3.bf16.msra.mxu1 %v1215_v0 }
  0x73   : > { %1066 = vmatpush3.bf16.msra.mxu0 %v1216_v1  ;;  %1098 = vmatprep.subr.bf16.mxu1 %v1322_v54 }
  0x74   : > { %1067 = vmatprep.subr.bf16.mxu0 %v1217_v2 }
  0x76   : > { %1099 = vmatpush3.bf16.msra.mxu1 %v1218_v3 }
  0x77   : > { %1068 = vmatpush3.bf16.msra.mxu0 %v1219_v4  ;;  %1100 = vmatprep.subr.bf16.mxu1 %v1322_v54 }
  0x78   : > { %1069 = vmatprep.subr.bf16.mxu0 %v1220_v5 }
  0x7a   : > { %1101 = vmatpush3.bf16.msra.mxu1 %v1221_v6 }
  0x7b   : > { %1070 = vmatpush3.bf16.msra.mxu0 %v1222_v7  ;;  %1102 = vmatprep.subr.bf16.mxu1 %v1322_v54 }
  0x7c   : > { %1071 = vmatprep.subr.bf16.mxu0 %v1223_v8 }
  0x7e   : > { %1103 = vmatpush3.bf16.msra.mxu1 %v1224_v9 }
  0x7f   : > { %1072 = vmatpush3.bf16.msra.mxu0 %v1225_v10  ;;  %1104 = vmatprep.subr.bf16.mxu1 %v1322_v54 }
  0x80   : > { %1073 = vmatprep.subr.bf16.mxu0 %v1226_v11 }
  0x82   : > { %1105 = vmatpush3.bf16.msra.mxu1 %v1227_v13 }
  0x83   : > { %1074 = vmatpush3.bf16.msra.mxu0 %v1228_v14 }
  0x85   : > { %1107 = vmatmul.mubr.bf16.vlgmr.msra.gmra.mxu1 %v1232_v15 }
  0x86   : > { %755 = vmatmul.mubr.bf16.vlgmr.msra.gmra.mxu0 %v1229_v16 }
 0x145   : > { %v797_v17 = vpop.f32.mrf.mxu1 }
 0x146   : > { %v1075_v18 = vpop.f32.mrf.mxu0 }
 0x147   : > { %v1108_v19 = vpop.f32.mrf.mxu1 }
 0x148   : > { %v1076_v20 = vpop.f32.mrf.mxu0 }
 0x149   : > { %v1077_v21 = vadd.f32 %v1076_v20, %v1075_v18  ;;  %v800_v22 = vpop.f32.mrf.mxu1 }
 0x14a   : > { %v1078_v24 = vpop.f32.mrf.mxu0 }
 0x14b   : > { %v798_v25 = vadd.f32 %v1077_v21, %v797_v17  ;;  %v1109_v26 = vpop.f32.mrf.mxu1 }
 0x14c   : > { %v1079_v27 = vpop.f32.mrf.mxu0 }
 0x14d   : > { %v804_v28 = vadd.f32 %v798_v25, %v508_v23  ;;  %v1080_v29 = vadd.f32 %v1079_v27, %v1078_v24 }
 0x14f   : > { %806 = vst [vmem:[#allocation2] sm:$0xff] %v804_v28  ;;  %v801_v31 = vadd.f32 %v1080_v29, %v800_v22  ;;  %811 = sbr.rel (%p1042_p5) target bundleno = 354 (0x162), region = 107 }
 0x151   : > { %v805_v32 = vadd.f32 %v801_v31, %v509_v30 }
 0x153   : > { %807 = vst [vmem:[#allocation2 + $0x8] sm:$0xff] %v805_v32 }
 0x154   : > { %v1043_v35 = vld [vmem:[%s499_s27] ss:$0 sm:$0xff] }
 0x156   : > { %v812_v33 = vld [vmem:[#allocation2] sm:$0xff] }
 0x157   : > { %v821_v36 = vadd.f32 %v1043_v35, %v812_v33 }
 0x159   : > { %v823_v38 = vmax.f32 %v821_v36, 0.0 }
 0x15a   : > { %v813_v34 = vld [vmem:[#allocation2 + $0x8] sm:$0xff] }
 0x15b   : > { %v822_v37 = vadd.f32 %v1043_v35, %v813_v34 }
 0x15d   : > { %v824_v39 = vmax.f32 %v822_v37, 0.0 }
 0x15f   : > { %v1057_v40 = vpack.c.bf16 %v824_v39, %v823_v38 }
 0x161   : > { %1058 = vst [vmem:[%s1575_s25] sm:$0xff] %v1057_v40  }
 0x162 PF: > { %841 = sbr.rel (!%p1438_p12) target bundleno = 362 (0x16a), region = 111  ;;  %s1047_s14 = sshll.u32 (%p1438_p12), %s1307_s19, 2 }
 0x163   : > { %s846_s0 = scalar_lea.vmem (%p1438_p12), %s1656_s3, %s1047_s14 }
 0x168   : > { %v863_v41 = vld [vmem:[%s1575_s25] sm:$0xf]  ;;  %v865_v42 = vld [vmem:[%s1575_s25 + $0x4] sm:$0xf] }
 0x169   : > { %864 = vst [vmem:[%s846_s0] sm:$0xf] %v863_v41  ;;  %866 = vst [vmem:[%s846_s0 + $0x8] sm:$0xf] %v865_v42 }
 0x16a PF: > { %s13_s22 = sadd.s32 1, %s1319_s22   ;;  %s1666_s25 = sld [smem:[#allocation6_spill]] }
 0x16b   : > { %p10_p6 = scmp.ge.s32.totalorder %s13_s22, 8   ;;  %s1667_s12 = smov %s1283_s13 }
 0x16c   : > { %s1668_s13 = smov %s1436_s9  ;;  %s1669_s14 = smov %s1291_s15 }
 0x16d   : > { %s1670_s15 = smov %s1433_s8  ;;  %s1671_s16 = smov %s1299_s17 }
 0x16e   : > { %s1672_s17 = smov %s1419_s30  ;;  %s1673_s18 = smov %s1311_s20 }
 0x16f   : > { %s1674_s19 = smov %s1315_s21  ;;  %s1675_s20 = smov %s1678_s24 }
 0x170   : > { %s1676_s21 = smov %s1666_s25  ;;  %12 = sbr.rel (!%p10_p6) target bundleno = 9 (0x9), region = 200 }

// kernel: resnet_forward.31
= control target key start
LH: loop header
LB: loop body
LE: loop exit
PB: predicated region body
PF: predicated region fallthrough
CT: control target
= control target key end

     0   :  { %s824_s12 = smov 0   ;;  %s826_s13 = smov 0   ;;  %s926_s0 = inlined_call_operand.vmem [shape: bf16[16,128], index: 0, kind: input, shape index: {}]   ;;  %s927_s1 = inlined_call_operand.vmem [shape: bf16[128,256], index: 1, kind: input, shape index: {}]   ;;  %s928_s2 = inlined_call_operand.vmem [shape: f32[1,256], index: 2, kind: input, shape index: {}]   ;;  %s929_s3 = inlined_call_operand.vmem [shape: bf16[16,256], index: 3, kind: output, shape index: {}]  }
   0x1   :  { %s828_s14 = smov 0   ;;  %s830_s15 = smov 0  }
   0x2   :  { %s832_s16 = smov 0  }
   0x3 LB: > { %s28_s17 = sadd.s32 1, %s796_s15  ;;  %s649_s18 = sadd.s32 4294967295, %s800_s16   ;;  %s800_s16 = sphi %s832_s16, %s13_s16   ;;  %s796_s15 = sphi %s830_s15, %s934_s15   ;;  %s792_s14 = sphi %s828_s14, %s933_s14   ;;  %s788_s13 = sphi %s826_s13, %s932_s13   ;;  %s784_s12 = sphi %s824_s12, %s931_s12  }
   0x4   : > { %p30_p0 = scmp.ge.s32.totalorder %s28_s17, 2  ;;  %p76_p1 = scmp.ne.s32.totalorder %s788_s13, %s784_s12 }
   0x5   : > { %p77_p2 = scmp.eq.s32.totalorder %s800_s16, 0  ;;  %p134_p4 = scmp.eq.s32.totalorder %s649_s18, 1 }
   0x6   : > { %s936_s17 = smov (%p30_p0, %s28_s17), 0  ;;  %s69_s20 = sadd.s32 1, %s788_s13 }
   0x7   : > { %p78_p3 = por %p77_p2, %p76_p1  ;;  %s65_s19 = ssub.s32 %s796_s15, %s936_s17 }
   0x8   : > { %p67_p5 = scmp.eq.s32.totalorder %s65_s19, 0  ;;  %p859_p6 = por %p134_p4, %p76_p1 }
   0x9   : > { %p653_p7 = scmp.ge.s32.totalorder %s800_s16, 2 }
   0xa   : > { %s864_s22 = scalar_select %p67_p5, %s788_s13, %s69_s20  }
   0xb   : > { %168 = sbr.rel (%p653_p7) target bundleno = 30 (0x1e), region = 20 }
  0x10   : > { %171 = sbr.rel (!%p78_p3) target bundleno = 30 (0x1e), region = 24  ;;  %s173_s23 = sand.u32 (%p78_p3), 1, %s788_s13  }
  0x11   : > { %s655_s24 = sshll.u32 (%p78_p3), %s796_s15, 2  ;;  %s654_s25 = sshll.u32 (%p78_p3), %s173_s23, 6 }
  0x12   : > { %s872_s28 = scalar_lea.vmem (%p78_p3), %s927_s1, %s655_s24  ;;  %s175_s29 = scalar_lea.vmem (%p78_p3), [#allocation3], %s654_s25 }
  0x13   : > { %v197_v0 = vld [vmem:[%s872_s28] sm:$0xf] (%p78_p3)  ;;  %v199_v1 = vld [vmem:[%s872_s28 + $0x8] sm:$0xf] (%p78_p3)  ;;  %v201_v2 = vld [vmem:[%s872_s28 + $0x10] sm:$0xf] (%p78_p3) }
  0x14   : > { %198 = vst [vmem:[%s175_s29] sm:$0xf] (%p78_p3), %v197_v0  ;;  %200 = vst [vmem:[%s175_s29 + $0x4] sm:$0xf] (%p78_p3), %v199_v1  ;;  %v203_v3 = vld [vmem:[%s872_s28 + $0x18] sm:$0xf] (%p78_p3) }
  0x15   : > { %v205_v4 = vld [vmem:[%s872_s28 + $0x20] sm:$0xf]  ;;  %202 = vst [vmem:[%s175_s29 + $0x8] sm:$0xf] %v201_v2  ;;  %204 = vst [vmem:[%s175_s29 + $0xc] sm:$0xf] %v203_v3 }
  0x16   : > { %206 = vst [vmem:[%s175_s29 + $0x10] sm:$0xf] %v205_v4  ;;  %v207_v5 = vld [vmem:[%s872_s28 + $0x28] sm:$0xf]  ;;  %v209_v6 = vld [vmem:[%s872_s28 + $0x30] sm:$0xf] }
  0x17   : > { %v211_v7 = vld [vmem:[%s872_s28 + $0x38] sm:$0xf]  ;;  %208 = vst [vmem:[%s175_s29 + $0x14] sm:$0xf] %v207_v5  ;;  %210 = vst [vmem:[%s175_s29 + $0x18] sm:$0xf] %v209_v6 }
  0x18   : > { %212 = vst [vmem:[%s175_s29 + $0x1c] sm:$0xf] %v211_v7  ;;  %v213_v8 = vld [vmem:[%s872_s28 + $0x40] sm:$0xf]  ;;  %v215_v9 = vld [vmem:[%s872_s28 + $0x48] sm:$0xf] }
  0x19   : > { %v217_v10 = vld [vmem:[%s872_s28 + $0x50] sm:$0xf]  ;;  %214 = vst [vmem:[%s175_s29 + $0x20] sm:$0xf] %v213_v8  ;;  %216 = vst [vmem:[%s175_s29 + $0x24] sm:$0xf] %v215_v9 }
  0x1a   : > { %218 = vst [vmem:[%s175_s29 + $0x28] sm:$0xf] %v217_v10  ;;  %v219_v11 = vld [vmem:[%s872_s28 + $0x58] sm:$0xf]  ;;  %v221_v12 = vld [vmem:[%s872_s28 + $0x60] sm:$0xf] }
  0x1b   : > { %v223_v13 = vld [vmem:[%s872_s28 + $0x68] sm:$0xf]  ;;  %220 = vst [vmem:[%s175_s29 + $0x2c] sm:$0xf] %v219_v11  ;;  %222 = vst [vmem:[%s175_s29 + $0x30] sm:$0xf] %v221_v12 }
  0x1c   : > { %224 = vst [vmem:[%s175_s29 + $0x34] sm:$0xf] %v223_v13  ;;  %v225_v14 = vld [vmem:[%s872_s28 + $0x70] sm:$0xf]  ;;  %v227_v15 = vld [vmem:[%s872_s28 + $0x78] sm:$0xf] }
  0x1d   : > { %226 = vst [vmem:[%s175_s29 + $0x38] sm:$0xf] %v225_v14  ;;  %228 = vst [vmem:[%s175_s29 + $0x3c] sm:$0xf] %v227_v15 }
  0x1e PF: > { %p656_p8 = scmp.ge.s32.totalorder %s800_s16, 1  ;;  %p289_p9 = scmp.lt.s32.totalorder %s800_s16, 3 }
  0x20   : > { %p290_p10 = pnand %p656_p8, %p289_p9 }
  0x21   : > { %s296_s30 = sand.u32 (!%p290_p10), 1, %s784_s12   ;;  %p339_p11 = scmp.lt.s32.totalorder (!%p290_p10), %s792_s14, 1 }
  0x22   : > { %293 = sbr.rel (%p290_p10) target bundleno = 282 (0x11a), region = 69  ;;  %s657_s4 = sshll.u32 (!%p290_p10), %s296_s30, 6 }
  0x23   : > { %s298_s5 = scalar_lea.vmem (!%p290_p10), [#allocation3], %s657_s4  ;;  %s658_s18 = sshll.u32 (!%p290_p10), %s296_s30, 3 }
  0x24   : > { %s328_s19 = scalar_lea.vmem (!%p290_p10), [#allocation4], %s658_s18 }
  0x27   : > { %v802_v16 = vmov 0.0   ;;  %vm803_vm0 = vmmov 0   ;;  %v753_v17 = vld [vmem:[%s298_s5 + $0x38] sm:$0xff]   ;;  %v754_v18 = vld [vmem:[%s298_s5 + $0x30] sm:$0xff]   ;;  %v755_v19 = vld [vmem:[%s298_s5 + $0x28] sm:$0xff]   ;;  %s340_s8 = scalar_select %p339_p11, %s792_s14, 1 }
  0x28   : > { %691 = vmatprep.subr.bf16.mxu0 %v802_v16  ;;  %707 = vmatprep.mubr.msk.bf16.mxu0 %vm803_vm0, %v802_v16  ;;  %v756_v20 = vld [vmem:[%s298_s5 + $0x20] sm:$0xff]   ;;  %v757_v21 = vld [vmem:[%s298_s5 + $0x18] sm:$0xff]   ;;  %v758_v22 = vld [vmem:[%s298_s5 + $0x10] sm:$0xff]   ;;  %s672_s20 = sshll.u32 (%p859_p6), %s792_s14, 2 }
  0x29   : > { %692 = vmatpush3.bf16.msra.mxu0 %v753_v17  ;;  %v759_v23 = vld [vmem:[%s298_s5 + $0x8] sm:$0xff]   ;;  %v760_v24 = vld [vmem:[%s298_s5] sm:$0xff]   ;;  %s341_s11 = scalar_lea.vmem %s928_s2, %s340_s8  ;;  %s504_s25 = scalar_lea.vmem (%p859_p6), %s929_s3, %s672_s20 }
  0x2a   : > { %693 = vmatprep.subr.bf16.mxu0 %v802_v16  ;;  %v761_v25 = vld [vmem:[%s926_s0] sm:$0xff]  }
  0x2b   : > { %v668_v27 = vld [vmem:[%s341_s11] ss:$0 sm:$0xff] }
  0x2d   : > { %694 = vmatpush3.bf16.msra.mxu0 %v754_v18 }
  0x2e   : > { %695 = vmatprep.subr.bf16.mxu0 %v802_v16 }
  0x31   : > { %696 = vmatpush3.bf16.msra.mxu0 %v755_v19 }
  0x32   : > { %697 = vmatprep.subr.bf16.mxu0 %v802_v16 }
  0x35   : > { %698 = vmatpush3.bf16.msra.mxu0 %v756_v20 }
  0x36   : > { %699 = vmatprep.subr.bf16.mxu0 %v802_v16 }
  0x39   : > { %700 = vmatpush3.bf16.msra.mxu0 %v757_v21 }
  0x3a   : > { %701 = vmatprep.subr.bf16.mxu0 %v802_v16 }
  0x3d   : > { %702 = vmatpush3.bf16.msra.mxu0 %v758_v22 }
  0x3e   : > { %703 = vmatprep.subr.bf16.mxu0 %v802_v16 }
  0x41   : > { %704 = vmatpush3.bf16.msra.mxu0 %v759_v23 }
  0x42   : > { %705 = vmatprep.subr.bf16.mxu0 %v802_v16 }
  0x45   : > { %706 = vmatpush3.bf16.msra.mxu0 %v760_v24 }
  0x48   : > { %708 = vmatmul.mubr.bf16.vlgmr.msra.gmra.mxu0 %v761_v25 }
 0x108   : > { %v458_v26 = vpop.f32.mrf.mxu0 }
 0x109   : > { %v481_v30 = vadd.f32 %v668_v27, %v458_v26 }
 0x10a   : > { %v709_v28 = vpop.f32.mrf.mxu0 }
 0x10c   : > { %v461_v29 = vpop.f32.mrf.mxu0 }
 0x10d   : > { %v482_v31 = vadd.f32 %v668_v27, %v461_v29  ;;  %499 = sbr.rel (!%p859_p6) target bundleno = 282 (0x11a), region = 85 }
 0x10e   : > { %v710_v32 = vpop.f32.mrf.mxu0 }
 0x10f   : > { %v680_v33 = vpack.c.bf16 %v482_v31, %v481_v30 }
 0x111   : > { %681 = vst [vmem:[%s328_s19] sm:$0xff] %v680_v33  }
 0x118   : > { %v521_v34 = vld [vmem:[%s328_s19] sm:$0xf]  ;;  %v523_v35 = vld [vmem:[%s328_s19 + $0x4] sm:$0xf] }
 0x119   : > { %522 = vst [vmem:[%s504_s25] sm:$0xf] %v521_v34  ;;  %524 = vst [vmem:[%s504_s25 + $0x8] sm:$0xf] %v523_v35 }
 0x11a PF: > { %s13_s16 = sadd.s32 1, %s800_s16   ;;  %s931_s12 = smov %s788_s13 }
 0x11b   : > { %p10_p12 = scmp.ge.s32.totalorder %s13_s16, 4   ;;  %s932_s13 = smov %s864_s22 }
 0x11c   : > { %s933_s14 = smov %s796_s15  ;;  %s934_s15 = smov %s936_s17 }
 0x11d   :  { %12 = sbr.rel (!%p10_p12) target bundleno = 3 (0x3), region = 163 }

// kernel: resnet_forward.32
= control target key start
LH: loop header
LB: loop body
LE: loop exit
PB: predicated region body
PF: predicated region fallthrough
CT: control target
= control target key end

     0   :  { %s2431_s0 = inlined_call_operand.vmem [shape: bf16[16,2304], index: 0, kind: input, shape index: {}]   ;;  %s2432_s1 = inlined_call_operand.vmem [shape: bf16[2304,256], index: 1, kind: input, shape index: {}]   ;;  %s2433_s2 = inlined_call_operand.vmem [shape: f32[1,256], index: 2, kind: input, shape index: {}]   ;;  %s2434_s3 = inlined_call_operand.vmem [shape: bf16[16,256], index: 3, kind: input, shape index: {}]   ;;  %s2435_s4 = inlined_call_operand.vmem [shape: bf16[16,256], index: 4, kind: output, shape index: {}]  }
   0x1   :  { %2438 = sst [smem:[#allocation9_spill]] %s2431_s0 }
   0x2   :  { %s1976_s15 = smov 0   ;;  %s1978_s16 = smov 0  }
   0x3   :  { %s1980_s17 = smov 0   ;;  %s1982_s18 = smov 0  }
   0x4   :  { %s1984_s19 = smov 0   ;;  %s1986_s20 = smov 0  }
   0x5   :  { %s1988_s21 = smov 0   ;;  %s1990_s22 = smov 0  }
   0x6   :  { %s1992_s23 = smov 0   ;;  %s1994_s24 = smov 0  }
   0x7   :  { %s1996_s25 = smov 0  }
   0x8 LB: > { %s1558_s26 = sadd.s32 4294967295, %s1948_s25   ;;  %s26_s27 = sadd.s32 1, %s1940_s23  ;;  %s1948_s25 = sphi %s1996_s25, %s14_s25   ;;  %s1944_s24 = sphi %s1994_s24, %s2457_s24   ;;  %s1940_s23 = sphi %s1992_s23, %s2456_s23   ;;  %s1936_s22 = sphi %s1990_s22, %s2455_s22   ;;  %s1932_s21 = sphi %s1988_s21, %s2454_s21   ;;  %s1928_s20 = sphi %s1986_s20, %s2453_s20   ;;  %s1924_s19 = sphi %s1984_s19, %s2452_s19   ;;  %s1920_s18 = sphi %s1982_s18, %s2451_s18   ;;  %s1916_s17 = sphi %s1980_s17, %s2450_s17   ;;  %s1912_s16 = sphi %s1978_s16, %s2449_s16   ;;  %s1908_s15 = sphi %s1976_s15, %s2448_s15  }
   0x9   : > { %p27_p0 = scmp.ge.s32.totalorder %s26_s27, 3  ;;  %s29_s28 = sadd.s32 1, %s1944_s24 }
   0xa   : > { %s42_s29 = sadd.s32 1, %s1928_s20  ;;  %p49_p1 = scmp.ne.s32.totalorder %s1928_s20, %s1924_s19 }
   0xb   : > { %s2459_s27 = smov (%p27_p0, %s26_s27), 0  ;;  %s2461_s28 = smov (!%p27_p0, %s29_s28), %s1944_s24 }
   0xc   : > { %2439 = sst [smem:[#allocation7_spill]] %s2459_s27  ;;  %s38_s30 = ssub.s32 %s1940_s23, %s2459_s27 }
   0xd   : > { %p50_p2 = scmp.eq.s32.totalorder %s1948_s25, 0  ;;  %p31_p3 = scmp.ge.s32.totalorder %s2461_s28, 2 }
   0xe   : > { %p40_p4 = scmp.eq.s32.totalorder %s38_s30, 0  ;;  %s70_s6 = sadd.s32 1, %s1920_s18 }
   0xf   : > { %p2045_p5 = por %p50_p2, %p49_p1  ;;  %s2463_s28 = smov (%p31_p3, %s2461_s28), 0 }
  0x10   : > { %2441 = sst [smem:[#allocation8_spill]] %s2463_s28  ;;  %s66_s8 = ssub.s32 %s1944_s24, %s2463_s28 }
  0x11   : > { %s2053_s7 = scalar_select %p40_p4, %s1928_s20, %s42_s29  }
  0x12   : > { %p77_p6 = scmp.ne.s32.totalorder %s1920_s18, %s1916_s17  ;;  %s67_s9 = sor.u32 %s66_s8, %s38_s30 }
  0x13   : > { %p122_p7 = scmp.eq.s32.totalorder %s66_s8, 0  ;;  %p68_p8 = scmp.eq.s32.totalorder %s67_s9, 0 }
  0x14   : > { %p2061_p9 = por %p77_p6, %p50_p2  ;;  %s124_s11 = sadd.s32 1, %s1912_s16 }
  0x15   : > { %p131_p10 = scmp.ne.s32.totalorder %s1912_s16, %s1908_s15  ;;  %p163_p12 = scmp.eq.s32.totalorder %s1558_s26, 5 }
  0x16   : > { %s2069_s12 = scalar_select %p68_p8, %s1920_s18, %s70_s6  }
  0x17   : > { %s2072_s13 = scalar_select %p122_p7, %s1912_s16, %s124_s11  }
  0x18   : > { %p2076_p11 = por %p131_p10, %p50_p2  ;;  %p2080_p13 = por %p163_p12, %p131_p10 }
  0x19   : > { %p1561_p0 = scmp.ge.s32.totalorder %s1948_s25, 6 }
  0x1b   : > { %185 = sbr.rel (%p1561_p0) target bundleno = 120 (0x78), region = 16 }
  0x20   : > { %188 = sbr.rel (!%p2045_p5) target bundleno = 44 (0x2c), region = 20  ;;  %s190_s30 = sand.u32 (%p2045_p5), 1, %s1928_s20  }
  0x21   : > { %s1633_s6 = smul.u32 (%p2045_p5), 24, %s1940_s23  ;;  %s2445_s0 = sld [smem:[#allocation9_spill]] (%p2045_p5) }
  0x22   : > { %s1712_s8 = smul.u32 (%p2045_p5), 48, %s190_s30 }
  0x24   : > { %s192_s26 = scalar_lea.vmem (%p2045_p5), [#allocation3], %s1712_s8 }
  0x27   : > { %s198_s28 = scalar_lea.vmem %s2445_s0, %s1633_s6 }
  0x28   : > { %v211_v0 = vld [vmem:[%s198_s28] sm:$0xff]  ;;  %v213_v1 = vld [vmem:[%s198_s28 + $0x8] sm:$0xff]  ;;  %v215_v2 = vld [vmem:[%s198_s28 + $0x10] sm:$0xff] }
  0x29   : > { %212 = vst [vmem:[%s192_s26] sm:$0xff] %v211_v0  ;;  %214 = vst [vmem:[%s192_s26 + $0x8] sm:$0xff] %v213_v1  ;;  %v217_v3 = vld [vmem:[%s198_s28 + $0x48] sm:$0xff]  ;;  %v219_v4 = vld [vmem:[%s198_s28 + $0x50] sm:$0xff] }
  0x2a   : > { %216 = vst [vmem:[%s192_s26 + $0x10] sm:$0xff] %v215_v2  ;;  %v221_v5 = vld [vmem:[%s198_s28 + $0x58] sm:$0xff]  ;;  %218 = vst [vmem:[%s192_s26 + $0x18] sm:$0xff] %v217_v3 }
  0x2b   : > { %220 = vst [vmem:[%s192_s26 + $0x20] sm:$0xff] %v219_v4  ;;  %222 = vst [vmem:[%s192_s26 + $0x28] sm:$0xff] %v221_v5 }
  0x2c PF: > { %228 = sbr.rel (!%p2061_p9) target bundleno = 115 (0x73), region = 43  ;;  %s230_s5 = sand.u32 (%p2061_p9), 1, %s1920_s18  }
  0x2d   : > { %s1634_s30 = smul.u32 (%p2061_p9), 192, %s1940_s23 }
  0x2e   : > { %s1713_s6 = smul.u32 (%p2061_p9), 384, %s230_s5 }
  0x2f   : > { %s235_s8 = sadd.s32 (%p2061_p9), %s1944_s24, %s1634_s30 }
  0x30   : > { %s1564_s9 = sshll.u32 (%p2061_p9), %s235_s8, 2  ;;  %s2105_s28 = scalar_lea.vmem (%p2061_p9), [#allocation4], %s1713_s6 }
  0x31   : > { %s2100_s27 = scalar_lea.vmem %s2432_s1, %s1564_s9 }
  0x32   : > { %v254_v6 = vld [vmem:[%s2100_s27] sm:$0xf]  ;;  %v256_v7 = vld [vmem:[%s2100_s27 + $0x8] sm:$0xf]  ;;  %v258_v8 = vld [vmem:[%s2100_s27 + $0x10] sm:$0xf] }
  0x33   : > { %255 = vst [vmem:[%s2105_s28] sm:$0xf] %v254_v6  ;;  %257 = vst [vmem:[%s2105_s28 + $0x4] sm:$0xf] %v256_v7  ;;  %v260_v9 = vld [vmem:[%s2100_s27 + $0x18] sm:$0xf] }
  0x34   : > { %259 = vst [vmem:[%s2105_s28 + $0x8] sm:$0xf] %v258_v8  ;;  %v262_v10 = vld [vmem:[%s2100_s27 + $0x20] sm:$0xf]  ;;  %v264_v11 = vld [vmem:[%s2100_s27 + $0x28] sm:$0xf] }
  0x35   : > { %261 = vst [vmem:[%s2105_s28 + $0xc] sm:$0xf] %v260_v9  ;;  %263 = vst [vmem:[%s2105_s28 + $0x10] sm:$0xf] %v262_v10  ;;  %v266_v12 = vld [vmem:[%s2100_s27 + $0x30] sm:$0xf] }
  0x36   : > { %265 = vst [vmem:[%s2105_s28 + $0x14] sm:$0xf] %v264_v11  ;;  %v268_v13 = vld [vmem:[%s2100_s27 + $0x38] sm:$0xf]  ;;  %v270_v14 = vld [vmem:[%s2100_s27 + $0x40] sm:$0xf] }
  0x37   : > { %267 = vst [vmem:[%s2105_s28 + $0x18] sm:$0xf] %v266_v12  ;;  %269 = vst [vmem:[%s2105_s28 + $0x1c] sm:$0xf] %v268_v13  ;;  %v272_v15 = vld [vmem:[%s2100_s27 + $0x48] sm:$0xf] }
  0x38   : > { %271 = vst [vmem:[%s2105_s28 + $0x20] sm:$0xf] %v270_v14  ;;  %v274_v16 = vld [vmem:[%s2100_s27 + $0x50] sm:$0xf]  ;;  %v276_v17 = vld [vmem:[%s2100_s27 + $0x58] sm:$0xf] }
  0x39   : > { %273 = vst [vmem:[%s2105_s28 + $0x24] sm:$0xf] %v272_v15  ;;  %275 = vst [vmem:[%s2105_s28 + $0x28] sm:$0xf] %v274_v16  ;;  %v278_v18 = vld [vmem:[%s2100_s27 + $0x60] sm:$0xf] }
  0x3a   : > { %277 = vst [vmem:[%s2105_s28 + $0x2c] sm:$0xf] %v276_v17  ;;  %v280_v19 = vld [vmem:[%s2100_s27 + $0x68] sm:$0xf]  ;;  %v282_v20 = vld [vmem:[%s2100_s27 + $0x70] sm:$0xf] }
  0x3b   : > { %279 = vst [vmem:[%s2105_s28 + $0x30] sm:$0xf] %v278_v18  ;;  %281 = vst [vmem:[%s2105_s28 + $0x34] sm:$0xf] %v280_v19  ;;  %v284_v21 = vld [vmem:[%s2100_s27 + $0x78] sm:$0xf] }
  0x3c   : > { %283 = vst [vmem:[%s2105_s28 + $0x38] sm:$0xf] %v282_v20  ;;  %v286_v22 = vld [vmem:[%s2100_s27 + $0x80] sm:$0xf]  ;;  %v288_v23 = vld [vmem:[%s2100_s27 + $0x88] sm:$0xf] }
  0x3d   : > { %285 = vst [vmem:[%s2105_s28 + $0x3c] sm:$0xf] %v284_v21  ;;  %287 = vst [vmem:[%s2105_s28 + $0x40] sm:$0xf] %v286_v22  ;;  %v290_v24 = vld [vmem:[%s2100_s27 + $0x90] sm:$0xf] }
  0x3e   : > { %289 = vst [vmem:[%s2105_s28 + $0x44] sm:$0xf] %v288_v23  ;;  %v292_v25 = vld [vmem:[%s2100_s27 + $0x98] sm:$0xf]  ;;  %v294_v26 = vld [vmem:[%s2100_s27 + $0xa0] sm:$0xf] }
  0x3f   : > { %291 = vst [vmem:[%s2105_s28 + $0x48] sm:$0xf] %v290_v24  ;;  %293 = vst [vmem:[%s2105_s28 + $0x4c] sm:$0xf] %v292_v25  ;;  %v296_v27 = vld [vmem:[%s2100_s27 + $0xa8] sm:$0xf] }
  0x40   : > { %295 = vst [vmem:[%s2105_s28 + $0x50] sm:$0xf] %v294_v26  ;;  %v298_v28 = vld [vmem:[%s2100_s27 + $0xb0] sm:$0xf]  ;;  %v300_v29 = vld [vmem:[%s2100_s27 + $0xb8] sm:$0xf] }
  0x41   : > { %297 = vst [vmem:[%s2105_s28 + $0x54] sm:$0xf] %v296_v27  ;;  %299 = vst [vmem:[%s2105_s28 + $0x58] sm:$0xf] %v298_v28  ;;  %v302_v30 = vld [vmem:[%s2100_s27 + $0xc0] sm:$0xf] }
  0x42   : > { %301 = vst [vmem:[%s2105_s28 + $0x5c] sm:$0xf] %v300_v29  ;;  %v304_v31 = vld [vmem:[%s2100_s27 + $0xc8] sm:$0xf]  ;;  %v306_v32 = vld [vmem:[%s2100_s27 + $0xd0] sm:$0xf] }
  0x43   : > { %303 = vst [vmem:[%s2105_s28 + $0x60] sm:$0xf] %v302_v30  ;;  %305 = vst [vmem:[%s2105_s28 + $0x64] sm:$0xf] %v304_v31  ;;  %v308_v33 = vld [vmem:[%s2100_s27 + $0xd8] sm:$0xf] }
  0x44   : > { %307 = vst [vmem:[%s2105_s28 + $0x68] sm:$0xf] %v306_v32  ;;  %v310_v34 = vld [vmem:[%s2100_s27 + $0xe0] sm:$0xf]  ;;  %v312_v35 = vld [vmem:[%s2100_s27 + $0xe8] sm:$0xf] }
  0x45   : > { %309 = vst [vmem:[%s2105_s28 + $0x6c] sm:$0xf] %v308_v33  ;;  %311 = vst [vmem:[%s2105_s28 + $0x70] sm:$0xf] %v310_v34  ;;  %v314_v36 = vld [vmem:[%s2100_s27 + $0xf0] sm:$0xf] }
  0x46   : > { %313 = vst [vmem:[%s2105_s28 + $0x74] sm:$0xf] %v312_v35  ;;  %v316_v37 = vld [vmem:[%s2100_s27 + $0xf8] sm:$0xf]  ;;  %v318_v38 = vld [vmem:[%s2100_s27 + $0x100] sm:$0xf] }
  0x47   : > { %315 = vst [vmem:[%s2105_s28 + $0x78] sm:$0xf] %v314_v36  ;;  %317 = vst [vmem:[%s2105_s28 + $0x7c] sm:$0xf] %v316_v37  ;;  %v320_v39 = vld [vmem:[%s2100_s27 + $0x108] sm:$0xf] }
  0x48   : > { %319 = vst [vmem:[%s2105_s28 + $0x80] sm:$0xf] %v318_v38  ;;  %v322_v40 = vld [vmem:[%s2100_s27 + $0x110] sm:$0xf]  ;;  %v324_v41 = vld [vmem:[%s2100_s27 + $0x118] sm:$0xf] }
  0x49   : > { %321 = vst [vmem:[%s2105_s28 + $0x84] sm:$0xf] %v320_v39  ;;  %323 = vst [vmem:[%s2105_s28 + $0x88] sm:$0xf] %v322_v40  ;;  %v326_v42 = vld [vmem:[%s2100_s27 + $0x120] sm:$0xf] }
  0x4a   : > { %325 = vst [vmem:[%s2105_s28 + $0x8c] sm:$0xf] %v324_v41  ;;  %v328_v43 = vld [vmem:[%s2100_s27 + $0x128] sm:$0xf]  ;;  %v330_v44 = vld [vmem:[%s2100_s27 + $0x130] sm:$0xf] }
  0x4b   : > { %327 = vst [vmem:[%s2105_s28 + $0x90] sm:$0xf] %v326_v42  ;;  %329 = vst [vmem:[%s2105_s28 + $0x94] sm:$0xf] %v328_v43  ;;  %v332_v45 = vld [vmem:[%s2100_s27 + $0x138] sm:$0xf] }
  0x4c   : > { %331 = vst [vmem:[%s2105_s28 + $0x98] sm:$0xf] %v330_v44  ;;  %v334_v46 = vld [vmem:[%s2100_s27 + $0x140] sm:$0xf]  ;;  %v336_v47 = vld [vmem:[%s2100_s27 + $0x148] sm:$0xf] }
  0x4d   : > { %333 = vst [vmem:[%s2105_s28 + $0x9c] sm:$0xf] %v332_v45  ;;  %335 = vst [vmem:[%s2105_s28 + $0xa0] sm:$0xf] %v334_v46  ;;  %v338_v48 = vld [vmem:[%s2100_s27 + $0x150] sm:$0xf] }
  0x4e   : > { %337 = vst [vmem:[%s2105_s28 + $0xa4] sm:$0xf] %v336_v47  ;;  %v340_v49 = vld [vmem:[%s2100_s27 + $0x158] sm:$0xf]  ;;  %v342_v50 = vld [vmem:[%s2100_s27 + $0x160] sm:$0xf] }
  0x4f   : > { %339 = vst [vmem:[%s2105_s28 + $0xa8] sm:$0xf] %v338_v48  ;;  %341 = vst [vmem:[%s2105_s28 + $0xac] sm:$0xf] %v340_v49  ;;  %v344_v51 = vld [vmem:[%s2100_s27 + $0x168] sm:$0xf] }
  0x50   : > { %343 = vst [vmem:[%s2105_s28 + $0xb0] sm:$0xf] %v342_v50  ;;  %v346_v52 = vld [vmem:[%s2100_s27 + $0x170] sm:$0xf]  ;;  %v348_v53 = vld [vmem:[%s2100_s27 + $0x178] sm:$0xf] }
  0x51   : > { %345 = vst [vmem:[%s2105_s28 + $0xb4] sm:$0xf] %v344_v51  ;;  %347 = vst [vmem:[%s2105_s28 + $0xb8] sm:$0xf] %v346_v52  ;;  %v350_v54 = vld [vmem:[%s2100_s27 + $0x180] sm:$0xf] }
  0x52   : > { %349 = vst [vmem:[%s2105_s28 + $0xbc] sm:$0xf] %v348_v53  ;;  %v352_v55 = vld [vmem:[%s2100_s27 + $0x188] sm:$0xf]  ;;  %v354_v56 = vld [vmem:[%s2100_s27 + $0x190] sm:$0xf] }
  0x53   : > { %351 = vst [vmem:[%s2105_s28 + $0xc0] sm:$0xf] %v350_v54  ;;  %353 = vst [vmem:[%s2105_s28 + $0xc4] sm:$0xf] %v352_v55  ;;  %v356_v57 = vld [vmem:[%s2100_s27 + $0x198] sm:$0xf] }
  0x54   : > { %355 = vst [vmem:[%s2105_s28 + $0xc8] sm:$0xf] %v354_v56  ;;  %v358_v58 = vld [vmem:[%s2100_s27 + $0x1a0] sm:$0xf]  ;;  %v360_v59 = vld [vmem:[%s2100_s27 + $0x1a8] sm:$0xf] }
  0x55   : > { %357 = vst [vmem:[%s2105_s28 + $0xcc] sm:$0xf] %v356_v57  ;;  %359 = vst [vmem:[%s2105_s28 + $0xd0] sm:$0xf] %v358_v58  ;;  %v362_v60 = vld [vmem:[%s2100_s27 + $0x1b0] sm:$0xf] }
  0x56   : > { %361 = vst [vmem:[%s2105_s28 + $0xd4] sm:$0xf] %v360_v59  ;;  %v364_v61 = vld [vmem:[%s2100_s27 + $0x1b8] sm:$0xf]  ;;  %v366_v62 = vld [vmem:[%s2100_s27 + $0x1c0] sm:$0xf] }
  0x57   : > { %363 = vst [vmem:[%s2105_s28 + $0xd8] sm:$0xf] %v362_v60  ;;  %365 = vst [vmem:[%s2105_s28 + $0xdc] sm:$0xf] %v364_v61  ;;  %v368_v63 = vld [vmem:[%s2100_s27 + $0x1c8] sm:$0xf] }
  0x58   : > { %367 = vst [vmem:[%s2105_s28 + $0xe0] sm:$0xf] %v366_v62  ;;  %v370_v0 = vld [vmem:[%s2100_s27 + $0x1d0] sm:$0xf]  ;;  %v372_v1 = vld [vmem:[%s2100_s27 + $0x1d8] sm:$0xf] }
  0x59   : > { %369 = vst [vmem:[%s2105_s28 + $0xe4] sm:$0xf] %v368_v63  ;;  %371 = vst [vmem:[%s2105_s28 + $0xe8] sm:$0xf] %v370_v0  ;;  %v374_v2 = vld [vmem:[%s2100_s27 + $0x1e0] sm:$0xf] }
  0x5a   : > { %373 = vst [vmem:[%s2105_s28 + $0xec] sm:$0xf] %v372_v1  ;;  %v376_v3 = vld [vmem:[%s2100_s27 + $0x1e8] sm:$0xf]  ;;  %v378_v4 = vld [vmem:[%s2100_s27 + $0x1f0] sm:$0xf] }
  0x5b   : > { %375 = vst [vmem:[%s2105_s28 + $0xf0] sm:$0xf] %v374_v2  ;;  %377 = vst [vmem:[%s2105_s28 + $0xf4] sm:$0xf] %v376_v3  ;;  %v380_v5 = vld [vmem:[%s2100_s27 + $0x1f8] sm:$0xf] }
  0x5c   : > { %379 = vst [vmem:[%s2105_s28 + $0xf8] sm:$0xf] %v378_v4  ;;  %v382_v6 = vld [vmem:[%s2100_s27 + $0x200] sm:$0xf]  ;;  %v384_v7 = vld [vmem:[%s2100_s27 + $0x208] sm:$0xf] }
  0x5d   : > { %381 = vst [vmem:[%s2105_s28 + $0xfc] sm:$0xf] %v380_v5  ;;  %383 = vst [vmem:[%s2105_s28 + $0x100] sm:$0xf] %v382_v6  ;;  %v386_v8 = vld [vmem:[%s2100_s27 + $0x210] sm:$0xf] }
  0x5e   : > { %385 = vst [vmem:[%s2105_s28 + $0x104] sm:$0xf] %v384_v7  ;;  %v388_v9 = vld [vmem:[%s2100_s27 + $0x218] sm:$0xf]  ;;  %v390_v10 = vld [vmem:[%s2100_s27 + $0x220] sm:$0xf] }
  0x5f   : > { %387 = vst [vmem:[%s2105_s28 + $0x108] sm:$0xf] %v386_v8  ;;  %389 = vst [vmem:[%s2105_s28 + $0x10c] sm:$0xf] %v388_v9  ;;  %v392_v11 = vld [vmem:[%s2100_s27 + $0x228] sm:$0xf] }
  0x60   : > { %391 = vst [vmem:[%s2105_s28 + $0x110] sm:$0xf] %v390_v10  ;;  %v394_v12 = vld [vmem:[%s2100_s27 + $0x230] sm:$0xf]  ;;  %v396_v13 = vld [vmem:[%s2100_s27 + $0x238] sm:$0xf] }
  0x61   : > { %393 = vst [vmem:[%s2105_s28 + $0x114] sm:$0xf] %v392_v11  ;;  %395 = vst [vmem:[%s2105_s28 + $0x118] sm:$0xf] %v394_v12  ;;  %v398_v14 = vld [vmem:[%s2100_s27 + $0x240] sm:$0xf] }
  0x62   : > { %397 = vst [vmem:[%s2105_s28 + $0x11c] sm:$0xf] %v396_v13  ;;  %v400_v15 = vld [vmem:[%s2100_s27 + $0x248] sm:$0xf]  ;;  %v402_v16 = vld [vmem:[%s2100_s27 + $0x250] sm:$0xf] }
  0x63   : > { %399 = vst [vmem:[%s2105_s28 + $0x120] sm:$0xf] %v398_v14  ;;  %401 = vst [vmem:[%s2105_s28 + $0x124] sm:$0xf] %v400_v15  ;;  %v404_v17 = vld [vmem:[%s2100_s27 + $0x258] sm:$0xf] }
  0x64   : > { %403 = vst [vmem:[%s2105_s28 + $0x128] sm:$0xf] %v402_v16  ;;  %v406_v18 = vld [vmem:[%s2100_s27 + $0x260] sm:$0xf]  ;;  %v408_v19 = vld [vmem:[%s2100_s27 + $0x268] sm:$0xf] }
  0x65   : > { %405 = vst [vmem:[%s2105_s28 + $0x12c] sm:$0xf] %v404_v17  ;;  %407 = vst [vmem:[%s2105_s28 + $0x130] sm:$0xf] %v406_v18  ;;  %v410_v20 = vld [vmem:[%s2100_s27 + $0x270] sm:$0xf] }
  0x66   : > { %409 = vst [vmem:[%s2105_s28 + $0x134] sm:$0xf] %v408_v19  ;;  %v412_v21 = vld [vmem:[%s2100_s27 + $0x278] sm:$0xf]  ;;  %v414_v22 = vld [vmem:[%s2100_s27 + $0x280] sm:$0xf] }
  0x67   : > { %411 = vst [vmem:[%s2105_s28 + $0x138] sm:$0xf] %v410_v20  ;;  %413 = vst [vmem:[%s2105_s28 + $0x13c] sm:$0xf] %v412_v21  ;;  %v416_v23 = vld [vmem:[%s2100_s27 + $0x288] sm:$0xf] }
  0x68   : > { %415 = vst [vmem:[%s2105_s28 + $0x140] sm:$0xf] %v414_v22  ;;  %v418_v24 = vld [vmem:[%s2100_s27 + $0x290] sm:$0xf]  ;;  %v420_v25 = vld [vmem:[%s2100_s27 + $0x298] sm:$0xf] }
  0x69   : > { %417 = vst [vmem:[%s2105_s28 + $0x144] sm:$0xf] %v416_v23  ;;  %419 = vst [vmem:[%s2105_s28 + $0x148] sm:$0xf] %v418_v24  ;;  %v422_v26 = vld [vmem:[%s2100_s27 + $0x2a0] sm:$0xf] }
  0x6a   : > { %421 = vst [vmem:[%s2105_s28 + $0x14c] sm:$0xf] %v420_v25  ;;  %v424_v27 = vld [vmem:[%s2100_s27 + $0x2a8] sm:$0xf]  ;;  %v426_v28 = vld [vmem:[%s2100_s27 + $0x2b0] sm:$0xf] }
  0x6b   : > { %423 = vst [vmem:[%s2105_s28 + $0x150] sm:$0xf] %v422_v26  ;;  %425 = vst [vmem:[%s2105_s28 + $0x154] sm:$0xf] %v424_v27  ;;  %v428_v29 = vld [vmem:[%s2100_s27 + $0x2b8] sm:$0xf] }
  0x6c   : > { %427 = vst [vmem:[%s2105_s28 + $0x158] sm:$0xf] %v426_v28  ;;  %v430_v30 = vld [vmem:[%s2100_s27 + $0x2c0] sm:$0xf]  ;;  %v432_v31 = vld [vmem:[%s2100_s27 + $0x2c8] sm:$0xf] }
  0x6d   : > { %429 = vst [vmem:[%s2105_s28 + $0x15c] sm:$0xf] %v428_v29  ;;  %431 = vst [vmem:[%s2105_s28 + $0x160] sm:$0xf] %v430_v30  ;;  %v434_v32 = vld [vmem:[%s2100_s27 + $0x2d0] sm:$0xf] }
  0x6e   : > { %433 = vst [vmem:[%s2105_s28 + $0x164] sm:$0xf] %v432_v31  ;;  %v436_v33 = vld [vmem:[%s2100_s27 + $0x2d8] sm:$0xf]  ;;  %v438_v34 = vld [vmem:[%s2100_s27 + $0x2e0] sm:$0xf] }
  0x6f   : > { %435 = vst [vmem:[%s2105_s28 + $0x168] sm:$0xf] %v434_v32  ;;  %437 = vst [vmem:[%s2105_s28 + $0x16c] sm:$0xf] %v436_v33  ;;  %v440_v35 = vld [vmem:[%s2100_s27 + $0x2e8] sm:$0xf] }
  0x70   : > { %439 = vst [vmem:[%s2105_s28 + $0x170] sm:$0xf] %v438_v34  ;;  %v442_v36 = vld [vmem:[%s2100_s27 + $0x2f0] sm:$0xf]  ;;  %v444_v37 = vld [vmem:[%s2100_s27 + $0x2f8] sm:$0xf] }
  0x71   : > { %441 = vst [vmem:[%s2105_s28 + $0x174] sm:$0xf] %v440_v35  ;;  %443 = vst [vmem:[%s2105_s28 + $0x178] sm:$0xf] %v442_v36 }
  0x72   : > { %445 = vst [vmem:[%s2105_s28 + $0x17c] sm:$0xf] %v444_v37 }
  0x73 PF: > { %667 = sbr.rel (!%p2076_p11) target bundleno = 120 (0x78), region = 88  ;;  %s669_s0 = sand.u32 (%p2076_p11), 1, %s1912_s16  }
  0x74   : > { %s1566_s10 = sshll.u32 (%p2076_p11), %s1944_s24, 2  ;;  %s1565_s26 = sshll.u32 (%p2076_p11), %s669_s0, 3 }
  0x75   : > { %s676_s6 = scalar_lea.vmem (%p2076_p11), %s2434_s3, %s1566_s10  ;;  %s671_s8 = scalar_lea.vmem (%p2076_p11), [#allocation5], %s1565_s26 }
  0x76   : > { %v693_v38 = vld [vmem:[%s676_s6] sm:$0xf] (%p2076_p11)  ;;  %v695_v39 = vld [vmem:[%s676_s6 + $0x8] sm:$0xf] (%p2076_p11) }
  0x77   : > { %694 = vst [vmem:[%s671_s8] sm:$0xf] (%p2076_p11), %v693_v38  ;;  %696 = vst [vmem:[%s671_s8 + $0x4] sm:$0xf] (%p2076_p11), %v695_v39 }
  0x78 PF: > { %p1567_p1 = scmp.ge.s32.totalorder %s1948_s25, 1  ;;  %p723_p2 = scmp.lt.s32.totalorder %s1948_s25, 7 }
  0x7a   : > { %p724_p3 = pnand %p1567_p1, %p723_p2 }
  0x7b   : > { %s730_s27 = sand.u32 (!%p724_p3), 1, %s1924_s19   ;;  %s737_s14 = sand.u32 (!%p724_p3), 1, %s1916_s17  }
  0x7c   : > { %727 = sbr.rel (%p724_p3) target bundleno = 435 (0x1b3), region = 129  ;;  %s744_s11 = sand.u32 (!%p724_p3), 1, %s1908_s15  }
  0x7d   : > { %s1714_s9 = smul.u32 (!%p724_p3), 48, %s730_s27  ;;  %s2308_s0 = sshll.u32 (!%p724_p3), %s744_s11, 3 }
  0x7e   : > { %s1715_s28 = smul.u32 (!%p724_p3), 384, %s737_s14  ;;  %p782_p4 = scmp.lt.s32.totalorder (!%p724_p3), %s1936_s22, 1 }
  0x7f   : > { %s2318_s6 = scalar_lea.vmem (!%p724_p3), [#allocation3], %s1714_s9  ;;  %s746_s17 = scalar_lea.vmem (!%p724_p3), [#allocation5], %s2308_s0 }
  0x80   : > { %s2320_s8 = scalar_lea.vmem (!%p724_p3), [#allocation4], %s1715_s28  ;;  %s2324_s19 = scalar_lea.vmem (!%p724_p3), [#allocation6], %s2308_s0 }
  0x81   : > { %s2312_s10 = scalar_select %p782_p4, %s1936_s22, 1 }
  0x82   : > { %p1570_p5 = scmp.ne.s32.totalorder %s1932_s21, 0 }
  0x83   : > { %s784_s30 = scalar_lea.vmem %s2433_s2, %s2312_s10 }
  0x84   : > { %791 = sbr.rel (%p1570_p5) target bundleno = 139 (0x8b), region = 145 }
  0x89   : > { %v1950_v40 = vmov 0.0  }
  0x8a   : > { %792 = vst [vmem:[#allocation2] sm:$0xff] %v1950_v40  ;;  %793 = vst [vmem:[#allocation2 + $0x8] sm:$0xff] %v1950_v40 }
  0x8b PF: > { %v1805_v41 = vld [vmem:[%s2320_s8 + $0x78] sm:$0xff]   ;;  %v1809_v45 = vld [vmem:[%s2320_s8 + $0x70] sm:$0xff]   ;;  %v1813_v49 = vld [vmem:[%s2320_s8 + $0x68] sm:$0xff]   ;;  %p1625_p6 = scmp.ne.s32.totalorder %s1932_s21, 2 }
  0x8c   : > { %v1806_v42 = vld [vmem:[%s2320_s8 + $0xf8] sm:$0xff]   ;;  %1646 = vmatprep.subr.bf16.mxu0 %v1805_v41  ;;  %v1810_v46 = vld [vmem:[%s2320_s8 + $0xf0] sm:$0xff]   ;;  %v1814_v50 = vld [vmem:[%s2320_s8 + $0xe8] sm:$0xff]  }
  0x8d   : > { %v1807_v43 = vld [vmem:[%s2320_s8 + $0x38] sm:$0xff]   ;;  %1668 = vmatprep.subr.bf16.mxu1 %v1806_v42  ;;  %v1811_v47 = vld [vmem:[%s2320_s8 + $0x30] sm:$0xff]   ;;  %v1815_v51 = vld [vmem:[%s2320_s8 + $0x28] sm:$0xff]  }
  0x8e   : > { %v1808_v44 = vld [vmem:[%s2320_s8 + $0xb8] sm:$0xff]   ;;  %1647 = vmatpush3.bf16.msra.mxu0 %v1807_v43  ;;  %v1812_v48 = vld [vmem:[%s2320_s8 + $0xb0] sm:$0xff]   ;;  %v1816_v52 = vld [vmem:[%s2320_s8 + $0xa8] sm:$0xff]  }
  0x8f   : > { %1669 = vmatpush3.bf16.msra.mxu1 %v1808_v44  ;;  %1648 = vmatprep.subr.bf16.mxu0 %v1809_v45  ;;  %v1817_v53 = vld [vmem:[%s2320_s8 + $0x60] sm:$0xff]   ;;  %v1821_v57 = vld [vmem:[%s2320_s8 + $0x58] sm:$0xff]   ;;  %v1825_v61 = vld [vmem:[%s2320_s8 + $0x50] sm:$0xff]  }
  0x90   : > { %1670 = vmatprep.subr.bf16.mxu1 %v1810_v46  ;;  %v1818_v54 = vld [vmem:[%s2320_s8 + $0xe0] sm:$0xff]   ;;  %v1822_v58 = vld [vmem:[%s2320_s8 + $0xd8] sm:$0xff]   ;;  %v1826_v62 = vld [vmem:[%s2320_s8 + $0xd0] sm:$0xff]  }
  0x91   : > { %v1819_v55 = vld [vmem:[%s2320_s8 + $0x20] sm:$0xff]   ;;  %v1823_v59 = vld [vmem:[%s2320_s8 + $0x18] sm:$0xff]   ;;  %v1827_v63 = vld [vmem:[%s2320_s8 + $0x10] sm:$0xff]  }
  0x92   : > { %1649 = vmatpush3.bf16.msra.mxu0 %v1811_v47  ;;  %v1820_v56 = vld [vmem:[%s2320_s8 + $0xa0] sm:$0xff]   ;;  %v1824_v60 = vld [vmem:[%s2320_s8 + $0x98] sm:$0xff]   ;;  %v1828_v0 = vld [vmem:[%s2320_s8 + $0x90] sm:$0xff]  }
  0x93   : > { %1671 = vmatpush3.bf16.msra.mxu1 %v1812_v48  ;;  %1650 = vmatprep.subr.bf16.mxu0 %v1813_v49  ;;  %v1829_v1 = vld [vmem:[%s2320_s8 + $0x48] sm:$0xff]   ;;  %v1833_v5 = vld [vmem:[%s2320_s8 + $0x40] sm:$0xff]   ;;  %v1843_v13 = vld [vmem:[%s2320_s8 + $0x178] sm:$0xff]  }
  0x94   : > { %1672 = vmatprep.subr.bf16.mxu1 %v1814_v50  ;;  %v1830_v2 = vld [vmem:[%s2320_s8 + $0xc8] sm:$0xff]   ;;  %v1834_v6 = vld [vmem:[%s2320_s8 + $0xc0] sm:$0xff]   ;;  %v1844_v14 = vld [vmem:[%s2320_s8 + $0x138] sm:$0xff]  }
  0x95   : > { %v1831_v3 = vld [vmem:[%s2320_s8 + $0x8] sm:$0xff]   ;;  %v1835_v7 = vld [vmem:[%s2320_s8] sm:$0xff]   ;;  %v1845_v15 = vld [vmem:[%s2320_s8 + $0x170] sm:$0xff]  }
  0x96   : > { %1651 = vmatpush3.bf16.msra.mxu0 %v1815_v51  ;;  %v1832_v4 = vld [vmem:[%s2320_s8 + $0x88] sm:$0xff]   ;;  %v1836_v8 = vld [vmem:[%s2320_s8 + $0x80] sm:$0xff]   ;;  %v1846_v16 = vld [vmem:[%s2320_s8 + $0x130] sm:$0xff]  }
  0x97   : > { %1673 = vmatpush3.bf16.msra.mxu1 %v1816_v52  ;;  %1652 = vmatprep.subr.bf16.mxu0 %v1817_v53  ;;  %v1837_v9 = vld [vmem:[%s2318_s6] ss:$24 sps:$4 sm:$0xff]   ;;  %v1839_v10 = vld [vmem:[%s2318_s6 + $0x4] ss:$24 sps:$4 sm:$0xff]   ;;  %v1861_v24 = vld [vmem:[%s2318_s6 + $0x14] ss:$24 sps:$4 sm:$0xff]  }
  0x98   : > { %1674 = vmatprep.subr.bf16.mxu1 %v1818_v54  ;;  %v1840_v11 = vld [vmem:[%s2318_s6 + $0x8] ss:$24 sps:$4 sm:$0xff]   ;;  %v1842_v12 = vld [vmem:[%s2318_s6 + $0xc] ss:$24 sps:$4 sm:$0xff]   ;;  %1248 = vmatprep.mubr.bf16.mxu0 %v1839_v10 }
  0x99   : > { %1289 = vmatprep.mubr.bf16.mxu1 %v1842_v12  ;;  %v1847_v17 = vld [vmem:[%s2320_s8 + $0x168] sm:$0xff]   ;;  %v1849_v19 = vld [vmem:[%s2320_s8 + $0x160] sm:$0xff]   ;;  %v1851_v21 = vld [vmem:[%s2320_s8 + $0x158] sm:$0xff]  }
  0x9a   : > { %1653 = vmatpush3.bf16.msra.mxu0 %v1819_v55  ;;  %v1848_v18 = vld [vmem:[%s2320_s8 + $0x128] sm:$0xff]   ;;  %v1850_v20 = vld [vmem:[%s2320_s8 + $0x120] sm:$0xff]   ;;  %v1852_v22 = vld [vmem:[%s2320_s8 + $0x118] sm:$0xff]  }
  0x9b   : > { %1675 = vmatpush3.bf16.msra.mxu1 %v1820_v56  ;;  %1654 = vmatprep.subr.bf16.mxu0 %v1821_v57  ;;  %v1853_v23 = vld [vmem:[%s2320_s8 + $0x150] sm:$0xff]   ;;  %v1855_v26 = vld [vmem:[%s2320_s8 + $0x148] sm:$0xff]   ;;  %v1857_v28 = vld [vmem:[%s2320_s8 + $0x140] sm:$0xff]  }
  0x9c   : > { %1676 = vmatprep.subr.bf16.mxu1 %v1822_v58  ;;  %v1854_v25 = vld [vmem:[%s2320_s8 + $0x110] sm:$0xff]   ;;  %v1856_v27 = vld [vmem:[%s2320_s8 + $0x108] sm:$0xff]   ;;  %v1858_v29 = vld [vmem:[%s2320_s8 + $0x100] sm:$0xff]  }
  0x9d   : > { %v1859_v30 = vld [vmem:[%s2318_s6 + $0x10] ss:$24 sps:$4 sm:$0xff]  }
  0x9e   : > { %1655 = vmatpush3.bf16.msra.mxu0 %v1823_v59  ;;  %v794_v47 = vld [vmem:[#allocation2] sm:$0xff]  ;;  %v795_v54 = vld [vmem:[#allocation2 + $0x8] sm:$0xff] }
  0x9f   : > { %1677 = vmatpush3.bf16.msra.mxu1 %v1824_v60  ;;  %1656 = vmatprep.subr.bf16.mxu0 %v1825_v61 }
  0xa0   : > { %1678 = vmatprep.subr.bf16.mxu1 %v1826_v62 }
  0xa2   : > { %1657 = vmatpush3.bf16.msra.mxu0 %v1827_v63 }
  0xa3   : > { %1679 = vmatpush3.bf16.msra.mxu1 %v1828_v0  ;;  %1658 = vmatprep.subr.bf16.mxu0 %v1829_v1 }
  0xa4   : > { %1680 = vmatprep.subr.bf16.mxu1 %v1830_v2 }
  0xa6   : > { %1659 = vmatpush3.bf16.msra.mxu0 %v1831_v3 }
  0xa7   : > { %1681 = vmatpush3.bf16.msra.mxu1 %v1832_v4  ;;  %1660 = vmatprep.subr.bf16.mxu0 %v1833_v5 }
  0xa8   : > { %1682 = vmatprep.subr.bf16.mxu1 %v1834_v6 }
  0xaa   : > { %1661 = vmatpush3.bf16.msra.mxu0 %v1835_v7 }
  0xab   : > { %1683 = vmatpush3.bf16.msra.mxu1 %v1836_v8  ;;  %1690 = vmatprep.subr.bf16.mxu0 %v1843_v13 }
  0xad   : > { %1249 = vmatmul.mubr.bf16.vlgmr.msra.gmra.mxu0 %v1837_v9 }
  0xae   : > { %1290 = vmatmul.mubr.bf16.vlgmr.msra.gmra.mxu1 %v1840_v11  ;;  %1691 = vmatpush3.bf16.msra.mxu0 %v1844_v14 }
  0xaf   : > { %1692 = vmatprep.subr.bf16.mxu0 %v1845_v15  ;;  %1330 = vmatprep.mubr.bf16.mxu0 %v1861_v24 }
  0xb2   : > { %1693 = vmatpush3.bf16.msra.mxu0 %v1846_v16 }
  0xb3   : > { %1694 = vmatprep.subr.bf16.mxu0 %v1847_v17 }
  0xb6   : > { %1695 = vmatpush3.bf16.msra.mxu0 %v1848_v18 }
  0xb7   : > { %1696 = vmatprep.subr.bf16.mxu0 %v1849_v19 }
  0xba   : > { %1697 = vmatpush3.bf16.msra.mxu0 %v1850_v20 }
  0xbb   : > { %1698 = vmatprep.subr.bf16.mxu0 %v1851_v21 }
  0xbe   : > { %1699 = vmatpush3.bf16.msra.mxu0 %v1852_v22 }
  0xbf   : > { %1700 = vmatprep.subr.bf16.mxu0 %v1853_v23 }
  0xc2   : > { %1701 = vmatpush3.bf16.msra.mxu0 %v1854_v25 }
  0xc3   : > { %1702 = vmatprep.subr.bf16.mxu0 %v1855_v26 }
  0xc6   : > { %1703 = vmatpush3.bf16.msra.mxu0 %v1856_v27 }
  0xc7   : > { %1704 = vmatprep.subr.bf16.mxu0 %v1857_v28 }
  0xca   : > { %1705 = vmatpush3.bf16.msra.mxu0 %v1858_v29 }
  0xcd   : > { %1331 = vmatmul.mubr.bf16.vlgmr.msra.gmra.mxu0 %v1859_v30 }
 0x16d   : > { %v1662_v31 = vpop.f32.mrf.mxu0 }
 0x16e   : > { %v1684_v32 = vpop.f32.mrf.mxu1 }
 0x16f   : > { %v1663_v33 = vpop.f32.mrf.mxu0 }
 0x170   : > { %v1685_v34 = vpop.f32.mrf.mxu1  ;;  %v1664_v38 = vadd.f32 %v1663_v33, %v1662_v31 }
 0x171   : > { %v1665_v35 = vpop.f32.mrf.mxu0  ;;  %v1686_v39 = vadd.f32 %v1685_v34, %v1684_v32 }
 0x172   : > { %v1687_v36 = vpop.f32.mrf.mxu1 }
 0x173   : > { %v1666_v37 = vpop.f32.mrf.mxu0  ;;  %v1292_v43 = vadd.f32 %v1686_v39, %v1664_v38 }
 0x174   : > { %v1688_v40 = vpop.f32.mrf.mxu1  ;;  %v1667_v44 = vadd.f32 %v1666_v37, %v1665_v35 }
 0x175   : > { %v1689_v45 = vadd.f32 %v1688_v40, %v1687_v36 }
 0x177   : > { %v1295_v51 = vadd.f32 %v1689_v45, %v1667_v44 }
 0x18d   : > { %v1706_v41 = vpop.f32.mrf.mxu0 }
 0x18f   : > { %v1707_v42 = vpop.f32.mrf.mxu0 }
 0x190   : > { %v1708_v46 = vadd.f32 %v1707_v42, %v1706_v41 }
 0x191   : > { %v1709_v48 = vpop.f32.mrf.mxu0 }
 0x192   : > { %v1333_v49 = vadd.f32 %v1708_v46, %v1292_v43 }
 0x193   : > { %v1710_v50 = vpop.f32.mrf.mxu0 }
 0x194   : > { %v1339_v52 = vadd.f32 %v1333_v49, %v794_v47  ;;  %v1711_v53 = vadd.f32 %v1710_v50, %v1709_v48 }
 0x196   : > { %1341 = vst [vmem:[#allocation2] sm:$0xff] %v1339_v52  ;;  %v1336_v55 = vadd.f32 %v1711_v53, %v1295_v51  ;;  %1346 = sbr.rel (%p1625_p6) target bundleno = 427 (0x1ab), region = 149 }
 0x198   : > { %v1340_v56 = vadd.f32 %v1336_v55, %v795_v54 }
 0x19a   : > { %1342 = vst [vmem:[#allocation2 + $0x8] sm:$0xff] %v1340_v56 }
 0x19b   : > { %v1626_v59 = vld [vmem:[%s784_s30] ss:$0 sm:$0xff]  ;;  %v1638_v62 = vld [vmem:[%s746_s17] sm:$0xff]  }
 0x19c   : > { %v1639_v63 = vunpack.c.l.bf16 %v1638_v62  ;;  %v1640_v0 = vunpack.c.h.bf16 %v1638_v62 }
 0x19d   : > { %v1347_v57 = vld [vmem:[#allocation2] sm:$0xff] }
 0x19e   : > { %v1356_v60 = vadd.f32 %v1626_v59, %v1347_v57 }
 0x1a0   : > { %v1362_v1 = vadd.f32 %v1639_v63, %v1356_v60 }
 0x1a1   : > { %v1348_v58 = vld [vmem:[#allocation2 + $0x8] sm:$0xff] }
 0x1a2   : > { %v1357_v61 = vadd.f32 %v1626_v59, %v1348_v58  ;;  %v1364_v3 = vmax.f32 %v1362_v1, 0.0 }
 0x1a4   : > { %v1363_v2 = vadd.f32 %v1640_v0, %v1357_v61 }
 0x1a6   : > { %v1365_v4 = vmax.f32 %v1363_v2, 0.0 }
 0x1a8   : > { %v1644_v5 = vpack.c.bf16 %v1365_v4, %v1364_v3 }
 0x1aa   : > { %1645 = vst [vmem:[%s2324_s19] sm:$0xff] %v1644_v5  }
 0x1ab PF: > { %1382 = sbr.rel (!%p2080_p13) target bundleno = 435 (0x1b3), region = 153  ;;  %s1630_s21 = sshll.u32 (%p2080_p13), %s1936_s22, 2 }
 0x1ac   : > { %s1387_s11 = scalar_lea.vmem (%p2080_p13), %s2435_s4, %s1630_s21 }
 0x1b1   : > { %v1404_v6 = vld [vmem:[%s2324_s19] sm:$0xf]  ;;  %v1406_v7 = vld [vmem:[%s2324_s19 + $0x4] sm:$0xf] }
 0x1b2   : > { %1405 = vst [vmem:[%s1387_s11] sm:$0xf] %v1404_v6  ;;  %1407 = vst [vmem:[%s1387_s11 + $0x8] sm:$0xf] %v1406_v7 }
 0x1b3 PF: > { %s14_s25 = sadd.s32 1, %s1948_s25   ;;  %s2446_s29 = sld [smem:[#allocation7_spill]] }
 0x1b4   : > { %p11_p7 = scmp.ge.s32.totalorder %s14_s25, 8   ;;  %s2447_s28 = sld [smem:[#allocation8_spill]] }
 0x1b5   : > { %s2448_s15 = smov %s1912_s16  ;;  %s2449_s16 = smov %s2072_s13 }
 0x1b6   : > { %s2450_s17 = smov %s1920_s18  ;;  %s2451_s18 = smov %s2069_s12 }
 0x1b7   : > { %s2452_s19 = smov %s1928_s20  ;;  %s2453_s20 = smov %s2053_s7 }
 0x1b8   : > { %s2454_s21 = smov %s1940_s23  ;;  %s2455_s22 = smov %s1944_s24 }
 0x1b9   : > { %s2456_s23 = smov %s2446_s29  ;;  %13 = sbr.rel (!%p11_p7) target bundleno = 8 (0x8), region = 244 }
 0x1ba   : > { %s2457_s24 = smov %s2447_s28 }

// kernel: resnet_forward.33
= control target key start
LH: loop header
LB: loop body
LE: loop exit
PB: predicated region body
PF: predicated region fallthrough
CT: control target
= control target key end

     0   :  { %s2270_s0 = inlined_call_operand.vmem [shape: bf16[16,2304], index: 0, kind: input, shape index: {}]   ;;  %s2271_s1 = inlined_call_operand.vmem [shape: bf16[2304,256], index: 1, kind: input, shape index: {}]   ;;  %s2272_s2 = inlined_call_operand.vmem [shape: f32[1,256], index: 2, kind: input, shape index: {}]   ;;  %s2273_s3 = inlined_call_operand.vmem [shape: bf16[16,256], index: 3, kind: output, shape index: {}]  }
   0x1   :  { %2275 = sst [smem:[#allocation7_spill]] %s2270_s0 }
   0x2   :  { %2276 = sst [smem:[#allocation8_spill]] %s2271_s1 }
   0x3   :  { %s1838_s12 = smov 0   ;;  %s1840_s13 = smov 0  }
   0x4   :  { %s1842_s14 = smov 0   ;;  %s1844_s15 = smov 0  }
   0x5   :  { %s1846_s16 = smov 0   ;;  %s1848_s17 = smov 0  }
   0x6   :  { %s1850_s18 = smov 0   ;;  %s1852_s19 = smov 0  }
   0x7   :  { %s1854_s20 = smov 0   ;;  %s1856_s21 = smov 0  }
   0x8   :  { %s1858_s22 = smov 0  }
   0x9 LB: > { %s1432_s23 = sadd.s32 4294967295, %s1815_s22   ;;  %s25_s24 = sadd.s32 1, %s1807_s20  ;;  %s1815_s22 = sphi %s1858_s22, %s13_s22   ;;  %s1811_s21 = sphi %s1856_s21, %s2293_s21   ;;  %s1807_s20 = sphi %s1854_s20, %s2292_s20   ;;  %s1803_s19 = sphi %s1852_s19, %s2291_s19   ;;  %s1799_s18 = sphi %s1850_s18, %s2290_s18   ;;  %s1795_s17 = sphi %s1848_s17, %s2289_s17   ;;  %s1791_s16 = sphi %s1846_s16, %s2288_s16   ;;  %s1787_s15 = sphi %s1844_s15, %s2287_s15   ;;  %s1783_s14 = sphi %s1842_s14, %s2286_s14   ;;  %s1779_s13 = sphi %s1840_s13, %s2285_s13   ;;  %s1775_s12 = sphi %s1838_s12, %s2284_s12  }
   0xa   : > { %p26_p0 = scmp.ge.s32.totalorder %s25_s24, 3  ;;  %s28_s25 = sadd.s32 1, %s1811_s21 }
   0xb   : > { %s41_s26 = sadd.s32 1, %s1795_s17  ;;  %p48_p1 = scmp.ne.s32.totalorder %s1795_s17, %s1791_s16 }
   0xc   : > { %s2295_s24 = smov (%p26_p0, %s25_s24), 0  ;;  %s2297_s25 = smov (!%p26_p0, %s28_s25), %s1811_s21 }
   0xd   : > { %s37_s27 = ssub.s32 %s1807_s20, %s2295_s24  ;;  %p49_p2 = scmp.eq.s32.totalorder %s1815_s22, 0 }
   0xe   : > { %p30_p3 = scmp.ge.s32.totalorder %s2297_s25, 2  ;;  %p39_p4 = scmp.eq.s32.totalorder %s37_s27, 0 }
   0xf   : > { %p1905_p5 = por %p49_p2, %p48_p1  ;;  %s69_s29 = sadd.s32 1, %s1787_s15 }
  0x10   : > { %s2299_s25 = smov (%p30_p3, %s2297_s25), 0  ;;  %p76_p6 = scmp.ne.s32.totalorder %s1787_s15, %s1783_s14 }
  0x11   : > { %2278 = sst [smem:[#allocation6_spill]] %s2299_s25  ;;  %s65_s4 = ssub.s32 %s1811_s21, %s2299_s25 }
  0x12   : > { %s1913_s30 = scalar_select %p39_p4, %s1795_s17, %s41_s26  }
  0x13   : > { %s66_s5 = sor.u32 %s65_s4, %s37_s27  ;;  %p121_p7 = scmp.eq.s32.totalorder %s65_s4, 0 }
  0x14   : > { %p67_p8 = scmp.eq.s32.totalorder %s66_s5, 0  ;;  %p1919_p9 = por %p76_p6, %p49_p2 }
  0x15   : > { %s123_s7 = sadd.s32 1, %s1779_s13  ;;  %p133_p10 = scmp.ne.s32.totalorder %s1779_s13, %s1775_s12 }
  0x16   : > { %s1927_s8 = scalar_select %p67_p8, %s1787_s15, %s69_s29  }
  0x17   : > { %s1930_s9 = scalar_select %p121_p7, %s1779_s13, %s123_s7  }
  0x18   : > { %p134_p11 = scmp.eq.s32.totalorder %s1432_s23, 5  ;;  %p1435_p13 = scmp.ge.s32.totalorder %s1815_s22, 6 }
  0x1a   : > { %p1932_p12 = por %p134_p11, %p133_p10  ;;  %156 = sbr.rel (%p1435_p13) target bundleno = 116 (0x74), region = 16 }
  0x1f   : > { %159 = sbr.rel (!%p1905_p5) target bundleno = 43 (0x2b), region = 20  ;;  %s161_s11 = sand.u32 (%p1905_p5), 1, %s1795_s17  }
  0x20   : > { %s1504_s26 = smul.u32 (%p1905_p5), 24, %s1807_s20  ;;  %s2281_s0 = sld [smem:[#allocation7_spill]] (%p1905_p5) }
  0x21   : > { %s1579_s27 = smul.u32 (%p1905_p5), 48, %s161_s11 }
  0x23   : > { %s163_s23 = scalar_lea.vmem (%p1905_p5), [#allocation3], %s1579_s27 }
  0x26   : > { %s169_s5 = scalar_lea.vmem %s2281_s0, %s1504_s26 }
  0x27   : > { %v182_v0 = vld [vmem:[%s169_s5] sm:$0xff]  ;;  %v184_v1 = vld [vmem:[%s169_s5 + $0x8] sm:$0xff]  ;;  %v186_v2 = vld [vmem:[%s169_s5 + $0x10] sm:$0xff] }
  0x28   : > { %183 = vst [vmem:[%s163_s23] sm:$0xff] %v182_v0  ;;  %185 = vst [vmem:[%s163_s23 + $0x8] sm:$0xff] %v184_v1  ;;  %v188_v3 = vld [vmem:[%s169_s5 + $0x48] sm:$0xff]  ;;  %v190_v4 = vld [vmem:[%s169_s5 + $0x50] sm:$0xff] }
  0x29   : > { %187 = vst [vmem:[%s163_s23 + $0x10] sm:$0xff] %v186_v2  ;;  %v192_v5 = vld [vmem:[%s169_s5 + $0x58] sm:$0xff]  ;;  %189 = vst [vmem:[%s163_s23 + $0x18] sm:$0xff] %v188_v3 }
  0x2a   : > { %191 = vst [vmem:[%s163_s23 + $0x20] sm:$0xff] %v190_v4  ;;  %193 = vst [vmem:[%s163_s23 + $0x28] sm:$0xff] %v192_v5 }
  0x2b PF: > { %199 = sbr.rel (!%p1919_p9) target bundleno = 116 (0x74), region = 43  ;;  %s201_s28 = sand.u32 (%p1919_p9), 1, %s1787_s15  }
  0x2c   : > { %s1505_s7 = smul.u32 (%p1919_p9), 192, %s1807_s20  ;;  %s2282_s1 = sld [smem:[#allocation8_spill]] (%p1919_p9) }
  0x2d   : > { %s1580_s11 = smul.u32 (%p1919_p9), 384, %s201_s28 }
  0x2e   : > { %s206_s26 = sadd.s32 (%p1919_p9), %s1811_s21, %s1505_s7 }
  0x2f   : > { %s1438_s27 = sshll.u32 (%p1919_p9), %s206_s26, 2  ;;  %s1957_s6 = scalar_lea.vmem (%p1919_p9), [#allocation4], %s1580_s11 }
  0x32   : > { %s1952_s0 = scalar_lea.vmem %s2282_s1, %s1438_s27 }
  0x33   : > { %v225_v6 = vld [vmem:[%s1952_s0] sm:$0xf]  ;;  %v227_v7 = vld [vmem:[%s1952_s0 + $0x8] sm:$0xf]  ;;  %v229_v8 = vld [vmem:[%s1952_s0 + $0x10] sm:$0xf] }
  0x34   : > { %226 = vst [vmem:[%s1957_s6] sm:$0xf] %v225_v6  ;;  %228 = vst [vmem:[%s1957_s6 + $0x4] sm:$0xf] %v227_v7  ;;  %v231_v9 = vld [vmem:[%s1952_s0 + $0x18] sm:$0xf] }
  0x35   : > { %230 = vst [vmem:[%s1957_s6 + $0x8] sm:$0xf] %v229_v8  ;;  %v233_v10 = vld [vmem:[%s1952_s0 + $0x20] sm:$0xf]  ;;  %v235_v11 = vld [vmem:[%s1952_s0 + $0x28] sm:$0xf] }
  0x36   : > { %232 = vst [vmem:[%s1957_s6 + $0xc] sm:$0xf] %v231_v9  ;;  %234 = vst [vmem:[%s1957_s6 + $0x10] sm:$0xf] %v233_v10  ;;  %v237_v12 = vld [vmem:[%s1952_s0 + $0x30] sm:$0xf] }
  0x37   : > { %236 = vst [vmem:[%s1957_s6 + $0x14] sm:$0xf] %v235_v11  ;;  %v239_v13 = vld [vmem:[%s1952_s0 + $0x38] sm:$0xf]  ;;  %v241_v14 = vld [vmem:[%s1952_s0 + $0x40] sm:$0xf] }
  0x38   : > { %238 = vst [vmem:[%s1957_s6 + $0x18] sm:$0xf] %v237_v12  ;;  %240 = vst [vmem:[%s1957_s6 + $0x1c] sm:$0xf] %v239_v13  ;;  %v243_v15 = vld [vmem:[%s1952_s0 + $0x48] sm:$0xf] }
  0x39   : > { %242 = vst [vmem:[%s1957_s6 + $0x20] sm:$0xf] %v241_v14  ;;  %v245_v16 = vld [vmem:[%s1952_s0 + $0x50] sm:$0xf]  ;;  %v247_v17 = vld [vmem:[%s1952_s0 + $0x58] sm:$0xf] }
  0x3a   : > { %244 = vst [vmem:[%s1957_s6 + $0x24] sm:$0xf] %v243_v15  ;;  %246 = vst [vmem:[%s1957_s6 + $0x28] sm:$0xf] %v245_v16  ;;  %v249_v18 = vld [vmem:[%s1952_s0 + $0x60] sm:$0xf] }
  0x3b   : > { %248 = vst [vmem:[%s1957_s6 + $0x2c] sm:$0xf] %v247_v17  ;;  %v251_v19 = vld [vmem:[%s1952_s0 + $0x68] sm:$0xf]  ;;  %v253_v20 = vld [vmem:[%s1952_s0 + $0x70] sm:$0xf] }
  0x3c   : > { %250 = vst [vmem:[%s1957_s6 + $0x30] sm:$0xf] %v249_v18  ;;  %252 = vst [vmem:[%s1957_s6 + $0x34] sm:$0xf] %v251_v19  ;;  %v255_v21 = vld [vmem:[%s1952_s0 + $0x78] sm:$0xf] }
  0x3d   : > { %254 = vst [vmem:[%s1957_s6 + $0x38] sm:$0xf] %v253_v20  ;;  %v257_v22 = vld [vmem:[%s1952_s0 + $0x80] sm:$0xf]  ;;  %v259_v23 = vld [vmem:[%s1952_s0 + $0x88] sm:$0xf] }
  0x3e   : > { %256 = vst [vmem:[%s1957_s6 + $0x3c] sm:$0xf] %v255_v21  ;;  %258 = vst [vmem:[%s1957_s6 + $0x40] sm:$0xf] %v257_v22  ;;  %v261_v24 = vld [vmem:[%s1952_s0 + $0x90] sm:$0xf] }
  0x3f   : > { %260 = vst [vmem:[%s1957_s6 + $0x44] sm:$0xf] %v259_v23  ;;  %v263_v25 = vld [vmem:[%s1952_s0 + $0x98] sm:$0xf]  ;;  %v265_v26 = vld [vmem:[%s1952_s0 + $0xa0] sm:$0xf] }
  0x40   : > { %262 = vst [vmem:[%s1957_s6 + $0x48] sm:$0xf] %v261_v24  ;;  %264 = vst [vmem:[%s1957_s6 + $0x4c] sm:$0xf] %v263_v25  ;;  %v267_v27 = vld [vmem:[%s1952_s0 + $0xa8] sm:$0xf] }
  0x41   : > { %266 = vst [vmem:[%s1957_s6 + $0x50] sm:$0xf] %v265_v26  ;;  %v269_v28 = vld [vmem:[%s1952_s0 + $0xb0] sm:$0xf]  ;;  %v271_v29 = vld [vmem:[%s1952_s0 + $0xb8] sm:$0xf] }
  0x42   : > { %268 = vst [vmem:[%s1957_s6 + $0x54] sm:$0xf] %v267_v27  ;;  %270 = vst [vmem:[%s1957_s6 + $0x58] sm:$0xf] %v269_v28  ;;  %v273_v30 = vld [vmem:[%s1952_s0 + $0xc0] sm:$0xf] }
  0x43   : > { %272 = vst [vmem:[%s1957_s6 + $0x5c] sm:$0xf] %v271_v29  ;;  %v275_v31 = vld [vmem:[%s1952_s0 + $0xc8] sm:$0xf]  ;;  %v277_v32 = vld [vmem:[%s1952_s0 + $0xd0] sm:$0xf] }
  0x44   : > { %274 = vst [vmem:[%s1957_s6 + $0x60] sm:$0xf] %v273_v30  ;;  %276 = vst [vmem:[%s1957_s6 + $0x64] sm:$0xf] %v275_v31  ;;  %v279_v33 = vld [vmem:[%s1952_s0 + $0xd8] sm:$0xf] }
  0x45   : > { %278 = vst [vmem:[%s1957_s6 + $0x68] sm:$0xf] %v277_v32  ;;  %v281_v34 = vld [vmem:[%s1952_s0 + $0xe0] sm:$0xf]  ;;  %v283_v35 = vld [vmem:[%s1952_s0 + $0xe8] sm:$0xf] }
  0x46   : > { %280 = vst [vmem:[%s1957_s6 + $0x6c] sm:$0xf] %v279_v33  ;;  %282 = vst [vmem:[%s1957_s6 + $0x70] sm:$0xf] %v281_v34  ;;  %v285_v36 = vld [vmem:[%s1952_s0 + $0xf0] sm:$0xf] }
  0x47   : > { %284 = vst [vmem:[%s1957_s6 + $0x74] sm:$0xf] %v283_v35  ;;  %v287_v37 = vld [vmem:[%s1952_s0 + $0xf8] sm:$0xf]  ;;  %v289_v38 = vld [vmem:[%s1952_s0 + $0x100] sm:$0xf] }
  0x48   : > { %286 = vst [vmem:[%s1957_s6 + $0x78] sm:$0xf] %v285_v36  ;;  %288 = vst [vmem:[%s1957_s6 + $0x7c] sm:$0xf] %v287_v37  ;;  %v291_v39 = vld [vmem:[%s1952_s0 + $0x108] sm:$0xf] }
  0x49   : > { %290 = vst [vmem:[%s1957_s6 + $0x80] sm:$0xf] %v289_v38  ;;  %v293_v40 = vld [vmem:[%s1952_s0 + $0x110] sm:$0xf]  ;;  %v295_v41 = vld [vmem:[%s1952_s0 + $0x118] sm:$0xf] }
  0x4a   : > { %292 = vst [vmem:[%s1957_s6 + $0x84] sm:$0xf] %v291_v39  ;;  %294 = vst [vmem:[%s1957_s6 + $0x88] sm:$0xf] %v293_v40  ;;  %v297_v42 = vld [vmem:[%s1952_s0 + $0x120] sm:$0xf] }
  0x4b   : > { %296 = vst [vmem:[%s1957_s6 + $0x8c] sm:$0xf] %v295_v41  ;;  %v299_v43 = vld [vmem:[%s1952_s0 + $0x128] sm:$0xf]  ;;  %v301_v44 = vld [vmem:[%s1952_s0 + $0x130] sm:$0xf] }
  0x4c   : > { %298 = vst [vmem:[%s1957_s6 + $0x90] sm:$0xf] %v297_v42  ;;  %300 = vst [vmem:[%s1957_s6 + $0x94] sm:$0xf] %v299_v43  ;;  %v303_v45 = vld [vmem:[%s1952_s0 + $0x138] sm:$0xf] }
  0x4d   : > { %302 = vst [vmem:[%s1957_s6 + $0x98] sm:$0xf] %v301_v44  ;;  %v305_v46 = vld [vmem:[%s1952_s0 + $0x140] sm:$0xf]  ;;  %v307_v47 = vld [vmem:[%s1952_s0 + $0x148] sm:$0xf] }
  0x4e   : > { %304 = vst [vmem:[%s1957_s6 + $0x9c] sm:$0xf] %v303_v45  ;;  %306 = vst [vmem:[%s1957_s6 + $0xa0] sm:$0xf] %v305_v46  ;;  %v309_v48 = vld [vmem:[%s1952_s0 + $0x150] sm:$0xf] }
  0x4f   : > { %308 = vst [vmem:[%s1957_s6 + $0xa4] sm:$0xf] %v307_v47  ;;  %v311_v49 = vld [vmem:[%s1952_s0 + $0x158] sm:$0xf]  ;;  %v313_v50 = vld [vmem:[%s1952_s0 + $0x160] sm:$0xf] }
  0x50   : > { %310 = vst [vmem:[%s1957_s6 + $0xa8] sm:$0xf] %v309_v48  ;;  %312 = vst [vmem:[%s1957_s6 + $0xac] sm:$0xf] %v311_v49  ;;  %v315_v51 = vld [vmem:[%s1952_s0 + $0x168] sm:$0xf] }
  0x51   : > { %314 = vst [vmem:[%s1957_s6 + $0xb0] sm:$0xf] %v313_v50  ;;  %v317_v52 = vld [vmem:[%s1952_s0 + $0x170] sm:$0xf]  ;;  %v319_v53 = vld [vmem:[%s1952_s0 + $0x178] sm:$0xf] }
  0x52   : > { %316 = vst [vmem:[%s1957_s6 + $0xb4] sm:$0xf] %v315_v51  ;;  %318 = vst [vmem:[%s1957_s6 + $0xb8] sm:$0xf] %v317_v52  ;;  %v321_v54 = vld [vmem:[%s1952_s0 + $0x180] sm:$0xf] }
  0x53   : > { %320 = vst [vmem:[%s1957_s6 + $0xbc] sm:$0xf] %v319_v53  ;;  %v323_v55 = vld [vmem:[%s1952_s0 + $0x188] sm:$0xf]  ;;  %v325_v56 = vld [vmem:[%s1952_s0 + $0x190] sm:$0xf] }
  0x54   : > { %322 = vst [vmem:[%s1957_s6 + $0xc0] sm:$0xf] %v321_v54  ;;  %324 = vst [vmem:[%s1957_s6 + $0xc4] sm:$0xf] %v323_v55  ;;  %v327_v57 = vld [vmem:[%s1952_s0 + $0x198] sm:$0xf] }
  0x55   : > { %326 = vst [vmem:[%s1957_s6 + $0xc8] sm:$0xf] %v325_v56  ;;  %v329_v58 = vld [vmem:[%s1952_s0 + $0x1a0] sm:$0xf]  ;;  %v331_v59 = vld [vmem:[%s1952_s0 + $0x1a8] sm:$0xf] }
  0x56   : > { %328 = vst [vmem:[%s1957_s6 + $0xcc] sm:$0xf] %v327_v57  ;;  %330 = vst [vmem:[%s1957_s6 + $0xd0] sm:$0xf] %v329_v58  ;;  %v333_v60 = vld [vmem:[%s1952_s0 + $0x1b0] sm:$0xf] }
  0x57   : > { %332 = vst [vmem:[%s1957_s6 + $0xd4] sm:$0xf] %v331_v59  ;;  %v335_v61 = vld [vmem:[%s1952_s0 + $0x1b8] sm:$0xf]  ;;  %v337_v62 = vld [vmem:[%s1952_s0 + $0x1c0] sm:$0xf] }
  0x58   : > { %334 = vst [vmem:[%s1957_s6 + $0xd8] sm:$0xf] %v333_v60  ;;  %336 = vst [vmem:[%s1957_s6 + $0xdc] sm:$0xf] %v335_v61  ;;  %v339_v63 = vld [vmem:[%s1952_s0 + $0x1c8] sm:$0xf] }
  0x59   : > { %338 = vst [vmem:[%s1957_s6 + $0xe0] sm:$0xf] %v337_v62  ;;  %v341_v0 = vld [vmem:[%s1952_s0 + $0x1d0] sm:$0xf]  ;;  %v343_v1 = vld [vmem:[%s1952_s0 + $0x1d8] sm:$0xf] }
  0x5a   : > { %340 = vst [vmem:[%s1957_s6 + $0xe4] sm:$0xf] %v339_v63  ;;  %342 = vst [vmem:[%s1957_s6 + $0xe8] sm:$0xf] %v341_v0  ;;  %v345_v2 = vld [vmem:[%s1952_s0 + $0x1e0] sm:$0xf] }
  0x5b   : > { %344 = vst [vmem:[%s1957_s6 + $0xec] sm:$0xf] %v343_v1  ;;  %v347_v3 = vld [vmem:[%s1952_s0 + $0x1e8] sm:$0xf]  ;;  %v349_v4 = vld [vmem:[%s1952_s0 + $0x1f0] sm:$0xf] }
  0x5c   : > { %346 = vst [vmem:[%s1957_s6 + $0xf0] sm:$0xf] %v345_v2  ;;  %348 = vst [vmem:[%s1957_s6 + $0xf4] sm:$0xf] %v347_v3  ;;  %v351_v5 = vld [vmem:[%s1952_s0 + $0x1f8] sm:$0xf] }
  0x5d   : > { %350 = vst [vmem:[%s1957_s6 + $0xf8] sm:$0xf] %v349_v4  ;;  %v353_v6 = vld [vmem:[%s1952_s0 + $0x200] sm:$0xf]  ;;  %v355_v7 = vld [vmem:[%s1952_s0 + $0x208] sm:$0xf] }
  0x5e   : > { %352 = vst [vmem:[%s1957_s6 + $0xfc] sm:$0xf] %v351_v5  ;;  %354 = vst [vmem:[%s1957_s6 + $0x100] sm:$0xf] %v353_v6  ;;  %v357_v8 = vld [vmem:[%s1952_s0 + $0x210] sm:$0xf] }
  0x5f   : > { %356 = vst [vmem:[%s1957_s6 + $0x104] sm:$0xf] %v355_v7  ;;  %v359_v9 = vld [vmem:[%s1952_s0 + $0x218] sm:$0xf]  ;;  %v361_v10 = vld [vmem:[%s1952_s0 + $0x220] sm:$0xf] }
  0x60   : > { %358 = vst [vmem:[%s1957_s6 + $0x108] sm:$0xf] %v357_v8  ;;  %360 = vst [vmem:[%s1957_s6 + $0x10c] sm:$0xf] %v359_v9  ;;  %v363_v11 = vld [vmem:[%s1952_s0 + $0x228] sm:$0xf] }
  0x61   : > { %362 = vst [vmem:[%s1957_s6 + $0x110] sm:$0xf] %v361_v10  ;;  %v365_v12 = vld [vmem:[%s1952_s0 + $0x230] sm:$0xf]  ;;  %v367_v13 = vld [vmem:[%s1952_s0 + $0x238] sm:$0xf] }
  0x62   : > { %364 = vst [vmem:[%s1957_s6 + $0x114] sm:$0xf] %v363_v11  ;;  %366 = vst [vmem:[%s1957_s6 + $0x118] sm:$0xf] %v365_v12  ;;  %v369_v14 = vld [vmem:[%s1952_s0 + $0x240] sm:$0xf] }
  0x63   : > { %368 = vst [vmem:[%s1957_s6 + $0x11c] sm:$0xf] %v367_v13  ;;  %v371_v15 = vld [vmem:[%s1952_s0 + $0x248] sm:$0xf]  ;;  %v373_v16 = vld [vmem:[%s1952_s0 + $0x250] sm:$0xf] }
  0x64   : > { %370 = vst [vmem:[%s1957_s6 + $0x120] sm:$0xf] %v369_v14  ;;  %372 = vst [vmem:[%s1957_s6 + $0x124] sm:$0xf] %v371_v15  ;;  %v375_v17 = vld [vmem:[%s1952_s0 + $0x258] sm:$0xf] }
  0x65   : > { %374 = vst [vmem:[%s1957_s6 + $0x128] sm:$0xf] %v373_v16  ;;  %v377_v18 = vld [vmem:[%s1952_s0 + $0x260] sm:$0xf]  ;;  %v379_v19 = vld [vmem:[%s1952_s0 + $0x268] sm:$0xf] }
  0x66   : > { %376 = vst [vmem:[%s1957_s6 + $0x12c] sm:$0xf] %v375_v17  ;;  %378 = vst [vmem:[%s1957_s6 + $0x130] sm:$0xf] %v377_v18  ;;  %v381_v20 = vld [vmem:[%s1952_s0 + $0x270] sm:$0xf] }
  0x67   : > { %380 = vst [vmem:[%s1957_s6 + $0x134] sm:$0xf] %v379_v19  ;;  %v383_v21 = vld [vmem:[%s1952_s0 + $0x278] sm:$0xf]  ;;  %v385_v22 = vld [vmem:[%s1952_s0 + $0x280] sm:$0xf] }
  0x68   : > { %382 = vst [vmem:[%s1957_s6 + $0x138] sm:$0xf] %v381_v20  ;;  %384 = vst [vmem:[%s1957_s6 + $0x13c] sm:$0xf] %v383_v21  ;;  %v387_v23 = vld [vmem:[%s1952_s0 + $0x288] sm:$0xf] }
  0x69   : > { %386 = vst [vmem:[%s1957_s6 + $0x140] sm:$0xf] %v385_v22  ;;  %v389_v24 = vld [vmem:[%s1952_s0 + $0x290] sm:$0xf]  ;;  %v391_v25 = vld [vmem:[%s1952_s0 + $0x298] sm:$0xf] }
  0x6a   : > { %388 = vst [vmem:[%s1957_s6 + $0x144] sm:$0xf] %v387_v23  ;;  %390 = vst [vmem:[%s1957_s6 + $0x148] sm:$0xf] %v389_v24  ;;  %v393_v26 = vld [vmem:[%s1952_s0 + $0x2a0] sm:$0xf] }
  0x6b   : > { %392 = vst [vmem:[%s1957_s6 + $0x14c] sm:$0xf] %v391_v25  ;;  %v395_v27 = vld [vmem:[%s1952_s0 + $0x2a8] sm:$0xf]  ;;  %v397_v28 = vld [vmem:[%s1952_s0 + $0x2b0] sm:$0xf] }
  0x6c   : > { %394 = vst [vmem:[%s1957_s6 + $0x150] sm:$0xf] %v393_v26  ;;  %396 = vst [vmem:[%s1957_s6 + $0x154] sm:$0xf] %v395_v27  ;;  %v399_v29 = vld [vmem:[%s1952_s0 + $0x2b8] sm:$0xf] }
  0x6d   : > { %398 = vst [vmem:[%s1957_s6 + $0x158] sm:$0xf] %v397_v28  ;;  %v401_v30 = vld [vmem:[%s1952_s0 + $0x2c0] sm:$0xf]  ;;  %v403_v31 = vld [vmem:[%s1952_s0 + $0x2c8] sm:$0xf] }
  0x6e   : > { %400 = vst [vmem:[%s1957_s6 + $0x15c] sm:$0xf] %v399_v29  ;;  %402 = vst [vmem:[%s1957_s6 + $0x160] sm:$0xf] %v401_v30  ;;  %v405_v32 = vld [vmem:[%s1952_s0 + $0x2d0] sm:$0xf] }
  0x6f   : > { %404 = vst [vmem:[%s1957_s6 + $0x164] sm:$0xf] %v403_v31  ;;  %v407_v33 = vld [vmem:[%s1952_s0 + $0x2d8] sm:$0xf]  ;;  %v409_v34 = vld [vmem:[%s1952_s0 + $0x2e0] sm:$0xf] }
  0x70   : > { %406 = vst [vmem:[%s1957_s6 + $0x168] sm:$0xf] %v405_v32  ;;  %408 = vst [vmem:[%s1957_s6 + $0x16c] sm:$0xf] %v407_v33  ;;  %v411_v35 = vld [vmem:[%s1952_s0 + $0x2e8] sm:$0xf] }
  0x71   : > { %410 = vst [vmem:[%s1957_s6 + $0x170] sm:$0xf] %v409_v34  ;;  %v413_v36 = vld [vmem:[%s1952_s0 + $0x2f0] sm:$0xf]  ;;  %v415_v37 = vld [vmem:[%s1952_s0 + $0x2f8] sm:$0xf] }
  0x72   : > { %412 = vst [vmem:[%s1957_s6 + $0x174] sm:$0xf] %v411_v35  ;;  %414 = vst [vmem:[%s1957_s6 + $0x178] sm:$0xf] %v413_v36 }
  0x73   : > { %416 = vst [vmem:[%s1957_s6 + $0x17c] sm:$0xf] %v415_v37 }
  0x74 PF: > { %p1439_p0 = scmp.ge.s32.totalorder %s1815_s22, 1  ;;  %p637_p1 = scmp.lt.s32.totalorder %s1815_s22, 7 }
  0x76   : > { %p638_p2 = pnand %p1439_p0, %p637_p1 }
  0x77   : > { %s644_s5 = sand.u32 (!%p638_p2), 1, %s1791_s16   ;;  %s651_s23 = sand.u32 (!%p638_p2), 1, %s1783_s14  }
  0x78   : > { %641 = sbr.rel (%p638_p2) target bundleno = 427 (0x1ab), region = 88  ;;  %s677_s0 = sand.u32 (!%p638_p2), 1, %s1775_s12  }
  0x79   : > { %s1581_s28 = smul.u32 (!%p638_p2), 48, %s644_s5  ;;  %s1440_s11 = sshll.u32 (!%p638_p2), %s677_s0, 3 }
  0x7a   : > { %s1582_s7 = smul.u32 (!%p638_p2), 384, %s651_s23  ;;  %p683_p3 = scmp.lt.s32.totalorder (!%p638_p2), %s1803_s19, 1 }
  0x7b   : > { %s2161_s6 = scalar_lea.vmem (!%p638_p2), [#allocation3], %s1581_s28  ;;  %s2165_s25 = scalar_lea.vmem (!%p638_p2), [#allocation5], %s1440_s11 }
  0x7c   : > { %s2163_s1 = scalar_lea.vmem (!%p638_p2), [#allocation4], %s1582_s7  ;;  %p1441_p4 = scmp.ne.s32.totalorder (!%p638_p2), %s1799_s18, 0 }
  0x7d   : > { %s2155_s26 = scalar_select %p683_p3, %s1803_s19, 1 }
  0x7e   : > { %691 = sbr.rel (%p1441_p4) target bundleno = 133 (0x85), region = 100 }
  0x7f   : > { %s685_s4 = scalar_lea.vmem %s2272_s2, %s2155_s26 }
  0x83   : > { %v1817_v38 = vmov 0.0  }
  0x84   : > { %692 = vst [vmem:[#allocation2] sm:$0xff] %v1817_v38  ;;  %693 = vst [vmem:[#allocation2 + $0x8] sm:$0xff] %v1817_v38 }
  0x85 PF: > { %v1672_v39 = vld [vmem:[%s2163_s1 + $0x78] sm:$0xff]   ;;  %v1676_v43 = vld [vmem:[%s2163_s1 + $0x70] sm:$0xff]   ;;  %v1680_v47 = vld [vmem:[%s2163_s1 + $0x68] sm:$0xff]   ;;  %p1496_p5 = scmp.ne.s32.totalorder %s1799_s18, 2 }
  0x86   : > { %v1673_v40 = vld [vmem:[%s2163_s1 + $0xf8] sm:$0xff]   ;;  %1513 = vmatprep.subr.bf16.mxu0 %v1672_v39  ;;  %v1677_v44 = vld [vmem:[%s2163_s1 + $0xf0] sm:$0xff]   ;;  %v1681_v48 = vld [vmem:[%s2163_s1 + $0xe8] sm:$0xff]  }
  0x87   : > { %v1674_v41 = vld [vmem:[%s2163_s1 + $0x38] sm:$0xff]   ;;  %1535 = vmatprep.subr.bf16.mxu1 %v1673_v40  ;;  %v1678_v45 = vld [vmem:[%s2163_s1 + $0x30] sm:$0xff]   ;;  %v1682_v49 = vld [vmem:[%s2163_s1 + $0x28] sm:$0xff]  }
  0x88   : > { %v1675_v42 = vld [vmem:[%s2163_s1 + $0xb8] sm:$0xff]   ;;  %1514 = vmatpush3.bf16.msra.mxu0 %v1674_v41  ;;  %v1679_v46 = vld [vmem:[%s2163_s1 + $0xb0] sm:$0xff]   ;;  %v1683_v50 = vld [vmem:[%s2163_s1 + $0xa8] sm:$0xff]  }
  0x89   : > { %1536 = vmatpush3.bf16.msra.mxu1 %v1675_v42  ;;  %1515 = vmatprep.subr.bf16.mxu0 %v1676_v43  ;;  %v1684_v51 = vld [vmem:[%s2163_s1 + $0x60] sm:$0xff]   ;;  %v1688_v55 = vld [vmem:[%s2163_s1 + $0x58] sm:$0xff]   ;;  %v1692_v59 = vld [vmem:[%s2163_s1 + $0x50] sm:$0xff]  }
  0x8a   : > { %1537 = vmatprep.subr.bf16.mxu1 %v1677_v44  ;;  %v1685_v52 = vld [vmem:[%s2163_s1 + $0xe0] sm:$0xff]   ;;  %v1689_v56 = vld [vmem:[%s2163_s1 + $0xd8] sm:$0xff]   ;;  %v1693_v60 = vld [vmem:[%s2163_s1 + $0xd0] sm:$0xff]  }
  0x8b   : > { %v1686_v53 = vld [vmem:[%s2163_s1 + $0x20] sm:$0xff]   ;;  %v1690_v57 = vld [vmem:[%s2163_s1 + $0x18] sm:$0xff]   ;;  %v1694_v61 = vld [vmem:[%s2163_s1 + $0x10] sm:$0xff]  }
  0x8c   : > { %1516 = vmatpush3.bf16.msra.mxu0 %v1678_v45  ;;  %v1687_v54 = vld [vmem:[%s2163_s1 + $0xa0] sm:$0xff]   ;;  %v1691_v58 = vld [vmem:[%s2163_s1 + $0x98] sm:$0xff]   ;;  %v1695_v62 = vld [vmem:[%s2163_s1 + $0x90] sm:$0xff]  }
  0x8d   : > { %1538 = vmatpush3.bf16.msra.mxu1 %v1679_v46  ;;  %1517 = vmatprep.subr.bf16.mxu0 %v1680_v47  ;;  %v1696_v63 = vld [vmem:[%s2163_s1 + $0x48] sm:$0xff]   ;;  %v1700_v3 = vld [vmem:[%s2163_s1 + $0x40] sm:$0xff]   ;;  %v1710_v11 = vld [vmem:[%s2163_s1 + $0x178] sm:$0xff]  }
  0x8e   : > { %1539 = vmatprep.subr.bf16.mxu1 %v1681_v48  ;;  %v1697_v0 = vld [vmem:[%s2163_s1 + $0xc8] sm:$0xff]   ;;  %v1701_v4 = vld [vmem:[%s2163_s1 + $0xc0] sm:$0xff]   ;;  %v1711_v12 = vld [vmem:[%s2163_s1 + $0x138] sm:$0xff]  }
  0x8f   : > { %v1698_v1 = vld [vmem:[%s2163_s1 + $0x8] sm:$0xff]   ;;  %v1702_v5 = vld [vmem:[%s2163_s1] sm:$0xff]   ;;  %v1712_v13 = vld [vmem:[%s2163_s1 + $0x170] sm:$0xff]  }
  0x90   : > { %1518 = vmatpush3.bf16.msra.mxu0 %v1682_v49  ;;  %v1699_v2 = vld [vmem:[%s2163_s1 + $0x88] sm:$0xff]   ;;  %v1703_v6 = vld [vmem:[%s2163_s1 + $0x80] sm:$0xff]   ;;  %v1713_v14 = vld [vmem:[%s2163_s1 + $0x130] sm:$0xff]  }
  0x91   : > { %1540 = vmatpush3.bf16.msra.mxu1 %v1683_v50  ;;  %1519 = vmatprep.subr.bf16.mxu0 %v1684_v51  ;;  %v1704_v7 = vld [vmem:[%s2161_s6] ss:$24 sps:$4 sm:$0xff]   ;;  %v1706_v8 = vld [vmem:[%s2161_s6 + $0x4] ss:$24 sps:$4 sm:$0xff]   ;;  %v1728_v22 = vld [vmem:[%s2161_s6 + $0x14] ss:$24 sps:$4 sm:$0xff]  }
  0x92   : > { %1541 = vmatprep.subr.bf16.mxu1 %v1685_v52  ;;  %v1707_v9 = vld [vmem:[%s2161_s6 + $0x8] ss:$24 sps:$4 sm:$0xff]   ;;  %v1709_v10 = vld [vmem:[%s2161_s6 + $0xc] ss:$24 sps:$4 sm:$0xff]   ;;  %1148 = vmatprep.mubr.bf16.mxu0 %v1706_v8 }
  0x93   : > { %1189 = vmatprep.mubr.bf16.mxu1 %v1709_v10  ;;  %v1714_v15 = vld [vmem:[%s2163_s1 + $0x168] sm:$0xff]   ;;  %v1716_v17 = vld [vmem:[%s2163_s1 + $0x160] sm:$0xff]   ;;  %v1718_v19 = vld [vmem:[%s2163_s1 + $0x158] sm:$0xff]  }
  0x94   : > { %1520 = vmatpush3.bf16.msra.mxu0 %v1686_v53  ;;  %v1715_v16 = vld [vmem:[%s2163_s1 + $0x128] sm:$0xff]   ;;  %v1717_v18 = vld [vmem:[%s2163_s1 + $0x120] sm:$0xff]   ;;  %v1719_v20 = vld [vmem:[%s2163_s1 + $0x118] sm:$0xff]  }
  0x95   : > { %1542 = vmatpush3.bf16.msra.mxu1 %v1687_v54  ;;  %1521 = vmatprep.subr.bf16.mxu0 %v1688_v55  ;;  %v1720_v21 = vld [vmem:[%s2163_s1 + $0x150] sm:$0xff]   ;;  %v1722_v24 = vld [vmem:[%s2163_s1 + $0x148] sm:$0xff]   ;;  %v1724_v26 = vld [vmem:[%s2163_s1 + $0x140] sm:$0xff]  }
  0x96   : > { %1543 = vmatprep.subr.bf16.mxu1 %v1689_v56  ;;  %v1721_v23 = vld [vmem:[%s2163_s1 + $0x110] sm:$0xff]   ;;  %v1723_v25 = vld [vmem:[%s2163_s1 + $0x108] sm:$0xff]   ;;  %v1725_v27 = vld [vmem:[%s2163_s1 + $0x100] sm:$0xff]  }
  0x97   : > { %v1726_v28 = vld [vmem:[%s2161_s6 + $0x10] ss:$24 sps:$4 sm:$0xff]  }
  0x98   : > { %1522 = vmatpush3.bf16.msra.mxu0 %v1690_v57  ;;  %v694_v45 = vld [vmem:[#allocation2] sm:$0xff]  ;;  %v695_v52 = vld [vmem:[#allocation2 + $0x8] sm:$0xff] }
  0x99   : > { %1544 = vmatpush3.bf16.msra.mxu1 %v1691_v58  ;;  %1523 = vmatprep.subr.bf16.mxu0 %v1692_v59 }
  0x9a   : > { %1545 = vmatprep.subr.bf16.mxu1 %v1693_v60 }
  0x9c   : > { %1524 = vmatpush3.bf16.msra.mxu0 %v1694_v61 }
  0x9d   : > { %1546 = vmatpush3.bf16.msra.mxu1 %v1695_v62  ;;  %1525 = vmatprep.subr.bf16.mxu0 %v1696_v63 }
  0x9e   : > { %1547 = vmatprep.subr.bf16.mxu1 %v1697_v0 }
  0xa0   : > { %1526 = vmatpush3.bf16.msra.mxu0 %v1698_v1 }
  0xa1   : > { %1548 = vmatpush3.bf16.msra.mxu1 %v1699_v2  ;;  %1527 = vmatprep.subr.bf16.mxu0 %v1700_v3 }
  0xa2   : > { %1549 = vmatprep.subr.bf16.mxu1 %v1701_v4 }
  0xa4   : > { %1528 = vmatpush3.bf16.msra.mxu0 %v1702_v5 }
  0xa5   : > { %1550 = vmatpush3.bf16.msra.mxu1 %v1703_v6  ;;  %1557 = vmatprep.subr.bf16.mxu0 %v1710_v11 }
  0xa7   : > { %1149 = vmatmul.mubr.bf16.vlgmr.msra.gmra.mxu0 %v1704_v7 }
  0xa8   : > { %1190 = vmatmul.mubr.bf16.vlgmr.msra.gmra.mxu1 %v1707_v9  ;;  %1558 = vmatpush3.bf16.msra.mxu0 %v1711_v12 }
  0xa9   : > { %1559 = vmatprep.subr.bf16.mxu0 %v1712_v13  ;;  %1230 = vmatprep.mubr.bf16.mxu0 %v1728_v22 }
  0xac   : > { %1560 = vmatpush3.bf16.msra.mxu0 %v1713_v14 }
  0xad   : > { %1561 = vmatprep.subr.bf16.mxu0 %v1714_v15 }
  0xb0   : > { %1562 = vmatpush3.bf16.msra.mxu0 %v1715_v16 }
  0xb1   : > { %1563 = vmatprep.subr.bf16.mxu0 %v1716_v17 }
  0xb4   : > { %1564 = vmatpush3.bf16.msra.mxu0 %v1717_v18 }
  0xb5   : > { %1565 = vmatprep.subr.bf16.mxu0 %v1718_v19 }
  0xb8   : > { %1566 = vmatpush3.bf16.msra.mxu0 %v1719_v20 }
  0xb9   : > { %1567 = vmatprep.subr.bf16.mxu0 %v1720_v21 }
  0xbc   : > { %1568 = vmatpush3.bf16.msra.mxu0 %v1721_v23 }
  0xbd   : > { %1569 = vmatprep.subr.bf16.mxu0 %v1722_v24 }
  0xc0   : > { %1570 = vmatpush3.bf16.msra.mxu0 %v1723_v25 }
  0xc1   : > { %1571 = vmatprep.subr.bf16.mxu0 %v1724_v26 }
  0xc4   : > { %1572 = vmatpush3.bf16.msra.mxu0 %v1725_v27 }
  0xc7   : > { %1231 = vmatmul.mubr.bf16.vlgmr.msra.gmra.mxu0 %v1726_v28 }
 0x167   : > { %v1529_v29 = vpop.f32.mrf.mxu0 }
 0x168   : > { %v1551_v30 = vpop.f32.mrf.mxu1 }
 0x169   : > { %v1530_v31 = vpop.f32.mrf.mxu0 }
 0x16a   : > { %v1552_v32 = vpop.f32.mrf.mxu1  ;;  %v1531_v36 = vadd.f32 %v1530_v31, %v1529_v29 }
 0x16b   : > { %v1532_v33 = vpop.f32.mrf.mxu0  ;;  %v1553_v37 = vadd.f32 %v1552_v32, %v1551_v30 }
 0x16c   : > { %v1554_v34 = vpop.f32.mrf.mxu1 }
 0x16d   : > { %v1533_v35 = vpop.f32.mrf.mxu0  ;;  %v1192_v41 = vadd.f32 %v1553_v37, %v1531_v36 }
 0x16e   : > { %v1555_v38 = vpop.f32.mrf.mxu1  ;;  %v1534_v42 = vadd.f32 %v1533_v35, %v1532_v33 }
 0x16f   : > { %v1556_v43 = vadd.f32 %v1555_v38, %v1554_v34 }
 0x171   : > { %v1195_v49 = vadd.f32 %v1556_v43, %v1534_v42 }
 0x187   : > { %v1573_v39 = vpop.f32.mrf.mxu0 }
 0x189   : > { %v1574_v40 = vpop.f32.mrf.mxu0 }
 0x18a   : > { %v1575_v44 = vadd.f32 %v1574_v40, %v1573_v39 }
 0x18b   : > { %v1576_v46 = vpop.f32.mrf.mxu0 }
 0x18c   : > { %v1233_v47 = vadd.f32 %v1575_v44, %v1192_v41 }
 0x18d   : > { %v1577_v48 = vpop.f32.mrf.mxu0 }
 0x18e   : > { %v1239_v50 = vadd.f32 %v1233_v47, %v694_v45  ;;  %v1578_v51 = vadd.f32 %v1577_v48, %v1576_v46 }
 0x190   : > { %1241 = vst [vmem:[#allocation2] sm:$0xff] %v1239_v50  ;;  %v1236_v53 = vadd.f32 %v1578_v51, %v1195_v49  ;;  %1246 = sbr.rel (%p1496_p5) target bundleno = 419 (0x1a3), region = 104 }
 0x192   : > { %v1240_v54 = vadd.f32 %v1236_v53, %v695_v52 }
 0x194   : > { %1242 = vst [vmem:[#allocation2 + $0x8] sm:$0xff] %v1240_v54 }
 0x195   : > { %v1497_v57 = vld [vmem:[%s685_s4] ss:$0 sm:$0xff] }
 0x197   : > { %v1247_v55 = vld [vmem:[#allocation2] sm:$0xff] }
 0x198   : > { %v1256_v58 = vadd.f32 %v1497_v57, %v1247_v55 }
 0x19a   : > { %v1258_v60 = vmax.f32 %v1256_v58, 0.0 }
 0x19b   : > { %v1248_v56 = vld [vmem:[#allocation2 + $0x8] sm:$0xff] }
 0x19c   : > { %v1257_v59 = vadd.f32 %v1497_v57, %v1248_v56 }
 0x19e   : > { %v1259_v61 = vmax.f32 %v1257_v59, 0.0 }
 0x1a0   : > { %v1511_v62 = vpack.c.bf16 %v1259_v61, %v1258_v60 }
 0x1a2   : > { %1512 = vst [vmem:[%s2165_s25] sm:$0xff] %v1511_v62  }
 0x1a3 PF: > { %1276 = sbr.rel (!%p1932_p12) target bundleno = 427 (0x1ab), region = 108  ;;  %s1501_s14 = sshll.u32 (%p1932_p12), %s1803_s19, 2 }
 0x1a4   : > { %s1281_s5 = scalar_lea.vmem (%p1932_p12), %s2273_s3, %s1501_s14 }
 0x1a9   : > { %v1298_v63 = vld [vmem:[%s2165_s25] sm:$0xf]  ;;  %v1300_v0 = vld [vmem:[%s2165_s25 + $0x4] sm:$0xf] }
 0x1aa   : > { %1299 = vst [vmem:[%s1281_s5] sm:$0xf] %v1298_v63  ;;  %1301 = vst [vmem:[%s1281_s5 + $0x8] sm:$0xf] %v1300_v0 }
 0x1ab PF: > { %s13_s22 = sadd.s32 1, %s1815_s22   ;;  %s2283_s25 = sld [smem:[#allocation6_spill]] }
 0x1ac   : > { %p10_p6 = scmp.ge.s32.totalorder %s13_s22, 8   ;;  %s2284_s12 = smov %s1779_s13 }
 0x1ad   : > { %s2285_s13 = smov %s1930_s9  ;;  %s2286_s14 = smov %s1787_s15 }
 0x1ae   : > { %s2287_s15 = smov %s1927_s8  ;;  %s2288_s16 = smov %s1795_s17 }
 0x1af   : > { %s2289_s17 = smov %s1913_s30  ;;  %s2290_s18 = smov %s1807_s20 }
 0x1b0   : > { %s2291_s19 = smov %s1811_s21  ;;  %s2292_s20 = smov %s2295_s24 }
 0x1b1   : > { %s2293_s21 = smov %s2283_s25  ;;  %12 = sbr.rel (!%p10_p6) target bundleno = 9 (0x9), region = 191 }

// kernel: resnet_forward.35
= control target key start
LH: loop header
LB: loop body
LE: loop exit
PB: predicated region body
PF: predicated region fallthrough
CT: control target
= control target key end

     0   :  { %s2609_s0 = inlined_call_operand.vmem [shape: bf16[16,2304], index: 0, kind: input, shape index: {}]   ;;  %s2610_s1 = inlined_call_operand.vmem [shape: bf16[2304,512], index: 1, kind: input, shape index: {}]   ;;  %s2611_s2 = inlined_call_operand.vmem [shape: f32[1,512], index: 2, kind: input, shape index: {}]   ;;  %s2612_s3 = inlined_call_operand.vmem [shape: bf16[16,512], index: 3, kind: output, shape index: {}]  }
   0x1   :  { %2614 = sst [smem:[#allocation7_spill]] %s2609_s0 }
   0x2   :  { %2615 = sst [smem:[#allocation8_spill]] %s2610_s1 }
   0x3   :  { %s2129_s12 = smov 0   ;;  %s2131_s13 = smov 0  }
   0x4   :  { %s2133_s14 = smov 0   ;;  %s2135_s15 = smov 0  }
   0x5   :  { %s2137_s16 = smov 0   ;;  %s2139_s17 = smov 0  }
   0x6   :  { %s2141_s18 = smov 0   ;;  %s2143_s19 = smov 0  }
   0x7   :  { %s2145_s20 = smov 0   ;;  %s2147_s21 = smov 0  }
   0x8   :  { %s2149_s22 = smov 0  }
   0x9 LB: > { %s1647_s23 = sadd.s32 4294967295, %s2106_s22   ;;  %s25_s24 = sadd.s32 1, %s2098_s20  ;;  %s2106_s22 = sphi %s2149_s22, %s13_s22   ;;  %s2102_s21 = sphi %s2147_s21, %s2632_s21   ;;  %s2098_s20 = sphi %s2145_s20, %s2631_s20   ;;  %s2094_s19 = sphi %s2143_s19, %s2630_s19   ;;  %s2090_s18 = sphi %s2141_s18, %s2629_s18   ;;  %s2086_s17 = sphi %s2139_s17, %s2628_s17   ;;  %s2082_s16 = sphi %s2137_s16, %s2627_s16   ;;  %s2078_s15 = sphi %s2135_s15, %s2626_s15   ;;  %s2074_s14 = sphi %s2133_s14, %s2625_s14   ;;  %s2070_s13 = sphi %s2131_s13, %s2624_s13   ;;  %s2066_s12 = sphi %s2129_s12, %s2623_s12  }
   0xa   : > { %p26_p0 = scmp.ge.s32.totalorder %s25_s24, 3  ;;  %s28_s25 = sadd.s32 1, %s2102_s21 }
   0xb   : > { %s41_s26 = sadd.s32 1, %s2086_s17  ;;  %p48_p1 = scmp.ne.s32.totalorder %s2086_s17, %s2082_s16 }
   0xc   : > { %s2634_s24 = smov (%p26_p0, %s25_s24), 0  ;;  %s2636_s25 = smov (!%p26_p0, %s28_s25), %s2102_s21 }
   0xd   : > { %s37_s27 = ssub.s32 %s2098_s20, %s2634_s24  ;;  %p49_p2 = scmp.eq.s32.totalorder %s2106_s22, 0 }
   0xe   : > { %p30_p3 = scmp.ge.s32.totalorder %s2636_s25, 2  ;;  %p39_p4 = scmp.eq.s32.totalorder %s37_s27, 0 }
   0xf   : > { %p2196_p5 = por %p49_p2, %p48_p1  ;;  %s69_s29 = sadd.s32 1, %s2078_s15 }
  0x10   : > { %s2638_s25 = smov (%p30_p3, %s2636_s25), 0  ;;  %p76_p6 = scmp.ne.s32.totalorder %s2078_s15, %s2074_s14 }
  0x11   : > { %2617 = sst [smem:[#allocation6_spill]] %s2638_s25  ;;  %s65_s4 = ssub.s32 %s2102_s21, %s2638_s25 }
  0x12   : > { %s2204_s30 = scalar_select %p39_p4, %s2086_s17, %s41_s26  }
  0x13   : > { %s66_s5 = sor.u32 %s65_s4, %s37_s27  ;;  %p121_p7 = scmp.eq.s32.totalorder %s65_s4, 0 }
  0x14   : > { %p67_p8 = scmp.eq.s32.totalorder %s66_s5, 0  ;;  %p2210_p9 = por %p76_p6, %p49_p2 }
  0x15   : > { %s123_s7 = sadd.s32 1, %s2070_s13  ;;  %p133_p10 = scmp.ne.s32.totalorder %s2070_s13, %s2066_s12 }
  0x16   : > { %s2218_s8 = scalar_select %p67_p8, %s2078_s15, %s69_s29  }
  0x17   : > { %s2221_s9 = scalar_select %p121_p7, %s2070_s13, %s123_s7  }
  0x18   : > { %p134_p11 = scmp.eq.s32.totalorder %s1647_s23, 5  ;;  %p1650_p13 = scmp.ge.s32.totalorder %s2106_s22, 6 }
  0x1a   : > { %p2223_p12 = por %p134_p11, %p133_p10  ;;  %156 = sbr.rel (%p1650_p13) target bundleno = 101 (0x65), region = 16 }
  0x1f   : > { %159 = sbr.rel (!%p2196_p5) target bundleno = 43 (0x2b), region = 20  ;;  %s161_s11 = sand.u32 (%p2196_p5), 1, %s2086_s17  }
  0x20   : > { %s1769_s26 = smul.u32 (%p2196_p5), 24, %s2098_s20  ;;  %s2620_s0 = sld [smem:[#allocation7_spill]] (%p2196_p5) }
  0x21   : > { %s1774_s27 = smul.u32 (%p2196_p5), 48, %s161_s11 }
  0x23   : > { %s163_s23 = scalar_lea.vmem (%p2196_p5), [#allocation3], %s1774_s27 }
  0x26   : > { %s169_s5 = scalar_lea.vmem %s2620_s0, %s1769_s26 }
  0x27   : > { %v182_v0 = vld [vmem:[%s169_s5] sm:$0xff]  ;;  %v184_v1 = vld [vmem:[%s169_s5 + $0x8] sm:$0xff]  ;;  %v186_v2 = vld [vmem:[%s169_s5 + $0x10] sm:$0xff] }
  0x28   : > { %183 = vst [vmem:[%s163_s23] sm:$0xff] %v182_v0  ;;  %185 = vst [vmem:[%s163_s23 + $0x8] sm:$0xff] %v184_v1  ;;  %v188_v3 = vld [vmem:[%s169_s5 + $0x48] sm:$0xff]  ;;  %v190_v4 = vld [vmem:[%s169_s5 + $0x50] sm:$0xff] }
  0x29   : > { %187 = vst [vmem:[%s163_s23 + $0x10] sm:$0xff] %v186_v2  ;;  %v192_v5 = vld [vmem:[%s169_s5 + $0x58] sm:$0xff]  ;;  %189 = vst [vmem:[%s163_s23 + $0x18] sm:$0xff] %v188_v3 }
  0x2a   : > { %191 = vst [vmem:[%s163_s23 + $0x20] sm:$0xff] %v190_v4  ;;  %193 = vst [vmem:[%s163_s23 + $0x28] sm:$0xff] %v192_v5 }
  0x2b PF: > { %199 = sbr.rel (!%p2210_p9) target bundleno = 101 (0x65), region = 43  ;;  %s201_s28 = sand.u32 (%p2210_p9), 1, %s2078_s15  }
  0x2c   : > { %s1775_s7 = smul.u32 (%p2210_p9), 768, %s201_s28  ;;  %s1652_s11 = sshll.u32 (%p2210_p9), %s2102_s21, 1 }
  0x2d   : > { %s1770_s26 = smul.u32 (%p2210_p9), 384, %s2098_s20  ;;  %s2621_s1 = sld [smem:[#allocation8_spill]] (%p2210_p9) }
  0x2e   : > { %s2248_s6 = scalar_lea.vmem (%p2210_p9), [#allocation4], %s1775_s7 }
  0x2f   : > { %s207_s27 = sadd.s32 (%p2210_p9), %s1770_s26, %s1652_s11 }
  0x30   : > { %s1654_s29 = sshll.u32 %s207_s27, 2 }
  0x33   : > { %s2243_s5 = scalar_lea.vmem %s2621_s1, %s1654_s29 }
  0x34   : > { %v428_v6 = vld [vmem:[%s2243_s5] sm:$0xff]  ;;  %v430_v7 = vld [vmem:[%s2243_s5 + $0x10] sm:$0xff] }
  0x35   : > { %v432_v8 = vld [vmem:[%s2243_s5 + $0x20] sm:$0xff]  ;;  %429 = vst [vmem:[%s2248_s6] sm:$0xff] %v428_v6  ;;  %431 = vst [vmem:[%s2248_s6 + $0x8] sm:$0xff] %v430_v7  ;;  %v434_v9 = vld [vmem:[%s2243_s5 + $0x30] sm:$0xff] }
  0x36   : > { %433 = vst [vmem:[%s2248_s6 + $0x10] sm:$0xff] %v432_v8  ;;  %v436_v10 = vld [vmem:[%s2243_s5 + $0x40] sm:$0xff]  ;;  %v438_v11 = vld [vmem:[%s2243_s5 + $0x50] sm:$0xff]  ;;  %435 = vst [vmem:[%s2248_s6 + $0x18] sm:$0xff] %v434_v9 }
  0x37   : > { %437 = vst [vmem:[%s2248_s6 + $0x20] sm:$0xff] %v436_v10  ;;  %439 = vst [vmem:[%s2248_s6 + $0x28] sm:$0xff] %v438_v11  ;;  %v440_v12 = vld [vmem:[%s2243_s5 + $0x60] sm:$0xff]  ;;  %v442_v13 = vld [vmem:[%s2243_s5 + $0x70] sm:$0xff] }
  0x38   : > { %v444_v14 = vld [vmem:[%s2243_s5 + $0x80] sm:$0xff]  ;;  %441 = vst [vmem:[%s2248_s6 + $0x30] sm:$0xff] %v440_v12  ;;  %443 = vst [vmem:[%s2248_s6 + $0x38] sm:$0xff] %v442_v13  ;;  %v446_v15 = vld [vmem:[%s2243_s5 + $0x90] sm:$0xff] }
  0x39   : > { %445 = vst [vmem:[%s2248_s6 + $0x40] sm:$0xff] %v444_v14  ;;  %v448_v16 = vld [vmem:[%s2243_s5 + $0xa0] sm:$0xff]  ;;  %v450_v17 = vld [vmem:[%s2243_s5 + $0xb0] sm:$0xff]  ;;  %447 = vst [vmem:[%s2248_s6 + $0x48] sm:$0xff] %v446_v15 }
  0x3a   : > { %449 = vst [vmem:[%s2248_s6 + $0x50] sm:$0xff] %v448_v16  ;;  %451 = vst [vmem:[%s2248_s6 + $0x58] sm:$0xff] %v450_v17  ;;  %v452_v18 = vld [vmem:[%s2243_s5 + $0xc0] sm:$0xff]  ;;  %v454_v19 = vld [vmem:[%s2243_s5 + $0xd0] sm:$0xff] }
  0x3b   : > { %v456_v20 = vld [vmem:[%s2243_s5 + $0xe0] sm:$0xff]  ;;  %453 = vst [vmem:[%s2248_s6 + $0x60] sm:$0xff] %v452_v18  ;;  %455 = vst [vmem:[%s2248_s6 + $0x68] sm:$0xff] %v454_v19  ;;  %v458_v21 = vld [vmem:[%s2243_s5 + $0xf0] sm:$0xff] }
  0x3c   : > { %457 = vst [vmem:[%s2248_s6 + $0x70] sm:$0xff] %v456_v20  ;;  %v460_v22 = vld [vmem:[%s2243_s5 + $0x100] sm:$0xff]  ;;  %v462_v23 = vld [vmem:[%s2243_s5 + $0x110] sm:$0xff]  ;;  %459 = vst [vmem:[%s2248_s6 + $0x78] sm:$0xff] %v458_v21 }
  0x3d   : > { %461 = vst [vmem:[%s2248_s6 + $0x80] sm:$0xff] %v460_v22  ;;  %463 = vst [vmem:[%s2248_s6 + $0x88] sm:$0xff] %v462_v23  ;;  %v464_v24 = vld [vmem:[%s2243_s5 + $0x120] sm:$0xff]  ;;  %v466_v25 = vld [vmem:[%s2243_s5 + $0x130] sm:$0xff] }
  0x3e   : > { %v468_v26 = vld [vmem:[%s2243_s5 + $0x140] sm:$0xff]  ;;  %465 = vst [vmem:[%s2248_s6 + $0x90] sm:$0xff] %v464_v24  ;;  %467 = vst [vmem:[%s2248_s6 + $0x98] sm:$0xff] %v466_v25  ;;  %v470_v27 = vld [vmem:[%s2243_s5 + $0x150] sm:$0xff] }
  0x3f   : > { %469 = vst [vmem:[%s2248_s6 + $0xa0] sm:$0xff] %v468_v26  ;;  %v472_v28 = vld [vmem:[%s2243_s5 + $0x160] sm:$0xff]  ;;  %v474_v29 = vld [vmem:[%s2243_s5 + $0x170] sm:$0xff]  ;;  %471 = vst [vmem:[%s2248_s6 + $0xa8] sm:$0xff] %v470_v27 }
  0x40   : > { %473 = vst [vmem:[%s2248_s6 + $0xb0] sm:$0xff] %v472_v28  ;;  %475 = vst [vmem:[%s2248_s6 + $0xb8] sm:$0xff] %v474_v29  ;;  %v476_v30 = vld [vmem:[%s2243_s5 + $0x180] sm:$0xff]  ;;  %v478_v31 = vld [vmem:[%s2243_s5 + $0x190] sm:$0xff] }
  0x41   : > { %v480_v32 = vld [vmem:[%s2243_s5 + $0x1a0] sm:$0xff]  ;;  %477 = vst [vmem:[%s2248_s6 + $0xc0] sm:$0xff] %v476_v30  ;;  %479 = vst [vmem:[%s2248_s6 + $0xc8] sm:$0xff] %v478_v31  ;;  %v482_v33 = vld [vmem:[%s2243_s5 + $0x1b0] sm:$0xff] }
  0x42   : > { %481 = vst [vmem:[%s2248_s6 + $0xd0] sm:$0xff] %v480_v32  ;;  %v484_v34 = vld [vmem:[%s2243_s5 + $0x1c0] sm:$0xff]  ;;  %v486_v35 = vld [vmem:[%s2243_s5 + $0x1d0] sm:$0xff]  ;;  %483 = vst [vmem:[%s2248_s6 + $0xd8] sm:$0xff] %v482_v33 }
  0x43   : > { %485 = vst [vmem:[%s2248_s6 + $0xe0] sm:$0xff] %v484_v34  ;;  %487 = vst [vmem:[%s2248_s6 + $0xe8] sm:$0xff] %v486_v35  ;;  %v488_v36 = vld [vmem:[%s2243_s5 + $0x1e0] sm:$0xff]  ;;  %v490_v37 = vld [vmem:[%s2243_s5 + $0x1f0] sm:$0xff] }
  0x44   : > { %v492_v38 = vld [vmem:[%s2243_s5 + $0x200] sm:$0xff]  ;;  %489 = vst [vmem:[%s2248_s6 + $0xf0] sm:$0xff] %v488_v36  ;;  %491 = vst [vmem:[%s2248_s6 + $0xf8] sm:$0xff] %v490_v37  ;;  %v494_v39 = vld [vmem:[%s2243_s5 + $0x210] sm:$0xff] }
  0x45   : > { %493 = vst [vmem:[%s2248_s6 + $0x100] sm:$0xff] %v492_v38  ;;  %v496_v40 = vld [vmem:[%s2243_s5 + $0x220] sm:$0xff]  ;;  %v498_v41 = vld [vmem:[%s2243_s5 + $0x230] sm:$0xff]  ;;  %495 = vst [vmem:[%s2248_s6 + $0x108] sm:$0xff] %v494_v39 }
  0x46   : > { %497 = vst [vmem:[%s2248_s6 + $0x110] sm:$0xff] %v496_v40  ;;  %499 = vst [vmem:[%s2248_s6 + $0x118] sm:$0xff] %v498_v41  ;;  %v500_v42 = vld [vmem:[%s2243_s5 + $0x240] sm:$0xff]  ;;  %v502_v43 = vld [vmem:[%s2243_s5 + $0x250] sm:$0xff] }
  0x47   : > { %v504_v44 = vld [vmem:[%s2243_s5 + $0x260] sm:$0xff]  ;;  %501 = vst [vmem:[%s2248_s6 + $0x120] sm:$0xff] %v500_v42  ;;  %503 = vst [vmem:[%s2248_s6 + $0x128] sm:$0xff] %v502_v43  ;;  %v506_v45 = vld [vmem:[%s2243_s5 + $0x270] sm:$0xff] }
  0x48   : > { %505 = vst [vmem:[%s2248_s6 + $0x130] sm:$0xff] %v504_v44  ;;  %v508_v46 = vld [vmem:[%s2243_s5 + $0x280] sm:$0xff]  ;;  %v510_v47 = vld [vmem:[%s2243_s5 + $0x290] sm:$0xff]  ;;  %507 = vst [vmem:[%s2248_s6 + $0x138] sm:$0xff] %v506_v45 }
  0x49   : > { %509 = vst [vmem:[%s2248_s6 + $0x140] sm:$0xff] %v508_v46  ;;  %511 = vst [vmem:[%s2248_s6 + $0x148] sm:$0xff] %v510_v47  ;;  %v512_v48 = vld [vmem:[%s2243_s5 + $0x2a0] sm:$0xff]  ;;  %v514_v49 = vld [vmem:[%s2243_s5 + $0x2b0] sm:$0xff] }
  0x4a   : > { %v516_v50 = vld [vmem:[%s2243_s5 + $0x2c0] sm:$0xff]  ;;  %513 = vst [vmem:[%s2248_s6 + $0x150] sm:$0xff] %v512_v48  ;;  %515 = vst [vmem:[%s2248_s6 + $0x158] sm:$0xff] %v514_v49  ;;  %v518_v51 = vld [vmem:[%s2243_s5 + $0x2d0] sm:$0xff] }
  0x4b   : > { %517 = vst [vmem:[%s2248_s6 + $0x160] sm:$0xff] %v516_v50  ;;  %v520_v52 = vld [vmem:[%s2243_s5 + $0x2e0] sm:$0xff]  ;;  %v522_v53 = vld [vmem:[%s2243_s5 + $0x2f0] sm:$0xff]  ;;  %519 = vst [vmem:[%s2248_s6 + $0x168] sm:$0xff] %v518_v51 }
  0x4c   : > { %521 = vst [vmem:[%s2248_s6 + $0x170] sm:$0xff] %v520_v52  ;;  %523 = vst [vmem:[%s2248_s6 + $0x178] sm:$0xff] %v522_v53  ;;  %v524_v54 = vld [vmem:[%s2243_s5 + $0x300] sm:$0xff]  ;;  %v526_v55 = vld [vmem:[%s2243_s5 + $0x310] sm:$0xff] }
  0x4d   : > { %v528_v56 = vld [vmem:[%s2243_s5 + $0x320] sm:$0xff]  ;;  %525 = vst [vmem:[%s2248_s6 + $0x180] sm:$0xff] %v524_v54  ;;  %527 = vst [vmem:[%s2248_s6 + $0x188] sm:$0xff] %v526_v55  ;;  %v530_v57 = vld [vmem:[%s2243_s5 + $0x330] sm:$0xff] }
  0x4e   : > { %529 = vst [vmem:[%s2248_s6 + $0x190] sm:$0xff] %v528_v56  ;;  %v532_v58 = vld [vmem:[%s2243_s5 + $0x340] sm:$0xff]  ;;  %v534_v59 = vld [vmem:[%s2243_s5 + $0x350] sm:$0xff]  ;;  %531 = vst [vmem:[%s2248_s6 + $0x198] sm:$0xff] %v530_v57 }
  0x4f   : > { %533 = vst [vmem:[%s2248_s6 + $0x1a0] sm:$0xff] %v532_v58  ;;  %535 = vst [vmem:[%s2248_s6 + $0x1a8] sm:$0xff] %v534_v59  ;;  %v536_v60 = vld [vmem:[%s2243_s5 + $0x360] sm:$0xff]  ;;  %v538_v61 = vld [vmem:[%s2243_s5 + $0x370] sm:$0xff] }
  0x50   : > { %v540_v62 = vld [vmem:[%s2243_s5 + $0x380] sm:$0xff]  ;;  %537 = vst [vmem:[%s2248_s6 + $0x1b0] sm:$0xff] %v536_v60  ;;  %539 = vst [vmem:[%s2248_s6 + $0x1b8] sm:$0xff] %v538_v61  ;;  %v542_v63 = vld [vmem:[%s2243_s5 + $0x390] sm:$0xff] }
  0x51   : > { %541 = vst [vmem:[%s2248_s6 + $0x1c0] sm:$0xff] %v540_v62  ;;  %v544_v0 = vld [vmem:[%s2243_s5 + $0x3a0] sm:$0xff]  ;;  %v546_v1 = vld [vmem:[%s2243_s5 + $0x3b0] sm:$0xff]  ;;  %543 = vst [vmem:[%s2248_s6 + $0x1c8] sm:$0xff] %v542_v63 }
  0x52   : > { %545 = vst [vmem:[%s2248_s6 + $0x1d0] sm:$0xff] %v544_v0  ;;  %547 = vst [vmem:[%s2248_s6 + $0x1d8] sm:$0xff] %v546_v1  ;;  %v548_v2 = vld [vmem:[%s2243_s5 + $0x3c0] sm:$0xff]  ;;  %v550_v3 = vld [vmem:[%s2243_s5 + $0x3d0] sm:$0xff] }
  0x53   : > { %v552_v4 = vld [vmem:[%s2243_s5 + $0x3e0] sm:$0xff]  ;;  %549 = vst [vmem:[%s2248_s6 + $0x1e0] sm:$0xff] %v548_v2  ;;  %551 = vst [vmem:[%s2248_s6 + $0x1e8] sm:$0xff] %v550_v3  ;;  %v554_v5 = vld [vmem:[%s2243_s5 + $0x3f0] sm:$0xff] }
  0x54   : > { %553 = vst [vmem:[%s2248_s6 + $0x1f0] sm:$0xff] %v552_v4  ;;  %v556_v6 = vld [vmem:[%s2243_s5 + $0x400] sm:$0xff]  ;;  %v558_v7 = vld [vmem:[%s2243_s5 + $0x410] sm:$0xff]  ;;  %555 = vst [vmem:[%s2248_s6 + $0x1f8] sm:$0xff] %v554_v5 }
  0x55   : > { %557 = vst [vmem:[%s2248_s6 + $0x200] sm:$0xff] %v556_v6  ;;  %559 = vst [vmem:[%s2248_s6 + $0x208] sm:$0xff] %v558_v7  ;;  %v560_v8 = vld [vmem:[%s2243_s5 + $0x420] sm:$0xff]  ;;  %v562_v9 = vld [vmem:[%s2243_s5 + $0x430] sm:$0xff] }
  0x56   : > { %v564_v10 = vld [vmem:[%s2243_s5 + $0x440] sm:$0xff]  ;;  %561 = vst [vmem:[%s2248_s6 + $0x210] sm:$0xff] %v560_v8  ;;  %563 = vst [vmem:[%s2248_s6 + $0x218] sm:$0xff] %v562_v9  ;;  %v566_v11 = vld [vmem:[%s2243_s5 + $0x450] sm:$0xff] }
  0x57   : > { %565 = vst [vmem:[%s2248_s6 + $0x220] sm:$0xff] %v564_v10  ;;  %v568_v12 = vld [vmem:[%s2243_s5 + $0x460] sm:$0xff]  ;;  %v570_v13 = vld [vmem:[%s2243_s5 + $0x470] sm:$0xff]  ;;  %567 = vst [vmem:[%s2248_s6 + $0x228] sm:$0xff] %v566_v11 }
  0x58   : > { %569 = vst [vmem:[%s2248_s6 + $0x230] sm:$0xff] %v568_v12  ;;  %571 = vst [vmem:[%s2248_s6 + $0x238] sm:$0xff] %v570_v13  ;;  %v572_v14 = vld [vmem:[%s2243_s5 + $0x480] sm:$0xff]  ;;  %v574_v15 = vld [vmem:[%s2243_s5 + $0x490] sm:$0xff] }
  0x59   : > { %v576_v16 = vld [vmem:[%s2243_s5 + $0x4a0] sm:$0xff]  ;;  %573 = vst [vmem:[%s2248_s6 + $0x240] sm:$0xff] %v572_v14  ;;  %575 = vst [vmem:[%s2248_s6 + $0x248] sm:$0xff] %v574_v15  ;;  %v578_v17 = vld [vmem:[%s2243_s5 + $0x4b0] sm:$0xff] }
  0x5a   : > { %577 = vst [vmem:[%s2248_s6 + $0x250] sm:$0xff] %v576_v16  ;;  %v580_v18 = vld [vmem:[%s2243_s5 + $0x4c0] sm:$0xff]  ;;  %v582_v19 = vld [vmem:[%s2243_s5 + $0x4d0] sm:$0xff]  ;;  %579 = vst [vmem:[%s2248_s6 + $0x258] sm:$0xff] %v578_v17 }
  0x5b   : > { %581 = vst [vmem:[%s2248_s6 + $0x260] sm:$0xff] %v580_v18  ;;  %583 = vst [vmem:[%s2248_s6 + $0x268] sm:$0xff] %v582_v19  ;;  %v584_v20 = vld [vmem:[%s2243_s5 + $0x4e0] sm:$0xff]  ;;  %v586_v21 = vld [vmem:[%s2243_s5 + $0x4f0] sm:$0xff] }
  0x5c   : > { %v588_v22 = vld [vmem:[%s2243_s5 + $0x500] sm:$0xff]  ;;  %585 = vst [vmem:[%s2248_s6 + $0x270] sm:$0xff] %v584_v20  ;;  %587 = vst [vmem:[%s2248_s6 + $0x278] sm:$0xff] %v586_v21  ;;  %v590_v23 = vld [vmem:[%s2243_s5 + $0x510] sm:$0xff] }
  0x5d   : > { %589 = vst [vmem:[%s2248_s6 + $0x280] sm:$0xff] %v588_v22  ;;  %v592_v24 = vld [vmem:[%s2243_s5 + $0x520] sm:$0xff]  ;;  %v594_v25 = vld [vmem:[%s2243_s5 + $0x530] sm:$0xff]  ;;  %591 = vst [vmem:[%s2248_s6 + $0x288] sm:$0xff] %v590_v23 }
  0x5e   : > { %593 = vst [vmem:[%s2248_s6 + $0x290] sm:$0xff] %v592_v24  ;;  %595 = vst [vmem:[%s2248_s6 + $0x298] sm:$0xff] %v594_v25  ;;  %v596_v26 = vld [vmem:[%s2243_s5 + $0x540] sm:$0xff]  ;;  %v598_v27 = vld [vmem:[%s2243_s5 + $0x550] sm:$0xff] }
  0x5f   : > { %v600_v28 = vld [vmem:[%s2243_s5 + $0x560] sm:$0xff]  ;;  %597 = vst [vmem:[%s2248_s6 + $0x2a0] sm:$0xff] %v596_v26  ;;  %599 = vst [vmem:[%s2248_s6 + $0x2a8] sm:$0xff] %v598_v27  ;;  %v602_v29 = vld [vmem:[%s2243_s5 + $0x570] sm:$0xff] }
  0x60   : > { %601 = vst [vmem:[%s2248_s6 + $0x2b0] sm:$0xff] %v600_v28  ;;  %v604_v30 = vld [vmem:[%s2243_s5 + $0x580] sm:$0xff]  ;;  %v606_v31 = vld [vmem:[%s2243_s5 + $0x590] sm:$0xff]  ;;  %603 = vst [vmem:[%s2248_s6 + $0x2b8] sm:$0xff] %v602_v29 }
  0x61   : > { %605 = vst [vmem:[%s2248_s6 + $0x2c0] sm:$0xff] %v604_v30  ;;  %607 = vst [vmem:[%s2248_s6 + $0x2c8] sm:$0xff] %v606_v31  ;;  %v608_v32 = vld [vmem:[%s2243_s5 + $0x5a0] sm:$0xff]  ;;  %v610_v33 = vld [vmem:[%s2243_s5 + $0x5b0] sm:$0xff] }
  0x62   : > { %v612_v34 = vld [vmem:[%s2243_s5 + $0x5c0] sm:$0xff]  ;;  %609 = vst [vmem:[%s2248_s6 + $0x2d0] sm:$0xff] %v608_v32  ;;  %611 = vst [vmem:[%s2248_s6 + $0x2d8] sm:$0xff] %v610_v33  ;;  %v614_v35 = vld [vmem:[%s2243_s5 + $0x5d0] sm:$0xff] }
  0x63   : > { %613 = vst [vmem:[%s2248_s6 + $0x2e0] sm:$0xff] %v612_v34  ;;  %v616_v36 = vld [vmem:[%s2243_s5 + $0x5e0] sm:$0xff]  ;;  %v618_v37 = vld [vmem:[%s2243_s5 + $0x5f0] sm:$0xff]  ;;  %615 = vst [vmem:[%s2248_s6 + $0x2e8] sm:$0xff] %v614_v35 }
  0x64   : > { %617 = vst [vmem:[%s2248_s6 + $0x2f0] sm:$0xff] %v616_v36  ;;  %619 = vst [vmem:[%s2248_s6 + $0x2f8] sm:$0xff] %v618_v37 }
  0x65 PF: > { %p1655_p0 = scmp.ge.s32.totalorder %s2106_s22, 1  ;;  %p632_p1 = scmp.lt.s32.totalorder %s2106_s22, 7 }
  0x67   : > { %p633_p2 = pnand %p1655_p0, %p632_p1 }
  0x68   : > { %s639_s0 = sand.u32 (!%p633_p2), 1, %s2082_s16   ;;  %s646_s23 = sand.u32 (!%p633_p2), 1, %s2074_s14  }
  0x69   : > { %636 = sbr.rel (%p633_p2) target bundleno = 476 (0x1dc), region = 85  ;;  %s673_s7 = sand.u32 (!%p633_p2), 1, %s2066_s12  }
  0x6a   : > { %s1776_s28 = smul.u32 (!%p633_p2), 48, %s639_s0  ;;  %s1656_s26 = sshll.u32 (!%p633_p2), %s673_s7, 4 }
  0x6b   : > { %s1777_s11 = smul.u32 (!%p633_p2), 768, %s646_s23  ;;  %s1657_s27 = sshll.u32 (!%p633_p2), %s2094_s19, 1 }
  0x6c   : > { %p681_p3 = scmp.lt.s32.totalorder (!%p633_p2), %s1657_s27, 3  ;;  %s2451_s6 = scalar_lea.vmem (!%p633_p2), [#allocation3], %s1776_s28 }
  0x6d   : > { %s2453_s1 = scalar_lea.vmem (!%p633_p2), [#allocation4], %s1777_s11  ;;  %s2455_s25 = scalar_lea.vmem (!%p633_p2), [#allocation5], %s1656_s26 }
  0x6e   : > { %s2640_s27 = smov (!%p681_p3, %s1657_s27), 3  ;;  %p1658_p4 = scmp.ne.s32.totalorder %s2090_s18, 0 }
  0x6f   : > { %s683_s5 = scalar_lea.vmem %s2611_s2, %s2640_s27 }
  0x70   : > { %690 = sbr.rel (%p1658_p4) target bundleno = 120 (0x78), region = 97 }
  0x75   : > { %v2108_v38 = vmov 0.0  }
  0x76   : > { %691 = vst [vmem:[#allocation2 + $0x10] sm:$0xff] %v2108_v38  ;;  %692 = vst [vmem:[#allocation2] sm:$0xff] %v2108_v38 }
  0x77   : > { %693 = vst [vmem:[#allocation2 + $0x18] sm:$0xff] %v2108_v38  ;;  %694 = vst [vmem:[#allocation2 + $0x8] sm:$0xff] %v2108_v38 }
  0x78 PF: > { %v1867_v39 = vld [vmem:[%s2453_s1 + $0x74] ss:$8 sps:$4 sm:$0xff]   ;;  %v1871_v41 = vld [vmem:[%s2453_s1 + $0x70] ss:$8 sps:$4 sm:$0xff]   ;;  %v1873_v43 = vld [vmem:[%s2453_s1 + $0x64] ss:$8 sps:$4 sm:$0xff]  }
  0x79   : > { %v1869_v40 = vld [vmem:[%s2453_s1 + $0x174] ss:$8 sps:$4 sm:$0xff]   ;;  %1311 = vmatprep.subr.bf16.mxu0 %v1867_v39  ;;  %v1872_v42 = vld [vmem:[%s2453_s1 + $0x170] ss:$8 sps:$4 sm:$0xff]   ;;  %v1875_v44 = vld [vmem:[%s2453_s1 + $0x164] ss:$8 sps:$4 sm:$0xff]  }
  0x7a   : > { %1354 = vmatprep.subr.bf16.mxu1 %v1869_v40  ;;  %1312 = vmatpush1.bf16.msra.mxu0 %v1871_v41  ;;  %v1877_v45 = vld [vmem:[%s2453_s1 + $0x60] ss:$8 sps:$4 sm:$0xff]   ;;  %v1879_v47 = vld [vmem:[%s2453_s1 + $0x54] ss:$8 sps:$4 sm:$0xff]   ;;  %v1883_v49 = vld [vmem:[%s2453_s1 + $0x50] ss:$8 sps:$4 sm:$0xff]  }
  0x7b   : > { %1355 = vmatpush1.bf16.msra.mxu1 %v1872_v42  ;;  %1313 = vmatprep.subr.bf16.mxu0 %v1873_v43  ;;  %v1878_v46 = vld [vmem:[%s2453_s1 + $0x160] ss:$8 sps:$4 sm:$0xff]   ;;  %v1881_v48 = vld [vmem:[%s2453_s1 + $0x154] ss:$8 sps:$4 sm:$0xff]   ;;  %v1884_v50 = vld [vmem:[%s2453_s1 + $0x150] ss:$8 sps:$4 sm:$0xff]  }
  0x7c   : > { %1356 = vmatprep.subr.bf16.mxu1 %v1875_v44  ;;  %v1885_v51 = vld [vmem:[%s2453_s1 + $0x44] ss:$8 sps:$4 sm:$0xff]   ;;  %v1889_v53 = vld [vmem:[%s2453_s1 + $0x40] ss:$8 sps:$4 sm:$0xff]   ;;  %v1891_v55 = vld [vmem:[%s2453_s1 + $0x34] ss:$8 sps:$4 sm:$0xff]  }
  0x7d   : > { %v1887_v52 = vld [vmem:[%s2453_s1 + $0x144] ss:$8 sps:$4 sm:$0xff]   ;;  %v1890_v54 = vld [vmem:[%s2453_s1 + $0x140] ss:$8 sps:$4 sm:$0xff]   ;;  %v1893_v56 = vld [vmem:[%s2453_s1 + $0x134] ss:$8 sps:$4 sm:$0xff]  }
  0x7e   : > { %1314 = vmatpush1.bf16.msra.mxu0 %v1877_v45  ;;  %v1895_v57 = vld [vmem:[%s2453_s1 + $0x30] ss:$8 sps:$4 sm:$0xff]   ;;  %v1897_v59 = vld [vmem:[%s2453_s1 + $0x24] ss:$8 sps:$4 sm:$0xff]   ;;  %v1901_v61 = vld [vmem:[%s2453_s1 + $0x20] ss:$8 sps:$4 sm:$0xff]  }
  0x7f   : > { %1357 = vmatpush1.bf16.msra.mxu1 %v1878_v46  ;;  %1315 = vmatprep.subr.bf16.mxu0 %v1879_v47  ;;  %v1896_v58 = vld [vmem:[%s2453_s1 + $0x130] ss:$8 sps:$4 sm:$0xff]   ;;  %v1899_v60 = vld [vmem:[%s2453_s1 + $0x124] ss:$8 sps:$4 sm:$0xff]   ;;  %v1902_v62 = vld [vmem:[%s2453_s1 + $0x120] ss:$8 sps:$4 sm:$0xff]  }
  0x80   : > { %1358 = vmatprep.subr.bf16.mxu1 %v1881_v48  ;;  %v1903_v63 = vld [vmem:[%s2453_s1 + $0x14] ss:$8 sps:$4 sm:$0xff]   ;;  %v1907_v1 = vld [vmem:[%s2453_s1 + $0x10] ss:$8 sps:$4 sm:$0xff]   ;;  %v1909_v3 = vld [vmem:[%s2453_s1 + $0x4] ss:$8 sps:$4 sm:$0xff]  }
  0x81   : > { %v1905_v0 = vld [vmem:[%s2453_s1 + $0x114] ss:$8 sps:$4 sm:$0xff]   ;;  %v1908_v2 = vld [vmem:[%s2453_s1 + $0x110] ss:$8 sps:$4 sm:$0xff]   ;;  %v1911_v4 = vld [vmem:[%s2453_s1 + $0x104] ss:$8 sps:$4 sm:$0xff]  }
  0x82   : > { %1316 = vmatpush1.bf16.msra.mxu0 %v1883_v49  ;;  %v1913_v5 = vld [vmem:[%s2453_s1] ss:$8 sps:$4 sm:$0xff]   ;;  %v1915_v7 = vld [vmem:[%s2453_s1 + $0xf4] ss:$8 sps:$4 sm:$0xff]   ;;  %v1919_v9 = vld [vmem:[%s2453_s1 + $0xf0] ss:$8 sps:$4 sm:$0xff]  }
  0x83   : > { %1359 = vmatpush1.bf16.msra.mxu1 %v1884_v50  ;;  %1317 = vmatprep.subr.bf16.mxu0 %v1885_v51  ;;  %v1914_v6 = vld [vmem:[%s2453_s1 + $0x100] ss:$8 sps:$4 sm:$0xff]   ;;  %v1917_v8 = vld [vmem:[%s2453_s1 + $0x1f4] ss:$8 sps:$4 sm:$0xff]   ;;  %v1920_v10 = vld [vmem:[%s2453_s1 + $0x1f0] ss:$8 sps:$4 sm:$0xff]  }
  0x84   : > { %1360 = vmatprep.subr.bf16.mxu1 %v1887_v52  ;;  %v1921_v11 = vld [vmem:[%s2453_s1 + $0xe4] ss:$8 sps:$4 sm:$0xff]   ;;  %v1925_v13 = vld [vmem:[%s2453_s1 + $0xe0] ss:$8 sps:$4 sm:$0xff]   ;;  %v1927_v15 = vld [vmem:[%s2453_s1 + $0xd4] ss:$8 sps:$4 sm:$0xff]  }
  0x85   : > { %v1923_v12 = vld [vmem:[%s2453_s1 + $0x1e4] ss:$8 sps:$4 sm:$0xff]   ;;  %v1926_v14 = vld [vmem:[%s2453_s1 + $0x1e0] ss:$8 sps:$4 sm:$0xff]   ;;  %v1929_v16 = vld [vmem:[%s2453_s1 + $0x1d4] ss:$8 sps:$4 sm:$0xff]  }
  0x86   : > { %1318 = vmatpush1.bf16.msra.mxu0 %v1889_v53  ;;  %v1931_v17 = vld [vmem:[%s2453_s1 + $0xd0] ss:$8 sps:$4 sm:$0xff]   ;;  %v1933_v19 = vld [vmem:[%s2453_s1 + $0xc4] ss:$8 sps:$4 sm:$0xff]   ;;  %v1937_v21 = vld [vmem:[%s2453_s1 + $0xc0] ss:$8 sps:$4 sm:$0xff]  }
  0x87   : > { %1361 = vmatpush1.bf16.msra.mxu1 %v1890_v54  ;;  %1319 = vmatprep.subr.bf16.mxu0 %v1891_v55  ;;  %v1932_v18 = vld [vmem:[%s2453_s1 + $0x1d0] ss:$8 sps:$4 sm:$0xff]   ;;  %v1935_v20 = vld [vmem:[%s2453_s1 + $0x1c4] ss:$8 sps:$4 sm:$0xff]   ;;  %v1938_v22 = vld [vmem:[%s2453_s1 + $0x1c0] ss:$8 sps:$4 sm:$0xff]  }
  0x88   : > { %1362 = vmatprep.subr.bf16.mxu1 %v1893_v56  ;;  %v1939_v23 = vld [vmem:[%s2453_s1 + $0xb4] ss:$8 sps:$4 sm:$0xff]   ;;  %v1943_v27 = vld [vmem:[%s2453_s1 + $0xb0] ss:$8 sps:$4 sm:$0xff]   ;;  %v1945_v29 = vld [vmem:[%s2453_s1 + $0xa4] ss:$8 sps:$4 sm:$0xff]  }
  0x89   : > { %v1965_v24 = vld [vmem:[%s2451_s6 + $0x4] ss:$24 sps:$4 sm:$0xff]   ;;  %v1944_v28 = vld [vmem:[%s2453_s1 + $0x1b0] ss:$8 sps:$4 sm:$0xff]   ;;  %v1949_v31 = vld [vmem:[%s2453_s1 + $0xa0] ss:$8 sps:$4 sm:$0xff]  }
  0x8a   : > { %1320 = vmatpush1.bf16.msra.mxu0 %v1895_v57  ;;  %v1941_v25 = vld [vmem:[%s2453_s1 + $0x1b4] ss:$8 sps:$4 sm:$0xff]   ;;  %1343 = vmatprep.mubr.bf16.mxu0 %v1965_v24  ;;  %v1947_v30 = vld [vmem:[%s2453_s1 + $0x1a4] ss:$8 sps:$4 sm:$0xff]   ;;  %v1950_v32 = vld [vmem:[%s2453_s1 + $0x1a0] ss:$8 sps:$4 sm:$0xff]  }
  0x8b   : > { %1363 = vmatpush1.bf16.msra.mxu1 %v1896_v58  ;;  %1321 = vmatprep.subr.bf16.mxu0 %v1897_v59  ;;  %v1968_v26 = vld [vmem:[%s2451_s6 + $0xc] ss:$24 sps:$4 sm:$0xff]   ;;  %v1955_v35 = vld [vmem:[%s2453_s1 + $0x90] ss:$8 sps:$4 sm:$0xff]   ;;  %v1961_v39 = vld [vmem:[%s2453_s1 + $0x80] ss:$8 sps:$4 sm:$0xff]  }
  0x8c   : > { %1364 = vmatprep.subr.bf16.mxu1 %v1899_v60  ;;  %1386 = vmatprep.mubr.bf16.mxu1 %v1968_v26  ;;  %v1951_v33 = vld [vmem:[%s2453_s1 + $0x94] ss:$8 sps:$4 sm:$0xff]   ;;  %v1956_v36 = vld [vmem:[%s2453_s1 + $0x190] ss:$8 sps:$4 sm:$0xff]   ;;  %v1957_v37 = vld [vmem:[%s2453_s1 + $0x84] ss:$8 sps:$4 sm:$0xff]  }
  0x8d   : > { %v1953_v34 = vld [vmem:[%s2453_s1 + $0x194] ss:$8 sps:$4 sm:$0xff]   ;;  %v1959_v38 = vld [vmem:[%s2453_s1 + $0x184] ss:$8 sps:$4 sm:$0xff]   ;;  %v1962_v40 = vld [vmem:[%s2453_s1 + $0x180] ss:$8 sps:$4 sm:$0xff]  }
  0x8e   : > { %1322 = vmatpush1.bf16.msra.mxu0 %v1901_v61  ;;  %v1971_v41 = vld [vmem:[%s2453_s1 + $0x274] ss:$8 sps:$4 sm:$0xff]   ;;  %v1963_v42 = vld [vmem:[%s2451_s6] ss:$24 sps:$4 sm:$0xff]   ;;  %v1974_v45 = vld [vmem:[%s2453_s1 + $0x264] ss:$8 sps:$4 sm:$0xff]  }
  0x8f   : > { %1365 = vmatpush1.bf16.msra.mxu1 %v1902_v62  ;;  %1323 = vmatprep.subr.bf16.mxu0 %v1903_v63  ;;  %v1966_v43 = vld [vmem:[%s2451_s6 + $0x8] ss:$24 sps:$4 sm:$0xff]   ;;  %v2019_v46 = vld [vmem:[%s2451_s6 + $0x14] ss:$24 sps:$4 sm:$0xff]   ;;  %p1761_p5 = scmp.ne.s32.totalorder %s2090_s18, 2 }
  0x90   : > { %1366 = vmatprep.subr.bf16.mxu1 %v1905_v0  ;;  %v1969_v44 = vld [vmem:[%s2453_s1 + $0x270] ss:$8 sps:$4 sm:$0xff]   ;;  %v1972_v47 = vld [vmem:[%s2453_s1 + $0x260] ss:$8 sps:$4 sm:$0xff]   ;;  %v1977_v48 = vld [vmem:[%s2453_s1 + $0x254] ss:$8 sps:$4 sm:$0xff]  }
  0x91   : > { %v1975_v49 = vld [vmem:[%s2453_s1 + $0x250] ss:$8 sps:$4 sm:$0xff]   ;;  %v1980_v50 = vld [vmem:[%s2453_s1 + $0x244] ss:$8 sps:$4 sm:$0xff]   ;;  %v1978_v51 = vld [vmem:[%s2453_s1 + $0x240] ss:$8 sps:$4 sm:$0xff]  }
  0x92   : > { %1324 = vmatpush1.bf16.msra.mxu0 %v1907_v1  ;;  %v1983_v52 = vld [vmem:[%s2453_s1 + $0x234] ss:$8 sps:$4 sm:$0xff]   ;;  %v1981_v53 = vld [vmem:[%s2453_s1 + $0x230] ss:$8 sps:$4 sm:$0xff]   ;;  %v1986_v54 = vld [vmem:[%s2453_s1 + $0x224] ss:$8 sps:$4 sm:$0xff]  }
  0x93   : > { %1367 = vmatpush1.bf16.msra.mxu1 %v1908_v2  ;;  %1325 = vmatprep.subr.bf16.mxu0 %v1909_v3  ;;  %v1984_v55 = vld [vmem:[%s2453_s1 + $0x220] ss:$8 sps:$4 sm:$0xff]   ;;  %v1989_v56 = vld [vmem:[%s2453_s1 + $0x214] ss:$8 sps:$4 sm:$0xff]   ;;  %v1987_v57 = vld [vmem:[%s2453_s1 + $0x210] ss:$8 sps:$4 sm:$0xff]  }
  0x94   : > { %1368 = vmatprep.subr.bf16.mxu1 %v1911_v4  ;;  %v1992_v58 = vld [vmem:[%s2453_s1 + $0x204] ss:$8 sps:$4 sm:$0xff]   ;;  %v1990_v59 = vld [vmem:[%s2453_s1 + $0x200] ss:$8 sps:$4 sm:$0xff]   ;;  %v1995_v60 = vld [vmem:[%s2453_s1 + $0x2f4] ss:$8 sps:$4 sm:$0xff]  }
  0x95   : > { %v1993_v61 = vld [vmem:[%s2453_s1 + $0x2f0] ss:$8 sps:$4 sm:$0xff]   ;;  %v1998_v62 = vld [vmem:[%s2453_s1 + $0x2e4] ss:$8 sps:$4 sm:$0xff]   ;;  %v1996_v63 = vld [vmem:[%s2453_s1 + $0x2e0] ss:$8 sps:$4 sm:$0xff]  }
  0x96   : > { %1326 = vmatpush1.bf16.msra.mxu0 %v1913_v5  ;;  %v2001_v0 = vld [vmem:[%s2453_s1 + $0x2d4] ss:$8 sps:$4 sm:$0xff]   ;;  %v1999_v1 = vld [vmem:[%s2453_s1 + $0x2d0] ss:$8 sps:$4 sm:$0xff]   ;;  %v2004_v2 = vld [vmem:[%s2453_s1 + $0x2c4] ss:$8 sps:$4 sm:$0xff]  }
  0x97   : > { %1369 = vmatpush1.bf16.msra.mxu1 %v1914_v6  ;;  %1327 = vmatprep.subr.bf16.mxu0 %v1915_v7  ;;  %v2002_v3 = vld [vmem:[%s2453_s1 + $0x2c0] ss:$8 sps:$4 sm:$0xff]   ;;  %v2007_v4 = vld [vmem:[%s2453_s1 + $0x2b4] ss:$8 sps:$4 sm:$0xff]   ;;  %v2005_v5 = vld [vmem:[%s2453_s1 + $0x2b0] ss:$8 sps:$4 sm:$0xff]  }
  0x98   : > { %1370 = vmatprep.subr.bf16.mxu1 %v1917_v8  ;;  %v2010_v6 = vld [vmem:[%s2453_s1 + $0x2a4] ss:$8 sps:$4 sm:$0xff]   ;;  %v2008_v7 = vld [vmem:[%s2453_s1 + $0x2a0] ss:$8 sps:$4 sm:$0xff]   ;;  %v2013_v8 = vld [vmem:[%s2453_s1 + $0x294] ss:$8 sps:$4 sm:$0xff]  }
  0x99   : > { %v696_v26 = vld [vmem:[#allocation2] sm:$0xff] }
  0x9a   : > { %1328 = vmatpush2.bf16.msra.mxu0 %v1919_v9  ;;  %v2011_v9 = vld [vmem:[%s2453_s1 + $0x290] ss:$8 sps:$4 sm:$0xff]  }
  0x9b   : > { %1371 = vmatpush2.bf16.msra.mxu1 %v1920_v10  ;;  %1329 = vmatprep.subr.bf16.mxu0 %v1921_v11  ;;  %v2016_v10 = vld [vmem:[%s2453_s1 + $0x284] ss:$8 sps:$4 sm:$0xff]   ;;  %v2014_v11 = vld [vmem:[%s2453_s1 + $0x280] ss:$8 sps:$4 sm:$0xff]  }
  0x9c   : > { %1372 = vmatprep.subr.bf16.mxu1 %v1923_v12  ;;  %v2017_v12 = vld [vmem:[%s2451_s6 + $0x10] ss:$24 sps:$4 sm:$0xff]  }
  0x9e   : > { %1330 = vmatpush2.bf16.msra.mxu0 %v1925_v13 }
  0x9f   : > { %1373 = vmatpush2.bf16.msra.mxu1 %v1926_v14  ;;  %1331 = vmatprep.subr.bf16.mxu0 %v1927_v15 }
  0xa0   : > { %1374 = vmatprep.subr.bf16.mxu1 %v1929_v16 }
  0xa2   : > { %1332 = vmatpush2.bf16.msra.mxu0 %v1931_v17 }
  0xa3   : > { %1375 = vmatpush2.bf16.msra.mxu1 %v1932_v18  ;;  %1333 = vmatprep.subr.bf16.mxu0 %v1933_v19 }
  0xa4   : > { %1376 = vmatprep.subr.bf16.mxu1 %v1935_v20 }
  0xa6   : > { %1334 = vmatpush2.bf16.msra.mxu0 %v1937_v21  ;;  %v695_v21 = vld [vmem:[#allocation2 + $0x10] sm:$0xff] }
  0xa7   : > { %1377 = vmatpush2.bf16.msra.mxu1 %v1938_v22  ;;  %1335 = vmatprep.subr.bf16.mxu0 %v1939_v23 }
  0xa8   : > { %1378 = vmatprep.subr.bf16.mxu1 %v1941_v25 }
  0xaa   : > { %1336 = vmatpush2.bf16.msra.mxu0 %v1943_v27 }
  0xab   : > { %1379 = vmatpush2.bf16.msra.mxu1 %v1944_v28  ;;  %1337 = vmatprep.subr.bf16.mxu0 %v1945_v29 }
  0xac   : > { %1380 = vmatprep.subr.bf16.mxu1 %v1947_v30 }
  0xae   : > { %1338 = vmatpush2.bf16.msra.mxu0 %v1949_v31  ;;  %v697_v31 = vld [vmem:[#allocation2 + $0x18] sm:$0xff] }
  0xaf   : > { %1381 = vmatpush2.bf16.msra.mxu1 %v1950_v32  ;;  %1339 = vmatprep.subr.bf16.mxu0 %v1951_v33 }
  0xb0   : > { %1382 = vmatprep.subr.bf16.mxu1 %v1953_v34 }
  0xb2   : > { %1340 = vmatpush2.bf16.msra.mxu0 %v1955_v35 }
  0xb3   : > { %1383 = vmatpush2.bf16.msra.mxu1 %v1956_v36  ;;  %1341 = vmatprep.subr.bf16.mxu0 %v1957_v37  ;;  %v698_v36 = vld [vmem:[#allocation2 + $0x8] sm:$0xff] }
  0xb4   : > { %1384 = vmatprep.subr.bf16.mxu1 %v1959_v38 }
  0xb6   : > { %1342 = vmatpush2.bf16.msra.mxu0 %v1961_v39 }
  0xb7   : > { %1385 = vmatpush2.bf16.msra.mxu1 %v1962_v40  ;;  %1397 = vmatprep.subr.bf16.mxu0 %v1971_v41 }
  0xb9   : > { %1344 = vmatmul.mubr.bf16.vlgmr.msra.gmra.mxu0 %v1963_v42 }
  0xba   : > { %1387 = vmatmul.mubr.bf16.vlgmr.msra.gmra.mxu1 %v1966_v43  ;;  %1398 = vmatpush1.bf16.msra.mxu0 %v1969_v44 }
  0xbb   : > { %1399 = vmatprep.subr.bf16.mxu0 %v1974_v45  ;;  %1429 = vmatprep.mubr.bf16.mxu0 %v2019_v46 }
  0xbe   : > { %1400 = vmatpush1.bf16.msra.mxu0 %v1972_v47 }
  0xbf   : > { %1401 = vmatprep.subr.bf16.mxu0 %v1977_v48 }
  0xc2   : > { %1402 = vmatpush1.bf16.msra.mxu0 %v1975_v49 }
  0xc3   : > { %1403 = vmatprep.subr.bf16.mxu0 %v1980_v50 }
  0xc6   : > { %1404 = vmatpush1.bf16.msra.mxu0 %v1978_v51 }
  0xc7   : > { %1405 = vmatprep.subr.bf16.mxu0 %v1983_v52 }
  0xca   : > { %1406 = vmatpush1.bf16.msra.mxu0 %v1981_v53 }
  0xcb   : > { %1407 = vmatprep.subr.bf16.mxu0 %v1986_v54 }
  0xce   : > { %1408 = vmatpush1.bf16.msra.mxu0 %v1984_v55 }
  0xcf   : > { %1409 = vmatprep.subr.bf16.mxu0 %v1989_v56 }
  0xd2   : > { %1410 = vmatpush1.bf16.msra.mxu0 %v1987_v57 }
  0xd3   : > { %1411 = vmatprep.subr.bf16.mxu0 %v1992_v58 }
  0xd6   : > { %1412 = vmatpush1.bf16.msra.mxu0 %v1990_v59 }
  0xd7   : > { %1413 = vmatprep.subr.bf16.mxu0 %v1995_v60 }
  0xda   : > { %1414 = vmatpush2.bf16.msra.mxu0 %v1993_v61 }
  0xdb   : > { %1415 = vmatprep.subr.bf16.mxu0 %v1998_v62 }
  0xde   : > { %1416 = vmatpush2.bf16.msra.mxu0 %v1996_v63 }
  0xdf   : > { %1417 = vmatprep.subr.bf16.mxu0 %v2001_v0 }
  0xe2   : > { %1418 = vmatpush2.bf16.msra.mxu0 %v1999_v1 }
  0xe3   : > { %1419 = vmatprep.subr.bf16.mxu0 %v2004_v2 }
  0xe6   : > { %1420 = vmatpush2.bf16.msra.mxu0 %v2002_v3 }
  0xe7   : > { %1421 = vmatprep.subr.bf16.mxu0 %v2007_v4 }
  0xea   : > { %1422 = vmatpush2.bf16.msra.mxu0 %v2005_v5 }
  0xeb   : > { %1423 = vmatprep.subr.bf16.mxu0 %v2010_v6 }
  0xee   : > { %1424 = vmatpush2.bf16.msra.mxu0 %v2008_v7 }
  0xef   : > { %1425 = vmatprep.subr.bf16.mxu0 %v2013_v8 }
  0xf2   : > { %1426 = vmatpush2.bf16.msra.mxu0 %v2011_v9 }
  0xf3   : > { %1427 = vmatprep.subr.bf16.mxu0 %v2016_v10 }
  0xf6   : > { %1428 = vmatpush2.bf16.msra.mxu0 %v2014_v11 }
  0xf9   : > { %1430 = vmatmul.mubr.bf16.vlgmr.msra.gmra.mxu0 %v2017_v12 }
 0x179   : > { %v1345_v13 = vpop.f32.mrf.mxu0 }
 0x17a   : > { %v1388_v14 = vpop.f32.mrf.mxu1 }
 0x17b   : > { %v1347_v15 = vpop.f32.mrf.mxu0  ;;  %v1389_v20 = vadd.f32 %v1388_v14, %v1345_v13 }
 0x17c   : > { %v1390_v16 = vpop.f32.mrf.mxu1 }
 0x17d   : > { %v1349_v17 = vpop.f32.mrf.mxu0  ;;  %v1391_v23 = vadd.f32 %v1390_v16, %v1347_v15 }
 0x17e   : > { %v1392_v18 = vpop.f32.mrf.mxu1 }
 0x17f   : > { %v1351_v19 = vpop.f32.mrf.mxu0  ;;  %v1393_v28 = vadd.f32 %v1392_v18, %v1349_v17 }
 0x180   : > { %v1394_v25 = vpop.f32.mrf.mxu1 }
 0x181   : > { %v1395_v33 = vadd.f32 %v1394_v25, %v1351_v19 }
 0x1b9   : > { %v1431_v22 = vpop.f32.mrf.mxu0 }
 0x1ba   : > { %v1432_v24 = vadd.f32 %v1431_v22, %v1389_v20 }
 0x1bb   : > { %v1433_v27 = vpop.f32.mrf.mxu0 }
 0x1bc   : > { %v1440_v29 = vadd.f32 %v1432_v24, %v695_v21  ;;  %v1434_v30 = vadd.f32 %v1433_v27, %v1391_v23 }
 0x1bd   : > { %v1435_v32 = vpop.f32.mrf.mxu0 }
 0x1be   : > { %1444 = vst [vmem:[#allocation2 + $0x10] sm:$0xff] %v1440_v29  ;;  %v1441_v34 = vadd.f32 %v1434_v30, %v696_v26  ;;  %v1436_v35 = vadd.f32 %v1435_v32, %v1393_v28 }
 0x1bf   : > { %v1437_v37 = vpop.f32.mrf.mxu0 }
 0x1c0   : > { %1445 = vst [vmem:[#allocation2] sm:$0xff] %v1441_v34  ;;  %v1442_v38 = vadd.f32 %v1436_v35, %v697_v31  ;;  %v1438_v39 = vadd.f32 %v1437_v37, %v1395_v33  ;;  %1451 = sbr.rel (%p1761_p5) target bundleno = 468 (0x1d4), region = 101 }
 0x1c2   : > { %1446 = vst [vmem:[#allocation2 + $0x18] sm:$0xff] %v1442_v38  ;;  %v1443_v40 = vadd.f32 %v1438_v39, %v698_v36 }
 0x1c4   : > { %1447 = vst [vmem:[#allocation2 + $0x8] sm:$0xff] %v1443_v40 }
 0x1c5   : > { %v1458_v41 = vlaneseq  ;;  %v1456_v43 = vld [vmem:[%s683_s5] sm:$0x3]  ;;  %v1452_v44 = vld [vmem:[#allocation2 + $0x10] sm:$0xff] }
 0x1c7   : > { %v1459_v42 = vshrl.u32 %v1458_v41, 7  ;;  %v1453_v47 = vld [vmem:[#allocation2] sm:$0xff] }
 0x1c9   : > { %v1460_v45 = vsub.s32 0, %v1459_v42  ;;  %v1464_v46 = vsub.s32 1, %v1459_v42  ;;  %v1454_v48 = vld [vmem:[#allocation2 + $0x18] sm:$0xff] }
 0x1cb   : > { %v1455_v49 = vld [vmem:[#allocation2 + $0x8] sm:$0xff]  ;;  %v1461_v50 = vrot.slane %v1456_v43, %v1460_v45  ;;  %v1465_v51 = vrot.slane %v1456_v43, %v1464_v46 }
 0x1cd   : > { %v1468_v52 = vadd.f32 %v1461_v50, %v1452_v44  ;;  %v1469_v53 = vadd.f32 %v1465_v51, %v1453_v47  ;;  %v1470_v54 = vadd.f32 %v1461_v50, %v1454_v48  ;;  %v1471_v55 = vadd.f32 %v1465_v51, %v1455_v49 }
 0x1cf   : > { %v1472_v56 = vmax.f32 %v1468_v52, 0.0  ;;  %v1473_v57 = vmax.f32 %v1469_v53, 0.0  ;;  %v1474_v58 = vmax.f32 %v1470_v54, 0.0  ;;  %v1475_v59 = vmax.f32 %v1471_v55, 0.0 }
 0x1d1   : > { %v1771_v60 = vpack.c.bf16 %v1473_v57, %v1472_v56  ;;  %v1772_v61 = vpack.c.bf16 %v1475_v59, %v1474_v58 }
 0x1d3   : > { %1488 = vst [vmem:[%s2455_s25] sm:$0xff] %v1771_v60  ;;  %1489 = vst [vmem:[%s2455_s25 + $0x8] sm:$0xff] %v1772_v61 }
 0x1d4 PF: > { %1496 = sbr.rel (!%p2223_p12) target bundleno = 476 (0x1dc), region = 105  ;;  %s1773_s14 = sshll.u32 (%p2223_p12), %s2094_s19, 3 }
 0x1d5   : > { %s1502_s0 = scalar_lea.vmem (%p2223_p12), %s2612_s3, %s1773_s14 }
 0x1da   : > { %v1533_v62 = vld [vmem:[%s2455_s25] sm:$0xff]  ;;  %v1535_v63 = vld [vmem:[%s2455_s25 + $0x8] sm:$0xff] }
 0x1db   : > { %1534 = vst [vmem:[%s1502_s0] sm:$0xff] %v1533_v62  ;;  %1536 = vst [vmem:[%s1502_s0 + $0x10] sm:$0xff] %v1535_v63 }
 0x1dc PF: > { %s13_s22 = sadd.s32 1, %s2106_s22   ;;  %s2622_s25 = sld [smem:[#allocation6_spill]] }
 0x1dd   : > { %p10_p6 = scmp.ge.s32.totalorder %s13_s22, 8   ;;  %s2623_s12 = smov %s2070_s13 }
 0x1de   : > { %s2624_s13 = smov %s2221_s9  ;;  %s2625_s14 = smov %s2078_s15 }
 0x1df   : > { %s2626_s15 = smov %s2218_s8  ;;  %s2627_s16 = smov %s2086_s17 }
 0x1e0   : > { %s2628_s17 = smov %s2204_s30  ;;  %s2629_s18 = smov %s2098_s20 }
 0x1e1   : > { %s2630_s19 = smov %s2102_s21  ;;  %s2631_s20 = smov %s2634_s24 }
 0x1e2   : > { %s2632_s21 = smov %s2622_s25  ;;  %12 = sbr.rel (!%p10_p6) target bundleno = 9 (0x9), region = 185 }

// kernel: resnet_forward.36
= control target key start
LH: loop header
LB: loop body
LE: loop exit
PB: predicated region body
PF: predicated region fallthrough
CT: control target
= control target key end

     0   :  { %s1081_s12 = smov 0   ;;  %s1083_s13 = smov 0   ;;  %s1269_s0 = inlined_call_operand.vmem [shape: bf16[16,256], index: 0, kind: input, shape index: {}]   ;;  %s1270_s1 = inlined_call_operand.vmem [shape: bf16[256,512], index: 1, kind: input, shape index: {}]   ;;  %s1271_s2 = inlined_call_operand.vmem [shape: f32[1,512], index: 2, kind: input, shape index: {}]   ;;  %s1272_s3 = inlined_call_operand.vmem [shape: bf16[16,512], index: 3, kind: output, shape index: {}]  }
   0x1   :  { %s1085_s14 = smov 0   ;;  %s1087_s15 = smov 0  }
   0x2   :  { %s1089_s16 = smov 0  }
   0x3 LB: > { %s28_s17 = sadd.s32 1, %s1055_s15  ;;  %s873_s18 = sadd.s32 4294967295, %s1059_s16   ;;  %s1059_s16 = sphi %s1089_s16, %s13_s16   ;;  %s1055_s15 = sphi %s1087_s15, %s1277_s15   ;;  %s1051_s14 = sphi %s1085_s14, %s1276_s14   ;;  %s1047_s13 = sphi %s1083_s13, %s1275_s13   ;;  %s1043_s12 = sphi %s1081_s12, %s1274_s12  }
   0x4   : > { %p30_p0 = scmp.ge.s32.totalorder %s28_s17, 2  ;;  %p76_p1 = scmp.ne.s32.totalorder %s1047_s13, %s1043_s12 }
   0x5   : > { %p77_p2 = scmp.eq.s32.totalorder %s1059_s16, 0  ;;  %p134_p4 = scmp.eq.s32.totalorder %s873_s18, 1 }
   0x6   : > { %s1279_s17 = smov (%p30_p0, %s28_s17), 0  ;;  %s69_s20 = sadd.s32 1, %s1047_s13 }
   0x7   : > { %p78_p3 = por %p77_p2, %p76_p1  ;;  %s65_s19 = ssub.s32 %s1055_s15, %s1279_s17 }
   0x8   : > { %p67_p5 = scmp.eq.s32.totalorder %s65_s19, 0  ;;  %p1116_p6 = por %p134_p4, %p76_p1 }
   0x9   : > { %p877_p7 = scmp.ge.s32.totalorder %s1059_s16, 2 }
   0xa   : > { %s1121_s22 = scalar_select %p67_p5, %s1047_s13, %s69_s20  }
   0xb   : > { %171 = sbr.rel (%p877_p7) target bundleno = 36 (0x24), region = 20 }
  0x10   : > { %174 = sbr.rel (!%p78_p3) target bundleno = 36 (0x24), region = 24  ;;  %s176_s23 = sand.u32 (%p78_p3), 1, %s1047_s13  }
  0x11   : > { %s926_s24 = sshll.u32 (%p78_p3), %s1055_s15, 3  ;;  %s878_s25 = sshll.u32 (%p78_p3), %s176_s23, 8 }
  0x12   : > { %s1129_s28 = scalar_lea.vmem (%p78_p3), %s1270_s1, %s926_s24  ;;  %s1134_s29 = scalar_lea.vmem (%p78_p3), [#allocation3], %s878_s25 }
  0x13   : > { %v275_v0 = vld [vmem:[%s1129_s28] sm:$0xff] (%p78_p3)  ;;  %v277_v1 = vld [vmem:[%s1129_s28 + $0x10] sm:$0xff] (%p78_p3) }
  0x14   : > { %v279_v2 = vld [vmem:[%s1129_s28 + $0x20] sm:$0xff] (%p78_p3)  ;;  %276 = vst [vmem:[%s1134_s29] sm:$0xff] (%p78_p3), %v275_v0  ;;  %278 = vst [vmem:[%s1134_s29 + $0x8] sm:$0xff] (%p78_p3), %v277_v1  ;;  %v281_v3 = vld [vmem:[%s1129_s28 + $0x30] sm:$0xff] (%p78_p3) }
  0x15   : > { %280 = vst [vmem:[%s1134_s29 + $0x10] sm:$0xff] %v279_v2  ;;  %v283_v4 = vld [vmem:[%s1129_s28 + $0x40] sm:$0xff]  ;;  %v285_v5 = vld [vmem:[%s1129_s28 + $0x50] sm:$0xff]  ;;  %282 = vst [vmem:[%s1134_s29 + $0x18] sm:$0xff] %v281_v3 }
  0x16   : > { %284 = vst [vmem:[%s1134_s29 + $0x20] sm:$0xff] %v283_v4  ;;  %286 = vst [vmem:[%s1134_s29 + $0x28] sm:$0xff] %v285_v5  ;;  %v287_v6 = vld [vmem:[%s1129_s28 + $0x60] sm:$0xff]  ;;  %v289_v7 = vld [vmem:[%s1129_s28 + $0x70] sm:$0xff] }
  0x17   : > { %v291_v8 = vld [vmem:[%s1129_s28 + $0x80] sm:$0xff]  ;;  %288 = vst [vmem:[%s1134_s29 + $0x30] sm:$0xff] %v287_v6  ;;  %290 = vst [vmem:[%s1134_s29 + $0x38] sm:$0xff] %v289_v7  ;;  %v293_v9 = vld [vmem:[%s1129_s28 + $0x90] sm:$0xff] }
  0x18   : > { %292 = vst [vmem:[%s1134_s29 + $0x40] sm:$0xff] %v291_v8  ;;  %v295_v10 = vld [vmem:[%s1129_s28 + $0xa0] sm:$0xff]  ;;  %v297_v11 = vld [vmem:[%s1129_s28 + $0xb0] sm:$0xff]  ;;  %294 = vst [vmem:[%s1134_s29 + $0x48] sm:$0xff] %v293_v9 }
  0x19   : > { %296 = vst [vmem:[%s1134_s29 + $0x50] sm:$0xff] %v295_v10  ;;  %298 = vst [vmem:[%s1134_s29 + $0x58] sm:$0xff] %v297_v11  ;;  %v299_v12 = vld [vmem:[%s1129_s28 + $0xc0] sm:$0xff]  ;;  %v301_v13 = vld [vmem:[%s1129_s28 + $0xd0] sm:$0xff] }
  0x1a   : > { %v303_v14 = vld [vmem:[%s1129_s28 + $0xe0] sm:$0xff]  ;;  %300 = vst [vmem:[%s1134_s29 + $0x60] sm:$0xff] %v299_v12  ;;  %302 = vst [vmem:[%s1134_s29 + $0x68] sm:$0xff] %v301_v13  ;;  %v305_v15 = vld [vmem:[%s1129_s28 + $0xf0] sm:$0xff] }
  0x1b   : > { %304 = vst [vmem:[%s1134_s29 + $0x70] sm:$0xff] %v303_v14  ;;  %v307_v16 = vld [vmem:[%s1129_s28 + $0x100] sm:$0xff]  ;;  %v309_v17 = vld [vmem:[%s1129_s28 + $0x110] sm:$0xff]  ;;  %306 = vst [vmem:[%s1134_s29 + $0x78] sm:$0xff] %v305_v15 }
  0x1c   : > { %308 = vst [vmem:[%s1134_s29 + $0x80] sm:$0xff] %v307_v16  ;;  %310 = vst [vmem:[%s1134_s29 + $0x88] sm:$0xff] %v309_v17  ;;  %v311_v18 = vld [vmem:[%s1129_s28 + $0x120] sm:$0xff]  ;;  %v313_v19 = vld [vmem:[%s1129_s28 + $0x130] sm:$0xff] }
  0x1d   : > { %v315_v20 = vld [vmem:[%s1129_s28 + $0x140] sm:$0xff]  ;;  %312 = vst [vmem:[%s1134_s29 + $0x90] sm:$0xff] %v311_v18  ;;  %314 = vst [vmem:[%s1134_s29 + $0x98] sm:$0xff] %v313_v19  ;;  %v317_v21 = vld [vmem:[%s1129_s28 + $0x150] sm:$0xff] }
  0x1e   : > { %316 = vst [vmem:[%s1134_s29 + $0xa0] sm:$0xff] %v315_v20  ;;  %v319_v22 = vld [vmem:[%s1129_s28 + $0x160] sm:$0xff]  ;;  %v321_v23 = vld [vmem:[%s1129_s28 + $0x170] sm:$0xff]  ;;  %318 = vst [vmem:[%s1134_s29 + $0xa8] sm:$0xff] %v317_v21 }
  0x1f   : > { %320 = vst [vmem:[%s1134_s29 + $0xb0] sm:$0xff] %v319_v22  ;;  %322 = vst [vmem:[%s1134_s29 + $0xb8] sm:$0xff] %v321_v23  ;;  %v323_v24 = vld [vmem:[%s1129_s28 + $0x180] sm:$0xff]  ;;  %v325_v25 = vld [vmem:[%s1129_s28 + $0x190] sm:$0xff] }
  0x20   : > { %v327_v26 = vld [vmem:[%s1129_s28 + $0x1a0] sm:$0xff]  ;;  %324 = vst [vmem:[%s1134_s29 + $0xc0] sm:$0xff] %v323_v24  ;;  %326 = vst [vmem:[%s1134_s29 + $0xc8] sm:$0xff] %v325_v25  ;;  %v329_v27 = vld [vmem:[%s1129_s28 + $0x1b0] sm:$0xff] }
  0x21   : > { %328 = vst [vmem:[%s1134_s29 + $0xd0] sm:$0xff] %v327_v26  ;;  %v331_v28 = vld [vmem:[%s1129_s28 + $0x1c0] sm:$0xff]  ;;  %v333_v29 = vld [vmem:[%s1129_s28 + $0x1d0] sm:$0xff]  ;;  %330 = vst [vmem:[%s1134_s29 + $0xd8] sm:$0xff] %v329_v27 }
  0x22   : > { %332 = vst [vmem:[%s1134_s29 + $0xe0] sm:$0xff] %v331_v28  ;;  %334 = vst [vmem:[%s1134_s29 + $0xe8] sm:$0xff] %v333_v29  ;;  %v335_v30 = vld [vmem:[%s1129_s28 + $0x1e0] sm:$0xff]  ;;  %v337_v31 = vld [vmem:[%s1129_s28 + $0x1f0] sm:$0xff] }
  0x23   : > { %336 = vst [vmem:[%s1134_s29 + $0xf0] sm:$0xff] %v335_v30  ;;  %338 = vst [vmem:[%s1134_s29 + $0xf8] sm:$0xff] %v337_v31 }
  0x24 PF: > { %p881_p8 = scmp.ge.s32.totalorder %s1059_s16, 1  ;;  %p351_p9 = scmp.lt.s32.totalorder %s1059_s16, 3 }
  0x26   : > { %p352_p10 = pnand %p881_p8, %p351_p9 }
  0x27   : > { %s358_s30 = sand.u32 (!%p352_p10), 1, %s1043_s12   ;;  %s884_s10 = sshll.u32 (!%p352_p10), %s1051_s14, 1 }
  0x28   : > { %355 = sbr.rel (%p352_p10) target bundleno = 322 (0x142), region = 66  ;;  %s882_s4 = sshll.u32 (!%p352_p10), %s358_s30, 8 }
  0x29   : > { %s1205_s7 = scalar_lea.vmem (!%p352_p10), [#allocation3], %s882_s4  ;;  %p409_p11 = scmp.lt.s32.totalorder (!%p352_p10), %s884_s10, 3 }
  0x2a   : > { %s883_s20 = sshll.u32 (!%p352_p10), %s358_s30, 4 }
  0x2b   : > { %s393_s23 = scalar_lea.vmem (!%p352_p10), [#allocation4], %s883_s20 }
  0x2d   : > { %v1020_v32 = vld [vmem:[%s1269_s0 + $0x4] ss:$8 sps:$4 sm:$0xff]   ;;  %v970_v33 = vld [vmem:[%s1205_s7 + $0x74] ss:$8 sps:$4 sm:$0xff]   ;;  %v972_v34 = vld [vmem:[%s1205_s7 + $0x70] ss:$8 sps:$4 sm:$0xff]   ;;  %v691_v2 = vlaneseq }
  0x2e   : > { %663 = vmatprep.mubr.bf16.mxu0 %v1020_v32  ;;  %631 = vmatprep.subr.bf16.mxu0 %v970_v33  ;;  %v973_v35 = vld [vmem:[%s1205_s7 + $0x64] ss:$8 sps:$4 sm:$0xff]   ;;  %v975_v36 = vld [vmem:[%s1205_s7 + $0x60] ss:$8 sps:$4 sm:$0xff]   ;;  %v976_v37 = vld [vmem:[%s1205_s7 + $0x54] ss:$8 sps:$4 sm:$0xff]  }
  0x2f   : > { %632 = vmatpush1.bf16.msra.mxu0 %v972_v34  ;;  %v978_v38 = vld [vmem:[%s1205_s7 + $0x50] ss:$8 sps:$4 sm:$0xff]   ;;  %v979_v39 = vld [vmem:[%s1205_s7 + $0x44] ss:$8 sps:$4 sm:$0xff]   ;;  %v981_v40 = vld [vmem:[%s1205_s7 + $0x40] ss:$8 sps:$4 sm:$0xff]  }
  0x30   : > { %633 = vmatprep.subr.bf16.mxu0 %v973_v35  ;;  %v982_v41 = vld [vmem:[%s1205_s7 + $0x34] ss:$8 sps:$4 sm:$0xff]   ;;  %v984_v42 = vld [vmem:[%s1205_s7 + $0x30] ss:$8 sps:$4 sm:$0xff]   ;;  %v985_v43 = vld [vmem:[%s1205_s7 + $0x24] ss:$8 sps:$4 sm:$0xff]  }
  0x31   : > { %v987_v44 = vld [vmem:[%s1205_s7 + $0x20] ss:$8 sps:$4 sm:$0xff]   ;;  %v988_v45 = vld [vmem:[%s1205_s7 + $0x14] ss:$8 sps:$4 sm:$0xff]   ;;  %v990_v46 = vld [vmem:[%s1205_s7 + $0x10] ss:$8 sps:$4 sm:$0xff]  }
  0x32   : > { %v991_v47 = vld [vmem:[%s1205_s7 + $0x4] ss:$8 sps:$4 sm:$0xff]   ;;  %v993_v48 = vld [vmem:[%s1205_s7] ss:$8 sps:$4 sm:$0xff]   ;;  %v994_v49 = vld [vmem:[%s1205_s7 + $0xf4] ss:$8 sps:$4 sm:$0xff]  }
  0x33   : > { %634 = vmatpush1.bf16.msra.mxu0 %v975_v36  ;;  %v996_v50 = vld [vmem:[%s1205_s7 + $0xf0] ss:$8 sps:$4 sm:$0xff]   ;;  %v997_v51 = vld [vmem:[%s1205_s7 + $0xe4] ss:$8 sps:$4 sm:$0xff]   ;;  %v999_v52 = vld [vmem:[%s1205_s7 + $0xe0] ss:$8 sps:$4 sm:$0xff]  }
  0x34   : > { %635 = vmatprep.subr.bf16.mxu0 %v976_v37  ;;  %v1000_v53 = vld [vmem:[%s1205_s7 + $0xd4] ss:$8 sps:$4 sm:$0xff]   ;;  %v1002_v54 = vld [vmem:[%s1205_s7 + $0xd0] ss:$8 sps:$4 sm:$0xff]   ;;  %v1003_v55 = vld [vmem:[%s1205_s7 + $0xc4] ss:$8 sps:$4 sm:$0xff]  }
  0x35   : > { %v1005_v56 = vld [vmem:[%s1205_s7 + $0xc0] ss:$8 sps:$4 sm:$0xff]   ;;  %v1006_v57 = vld [vmem:[%s1205_s7 + $0xb4] ss:$8 sps:$4 sm:$0xff]   ;;  %v1008_v58 = vld [vmem:[%s1205_s7 + $0xb0] ss:$8 sps:$4 sm:$0xff]  }
  0x36   : > { %v1009_v59 = vld [vmem:[%s1205_s7 + $0xa4] ss:$8 sps:$4 sm:$0xff]   ;;  %v1011_v60 = vld [vmem:[%s1205_s7 + $0xa0] ss:$8 sps:$4 sm:$0xff]   ;;  %v1012_v61 = vld [vmem:[%s1205_s7 + $0x94] ss:$8 sps:$4 sm:$0xff]  }
  0x37   : > { %636 = vmatpush1.bf16.msra.mxu0 %v978_v38  ;;  %v1014_v62 = vld [vmem:[%s1205_s7 + $0x90] ss:$8 sps:$4 sm:$0xff]   ;;  %v1015_v63 = vld [vmem:[%s1205_s7 + $0x84] ss:$8 sps:$4 sm:$0xff]   ;;  %v1017_v0 = vld [vmem:[%s1205_s7 + $0x80] ss:$8 sps:$4 sm:$0xff]  }
  0x38   : > { %637 = vmatprep.subr.bf16.mxu0 %v979_v39  ;;  %v1018_v1 = vld [vmem:[%s1269_s0] ss:$8 sps:$4 sm:$0xff]   ;;  %s1281_s10 = smov (!%p409_p11, %s884_s10), 3  ;;  %v692_v3 = vshrl.u32 %v691_v2, 7  ;;  %s929_s24 = sshll.u32 (%p1116_p6), %s1051_s14, 3 }
  0x39   : > { %s411_s19 = scalar_lea.vmem %s1271_s2, %s1281_s10  ;;  %s731_s26 = scalar_lea.vmem (%p1116_p6), %s1272_s3, %s929_s24 }
  0x3a   : > { %v693_v4 = vsub.s32 0, %v692_v3  ;;  %v697_v5 = vsub.s32 1, %v692_v3  ;;  %v689_v6 = vld [vmem:[%s411_s19] sm:$0x3] }
  0x3b   : > { %638 = vmatpush1.bf16.msra.mxu0 %v981_v40 }
  0x3c   : > { %639 = vmatprep.subr.bf16.mxu0 %v982_v41  ;;  %v694_v7 = vrot.slane %v689_v6, %v693_v4  ;;  %v698_v8 = vrot.slane %v689_v6, %v697_v5 }
  0x3f   : > { %640 = vmatpush1.bf16.msra.mxu0 %v984_v42 }
  0x40   : > { %641 = vmatprep.subr.bf16.mxu0 %v985_v43 }
  0x43   : > { %642 = vmatpush1.bf16.msra.mxu0 %v987_v44 }
  0x44   : > { %643 = vmatprep.subr.bf16.mxu0 %v988_v45 }
  0x47   : > { %644 = vmatpush1.bf16.msra.mxu0 %v990_v46 }
  0x48   : > { %645 = vmatprep.subr.bf16.mxu0 %v991_v47 }
  0x4b   : > { %646 = vmatpush1.bf16.msra.mxu0 %v993_v48 }
  0x4c   : > { %647 = vmatprep.subr.bf16.mxu0 %v994_v49 }
  0x4f   : > { %648 = vmatpush2.bf16.msra.mxu0 %v996_v50 }
  0x50   : > { %649 = vmatprep.subr.bf16.mxu0 %v997_v51 }
  0x53   : > { %650 = vmatpush2.bf16.msra.mxu0 %v999_v52 }
  0x54   : > { %651 = vmatprep.subr.bf16.mxu0 %v1000_v53 }
  0x57   : > { %652 = vmatpush2.bf16.msra.mxu0 %v1002_v54 }
  0x58   : > { %653 = vmatprep.subr.bf16.mxu0 %v1003_v55 }
  0x5b   : > { %654 = vmatpush2.bf16.msra.mxu0 %v1005_v56 }
  0x5c   : > { %655 = vmatprep.subr.bf16.mxu0 %v1006_v57 }
  0x5f   : > { %656 = vmatpush2.bf16.msra.mxu0 %v1008_v58 }
  0x60   : > { %657 = vmatprep.subr.bf16.mxu0 %v1009_v59 }
  0x63   : > { %658 = vmatpush2.bf16.msra.mxu0 %v1011_v60 }
  0x64   : > { %659 = vmatprep.subr.bf16.mxu0 %v1012_v61 }
  0x67   : > { %660 = vmatpush2.bf16.msra.mxu0 %v1014_v62 }
  0x68   : > { %661 = vmatprep.subr.bf16.mxu0 %v1015_v63 }
  0x6b   : > { %662 = vmatpush2.bf16.msra.mxu0 %v1017_v0 }
  0x6e   : > { %664 = vmatmul.mubr.bf16.vlgmr.msra.gmra.mxu0 %v1018_v1 }
 0x12e   : > { %v665_v9 = vpop.f32.mrf.mxu0 }
 0x12f   : > { %v701_v11 = vadd.f32 %v694_v7, %v665_v9 }
 0x130   : > { %v667_v10 = vpop.f32.mrf.mxu0 }
 0x131   : > { %v702_v12 = vadd.f32 %v698_v8, %v667_v10 }
 0x132   : > { %v669_v13 = vpop.f32.mrf.mxu0 }
 0x133   : > { %v927_v14 = vpack.c.bf16 %v702_v12, %v701_v11  ;;  %v703_v16 = vadd.f32 %v694_v7, %v669_v13 }
 0x134   : > { %v671_v15 = vpop.f32.mrf.mxu0 }
 0x135   : > { %717 = vst [vmem:[%s393_s23] sm:$0xff] %v927_v14  ;;  %v704_v17 = vadd.f32 %v698_v8, %v671_v15  ;;  %725 = sbr.rel (!%p1116_p6) target bundleno = 322 (0x142), region = 82 }
 0x137   : > { %v928_v18 = vpack.c.bf16 %v704_v17, %v703_v16 }
 0x139   : > { %718 = vst [vmem:[%s393_s23 + $0x8] sm:$0xff] %v928_v18 }
 0x13c   : > { %v762_v19 = vld [vmem:[%s393_s23] sm:$0xff] }
 0x13d   : > { %763 = vst [vmem:[%s731_s26] sm:$0xff] %v762_v19 }
 0x140   : > { %v764_v20 = vld [vmem:[%s393_s23 + $0x8] sm:$0xff] }
 0x141   : > { %765 = vst [vmem:[%s731_s26 + $0x10] sm:$0xff] %v764_v20 }
 0x142 PF: > { %s13_s16 = sadd.s32 1, %s1059_s16   ;;  %s1274_s12 = smov %s1047_s13 }
 0x143   : > { %p10_p12 = scmp.ge.s32.totalorder %s13_s16, 4   ;;  %s1275_s13 = smov %s1121_s22 }
 0x144   : > { %s1276_s14 = smov %s1055_s15  ;;  %s1277_s15 = smov %s1279_s17 }
 0x145   :  { %12 = sbr.rel (!%p10_p12) target bundleno = 3 (0x3), region = 157 }

// kernel: resnet_forward.38
= control target key start
LH: loop header
LB: loop body
LE: loop exit
PB: predicated region body
PF: predicated region fallthrough
CT: control target
= control target key end

     0   :  { %s2609_s0 = inlined_call_operand.vmem [shape: bf16[16,4608], index: 0, kind: input, shape index: {}]   ;;  %s2610_s1 = inlined_call_operand.vmem [shape: bf16[4608,512], index: 1, kind: input, shape index: {}]   ;;  %s2611_s2 = inlined_call_operand.vmem [shape: f32[1,512], index: 2, kind: input, shape index: {}]   ;;  %s2612_s3 = inlined_call_operand.vmem [shape: bf16[16,512], index: 3, kind: output, shape index: {}]  }
   0x1   :  { %2614 = sst [smem:[#allocation7_spill]] %s2609_s0 }
   0x2   :  { %2615 = sst [smem:[#allocation8_spill]] %s2610_s1 }
   0x3   :  { %s2129_s12 = smov 0   ;;  %s2131_s13 = smov 0  }
   0x4   :  { %s2133_s14 = smov 0   ;;  %s2135_s15 = smov 0  }
   0x5   :  { %s2137_s16 = smov 0   ;;  %s2139_s17 = smov 0  }
   0x6   :  { %s2141_s18 = smov 0   ;;  %s2143_s19 = smov 0  }
   0x7   :  { %s2145_s20 = smov 0   ;;  %s2147_s21 = smov 0  }
   0x8   :  { %s2149_s22 = smov 0  }
   0x9 LB: > { %s1647_s23 = sadd.s32 4294967295, %s2106_s22   ;;  %s25_s24 = sadd.s32 1, %s2098_s20  ;;  %s2106_s22 = sphi %s2149_s22, %s13_s22   ;;  %s2102_s21 = sphi %s2147_s21, %s2632_s21   ;;  %s2098_s20 = sphi %s2145_s20, %s2631_s20   ;;  %s2094_s19 = sphi %s2143_s19, %s2630_s19   ;;  %s2090_s18 = sphi %s2141_s18, %s2629_s18   ;;  %s2086_s17 = sphi %s2139_s17, %s2628_s17   ;;  %s2082_s16 = sphi %s2137_s16, %s2627_s16   ;;  %s2078_s15 = sphi %s2135_s15, %s2626_s15   ;;  %s2074_s14 = sphi %s2133_s14, %s2625_s14   ;;  %s2070_s13 = sphi %s2131_s13, %s2624_s13   ;;  %s2066_s12 = sphi %s2129_s12, %s2623_s12  }
   0xa   : > { %p26_p0 = scmp.ge.s32.totalorder %s25_s24, 6  ;;  %s28_s25 = sadd.s32 1, %s2102_s21 }
   0xb   : > { %s41_s26 = sadd.s32 1, %s2086_s17  ;;  %p48_p1 = scmp.ne.s32.totalorder %s2086_s17, %s2082_s16 }
   0xc   : > { %s2634_s24 = smov (%p26_p0, %s25_s24), 0  ;;  %s2636_s25 = smov (!%p26_p0, %s28_s25), %s2102_s21 }
   0xd   : > { %s37_s27 = ssub.s32 %s2098_s20, %s2634_s24  ;;  %p49_p2 = scmp.eq.s32.totalorder %s2106_s22, 0 }
   0xe   : > { %p30_p3 = scmp.ge.s32.totalorder %s2636_s25, 2  ;;  %p39_p4 = scmp.eq.s32.totalorder %s37_s27, 0 }
   0xf   : > { %p2196_p5 = por %p49_p2, %p48_p1  ;;  %s69_s29 = sadd.s32 1, %s2078_s15 }
  0x10   : > { %s2638_s25 = smov (%p30_p3, %s2636_s25), 0  ;;  %p76_p6 = scmp.ne.s32.totalorder %s2078_s15, %s2074_s14 }
  0x11   : > { %2617 = sst [smem:[#allocation6_spill]] %s2638_s25  ;;  %s65_s4 = ssub.s32 %s2102_s21, %s2638_s25 }
  0x12   : > { %s2204_s30 = scalar_select %p39_p4, %s2086_s17, %s41_s26  }
  0x13   : > { %s66_s5 = sor.u32 %s65_s4, %s37_s27  ;;  %p121_p7 = scmp.eq.s32.totalorder %s65_s4, 0 }
  0x14   : > { %p67_p8 = scmp.eq.s32.totalorder %s66_s5, 0  ;;  %p2210_p9 = por %p76_p6, %p49_p2 }
  0x15   : > { %s123_s7 = sadd.s32 1, %s2070_s13  ;;  %p133_p10 = scmp.ne.s32.totalorder %s2070_s13, %s2066_s12 }
  0x16   : > { %s2218_s8 = scalar_select %p67_p8, %s2078_s15, %s69_s29  }
  0x17   : > { %s2221_s9 = scalar_select %p121_p7, %s2070_s13, %s123_s7  }
  0x18   : > { %p134_p11 = scmp.eq.s32.totalorder %s1647_s23, 11  ;;  %p1650_p13 = scmp.ge.s32.totalorder %s2106_s22, 12 }
  0x1a   : > { %p2223_p12 = por %p134_p11, %p133_p10  ;;  %156 = sbr.rel (%p1650_p13) target bundleno = 101 (0x65), region = 16 }
  0x1f   : > { %159 = sbr.rel (!%p2196_p5) target bundleno = 43 (0x2b), region = 20  ;;  %s161_s11 = sand.u32 (%p2196_p5), 1, %s2086_s17  }
  0x20   : > { %s1769_s26 = smul.u32 (%p2196_p5), 24, %s2098_s20  ;;  %s2620_s0 = sld [smem:[#allocation7_spill]] (%p2196_p5) }
  0x21   : > { %s1774_s27 = smul.u32 (%p2196_p5), 48, %s161_s11 }
  0x23   : > { %s163_s23 = scalar_lea.vmem (%p2196_p5), [#allocation3], %s1774_s27 }
  0x26   : > { %s169_s5 = scalar_lea.vmem %s2620_s0, %s1769_s26 }
  0x27   : > { %v182_v0 = vld [vmem:[%s169_s5] sm:$0xff]  ;;  %v184_v1 = vld [vmem:[%s169_s5 + $0x8] sm:$0xff]  ;;  %v186_v2 = vld [vmem:[%s169_s5 + $0x10] sm:$0xff] }
  0x28   : > { %183 = vst [vmem:[%s163_s23] sm:$0xff] %v182_v0  ;;  %185 = vst [vmem:[%s163_s23 + $0x8] sm:$0xff] %v184_v1  ;;  %v188_v3 = vld [vmem:[%s169_s5 + $0x90] sm:$0xff]  ;;  %v190_v4 = vld [vmem:[%s169_s5 + $0x98] sm:$0xff] }
  0x29   : > { %187 = vst [vmem:[%s163_s23 + $0x10] sm:$0xff] %v186_v2  ;;  %v192_v5 = vld [vmem:[%s169_s5 + $0xa0] sm:$0xff]  ;;  %189 = vst [vmem:[%s163_s23 + $0x18] sm:$0xff] %v188_v3 }
  0x2a   : > { %191 = vst [vmem:[%s163_s23 + $0x20] sm:$0xff] %v190_v4  ;;  %193 = vst [vmem:[%s163_s23 + $0x28] sm:$0xff] %v192_v5 }
  0x2b PF: > { %199 = sbr.rel (!%p2210_p9) target bundleno = 101 (0x65), region = 43  ;;  %s201_s28 = sand.u32 (%p2210_p9), 1, %s2078_s15  }
  0x2c   : > { %s1775_s7 = smul.u32 (%p2210_p9), 768, %s201_s28  ;;  %s1652_s11 = sshll.u32 (%p2210_p9), %s2102_s21, 1 }
  0x2d   : > { %s1770_s26 = smul.u32 (%p2210_p9), 384, %s2098_s20  ;;  %s2621_s1 = sld [smem:[#allocation8_spill]] (%p2210_p9) }
  0x2e   : > { %s2248_s6 = scalar_lea.vmem (%p2210_p9), [#allocation4], %s1775_s7 }
  0x2f   : > { %s207_s27 = sadd.s32 (%p2210_p9), %s1770_s26, %s1652_s11 }
  0x30   : > { %s1654_s29 = sshll.u32 %s207_s27, 2 }
  0x33   : > { %s2243_s5 = scalar_lea.vmem %s2621_s1, %s1654_s29 }
  0x34   : > { %v428_v6 = vld [vmem:[%s2243_s5] sm:$0xff]  ;;  %v430_v7 = vld [vmem:[%s2243_s5 + $0x10] sm:$0xff] }
  0x35   : > { %v432_v8 = vld [vmem:[%s2243_s5 + $0x20] sm:$0xff]  ;;  %429 = vst [vmem:[%s2248_s6] sm:$0xff] %v428_v6  ;;  %431 = vst [vmem:[%s2248_s6 + $0x8] sm:$0xff] %v430_v7  ;;  %v434_v9 = vld [vmem:[%s2243_s5 + $0x30] sm:$0xff] }
  0x36   : > { %433 = vst [vmem:[%s2248_s6 + $0x10] sm:$0xff] %v432_v8  ;;  %v436_v10 = vld [vmem:[%s2243_s5 + $0x40] sm:$0xff]  ;;  %v438_v11 = vld [vmem:[%s2243_s5 + $0x50] sm:$0xff]  ;;  %435 = vst [vmem:[%s2248_s6 + $0x18] sm:$0xff] %v434_v9 }
  0x37   : > { %437 = vst [vmem:[%s2248_s6 + $0x20] sm:$0xff] %v436_v10  ;;  %439 = vst [vmem:[%s2248_s6 + $0x28] sm:$0xff] %v438_v11  ;;  %v440_v12 = vld [vmem:[%s2243_s5 + $0x60] sm:$0xff]  ;;  %v442_v13 = vld [vmem:[%s2243_s5 + $0x70] sm:$0xff] }
  0x38   : > { %v444_v14 = vld [vmem:[%s2243_s5 + $0x80] sm:$0xff]  ;;  %441 = vst [vmem:[%s2248_s6 + $0x30] sm:$0xff] %v440_v12  ;;  %443 = vst [vmem:[%s2248_s6 + $0x38] sm:$0xff] %v442_v13  ;;  %v446_v15 = vld [vmem:[%s2243_s5 + $0x90] sm:$0xff] }
  0x39   : > { %445 = vst [vmem:[%s2248_s6 + $0x40] sm:$0xff] %v444_v14  ;;  %v448_v16 = vld [vmem:[%s2243_s5 + $0xa0] sm:$0xff]  ;;  %v450_v17 = vld [vmem:[%s2243_s5 + $0xb0] sm:$0xff]  ;;  %447 = vst [vmem:[%s2248_s6 + $0x48] sm:$0xff] %v446_v15 }
  0x3a   : > { %449 = vst [vmem:[%s2248_s6 + $0x50] sm:$0xff] %v448_v16  ;;  %451 = vst [vmem:[%s2248_s6 + $0x58] sm:$0xff] %v450_v17  ;;  %v452_v18 = vld [vmem:[%s2243_s5 + $0xc0] sm:$0xff]  ;;  %v454_v19 = vld [vmem:[%s2243_s5 + $0xd0] sm:$0xff] }
  0x3b   : > { %v456_v20 = vld [vmem:[%s2243_s5 + $0xe0] sm:$0xff]  ;;  %453 = vst [vmem:[%s2248_s6 + $0x60] sm:$0xff] %v452_v18  ;;  %455 = vst [vmem:[%s2248_s6 + $0x68] sm:$0xff] %v454_v19  ;;  %v458_v21 = vld [vmem:[%s2243_s5 + $0xf0] sm:$0xff] }
  0x3c   : > { %457 = vst [vmem:[%s2248_s6 + $0x70] sm:$0xff] %v456_v20  ;;  %v460_v22 = vld [vmem:[%s2243_s5 + $0x100] sm:$0xff]  ;;  %v462_v23 = vld [vmem:[%s2243_s5 + $0x110] sm:$0xff]  ;;  %459 = vst [vmem:[%s2248_s6 + $0x78] sm:$0xff] %v458_v21 }
  0x3d   : > { %461 = vst [vmem:[%s2248_s6 + $0x80] sm:$0xff] %v460_v22  ;;  %463 = vst [vmem:[%s2248_s6 + $0x88] sm:$0xff] %v462_v23  ;;  %v464_v24 = vld [vmem:[%s2243_s5 + $0x120] sm:$0xff]  ;;  %v466_v25 = vld [vmem:[%s2243_s5 + $0x130] sm:$0xff] }
  0x3e   : > { %v468_v26 = vld [vmem:[%s2243_s5 + $0x140] sm:$0xff]  ;;  %465 = vst [vmem:[%s2248_s6 + $0x90] sm:$0xff] %v464_v24  ;;  %467 = vst [vmem:[%s2248_s6 + $0x98] sm:$0xff] %v466_v25  ;;  %v470_v27 = vld [vmem:[%s2243_s5 + $0x150] sm:$0xff] }
  0x3f   : > { %469 = vst [vmem:[%s2248_s6 + $0xa0] sm:$0xff] %v468_v26  ;;  %v472_v28 = vld [vmem:[%s2243_s5 + $0x160] sm:$0xff]  ;;  %v474_v29 = vld [vmem:[%s2243_s5 + $0x170] sm:$0xff]  ;;  %471 = vst [vmem:[%s2248_s6 + $0xa8] sm:$0xff] %v470_v27 }
  0x40   : > { %473 = vst [vmem:[%s2248_s6 + $0xb0] sm:$0xff] %v472_v28  ;;  %475 = vst [vmem:[%s2248_s6 + $0xb8] sm:$0xff] %v474_v29  ;;  %v476_v30 = vld [vmem:[%s2243_s5 + $0x180] sm:$0xff]  ;;  %v478_v31 = vld [vmem:[%s2243_s5 + $0x190] sm:$0xff] }
  0x41   : > { %v480_v32 = vld [vmem:[%s2243_s5 + $0x1a0] sm:$0xff]  ;;  %477 = vst [vmem:[%s2248_s6 + $0xc0] sm:$0xff] %v476_v30  ;;  %479 = vst [vmem:[%s2248_s6 + $0xc8] sm:$0xff] %v478_v31  ;;  %v482_v33 = vld [vmem:[%s2243_s5 + $0x1b0] sm:$0xff] }
  0x42   : > { %481 = vst [vmem:[%s2248_s6 + $0xd0] sm:$0xff] %v480_v32  ;;  %v484_v34 = vld [vmem:[%s2243_s5 + $0x1c0] sm:$0xff]  ;;  %v486_v35 = vld [vmem:[%s2243_s5 + $0x1d0] sm:$0xff]  ;;  %483 = vst [vmem:[%s2248_s6 + $0xd8] sm:$0xff] %v482_v33 }
  0x43   : > { %485 = vst [vmem:[%s2248_s6 + $0xe0] sm:$0xff] %v484_v34  ;;  %487 = vst [vmem:[%s2248_s6 + $0xe8] sm:$0xff] %v486_v35  ;;  %v488_v36 = vld [vmem:[%s2243_s5 + $0x1e0] sm:$0xff]  ;;  %v490_v37 = vld [vmem:[%s2243_s5 + $0x1f0] sm:$0xff] }
  0x44   : > { %v492_v38 = vld [vmem:[%s2243_s5 + $0x200] sm:$0xff]  ;;  %489 = vst [vmem:[%s2248_s6 + $0xf0] sm:$0xff] %v488_v36  ;;  %491 = vst [vmem:[%s2248_s6 + $0xf8] sm:$0xff] %v490_v37  ;;  %v494_v39 = vld [vmem:[%s2243_s5 + $0x210] sm:$0xff] }
  0x45   : > { %493 = vst [vmem:[%s2248_s6 + $0x100] sm:$0xff] %v492_v38  ;;  %v496_v40 = vld [vmem:[%s2243_s5 + $0x220] sm:$0xff]  ;;  %v498_v41 = vld [vmem:[%s2243_s5 + $0x230] sm:$0xff]  ;;  %495 = vst [vmem:[%s2248_s6 + $0x108] sm:$0xff] %v494_v39 }
  0x46   : > { %497 = vst [vmem:[%s2248_s6 + $0x110] sm:$0xff] %v496_v40  ;;  %499 = vst [vmem:[%s2248_s6 + $0x118] sm:$0xff] %v498_v41  ;;  %v500_v42 = vld [vmem:[%s2243_s5 + $0x240] sm:$0xff]  ;;  %v502_v43 = vld [vmem:[%s2243_s5 + $0x250] sm:$0xff] }
  0x47   : > { %v504_v44 = vld [vmem:[%s2243_s5 + $0x260] sm:$0xff]  ;;  %501 = vst [vmem:[%s2248_s6 + $0x120] sm:$0xff] %v500_v42  ;;  %503 = vst [vmem:[%s2248_s6 + $0x128] sm:$0xff] %v502_v43  ;;  %v506_v45 = vld [vmem:[%s2243_s5 + $0x270] sm:$0xff] }
  0x48   : > { %505 = vst [vmem:[%s2248_s6 + $0x130] sm:$0xff] %v504_v44  ;;  %v508_v46 = vld [vmem:[%s2243_s5 + $0x280] sm:$0xff]  ;;  %v510_v47 = vld [vmem:[%s2243_s5 + $0x290] sm:$0xff]  ;;  %507 = vst [vmem:[%s2248_s6 + $0x138] sm:$0xff] %v506_v45 }
  0x49   : > { %509 = vst [vmem:[%s2248_s6 + $0x140] sm:$0xff] %v508_v46  ;;  %511 = vst [vmem:[%s2248_s6 + $0x148] sm:$0xff] %v510_v47  ;;  %v512_v48 = vld [vmem:[%s2243_s5 + $0x2a0] sm:$0xff]  ;;  %v514_v49 = vld [vmem:[%s2243_s5 + $0x2b0] sm:$0xff] }
  0x4a   : > { %v516_v50 = vld [vmem:[%s2243_s5 + $0x2c0] sm:$0xff]  ;;  %513 = vst [vmem:[%s2248_s6 + $0x150] sm:$0xff] %v512_v48  ;;  %515 = vst [vmem:[%s2248_s6 + $0x158] sm:$0xff] %v514_v49  ;;  %v518_v51 = vld [vmem:[%s2243_s5 + $0x2d0] sm:$0xff] }
  0x4b   : > { %517 = vst [vmem:[%s2248_s6 + $0x160] sm:$0xff] %v516_v50  ;;  %v520_v52 = vld [vmem:[%s2243_s5 + $0x2e0] sm:$0xff]  ;;  %v522_v53 = vld [vmem:[%s2243_s5 + $0x2f0] sm:$0xff]  ;;  %519 = vst [vmem:[%s2248_s6 + $0x168] sm:$0xff] %v518_v51 }
  0x4c   : > { %521 = vst [vmem:[%s2248_s6 + $0x170] sm:$0xff] %v520_v52  ;;  %523 = vst [vmem:[%s2248_s6 + $0x178] sm:$0xff] %v522_v53  ;;  %v524_v54 = vld [vmem:[%s2243_s5 + $0x300] sm:$0xff]  ;;  %v526_v55 = vld [vmem:[%s2243_s5 + $0x310] sm:$0xff] }
  0x4d   : > { %v528_v56 = vld [vmem:[%s2243_s5 + $0x320] sm:$0xff]  ;;  %525 = vst [vmem:[%s2248_s6 + $0x180] sm:$0xff] %v524_v54  ;;  %527 = vst [vmem:[%s2248_s6 + $0x188] sm:$0xff] %v526_v55  ;;  %v530_v57 = vld [vmem:[%s2243_s5 + $0x330] sm:$0xff] }
  0x4e   : > { %529 = vst [vmem:[%s2248_s6 + $0x190] sm:$0xff] %v528_v56  ;;  %v532_v58 = vld [vmem:[%s2243_s5 + $0x340] sm:$0xff]  ;;  %v534_v59 = vld [vmem:[%s2243_s5 + $0x350] sm:$0xff]  ;;  %531 = vst [vmem:[%s2248_s6 + $0x198] sm:$0xff] %v530_v57 }
  0x4f   : > { %533 = vst [vmem:[%s2248_s6 + $0x1a0] sm:$0xff] %v532_v58  ;;  %535 = vst [vmem:[%s2248_s6 + $0x1a8] sm:$0xff] %v534_v59  ;;  %v536_v60 = vld [vmem:[%s2243_s5 + $0x360] sm:$0xff]  ;;  %v538_v61 = vld [vmem:[%s2243_s5 + $0x370] sm:$0xff] }
  0x50   : > { %v540_v62 = vld [vmem:[%s2243_s5 + $0x380] sm:$0xff]  ;;  %537 = vst [vmem:[%s2248_s6 + $0x1b0] sm:$0xff] %v536_v60  ;;  %539 = vst [vmem:[%s2248_s6 + $0x1b8] sm:$0xff] %v538_v61  ;;  %v542_v63 = vld [vmem:[%s2243_s5 + $0x390] sm:$0xff] }
  0x51   : > { %541 = vst [vmem:[%s2248_s6 + $0x1c0] sm:$0xff] %v540_v62  ;;  %v544_v0 = vld [vmem:[%s2243_s5 + $0x3a0] sm:$0xff]  ;;  %v546_v1 = vld [vmem:[%s2243_s5 + $0x3b0] sm:$0xff]  ;;  %543 = vst [vmem:[%s2248_s6 + $0x1c8] sm:$0xff] %v542_v63 }
  0x52   : > { %545 = vst [vmem:[%s2248_s6 + $0x1d0] sm:$0xff] %v544_v0  ;;  %547 = vst [vmem:[%s2248_s6 + $0x1d8] sm:$0xff] %v546_v1  ;;  %v548_v2 = vld [vmem:[%s2243_s5 + $0x3c0] sm:$0xff]  ;;  %v550_v3 = vld [vmem:[%s2243_s5 + $0x3d0] sm:$0xff] }
  0x53   : > { %v552_v4 = vld [vmem:[%s2243_s5 + $0x3e0] sm:$0xff]  ;;  %549 = vst [vmem:[%s2248_s6 + $0x1e0] sm:$0xff] %v548_v2  ;;  %551 = vst [vmem:[%s2248_s6 + $0x1e8] sm:$0xff] %v550_v3  ;;  %v554_v5 = vld [vmem:[%s2243_s5 + $0x3f0] sm:$0xff] }
  0x54   : > { %553 = vst [vmem:[%s2248_s6 + $0x1f0] sm:$0xff] %v552_v4  ;;  %v556_v6 = vld [vmem:[%s2243_s5 + $0x400] sm:$0xff]  ;;  %v558_v7 = vld [vmem:[%s2243_s5 + $0x410] sm:$0xff]  ;;  %555 = vst [vmem:[%s2248_s6 + $0x1f8] sm:$0xff] %v554_v5 }
  0x55   : > { %557 = vst [vmem:[%s2248_s6 + $0x200] sm:$0xff] %v556_v6  ;;  %559 = vst [vmem:[%s2248_s6 + $0x208] sm:$0xff] %v558_v7  ;;  %v560_v8 = vld [vmem:[%s2243_s5 + $0x420] sm:$0xff]  ;;  %v562_v9 = vld [vmem:[%s2243_s5 + $0x430] sm:$0xff] }
  0x56   : > { %v564_v10 = vld [vmem:[%s2243_s5 + $0x440] sm:$0xff]  ;;  %561 = vst [vmem:[%s2248_s6 + $0x210] sm:$0xff] %v560_v8  ;;  %563 = vst [vmem:[%s2248_s6 + $0x218] sm:$0xff] %v562_v9  ;;  %v566_v11 = vld [vmem:[%s2243_s5 + $0x450] sm:$0xff] }
  0x57   : > { %565 = vst [vmem:[%s2248_s6 + $0x220] sm:$0xff] %v564_v10  ;;  %v568_v12 = vld [vmem:[%s2243_s5 + $0x460] sm:$0xff]  ;;  %v570_v13 = vld [vmem:[%s2243_s5 + $0x470] sm:$0xff]  ;;  %567 = vst [vmem:[%s2248_s6 + $0x228] sm:$0xff] %v566_v11 }
  0x58   : > { %569 = vst [vmem:[%s2248_s6 + $0x230] sm:$0xff] %v568_v12  ;;  %571 = vst [vmem:[%s2248_s6 + $0x238] sm:$0xff] %v570_v13  ;;  %v572_v14 = vld [vmem:[%s2243_s5 + $0x480] sm:$0xff]  ;;  %v574_v15 = vld [vmem:[%s2243_s5 + $0x490] sm:$0xff] }
  0x59   : > { %v576_v16 = vld [vmem:[%s2243_s5 + $0x4a0] sm:$0xff]  ;;  %573 = vst [vmem:[%s2248_s6 + $0x240] sm:$0xff] %v572_v14  ;;  %575 = vst [vmem:[%s2248_s6 + $0x248] sm:$0xff] %v574_v15  ;;  %v578_v17 = vld [vmem:[%s2243_s5 + $0x4b0] sm:$0xff] }
  0x5a   : > { %577 = vst [vmem:[%s2248_s6 + $0x250] sm:$0xff] %v576_v16  ;;  %v580_v18 = vld [vmem:[%s2243_s5 + $0x4c0] sm:$0xff]  ;;  %v582_v19 = vld [vmem:[%s2243_s5 + $0x4d0] sm:$0xff]  ;;  %579 = vst [vmem:[%s2248_s6 + $0x258] sm:$0xff] %v578_v17 }
  0x5b   : > { %581 = vst [vmem:[%s2248_s6 + $0x260] sm:$0xff] %v580_v18  ;;  %583 = vst [vmem:[%s2248_s6 + $0x268] sm:$0xff] %v582_v19  ;;  %v584_v20 = vld [vmem:[%s2243_s5 + $0x4e0] sm:$0xff]  ;;  %v586_v21 = vld [vmem:[%s2243_s5 + $0x4f0] sm:$0xff] }
  0x5c   : > { %v588_v22 = vld [vmem:[%s2243_s5 + $0x500] sm:$0xff]  ;;  %585 = vst [vmem:[%s2248_s6 + $0x270] sm:$0xff] %v584_v20  ;;  %587 = vst [vmem:[%s2248_s6 + $0x278] sm:$0xff] %v586_v21  ;;  %v590_v23 = vld [vmem:[%s2243_s5 + $0x510] sm:$0xff] }
  0x5d   : > { %589 = vst [vmem:[%s2248_s6 + $0x280] sm:$0xff] %v588_v22  ;;  %v592_v24 = vld [vmem:[%s2243_s5 + $0x520] sm:$0xff]  ;;  %v594_v25 = vld [vmem:[%s2243_s5 + $0x530] sm:$0xff]  ;;  %591 = vst [vmem:[%s2248_s6 + $0x288] sm:$0xff] %v590_v23 }
  0x5e   : > { %593 = vst [vmem:[%s2248_s6 + $0x290] sm:$0xff] %v592_v24  ;;  %595 = vst [vmem:[%s2248_s6 + $0x298] sm:$0xff] %v594_v25  ;;  %v596_v26 = vld [vmem:[%s2243_s5 + $0x540] sm:$0xff]  ;;  %v598_v27 = vld [vmem:[%s2243_s5 + $0x550] sm:$0xff] }
  0x5f   : > { %v600_v28 = vld [vmem:[%s2243_s5 + $0x560] sm:$0xff]  ;;  %597 = vst [vmem:[%s2248_s6 + $0x2a0] sm:$0xff] %v596_v26  ;;  %599 = vst [vmem:[%s2248_s6 + $0x2a8] sm:$0xff] %v598_v27  ;;  %v602_v29 = vld [vmem:[%s2243_s5 + $0x570] sm:$0xff] }
  0x60   : > { %601 = vst [vmem:[%s2248_s6 + $0x2b0] sm:$0xff] %v600_v28  ;;  %v604_v30 = vld [vmem:[%s2243_s5 + $0x580] sm:$0xff]  ;;  %v606_v31 = vld [vmem:[%s2243_s5 + $0x590] sm:$0xff]  ;;  %603 = vst [vmem:[%s2248_s6 + $0x2b8] sm:$0xff] %v602_v29 }
  0x61   : > { %605 = vst [vmem:[%s2248_s6 + $0x2c0] sm:$0xff] %v604_v30  ;;  %607 = vst [vmem:[%s2248_s6 + $0x2c8] sm:$0xff] %v606_v31  ;;  %v608_v32 = vld [vmem:[%s2243_s5 + $0x5a0] sm:$0xff]  ;;  %v610_v33 = vld [vmem:[%s2243_s5 + $0x5b0] sm:$0xff] }
  0x62   : > { %v612_v34 = vld [vmem:[%s2243_s5 + $0x5c0] sm:$0xff]  ;;  %609 = vst [vmem:[%s2248_s6 + $0x2d0] sm:$0xff] %v608_v32  ;;  %611 = vst [vmem:[%s2248_s6 + $0x2d8] sm:$0xff] %v610_v33  ;;  %v614_v35 = vld [vmem:[%s2243_s5 + $0x5d0] sm:$0xff] }
  0x63   : > { %613 = vst [vmem:[%s2248_s6 + $0x2e0] sm:$0xff] %v612_v34  ;;  %v616_v36 = vld [vmem:[%s2243_s5 + $0x5e0] sm:$0xff]  ;;  %v618_v37 = vld [vmem:[%s2243_s5 + $0x5f0] sm:$0xff]  ;;  %615 = vst [vmem:[%s2248_s6 + $0x2e8] sm:$0xff] %v614_v35 }
  0x64   : > { %617 = vst [vmem:[%s2248_s6 + $0x2f0] sm:$0xff] %v616_v36  ;;  %619 = vst [vmem:[%s2248_s6 + $0x2f8] sm:$0xff] %v618_v37 }
  0x65 PF: > { %p1655_p0 = scmp.ge.s32.totalorder %s2106_s22, 1  ;;  %p632_p1 = scmp.lt.s32.totalorder %s2106_s22, 13 }
  0x67   : > { %p633_p2 = pnand %p1655_p0, %p632_p1 }
  0x68   : > { %s639_s0 = sand.u32 (!%p633_p2), 1, %s2082_s16   ;;  %s646_s23 = sand.u32 (!%p633_p2), 1, %s2074_s14  }
  0x69   : > { %636 = sbr.rel (%p633_p2) target bundleno = 476 (0x1dc), region = 85  ;;  %s673_s7 = sand.u32 (!%p633_p2), 1, %s2066_s12  }
  0x6a   : > { %s1776_s28 = smul.u32 (!%p633_p2), 48, %s639_s0  ;;  %s1656_s26 = sshll.u32 (!%p633_p2), %s673_s7, 4 }
  0x6b   : > { %s1777_s11 = smul.u32 (!%p633_p2), 768, %s646_s23  ;;  %s1657_s27 = sshll.u32 (!%p633_p2), %s2094_s19, 1 }
  0x6c   : > { %p681_p3 = scmp.lt.s32.totalorder (!%p633_p2), %s1657_s27, 3  ;;  %s2451_s6 = scalar_lea.vmem (!%p633_p2), [#allocation3], %s1776_s28 }
  0x6d   : > { %s2453_s1 = scalar_lea.vmem (!%p633_p2), [#allocation4], %s1777_s11  ;;  %s2455_s25 = scalar_lea.vmem (!%p633_p2), [#allocation5], %s1656_s26 }
  0x6e   : > { %s2640_s27 = smov (!%p681_p3, %s1657_s27), 3  ;;  %p1658_p4 = scmp.ne.s32.totalorder %s2090_s18, 0 }
  0x6f   : > { %s683_s5 = scalar_lea.vmem %s2611_s2, %s2640_s27 }
  0x70   : > { %690 = sbr.rel (%p1658_p4) target bundleno = 120 (0x78), region = 97 }
  0x75   : > { %v2108_v38 = vmov 0.0  }
  0x76   : > { %691 = vst [vmem:[#allocation2 + $0x10] sm:$0xff] %v2108_v38  ;;  %692 = vst [vmem:[#allocation2] sm:$0xff] %v2108_v38 }
  0x77   : > { %693 = vst [vmem:[#allocation2 + $0x18] sm:$0xff] %v2108_v38  ;;  %694 = vst [vmem:[#allocation2 + $0x8] sm:$0xff] %v2108_v38 }
  0x78 PF: > { %v1867_v39 = vld [vmem:[%s2453_s1 + $0x74] ss:$8 sps:$4 sm:$0xff]   ;;  %v1871_v41 = vld [vmem:[%s2453_s1 + $0x70] ss:$8 sps:$4 sm:$0xff]   ;;  %v1873_v43 = vld [vmem:[%s2453_s1 + $0x64] ss:$8 sps:$4 sm:$0xff]  }
  0x79   : > { %v1869_v40 = vld [vmem:[%s2453_s1 + $0x174] ss:$8 sps:$4 sm:$0xff]   ;;  %1311 = vmatprep.subr.bf16.mxu0 %v1867_v39  ;;  %v1872_v42 = vld [vmem:[%s2453_s1 + $0x170] ss:$8 sps:$4 sm:$0xff]   ;;  %v1875_v44 = vld [vmem:[%s2453_s1 + $0x164] ss:$8 sps:$4 sm:$0xff]  }
  0x7a   : > { %1354 = vmatprep.subr.bf16.mxu1 %v1869_v40  ;;  %1312 = vmatpush1.bf16.msra.mxu0 %v1871_v41  ;;  %v1877_v45 = vld [vmem:[%s2453_s1 + $0x60] ss:$8 sps:$4 sm:$0xff]   ;;  %v1879_v47 = vld [vmem:[%s2453_s1 + $0x54] ss:$8 sps:$4 sm:$0xff]   ;;  %v1883_v49 = vld [vmem:[%s2453_s1 + $0x50] ss:$8 sps:$4 sm:$0xff]  }
  0x7b   : > { %1355 = vmatpush1.bf16.msra.mxu1 %v1872_v42  ;;  %1313 = vmatprep.subr.bf16.mxu0 %v1873_v43  ;;  %v1878_v46 = vld [vmem:[%s2453_s1 + $0x160] ss:$8 sps:$4 sm:$0xff]   ;;  %v1881_v48 = vld [vmem:[%s2453_s1 + $0x154] ss:$8 sps:$4 sm:$0xff]   ;;  %v1884_v50 = vld [vmem:[%s2453_s1 + $0x150] ss:$8 sps:$4 sm:$0xff]  }
  0x7c   : > { %1356 = vmatprep.subr.bf16.mxu1 %v1875_v44  ;;  %v1885_v51 = vld [vmem:[%s2453_s1 + $0x44] ss:$8 sps:$4 sm:$0xff]   ;;  %v1889_v53 = vld [vmem:[%s2453_s1 + $0x40] ss:$8 sps:$4 sm:$0xff]   ;;  %v1891_v55 = vld [vmem:[%s2453_s1 + $0x34] ss:$8 sps:$4 sm:$0xff]  }
  0x7d   : > { %v1887_v52 = vld [vmem:[%s2453_s1 + $0x144] ss:$8 sps:$4 sm:$0xff]   ;;  %v1890_v54 = vld [vmem:[%s2453_s1 + $0x140] ss:$8 sps:$4 sm:$0xff]   ;;  %v1893_v56 = vld [vmem:[%s2453_s1 + $0x134] ss:$8 sps:$4 sm:$0xff]  }
  0x7e   : > { %1314 = vmatpush1.bf16.msra.mxu0 %v1877_v45  ;;  %v1895_v57 = vld [vmem:[%s2453_s1 + $0x30] ss:$8 sps:$4 sm:$0xff]   ;;  %v1897_v59 = vld [vmem:[%s2453_s1 + $0x24] ss:$8 sps:$4 sm:$0xff]   ;;  %v1901_v61 = vld [vmem:[%s2453_s1 + $0x20] ss:$8 sps:$4 sm:$0xff]  }
  0x7f   : > { %1357 = vmatpush1.bf16.msra.mxu1 %v1878_v46  ;;  %1315 = vmatprep.subr.bf16.mxu0 %v1879_v47  ;;  %v1896_v58 = vld [vmem:[%s2453_s1 + $0x130] ss:$8 sps:$4 sm:$0xff]   ;;  %v1899_v60 = vld [vmem:[%s2453_s1 + $0x124] ss:$8 sps:$4 sm:$0xff]   ;;  %v1902_v62 = vld [vmem:[%s2453_s1 + $0x120] ss:$8 sps:$4 sm:$0xff]  }
  0x80   : > { %1358 = vmatprep.subr.bf16.mxu1 %v1881_v48  ;;  %v1903_v63 = vld [vmem:[%s2453_s1 + $0x14] ss:$8 sps:$4 sm:$0xff]   ;;  %v1907_v1 = vld [vmem:[%s2453_s1 + $0x10] ss:$8 sps:$4 sm:$0xff]   ;;  %v1909_v3 = vld [vmem:[%s2453_s1 + $0x4] ss:$8 sps:$4 sm:$0xff]  }
  0x81   : > { %v1905_v0 = vld [vmem:[%s2453_s1 + $0x114] ss:$8 sps:$4 sm:$0xff]   ;;  %v1908_v2 = vld [vmem:[%s2453_s1 + $0x110] ss:$8 sps:$4 sm:$0xff]   ;;  %v1911_v4 = vld [vmem:[%s2453_s1 + $0x104] ss:$8 sps:$4 sm:$0xff]  }
  0x82   : > { %1316 = vmatpush1.bf16.msra.mxu0 %v1883_v49  ;;  %v1913_v5 = vld [vmem:[%s2453_s1] ss:$8 sps:$4 sm:$0xff]   ;;  %v1915_v7 = vld [vmem:[%s2453_s1 + $0xf4] ss:$8 sps:$4 sm:$0xff]   ;;  %v1919_v9 = vld [vmem:[%s2453_s1 + $0xf0] ss:$8 sps:$4 sm:$0xff]  }
  0x83   : > { %1359 = vmatpush1.bf16.msra.mxu1 %v1884_v50  ;;  %1317 = vmatprep.subr.bf16.mxu0 %v1885_v51  ;;  %v1914_v6 = vld [vmem:[%s2453_s1 + $0x100] ss:$8 sps:$4 sm:$0xff]   ;;  %v1917_v8 = vld [vmem:[%s2453_s1 + $0x1f4] ss:$8 sps:$4 sm:$0xff]   ;;  %v1920_v10 = vld [vmem:[%s2453_s1 + $0x1f0] ss:$8 sps:$4 sm:$0xff]  }
  0x84   : > { %1360 = vmatprep.subr.bf16.mxu1 %v1887_v52  ;;  %v1921_v11 = vld [vmem:[%s2453_s1 + $0xe4] ss:$8 sps:$4 sm:$0xff]   ;;  %v1925_v13 = vld [vmem:[%s2453_s1 + $0xe0] ss:$8 sps:$4 sm:$0xff]   ;;  %v1927_v15 = vld [vmem:[%s2453_s1 + $0xd4] ss:$8 sps:$4 sm:$0xff]  }
  0x85   : > { %v1923_v12 = vld [vmem:[%s2453_s1 + $0x1e4] ss:$8 sps:$4 sm:$0xff]   ;;  %v1926_v14 = vld [vmem:[%s2453_s1 + $0x1e0] ss:$8 sps:$4 sm:$0xff]   ;;  %v1929_v16 = vld [vmem:[%s2453_s1 + $0x1d4] ss:$8 sps:$4 sm:$0xff]  }
  0x86   : > { %1318 = vmatpush1.bf16.msra.mxu0 %v1889_v53  ;;  %v1931_v17 = vld [vmem:[%s2453_s1 + $0xd0] ss:$8 sps:$4 sm:$0xff]   ;;  %v1933_v19 = vld [vmem:[%s2453_s1 + $0xc4] ss:$8 sps:$4 sm:$0xff]   ;;  %v1937_v21 = vld [vmem:[%s2453_s1 + $0xc0] ss:$8 sps:$4 sm:$0xff]  }
  0x87   : > { %1361 = vmatpush1.bf16.msra.mxu1 %v1890_v54  ;;  %1319 = vmatprep.subr.bf16.mxu0 %v1891_v55  ;;  %v1932_v18 = vld [vmem:[%s2453_s1 + $0x1d0] ss:$8 sps:$4 sm:$0xff]   ;;  %v1935_v20 = vld [vmem:[%s2453_s1 + $0x1c4] ss:$8 sps:$4 sm:$0xff]   ;;  %v1938_v22 = vld [vmem:[%s2453_s1 + $0x1c0] ss:$8 sps:$4 sm:$0xff]  }
  0x88   : > { %1362 = vmatprep.subr.bf16.mxu1 %v1893_v56  ;;  %v1939_v23 = vld [vmem:[%s2453_s1 + $0xb4] ss:$8 sps:$4 sm:$0xff]   ;;  %v1943_v27 = vld [vmem:[%s2453_s1 + $0xb0] ss:$8 sps:$4 sm:$0xff]   ;;  %v1945_v29 = vld [vmem:[%s2453_s1 + $0xa4] ss:$8 sps:$4 sm:$0xff]  }
  0x89   : > { %v1965_v24 = vld [vmem:[%s2451_s6 + $0x4] ss:$24 sps:$4 sm:$0xff]   ;;  %v1944_v28 = vld [vmem:[%s2453_s1 + $0x1b0] ss:$8 sps:$4 sm:$0xff]   ;;  %v1949_v31 = vld [vmem:[%s2453_s1 + $0xa0] ss:$8 sps:$4 sm:$0xff]  }
  0x8a   : > { %1320 = vmatpush1.bf16.msra.mxu0 %v1895_v57  ;;  %v1941_v25 = vld [vmem:[%s2453_s1 + $0x1b4] ss:$8 sps:$4 sm:$0xff]   ;;  %1343 = vmatprep.mubr.bf16.mxu0 %v1965_v24  ;;  %v1947_v30 = vld [vmem:[%s2453_s1 + $0x1a4] ss:$8 sps:$4 sm:$0xff]   ;;  %v1950_v32 = vld [vmem:[%s2453_s1 + $0x1a0] ss:$8 sps:$4 sm:$0xff]  }
  0x8b   : > { %1363 = vmatpush1.bf16.msra.mxu1 %v1896_v58  ;;  %1321 = vmatprep.subr.bf16.mxu0 %v1897_v59  ;;  %v1968_v26 = vld [vmem:[%s2451_s6 + $0xc] ss:$24 sps:$4 sm:$0xff]   ;;  %v1955_v35 = vld [vmem:[%s2453_s1 + $0x90] ss:$8 sps:$4 sm:$0xff]   ;;  %v1961_v39 = vld [vmem:[%s2453_s1 + $0x80] ss:$8 sps:$4 sm:$0xff]  }
  0x8c   : > { %1364 = vmatprep.subr.bf16.mxu1 %v1899_v60  ;;  %1386 = vmatprep.mubr.bf16.mxu1 %v1968_v26  ;;  %v1951_v33 = vld [vmem:[%s2453_s1 + $0x94] ss:$8 sps:$4 sm:$0xff]   ;;  %v1956_v36 = vld [vmem:[%s2453_s1 + $0x190] ss:$8 sps:$4 sm:$0xff]   ;;  %v1957_v37 = vld [vmem:[%s2453_s1 + $0x84] ss:$8 sps:$4 sm:$0xff]  }
  0x8d   : > { %v1953_v34 = vld [vmem:[%s2453_s1 + $0x194] ss:$8 sps:$4 sm:$0xff]   ;;  %v1959_v38 = vld [vmem:[%s2453_s1 + $0x184] ss:$8 sps:$4 sm:$0xff]   ;;  %v1962_v40 = vld [vmem:[%s2453_s1 + $0x180] ss:$8 sps:$4 sm:$0xff]  }
  0x8e   : > { %1322 = vmatpush1.bf16.msra.mxu0 %v1901_v61  ;;  %v1971_v41 = vld [vmem:[%s2453_s1 + $0x274] ss:$8 sps:$4 sm:$0xff]   ;;  %v1963_v42 = vld [vmem:[%s2451_s6] ss:$24 sps:$4 sm:$0xff]   ;;  %v1974_v45 = vld [vmem:[%s2453_s1 + $0x264] ss:$8 sps:$4 sm:$0xff]  }
  0x8f   : > { %1365 = vmatpush1.bf16.msra.mxu1 %v1902_v62  ;;  %1323 = vmatprep.subr.bf16.mxu0 %v1903_v63  ;;  %v1966_v43 = vld [vmem:[%s2451_s6 + $0x8] ss:$24 sps:$4 sm:$0xff]   ;;  %v2019_v46 = vld [vmem:[%s2451_s6 + $0x14] ss:$24 sps:$4 sm:$0xff]   ;;  %p1761_p5 = scmp.ne.s32.totalorder %s2090_s18, 5 }
  0x90   : > { %1366 = vmatprep.subr.bf16.mxu1 %v1905_v0  ;;  %v1969_v44 = vld [vmem:[%s2453_s1 + $0x270] ss:$8 sps:$4 sm:$0xff]   ;;  %v1972_v47 = vld [vmem:[%s2453_s1 + $0x260] ss:$8 sps:$4 sm:$0xff]   ;;  %v1977_v48 = vld [vmem:[%s2453_s1 + $0x254] ss:$8 sps:$4 sm:$0xff]  }
  0x91   : > { %v1975_v49 = vld [vmem:[%s2453_s1 + $0x250] ss:$8 sps:$4 sm:$0xff]   ;;  %v1980_v50 = vld [vmem:[%s2453_s1 + $0x244] ss:$8 sps:$4 sm:$0xff]   ;;  %v1978_v51 = vld [vmem:[%s2453_s1 + $0x240] ss:$8 sps:$4 sm:$0xff]  }
  0x92   : > { %1324 = vmatpush1.bf16.msra.mxu0 %v1907_v1  ;;  %v1983_v52 = vld [vmem:[%s2453_s1 + $0x234] ss:$8 sps:$4 sm:$0xff]   ;;  %v1981_v53 = vld [vmem:[%s2453_s1 + $0x230] ss:$8 sps:$4 sm:$0xff]   ;;  %v1986_v54 = vld [vmem:[%s2453_s1 + $0x224] ss:$8 sps:$4 sm:$0xff]  }
  0x93   : > { %1367 = vmatpush1.bf16.msra.mxu1 %v1908_v2  ;;  %1325 = vmatprep.subr.bf16.mxu0 %v1909_v3  ;;  %v1984_v55 = vld [vmem:[%s2453_s1 + $0x220] ss:$8 sps:$4 sm:$0xff]   ;;  %v1989_v56 = vld [vmem:[%s2453_s1 + $0x214] ss:$8 sps:$4 sm:$0xff]   ;;  %v1987_v57 = vld [vmem:[%s2453_s1 + $0x210] ss:$8 sps:$4 sm:$0xff]  }
  0x94   : > { %1368 = vmatprep.subr.bf16.mxu1 %v1911_v4  ;;  %v1992_v58 = vld [vmem:[%s2453_s1 + $0x204] ss:$8 sps:$4 sm:$0xff]   ;;  %v1990_v59 = vld [vmem:[%s2453_s1 + $0x200] ss:$8 sps:$4 sm:$0xff]   ;;  %v1995_v60 = vld [vmem:[%s2453_s1 + $0x2f4] ss:$8 sps:$4 sm:$0xff]  }
  0x95   : > { %v1993_v61 = vld [vmem:[%s2453_s1 + $0x2f0] ss:$8 sps:$4 sm:$0xff]   ;;  %v1998_v62 = vld [vmem:[%s2453_s1 + $0x2e4] ss:$8 sps:$4 sm:$0xff]   ;;  %v1996_v63 = vld [vmem:[%s2453_s1 + $0x2e0] ss:$8 sps:$4 sm:$0xff]  }
  0x96   : > { %1326 = vmatpush1.bf16.msra.mxu0 %v1913_v5  ;;  %v2001_v0 = vld [vmem:[%s2453_s1 + $0x2d4] ss:$8 sps:$4 sm:$0xff]   ;;  %v1999_v1 = vld [vmem:[%s2453_s1 + $0x2d0] ss:$8 sps:$4 sm:$0xff]   ;;  %v2004_v2 = vld [vmem:[%s2453_s1 + $0x2c4] ss:$8 sps:$4 sm:$0xff]  }
  0x97   : > { %1369 = vmatpush1.bf16.msra.mxu1 %v1914_v6  ;;  %1327 = vmatprep.subr.bf16.mxu0 %v1915_v7  ;;  %v2002_v3 = vld [vmem:[%s2453_s1 + $0x2c0] ss:$8 sps:$4 sm:$0xff]   ;;  %v2007_v4 = vld [vmem:[%s2453_s1 + $0x2b4] ss:$8 sps:$4 sm:$0xff]   ;;  %v2005_v5 = vld [vmem:[%s2453_s1 + $0x2b0] ss:$8 sps:$4 sm:$0xff]  }
  0x98   : > { %1370 = vmatprep.subr.bf16.mxu1 %v1917_v8  ;;  %v2010_v6 = vld [vmem:[%s2453_s1 + $0x2a4] ss:$8 sps:$4 sm:$0xff]   ;;  %v2008_v7 = vld [vmem:[%s2453_s1 + $0x2a0] ss:$8 sps:$4 sm:$0xff]   ;;  %v2013_v8 = vld [vmem:[%s2453_s1 + $0x294] ss:$8 sps:$4 sm:$0xff]  }
  0x99   : > { %v696_v26 = vld [vmem:[#allocation2] sm:$0xff] }
  0x9a   : > { %1328 = vmatpush2.bf16.msra.mxu0 %v1919_v9  ;;  %v2011_v9 = vld [vmem:[%s2453_s1 + $0x290] ss:$8 sps:$4 sm:$0xff]  }
  0x9b   : > { %1371 = vmatpush2.bf16.msra.mxu1 %v1920_v10  ;;  %1329 = vmatprep.subr.bf16.mxu0 %v1921_v11  ;;  %v2016_v10 = vld [vmem:[%s2453_s1 + $0x284] ss:$8 sps:$4 sm:$0xff]   ;;  %v2014_v11 = vld [vmem:[%s2453_s1 + $0x280] ss:$8 sps:$4 sm:$0xff]  }
  0x9c   : > { %1372 = vmatprep.subr.bf16.mxu1 %v1923_v12  ;;  %v2017_v12 = vld [vmem:[%s2451_s6 + $0x10] ss:$24 sps:$4 sm:$0xff]  }
  0x9e   : > { %1330 = vmatpush2.bf16.msra.mxu0 %v1925_v13 }
  0x9f   : > { %1373 = vmatpush2.bf16.msra.mxu1 %v1926_v14  ;;  %1331 = vmatprep.subr.bf16.mxu0 %v1927_v15 }
  0xa0   : > { %1374 = vmatprep.subr.bf16.mxu1 %v1929_v16 }
  0xa2   : > { %1332 = vmatpush2.bf16.msra.mxu0 %v1931_v17 }
  0xa3   : > { %1375 = vmatpush2.bf16.msra.mxu1 %v1932_v18  ;;  %1333 = vmatprep.subr.bf16.mxu0 %v1933_v19 }
  0xa4   : > { %1376 = vmatprep.subr.bf16.mxu1 %v1935_v20 }
  0xa6   : > { %1334 = vmatpush2.bf16.msra.mxu0 %v1937_v21  ;;  %v695_v21 = vld [vmem:[#allocation2 + $0x10] sm:$0xff] }
  0xa7   : > { %1377 = vmatpush2.bf16.msra.mxu1 %v1938_v22  ;;  %1335 = vmatprep.subr.bf16.mxu0 %v1939_v23 }
  0xa8   : > { %1378 = vmatprep.subr.bf16.mxu1 %v1941_v25 }
  0xaa   : > { %1336 = vmatpush2.bf16.msra.mxu0 %v1943_v27 }
  0xab   : > { %1379 = vmatpush2.bf16.msra.mxu1 %v1944_v28  ;;  %1337 = vmatprep.subr.bf16.mxu0 %v1945_v29 }
  0xac   : > { %1380 = vmatprep.subr.bf16.mxu1 %v1947_v30 }
  0xae   : > { %1338 = vmatpush2.bf16.msra.mxu0 %v1949_v31  ;;  %v697_v31 = vld [vmem:[#allocation2 + $0x18] sm:$0xff] }
  0xaf   : > { %1381 = vmatpush2.bf16.msra.mxu1 %v1950_v32  ;;  %1339 = vmatprep.subr.bf16.mxu0 %v1951_v33 }
  0xb0   : > { %1382 = vmatprep.subr.bf16.mxu1 %v1953_v34 }
  0xb2   : > { %1340 = vmatpush2.bf16.msra.mxu0 %v1955_v35 }
  0xb3   : > { %1383 = vmatpush2.bf16.msra.mxu1 %v1956_v36  ;;  %1341 = vmatprep.subr.bf16.mxu0 %v1957_v37  ;;  %v698_v36 = vld [vmem:[#allocation2 + $0x8] sm:$0xff] }
  0xb4   : > { %1384 = vmatprep.subr.bf16.mxu1 %v1959_v38 }
  0xb6   : > { %1342 = vmatpush2.bf16.msra.mxu0 %v1961_v39 }
  0xb7   : > { %1385 = vmatpush2.bf16.msra.mxu1 %v1962_v40  ;;  %1397 = vmatprep.subr.bf16.mxu0 %v1971_v41 }
  0xb9   : > { %1344 = vmatmul.mubr.bf16.vlgmr.msra.gmra.mxu0 %v1963_v42 }
  0xba   : > { %1387 = vmatmul.mubr.bf16.vlgmr.msra.gmra.mxu1 %v1966_v43  ;;  %1398 = vmatpush1.bf16.msra.mxu0 %v1969_v44 }
  0xbb   : > { %1399 = vmatprep.subr.bf16.mxu0 %v1974_v45  ;;  %1429 = vmatprep.mubr.bf16.mxu0 %v2019_v46 }
  0xbe   : > { %1400 = vmatpush1.bf16.msra.mxu0 %v1972_v47 }
  0xbf   : > { %1401 = vmatprep.subr.bf16.mxu0 %v1977_v48 }
  0xc2   : > { %1402 = vmatpush1.bf16.msra.mxu0 %v1975_v49 }
  0xc3   : > { %1403 = vmatprep.subr.bf16.mxu0 %v1980_v50 }
  0xc6   : > { %1404 = vmatpush1.bf16.msra.mxu0 %v1978_v51 }
  0xc7   : > { %1405 = vmatprep.subr.bf16.mxu0 %v1983_v52 }
  0xca   : > { %1406 = vmatpush1.bf16.msra.mxu0 %v1981_v53 }
  0xcb   : > { %1407 = vmatprep.subr.bf16.mxu0 %v1986_v54 }
  0xce   : > { %1408 = vmatpush1.bf16.msra.mxu0 %v1984_v55 }
  0xcf   : > { %1409 = vmatprep.subr.bf16.mxu0 %v1989_v56 }
  0xd2   : > { %1410 = vmatpush1.bf16.msra.mxu0 %v1987_v57 }
  0xd3   : > { %1411 = vmatprep.subr.bf16.mxu0 %v1992_v58 }
  0xd6   : > { %1412 = vmatpush1.bf16.msra.mxu0 %v1990_v59 }
  0xd7   : > { %1413 = vmatprep.subr.bf16.mxu0 %v1995_v60 }
  0xda   : > { %1414 = vmatpush2.bf16.msra.mxu0 %v1993_v61 }
  0xdb   : > { %1415 = vmatprep.subr.bf16.mxu0 %v1998_v62 }
  0xde   : > { %1416 = vmatpush2.bf16.msra.mxu0 %v1996_v63 }
  0xdf   : > { %1417 = vmatprep.subr.bf16.mxu0 %v2001_v0 }
  0xe2   : > { %1418 = vmatpush2.bf16.msra.mxu0 %v1999_v1 }
  0xe3   : > { %1419 = vmatprep.subr.bf16.mxu0 %v2004_v2 }
  0xe6   : > { %1420 = vmatpush2.bf16.msra.mxu0 %v2002_v3 }
  0xe7   : > { %1421 = vmatprep.subr.bf16.mxu0 %v2007_v4 }
  0xea   : > { %1422 = vmatpush2.bf16.msra.mxu0 %v2005_v5 }
  0xeb   : > { %1423 = vmatprep.subr.bf16.mxu0 %v2010_v6 }
  0xee   : > { %1424 = vmatpush2.bf16.msra.mxu0 %v2008_v7 }
  0xef   : > { %1425 = vmatprep.subr.bf16.mxu0 %v2013_v8 }
  0xf2   : > { %1426 = vmatpush2.bf16.msra.mxu0 %v2011_v9 }
  0xf3   : > { %1427 = vmatprep.subr.bf16.mxu0 %v2016_v10 }
  0xf6   : > { %1428 = vmatpush2.bf16.msra.mxu0 %v2014_v11 }
  0xf9   : > { %1430 = vmatmul.mubr.bf16.vlgmr.msra.gmra.mxu0 %v2017_v12 }
 0x179   : > { %v1345_v13 = vpop.f32.mrf.mxu0 }
 0x17a   : > { %v1388_v14 = vpop.f32.mrf.mxu1 }
 0x17b   : > { %v1347_v15 = vpop.f32.mrf.mxu0  ;;  %v1389_v20 = vadd.f32 %v1388_v14, %v1345_v13 }
 0x17c   : > { %v1390_v16 = vpop.f32.mrf.mxu1 }
 0x17d   : > { %v1349_v17 = vpop.f32.mrf.mxu0  ;;  %v1391_v23 = vadd.f32 %v1390_v16, %v1347_v15 }
 0x17e   : > { %v1392_v18 = vpop.f32.mrf.mxu1 }
 0x17f   : > { %v1351_v19 = vpop.f32.mrf.mxu0  ;;  %v1393_v28 = vadd.f32 %v1392_v18, %v1349_v17 }
 0x180   : > { %v1394_v25 = vpop.f32.mrf.mxu1 }
 0x181   : > { %v1395_v33 = vadd.f32 %v1394_v25, %v1351_v19 }
 0x1b9   : > { %v1431_v22 = vpop.f32.mrf.mxu0 }
 0x1ba   : > { %v1432_v24 = vadd.f32 %v1431_v22, %v1389_v20 }
 0x1bb   : > { %v1433_v27 = vpop.f32.mrf.mxu0 }
 0x1bc   : > { %v1440_v29 = vadd.f32 %v1432_v24, %v695_v21  ;;  %v1434_v30 = vadd.f32 %v1433_v27, %v1391_v23 }
 0x1bd   : > { %v1435_v32 = vpop.f32.mrf.mxu0 }
 0x1be   : > { %1444 = vst [vmem:[#allocation2 + $0x10] sm:$0xff] %v1440_v29  ;;  %v1441_v34 = vadd.f32 %v1434_v30, %v696_v26  ;;  %v1436_v35 = vadd.f32 %v1435_v32, %v1393_v28 }
 0x1bf   : > { %v1437_v37 = vpop.f32.mrf.mxu0 }
 0x1c0   : > { %1445 = vst [vmem:[#allocation2] sm:$0xff] %v1441_v34  ;;  %v1442_v38 = vadd.f32 %v1436_v35, %v697_v31  ;;  %v1438_v39 = vadd.f32 %v1437_v37, %v1395_v33  ;;  %1451 = sbr.rel (%p1761_p5) target bundleno = 468 (0x1d4), region = 101 }
 0x1c2   : > { %1446 = vst [vmem:[#allocation2 + $0x18] sm:$0xff] %v1442_v38  ;;  %v1443_v40 = vadd.f32 %v1438_v39, %v698_v36 }
 0x1c4   : > { %1447 = vst [vmem:[#allocation2 + $0x8] sm:$0xff] %v1443_v40 }
 0x1c5   : > { %v1458_v41 = vlaneseq  ;;  %v1456_v43 = vld [vmem:[%s683_s5] sm:$0x3]  ;;  %v1452_v44 = vld [vmem:[#allocation2 + $0x10] sm:$0xff] }
 0x1c7   : > { %v1459_v42 = vshrl.u32 %v1458_v41, 7  ;;  %v1453_v47 = vld [vmem:[#allocation2] sm:$0xff] }
 0x1c9   : > { %v1460_v45 = vsub.s32 0, %v1459_v42  ;;  %v1464_v46 = vsub.s32 1, %v1459_v42  ;;  %v1454_v48 = vld [vmem:[#allocation2 + $0x18] sm:$0xff] }
 0x1cb   : > { %v1455_v49 = vld [vmem:[#allocation2 + $0x8] sm:$0xff]  ;;  %v1461_v50 = vrot.slane %v1456_v43, %v1460_v45  ;;  %v1465_v51 = vrot.slane %v1456_v43, %v1464_v46 }
 0x1cd   : > { %v1468_v52 = vadd.f32 %v1461_v50, %v1452_v44  ;;  %v1469_v53 = vadd.f32 %v1465_v51, %v1453_v47  ;;  %v1470_v54 = vadd.f32 %v1461_v50, %v1454_v48  ;;  %v1471_v55 = vadd.f32 %v1465_v51, %v1455_v49 }
 0x1cf   : > { %v1472_v56 = vmax.f32 %v1468_v52, 0.0  ;;  %v1473_v57 = vmax.f32 %v1469_v53, 0.0  ;;  %v1474_v58 = vmax.f32 %v1470_v54, 0.0  ;;  %v1475_v59 = vmax.f32 %v1471_v55, 0.0 }
 0x1d1   : > { %v1771_v60 = vpack.c.bf16 %v1473_v57, %v1472_v56  ;;  %v1772_v61 = vpack.c.bf16 %v1475_v59, %v1474_v58 }
 0x1d3   : > { %1488 = vst [vmem:[%s2455_s25] sm:$0xff] %v1771_v60  ;;  %1489 = vst [vmem:[%s2455_s25 + $0x8] sm:$0xff] %v1772_v61 }
 0x1d4 PF: > { %1496 = sbr.rel (!%p2223_p12) target bundleno = 476 (0x1dc), region = 105  ;;  %s1773_s14 = sshll.u32 (%p2223_p12), %s2094_s19, 3 }
 0x1d5   : > { %s1502_s0 = scalar_lea.vmem (%p2223_p12), %s2612_s3, %s1773_s14 }
 0x1da   : > { %v1533_v62 = vld [vmem:[%s2455_s25] sm:$0xff]  ;;  %v1535_v63 = vld [vmem:[%s2455_s25 + $0x8] sm:$0xff] }
 0x1db   : > { %1534 = vst [vmem:[%s1502_s0] sm:$0xff] %v1533_v62  ;;  %1536 = vst [vmem:[%s1502_s0 + $0x10] sm:$0xff] %v1535_v63 }
 0x1dc PF: > { %s13_s22 = sadd.s32 1, %s2106_s22   ;;  %s2622_s25 = sld [smem:[#allocation6_spill]] }
 0x1dd   : > { %p10_p6 = scmp.ge.s32.totalorder %s13_s22, 14   ;;  %s2623_s12 = smov %s2070_s13 }
 0x1de   : > { %s2624_s13 = smov %s2221_s9  ;;  %s2625_s14 = smov %s2078_s15 }
 0x1df   : > { %s2626_s15 = smov %s2218_s8  ;;  %s2627_s16 = smov %s2086_s17 }
 0x1e0   : > { %s2628_s17 = smov %s2204_s30  ;;  %s2629_s18 = smov %s2098_s20 }
 0x1e1   : > { %s2630_s19 = smov %s2102_s21  ;;  %s2631_s20 = smov %s2634_s24 }
 0x1e2   : > { %s2632_s21 = smov %s2622_s25  ;;  %12 = sbr.rel (!%p10_p6) target bundleno = 9 (0x9), region = 185 }

// kernel: resnet_forward.37
= control target key start
LH: loop header
LB: loop body
LE: loop exit
PB: predicated region body
PF: predicated region fallthrough
CT: control target
= control target key end

     0   :  { %s2769_s0 = inlined_call_operand.vmem [shape: bf16[16,4608], index: 0, kind: input, shape index: {}]   ;;  %s2770_s1 = inlined_call_operand.vmem [shape: bf16[4608,512], index: 1, kind: input, shape index: {}]   ;;  %s2771_s2 = inlined_call_operand.vmem [shape: f32[1,512], index: 2, kind: input, shape index: {}]   ;;  %s2772_s3 = inlined_call_operand.vmem [shape: bf16[16,512], index: 3, kind: input, shape index: {}]   ;;  %s2773_s4 = inlined_call_operand.vmem [shape: bf16[16,512], index: 4, kind: output, shape index: {}]  }
   0x1   :  { %2776 = sst [smem:[#allocation9_spill]] %s2769_s0 }
   0x2   :  { %s2264_s15 = smov 0   ;;  %s2266_s16 = smov 0  }
   0x3   :  { %s2268_s17 = smov 0   ;;  %s2270_s18 = smov 0  }
   0x4   :  { %s2272_s19 = smov 0   ;;  %s2274_s20 = smov 0  }
   0x5   :  { %s2276_s21 = smov 0   ;;  %s2278_s22 = smov 0  }
   0x6   :  { %s2280_s23 = smov 0   ;;  %s2282_s24 = smov 0  }
   0x7   :  { %s2284_s25 = smov 0  }
   0x8 LB: > { %s1772_s26 = sadd.s32 4294967295, %s2236_s25   ;;  %s26_s27 = sadd.s32 1, %s2228_s23  ;;  %s2236_s25 = sphi %s2284_s25, %s14_s25   ;;  %s2232_s24 = sphi %s2282_s24, %s2795_s24   ;;  %s2228_s23 = sphi %s2280_s23, %s2794_s23   ;;  %s2224_s22 = sphi %s2278_s22, %s2793_s22   ;;  %s2220_s21 = sphi %s2276_s21, %s2792_s21   ;;  %s2216_s20 = sphi %s2274_s20, %s2791_s20   ;;  %s2212_s19 = sphi %s2272_s19, %s2790_s19   ;;  %s2208_s18 = sphi %s2270_s18, %s2789_s18   ;;  %s2204_s17 = sphi %s2268_s17, %s2788_s17   ;;  %s2200_s16 = sphi %s2266_s16, %s2787_s16   ;;  %s2196_s15 = sphi %s2264_s15, %s2786_s15  }
   0x9   : > { %p27_p0 = scmp.ge.s32.totalorder %s26_s27, 6  ;;  %s29_s28 = sadd.s32 1, %s2232_s24 }
   0xa   : > { %s42_s29 = sadd.s32 1, %s2216_s20  ;;  %p49_p1 = scmp.ne.s32.totalorder %s2216_s20, %s2212_s19 }
   0xb   : > { %s2797_s27 = smov (%p27_p0, %s26_s27), 0  ;;  %s2799_s28 = smov (!%p27_p0, %s29_s28), %s2232_s24 }
   0xc   : > { %2777 = sst [smem:[#allocation7_spill]] %s2797_s27  ;;  %s38_s30 = ssub.s32 %s2228_s23, %s2797_s27 }
   0xd   : > { %p50_p2 = scmp.eq.s32.totalorder %s2236_s25, 0  ;;  %p31_p3 = scmp.ge.s32.totalorder %s2799_s28, 2 }
   0xe   : > { %p40_p4 = scmp.eq.s32.totalorder %s38_s30, 0  ;;  %s70_s6 = sadd.s32 1, %s2208_s18 }
   0xf   : > { %p2333_p5 = por %p50_p2, %p49_p1  ;;  %s2801_s28 = smov (%p31_p3, %s2799_s28), 0 }
  0x10   : > { %2779 = sst [smem:[#allocation8_spill]] %s2801_s28  ;;  %s66_s8 = ssub.s32 %s2232_s24, %s2801_s28 }
  0x11   : > { %s2341_s7 = scalar_select %p40_p4, %s2216_s20, %s42_s29  }
  0x12   : > { %p77_p6 = scmp.ne.s32.totalorder %s2208_s18, %s2204_s17  ;;  %s67_s9 = sor.u32 %s66_s8, %s38_s30 }
  0x13   : > { %p122_p7 = scmp.eq.s32.totalorder %s66_s8, 0  ;;  %p68_p8 = scmp.eq.s32.totalorder %s67_s9, 0 }
  0x14   : > { %p2349_p9 = por %p77_p6, %p50_p2  ;;  %s124_s11 = sadd.s32 1, %s2200_s16 }
  0x15   : > { %p131_p10 = scmp.ne.s32.totalorder %s2200_s16, %s2196_s15  ;;  %p163_p12 = scmp.eq.s32.totalorder %s1772_s26, 11 }
  0x16   : > { %s2357_s12 = scalar_select %p68_p8, %s2208_s18, %s70_s6  }
  0x17   : > { %s2360_s13 = scalar_select %p122_p7, %s2200_s16, %s124_s11  }
  0x18   : > { %p2364_p11 = por %p131_p10, %p50_p2  ;;  %p2368_p13 = por %p163_p12, %p131_p10 }
  0x19   : > { %p1775_p0 = scmp.ge.s32.totalorder %s2236_s25, 12 }
  0x1b   : > { %185 = sbr.rel (%p1775_p0) target bundleno = 105 (0x69), region = 16 }
  0x20   : > { %188 = sbr.rel (!%p2333_p5) target bundleno = 44 (0x2c), region = 20  ;;  %s190_s30 = sand.u32 (%p2333_p5), 1, %s2216_s20  }
  0x21   : > { %s1898_s6 = smul.u32 (%p2333_p5), 24, %s2228_s23  ;;  %s2783_s0 = sld [smem:[#allocation9_spill]] (%p2333_p5) }
  0x22   : > { %s1904_s8 = smul.u32 (%p2333_p5), 48, %s190_s30 }
  0x24   : > { %s192_s26 = scalar_lea.vmem (%p2333_p5), [#allocation3], %s1904_s8 }
  0x27   : > { %s198_s28 = scalar_lea.vmem %s2783_s0, %s1898_s6 }
  0x28   : > { %v211_v0 = vld [vmem:[%s198_s28] sm:$0xff]  ;;  %v213_v1 = vld [vmem:[%s198_s28 + $0x8] sm:$0xff]  ;;  %v215_v2 = vld [vmem:[%s198_s28 + $0x10] sm:$0xff] }
  0x29   : > { %212 = vst [vmem:[%s192_s26] sm:$0xff] %v211_v0  ;;  %214 = vst [vmem:[%s192_s26 + $0x8] sm:$0xff] %v213_v1  ;;  %v217_v3 = vld [vmem:[%s198_s28 + $0x90] sm:$0xff]  ;;  %v219_v4 = vld [vmem:[%s198_s28 + $0x98] sm:$0xff] }
  0x2a   : > { %216 = vst [vmem:[%s192_s26 + $0x10] sm:$0xff] %v215_v2  ;;  %v221_v5 = vld [vmem:[%s198_s28 + $0xa0] sm:$0xff]  ;;  %218 = vst [vmem:[%s192_s26 + $0x18] sm:$0xff] %v217_v3 }
  0x2b   : > { %220 = vst [vmem:[%s192_s26 + $0x20] sm:$0xff] %v219_v4  ;;  %222 = vst [vmem:[%s192_s26 + $0x28] sm:$0xff] %v221_v5 }
  0x2c PF: > { %228 = sbr.rel (!%p2349_p9) target bundleno = 100 (0x64), region = 43  ;;  %s230_s5 = sand.u32 (%p2349_p9), 1, %s2208_s18  }
  0x2d   : > { %s1905_s30 = smul.u32 (%p2349_p9), 768, %s230_s5  ;;  %s1777_s6 = sshll.u32 (%p2349_p9), %s2232_s24, 1 }
  0x2e   : > { %s1899_s8 = smul.u32 (%p2349_p9), 384, %s2228_s23 }
  0x2f   : > { %s2393_s10 = scalar_lea.vmem (%p2349_p9), [#allocation4], %s1905_s30 }
  0x30   : > { %s236_s9 = sadd.s32 (%p2349_p9), %s1899_s8, %s1777_s6 }
  0x31   : > { %s1779_s11 = sshll.u32 %s236_s9, 2 }
  0x32   : > { %s2388_s28 = scalar_lea.vmem %s2770_s1, %s1779_s11 }
  0x33   : > { %v457_v6 = vld [vmem:[%s2388_s28] sm:$0xff]  ;;  %v459_v7 = vld [vmem:[%s2388_s28 + $0x10] sm:$0xff] }
  0x34   : > { %v461_v8 = vld [vmem:[%s2388_s28 + $0x20] sm:$0xff]  ;;  %458 = vst [vmem:[%s2393_s10] sm:$0xff] %v457_v6  ;;  %460 = vst [vmem:[%s2393_s10 + $0x8] sm:$0xff] %v459_v7  ;;  %v463_v9 = vld [vmem:[%s2388_s28 + $0x30] sm:$0xff] }
  0x35   : > { %462 = vst [vmem:[%s2393_s10 + $0x10] sm:$0xff] %v461_v8  ;;  %v465_v10 = vld [vmem:[%s2388_s28 + $0x40] sm:$0xff]  ;;  %v467_v11 = vld [vmem:[%s2388_s28 + $0x50] sm:$0xff]  ;;  %464 = vst [vmem:[%s2393_s10 + $0x18] sm:$0xff] %v463_v9 }
  0x36   : > { %466 = vst [vmem:[%s2393_s10 + $0x20] sm:$0xff] %v465_v10  ;;  %468 = vst [vmem:[%s2393_s10 + $0x28] sm:$0xff] %v467_v11  ;;  %v469_v12 = vld [vmem:[%s2388_s28 + $0x60] sm:$0xff]  ;;  %v471_v13 = vld [vmem:[%s2388_s28 + $0x70] sm:$0xff] }
  0x37   : > { %v473_v14 = vld [vmem:[%s2388_s28 + $0x80] sm:$0xff]  ;;  %470 = vst [vmem:[%s2393_s10 + $0x30] sm:$0xff] %v469_v12  ;;  %472 = vst [vmem:[%s2393_s10 + $0x38] sm:$0xff] %v471_v13  ;;  %v475_v15 = vld [vmem:[%s2388_s28 + $0x90] sm:$0xff] }
  0x38   : > { %474 = vst [vmem:[%s2393_s10 + $0x40] sm:$0xff] %v473_v14  ;;  %v477_v16 = vld [vmem:[%s2388_s28 + $0xa0] sm:$0xff]  ;;  %v479_v17 = vld [vmem:[%s2388_s28 + $0xb0] sm:$0xff]  ;;  %476 = vst [vmem:[%s2393_s10 + $0x48] sm:$0xff] %v475_v15 }
  0x39   : > { %478 = vst [vmem:[%s2393_s10 + $0x50] sm:$0xff] %v477_v16  ;;  %480 = vst [vmem:[%s2393_s10 + $0x58] sm:$0xff] %v479_v17  ;;  %v481_v18 = vld [vmem:[%s2388_s28 + $0xc0] sm:$0xff]  ;;  %v483_v19 = vld [vmem:[%s2388_s28 + $0xd0] sm:$0xff] }
  0x3a   : > { %v485_v20 = vld [vmem:[%s2388_s28 + $0xe0] sm:$0xff]  ;;  %482 = vst [vmem:[%s2393_s10 + $0x60] sm:$0xff] %v481_v18  ;;  %484 = vst [vmem:[%s2393_s10 + $0x68] sm:$0xff] %v483_v19  ;;  %v487_v21 = vld [vmem:[%s2388_s28 + $0xf0] sm:$0xff] }
  0x3b   : > { %486 = vst [vmem:[%s2393_s10 + $0x70] sm:$0xff] %v485_v20  ;;  %v489_v22 = vld [vmem:[%s2388_s28 + $0x100] sm:$0xff]  ;;  %v491_v23 = vld [vmem:[%s2388_s28 + $0x110] sm:$0xff]  ;;  %488 = vst [vmem:[%s2393_s10 + $0x78] sm:$0xff] %v487_v21 }
  0x3c   : > { %490 = vst [vmem:[%s2393_s10 + $0x80] sm:$0xff] %v489_v22  ;;  %492 = vst [vmem:[%s2393_s10 + $0x88] sm:$0xff] %v491_v23  ;;  %v493_v24 = vld [vmem:[%s2388_s28 + $0x120] sm:$0xff]  ;;  %v495_v25 = vld [vmem:[%s2388_s28 + $0x130] sm:$0xff] }
  0x3d   : > { %v497_v26 = vld [vmem:[%s2388_s28 + $0x140] sm:$0xff]  ;;  %494 = vst [vmem:[%s2393_s10 + $0x90] sm:$0xff] %v493_v24  ;;  %496 = vst [vmem:[%s2393_s10 + $0x98] sm:$0xff] %v495_v25  ;;  %v499_v27 = vld [vmem:[%s2388_s28 + $0x150] sm:$0xff] }
  0x3e   : > { %498 = vst [vmem:[%s2393_s10 + $0xa0] sm:$0xff] %v497_v26  ;;  %v501_v28 = vld [vmem:[%s2388_s28 + $0x160] sm:$0xff]  ;;  %v503_v29 = vld [vmem:[%s2388_s28 + $0x170] sm:$0xff]  ;;  %500 = vst [vmem:[%s2393_s10 + $0xa8] sm:$0xff] %v499_v27 }
  0x3f   : > { %502 = vst [vmem:[%s2393_s10 + $0xb0] sm:$0xff] %v501_v28  ;;  %504 = vst [vmem:[%s2393_s10 + $0xb8] sm:$0xff] %v503_v29  ;;  %v505_v30 = vld [vmem:[%s2388_s28 + $0x180] sm:$0xff]  ;;  %v507_v31 = vld [vmem:[%s2388_s28 + $0x190] sm:$0xff] }
  0x40   : > { %v509_v32 = vld [vmem:[%s2388_s28 + $0x1a0] sm:$0xff]  ;;  %506 = vst [vmem:[%s2393_s10 + $0xc0] sm:$0xff] %v505_v30  ;;  %508 = vst [vmem:[%s2393_s10 + $0xc8] sm:$0xff] %v507_v31  ;;  %v511_v33 = vld [vmem:[%s2388_s28 + $0x1b0] sm:$0xff] }
  0x41   : > { %510 = vst [vmem:[%s2393_s10 + $0xd0] sm:$0xff] %v509_v32  ;;  %v513_v34 = vld [vmem:[%s2388_s28 + $0x1c0] sm:$0xff]  ;;  %v515_v35 = vld [vmem:[%s2388_s28 + $0x1d0] sm:$0xff]  ;;  %512 = vst [vmem:[%s2393_s10 + $0xd8] sm:$0xff] %v511_v33 }
  0x42   : > { %514 = vst [vmem:[%s2393_s10 + $0xe0] sm:$0xff] %v513_v34  ;;  %516 = vst [vmem:[%s2393_s10 + $0xe8] sm:$0xff] %v515_v35  ;;  %v517_v36 = vld [vmem:[%s2388_s28 + $0x1e0] sm:$0xff]  ;;  %v519_v37 = vld [vmem:[%s2388_s28 + $0x1f0] sm:$0xff] }
  0x43   : > { %v521_v38 = vld [vmem:[%s2388_s28 + $0x200] sm:$0xff]  ;;  %518 = vst [vmem:[%s2393_s10 + $0xf0] sm:$0xff] %v517_v36  ;;  %520 = vst [vmem:[%s2393_s10 + $0xf8] sm:$0xff] %v519_v37  ;;  %v523_v39 = vld [vmem:[%s2388_s28 + $0x210] sm:$0xff] }
  0x44   : > { %522 = vst [vmem:[%s2393_s10 + $0x100] sm:$0xff] %v521_v38  ;;  %v525_v40 = vld [vmem:[%s2388_s28 + $0x220] sm:$0xff]  ;;  %v527_v41 = vld [vmem:[%s2388_s28 + $0x230] sm:$0xff]  ;;  %524 = vst [vmem:[%s2393_s10 + $0x108] sm:$0xff] %v523_v39 }
  0x45   : > { %526 = vst [vmem:[%s2393_s10 + $0x110] sm:$0xff] %v525_v40  ;;  %528 = vst [vmem:[%s2393_s10 + $0x118] sm:$0xff] %v527_v41  ;;  %v529_v42 = vld [vmem:[%s2388_s28 + $0x240] sm:$0xff]  ;;  %v531_v43 = vld [vmem:[%s2388_s28 + $0x250] sm:$0xff] }
  0x46   : > { %v533_v44 = vld [vmem:[%s2388_s28 + $0x260] sm:$0xff]  ;;  %530 = vst [vmem:[%s2393_s10 + $0x120] sm:$0xff] %v529_v42  ;;  %532 = vst [vmem:[%s2393_s10 + $0x128] sm:$0xff] %v531_v43  ;;  %v535_v45 = vld [vmem:[%s2388_s28 + $0x270] sm:$0xff] }
  0x47   : > { %534 = vst [vmem:[%s2393_s10 + $0x130] sm:$0xff] %v533_v44  ;;  %v537_v46 = vld [vmem:[%s2388_s28 + $0x280] sm:$0xff]  ;;  %v539_v47 = vld [vmem:[%s2388_s28 + $0x290] sm:$0xff]  ;;  %536 = vst [vmem:[%s2393_s10 + $0x138] sm:$0xff] %v535_v45 }
  0x48   : > { %538 = vst [vmem:[%s2393_s10 + $0x140] sm:$0xff] %v537_v46  ;;  %540 = vst [vmem:[%s2393_s10 + $0x148] sm:$0xff] %v539_v47  ;;  %v541_v48 = vld [vmem:[%s2388_s28 + $0x2a0] sm:$0xff]  ;;  %v543_v49 = vld [vmem:[%s2388_s28 + $0x2b0] sm:$0xff] }
  0x49   : > { %v545_v50 = vld [vmem:[%s2388_s28 + $0x2c0] sm:$0xff]  ;;  %542 = vst [vmem:[%s2393_s10 + $0x150] sm:$0xff] %v541_v48  ;;  %544 = vst [vmem:[%s2393_s10 + $0x158] sm:$0xff] %v543_v49  ;;  %v547_v51 = vld [vmem:[%s2388_s28 + $0x2d0] sm:$0xff] }
  0x4a   : > { %546 = vst [vmem:[%s2393_s10 + $0x160] sm:$0xff] %v545_v50  ;;  %v549_v52 = vld [vmem:[%s2388_s28 + $0x2e0] sm:$0xff]  ;;  %v551_v53 = vld [vmem:[%s2388_s28 + $0x2f0] sm:$0xff]  ;;  %548 = vst [vmem:[%s2393_s10 + $0x168] sm:$0xff] %v547_v51 }
  0x4b   : > { %550 = vst [vmem:[%s2393_s10 + $0x170] sm:$0xff] %v549_v52  ;;  %552 = vst [vmem:[%s2393_s10 + $0x178] sm:$0xff] %v551_v53  ;;  %v553_v54 = vld [vmem:[%s2388_s28 + $0x300] sm:$0xff]  ;;  %v555_v55 = vld [vmem:[%s2388_s28 + $0x310] sm:$0xff] }
  0x4c   : > { %v557_v56 = vld [vmem:[%s2388_s28 + $0x320] sm:$0xff]  ;;  %554 = vst [vmem:[%s2393_s10 + $0x180] sm:$0xff] %v553_v54  ;;  %556 = vst [vmem:[%s2393_s10 + $0x188] sm:$0xff] %v555_v55  ;;  %v559_v57 = vld [vmem:[%s2388_s28 + $0x330] sm:$0xff] }
  0x4d   : > { %558 = vst [vmem:[%s2393_s10 + $0x190] sm:$0xff] %v557_v56  ;;  %v561_v58 = vld [vmem:[%s2388_s28 + $0x340] sm:$0xff]  ;;  %v563_v59 = vld [vmem:[%s2388_s28 + $0x350] sm:$0xff]  ;;  %560 = vst [vmem:[%s2393_s10 + $0x198] sm:$0xff] %v559_v57 }
  0x4e   : > { %562 = vst [vmem:[%s2393_s10 + $0x1a0] sm:$0xff] %v561_v58  ;;  %564 = vst [vmem:[%s2393_s10 + $0x1a8] sm:$0xff] %v563_v59  ;;  %v565_v60 = vld [vmem:[%s2388_s28 + $0x360] sm:$0xff]  ;;  %v567_v61 = vld [vmem:[%s2388_s28 + $0x370] sm:$0xff] }
  0x4f   : > { %v569_v62 = vld [vmem:[%s2388_s28 + $0x380] sm:$0xff]  ;;  %566 = vst [vmem:[%s2393_s10 + $0x1b0] sm:$0xff] %v565_v60  ;;  %568 = vst [vmem:[%s2393_s10 + $0x1b8] sm:$0xff] %v567_v61  ;;  %v571_v63 = vld [vmem:[%s2388_s28 + $0x390] sm:$0xff] }
  0x50   : > { %570 = vst [vmem:[%s2393_s10 + $0x1c0] sm:$0xff] %v569_v62  ;;  %v573_v0 = vld [vmem:[%s2388_s28 + $0x3a0] sm:$0xff]  ;;  %v575_v1 = vld [vmem:[%s2388_s28 + $0x3b0] sm:$0xff]  ;;  %572 = vst [vmem:[%s2393_s10 + $0x1c8] sm:$0xff] %v571_v63 }
  0x51   : > { %574 = vst [vmem:[%s2393_s10 + $0x1d0] sm:$0xff] %v573_v0  ;;  %576 = vst [vmem:[%s2393_s10 + $0x1d8] sm:$0xff] %v575_v1  ;;  %v577_v2 = vld [vmem:[%s2388_s28 + $0x3c0] sm:$0xff]  ;;  %v579_v3 = vld [vmem:[%s2388_s28 + $0x3d0] sm:$0xff] }
  0x52   : > { %v581_v4 = vld [vmem:[%s2388_s28 + $0x3e0] sm:$0xff]  ;;  %578 = vst [vmem:[%s2393_s10 + $0x1e0] sm:$0xff] %v577_v2  ;;  %580 = vst [vmem:[%s2393_s10 + $0x1e8] sm:$0xff] %v579_v3  ;;  %v583_v5 = vld [vmem:[%s2388_s28 + $0x3f0] sm:$0xff] }
  0x53   : > { %582 = vst [vmem:[%s2393_s10 + $0x1f0] sm:$0xff] %v581_v4  ;;  %v585_v6 = vld [vmem:[%s2388_s28 + $0x400] sm:$0xff]  ;;  %v587_v7 = vld [vmem:[%s2388_s28 + $0x410] sm:$0xff]  ;;  %584 = vst [vmem:[%s2393_s10 + $0x1f8] sm:$0xff] %v583_v5 }
  0x54   : > { %586 = vst [vmem:[%s2393_s10 + $0x200] sm:$0xff] %v585_v6  ;;  %588 = vst [vmem:[%s2393_s10 + $0x208] sm:$0xff] %v587_v7  ;;  %v589_v8 = vld [vmem:[%s2388_s28 + $0x420] sm:$0xff]  ;;  %v591_v9 = vld [vmem:[%s2388_s28 + $0x430] sm:$0xff] }
  0x55   : > { %v593_v10 = vld [vmem:[%s2388_s28 + $0x440] sm:$0xff]  ;;  %590 = vst [vmem:[%s2393_s10 + $0x210] sm:$0xff] %v589_v8  ;;  %592 = vst [vmem:[%s2393_s10 + $0x218] sm:$0xff] %v591_v9  ;;  %v595_v11 = vld [vmem:[%s2388_s28 + $0x450] sm:$0xff] }
  0x56   : > { %594 = vst [vmem:[%s2393_s10 + $0x220] sm:$0xff] %v593_v10  ;;  %v597_v12 = vld [vmem:[%s2388_s28 + $0x460] sm:$0xff]  ;;  %v599_v13 = vld [vmem:[%s2388_s28 + $0x470] sm:$0xff]  ;;  %596 = vst [vmem:[%s2393_s10 + $0x228] sm:$0xff] %v595_v11 }
  0x57   : > { %598 = vst [vmem:[%s2393_s10 + $0x230] sm:$0xff] %v597_v12  ;;  %600 = vst [vmem:[%s2393_s10 + $0x238] sm:$0xff] %v599_v13  ;;  %v601_v14 = vld [vmem:[%s2388_s28 + $0x480] sm:$0xff]  ;;  %v603_v15 = vld [vmem:[%s2388_s28 + $0x490] sm:$0xff] }
  0x58   : > { %v605_v16 = vld [vmem:[%s2388_s28 + $0x4a0] sm:$0xff]  ;;  %602 = vst [vmem:[%s2393_s10 + $0x240] sm:$0xff] %v601_v14  ;;  %604 = vst [vmem:[%s2393_s10 + $0x248] sm:$0xff] %v603_v15  ;;  %v607_v17 = vld [vmem:[%s2388_s28 + $0x4b0] sm:$0xff] }
  0x59   : > { %606 = vst [vmem:[%s2393_s10 + $0x250] sm:$0xff] %v605_v16  ;;  %v609_v18 = vld [vmem:[%s2388_s28 + $0x4c0] sm:$0xff]  ;;  %v611_v19 = vld [vmem:[%s2388_s28 + $0x4d0] sm:$0xff]  ;;  %608 = vst [vmem:[%s2393_s10 + $0x258] sm:$0xff] %v607_v17 }
  0x5a   : > { %610 = vst [vmem:[%s2393_s10 + $0x260] sm:$0xff] %v609_v18  ;;  %612 = vst [vmem:[%s2393_s10 + $0x268] sm:$0xff] %v611_v19  ;;  %v613_v20 = vld [vmem:[%s2388_s28 + $0x4e0] sm:$0xff]  ;;  %v615_v21 = vld [vmem:[%s2388_s28 + $0x4f0] sm:$0xff] }
  0x5b   : > { %v617_v22 = vld [vmem:[%s2388_s28 + $0x500] sm:$0xff]  ;;  %614 = vst [vmem:[%s2393_s10 + $0x270] sm:$0xff] %v613_v20  ;;  %616 = vst [vmem:[%s2393_s10 + $0x278] sm:$0xff] %v615_v21  ;;  %v619_v23 = vld [vmem:[%s2388_s28 + $0x510] sm:$0xff] }
  0x5c   : > { %618 = vst [vmem:[%s2393_s10 + $0x280] sm:$0xff] %v617_v22  ;;  %v621_v24 = vld [vmem:[%s2388_s28 + $0x520] sm:$0xff]  ;;  %v623_v25 = vld [vmem:[%s2388_s28 + $0x530] sm:$0xff]  ;;  %620 = vst [vmem:[%s2393_s10 + $0x288] sm:$0xff] %v619_v23 }
  0x5d   : > { %622 = vst [vmem:[%s2393_s10 + $0x290] sm:$0xff] %v621_v24  ;;  %624 = vst [vmem:[%s2393_s10 + $0x298] sm:$0xff] %v623_v25  ;;  %v625_v26 = vld [vmem:[%s2388_s28 + $0x540] sm:$0xff]  ;;  %v627_v27 = vld [vmem:[%s2388_s28 + $0x550] sm:$0xff] }
  0x5e   : > { %v629_v28 = vld [vmem:[%s2388_s28 + $0x560] sm:$0xff]  ;;  %626 = vst [vmem:[%s2393_s10 + $0x2a0] sm:$0xff] %v625_v26  ;;  %628 = vst [vmem:[%s2393_s10 + $0x2a8] sm:$0xff] %v627_v27  ;;  %v631_v29 = vld [vmem:[%s2388_s28 + $0x570] sm:$0xff] }
  0x5f   : > { %630 = vst [vmem:[%s2393_s10 + $0x2b0] sm:$0xff] %v629_v28  ;;  %v633_v30 = vld [vmem:[%s2388_s28 + $0x580] sm:$0xff]  ;;  %v635_v31 = vld [vmem:[%s2388_s28 + $0x590] sm:$0xff]  ;;  %632 = vst [vmem:[%s2393_s10 + $0x2b8] sm:$0xff] %v631_v29 }
  0x60   : > { %634 = vst [vmem:[%s2393_s10 + $0x2c0] sm:$0xff] %v633_v30  ;;  %636 = vst [vmem:[%s2393_s10 + $0x2c8] sm:$0xff] %v635_v31  ;;  %v637_v32 = vld [vmem:[%s2388_s28 + $0x5a0] sm:$0xff]  ;;  %v639_v33 = vld [vmem:[%s2388_s28 + $0x5b0] sm:$0xff] }
  0x61   : > { %v641_v34 = vld [vmem:[%s2388_s28 + $0x5c0] sm:$0xff]  ;;  %638 = vst [vmem:[%s2393_s10 + $0x2d0] sm:$0xff] %v637_v32  ;;  %640 = vst [vmem:[%s2393_s10 + $0x2d8] sm:$0xff] %v639_v33  ;;  %v643_v35 = vld [vmem:[%s2388_s28 + $0x5d0] sm:$0xff] }
  0x62   : > { %642 = vst [vmem:[%s2393_s10 + $0x2e0] sm:$0xff] %v641_v34  ;;  %v645_v36 = vld [vmem:[%s2388_s28 + $0x5e0] sm:$0xff]  ;;  %v647_v37 = vld [vmem:[%s2388_s28 + $0x5f0] sm:$0xff]  ;;  %644 = vst [vmem:[%s2393_s10 + $0x2e8] sm:$0xff] %v643_v35 }
  0x63   : > { %646 = vst [vmem:[%s2393_s10 + $0x2f0] sm:$0xff] %v645_v36  ;;  %648 = vst [vmem:[%s2393_s10 + $0x2f8] sm:$0xff] %v647_v37 }
  0x64 PF: > { %662 = sbr.rel (!%p2364_p11) target bundleno = 105 (0x69), region = 85  ;;  %s664_s0 = sand.u32 (%p2364_p11), 1, %s2200_s16  }
  0x65   : > { %s1900_s27 = sshll.u32 (%p2364_p11), %s2232_s24, 3  ;;  %s1780_s26 = sshll.u32 (%p2364_p11), %s664_s0, 4 }
  0x66   : > { %s672_s6 = scalar_lea.vmem (%p2364_p11), %s2772_s3, %s1900_s27  ;;  %s666_s8 = scalar_lea.vmem (%p2364_p11), [#allocation5], %s1780_s26 }
  0x67   : > { %v703_v38 = vld [vmem:[%s672_s6] sm:$0xff] (%p2364_p11)  ;;  %v705_v39 = vld [vmem:[%s672_s6 + $0x10] sm:$0xff] (%p2364_p11) }
  0x68   : > { %704 = vst [vmem:[%s666_s8] sm:$0xff] (%p2364_p11), %v703_v38  ;;  %706 = vst [vmem:[%s666_s8 + $0x8] sm:$0xff] (%p2364_p11), %v705_v39 }
  0x69 PF: > { %p1783_p1 = scmp.ge.s32.totalorder %s2236_s25, 1  ;;  %p711_p2 = scmp.lt.s32.totalorder %s2236_s25, 13 }
  0x6b   : > { %p712_p3 = pnand %p1783_p1, %p711_p2 }
  0x6c   : > { %s718_s14 = sand.u32 (!%p712_p3), 1, %s2212_s19   ;;  %s725_s9 = sand.u32 (!%p712_p3), 1, %s2204_s17  }
  0x6d   : > { %715 = sbr.rel (%p712_p3) target bundleno = 483 (0x1e3), region = 123  ;;  %s732_s28 = sand.u32 (!%p712_p3), 1, %s2196_s15  }
  0x6e   : > { %s1906_s11 = smul.u32 (!%p712_p3), 48, %s718_s14  ;;  %s2596_s0 = sshll.u32 (!%p712_p3), %s732_s28, 4 }
  0x6f   : > { %s1907_s10 = smul.u32 (!%p712_p3), 768, %s725_s9  ;;  %s1786_s27 = sshll.u32 (!%p712_p3), %s2224_s22, 1 }
  0x70   : > { %p773_p4 = scmp.lt.s32.totalorder (!%p712_p3), %s1786_s27, 3  ;;  %s2605_s6 = scalar_lea.vmem (!%p712_p3), [#allocation3], %s1906_s11 }
  0x71   : > { %s2607_s19 = scalar_lea.vmem (!%p712_p3), [#allocation4], %s1907_s10  ;;  %s734_s17 = scalar_lea.vmem (!%p712_p3), [#allocation5], %s2596_s0 }
  0x72   : > { %s2803_s27 = smov (!%p773_p4, %s1786_s27), 3  ;;  %s2611_s15 = scalar_lea.vmem [#allocation6], %s2596_s0 }
  0x73   : > { %s775_s30 = scalar_lea.vmem %s2771_s2, %s2803_s27  ;;  %p1787_p5 = scmp.ne.s32.totalorder %s2220_s21, 0 }
  0x75   : > { %784 = sbr.rel (%p1787_p5) target bundleno = 125 (0x7d), region = 139 }
  0x7a   : > { %v2238_v40 = vmov 0.0  }
  0x7b   : > { %785 = vst [vmem:[#allocation2 + $0x10] sm:$0xff] %v2238_v40  ;;  %786 = vst [vmem:[#allocation2] sm:$0xff] %v2238_v40 }
  0x7c   : > { %787 = vst [vmem:[#allocation2 + $0x18] sm:$0xff] %v2238_v40  ;;  %788 = vst [vmem:[#allocation2 + $0x8] sm:$0xff] %v2238_v40 }
  0x7d PF: > { %v1997_v41 = vld [vmem:[%s2607_s19 + $0x74] ss:$8 sps:$4 sm:$0xff]   ;;  %v2001_v43 = vld [vmem:[%s2607_s19 + $0x70] ss:$8 sps:$4 sm:$0xff]   ;;  %v2003_v45 = vld [vmem:[%s2607_s19 + $0x64] ss:$8 sps:$4 sm:$0xff]  }
  0x7e   : > { %v1999_v42 = vld [vmem:[%s2607_s19 + $0x174] ss:$8 sps:$4 sm:$0xff]   ;;  %1405 = vmatprep.subr.bf16.mxu0 %v1997_v41  ;;  %v2002_v44 = vld [vmem:[%s2607_s19 + $0x170] ss:$8 sps:$4 sm:$0xff]   ;;  %v2005_v46 = vld [vmem:[%s2607_s19 + $0x164] ss:$8 sps:$4 sm:$0xff]  }
  0x7f   : > { %1448 = vmatprep.subr.bf16.mxu1 %v1999_v42  ;;  %1406 = vmatpush1.bf16.msra.mxu0 %v2001_v43  ;;  %v2007_v47 = vld [vmem:[%s2607_s19 + $0x60] ss:$8 sps:$4 sm:$0xff]   ;;  %v2009_v49 = vld [vmem:[%s2607_s19 + $0x54] ss:$8 sps:$4 sm:$0xff]   ;;  %v2013_v51 = vld [vmem:[%s2607_s19 + $0x50] ss:$8 sps:$4 sm:$0xff]  }
  0x80   : > { %1449 = vmatpush1.bf16.msra.mxu1 %v2002_v44  ;;  %1407 = vmatprep.subr.bf16.mxu0 %v2003_v45  ;;  %v2008_v48 = vld [vmem:[%s2607_s19 + $0x160] ss:$8 sps:$4 sm:$0xff]   ;;  %v2011_v50 = vld [vmem:[%s2607_s19 + $0x154] ss:$8 sps:$4 sm:$0xff]   ;;  %v2014_v52 = vld [vmem:[%s2607_s19 + $0x150] ss:$8 sps:$4 sm:$0xff]  }
  0x81   : > { %1450 = vmatprep.subr.bf16.mxu1 %v2005_v46  ;;  %v2015_v53 = vld [vmem:[%s2607_s19 + $0x44] ss:$8 sps:$4 sm:$0xff]   ;;  %v2019_v55 = vld [vmem:[%s2607_s19 + $0x40] ss:$8 sps:$4 sm:$0xff]   ;;  %v2021_v57 = vld [vmem:[%s2607_s19 + $0x34] ss:$8 sps:$4 sm:$0xff]  }
  0x82   : > { %v2017_v54 = vld [vmem:[%s2607_s19 + $0x144] ss:$8 sps:$4 sm:$0xff]   ;;  %v2020_v56 = vld [vmem:[%s2607_s19 + $0x140] ss:$8 sps:$4 sm:$0xff]   ;;  %v2023_v58 = vld [vmem:[%s2607_s19 + $0x134] ss:$8 sps:$4 sm:$0xff]  }
  0x83   : > { %1408 = vmatpush1.bf16.msra.mxu0 %v2007_v47  ;;  %v2025_v59 = vld [vmem:[%s2607_s19 + $0x30] ss:$8 sps:$4 sm:$0xff]   ;;  %v2027_v61 = vld [vmem:[%s2607_s19 + $0x24] ss:$8 sps:$4 sm:$0xff]   ;;  %v2031_v63 = vld [vmem:[%s2607_s19 + $0x20] ss:$8 sps:$4 sm:$0xff]  }
  0x84   : > { %1451 = vmatpush1.bf16.msra.mxu1 %v2008_v48  ;;  %1409 = vmatprep.subr.bf16.mxu0 %v2009_v49  ;;  %v2026_v60 = vld [vmem:[%s2607_s19 + $0x130] ss:$8 sps:$4 sm:$0xff]   ;;  %v2029_v62 = vld [vmem:[%s2607_s19 + $0x124] ss:$8 sps:$4 sm:$0xff]   ;;  %v2032_v0 = vld [vmem:[%s2607_s19 + $0x120] ss:$8 sps:$4 sm:$0xff]  }
  0x85   : > { %1452 = vmatprep.subr.bf16.mxu1 %v2011_v50  ;;  %v2033_v1 = vld [vmem:[%s2607_s19 + $0x14] ss:$8 sps:$4 sm:$0xff]   ;;  %v2037_v3 = vld [vmem:[%s2607_s19 + $0x10] ss:$8 sps:$4 sm:$0xff]   ;;  %v2039_v5 = vld [vmem:[%s2607_s19 + $0x4] ss:$8 sps:$4 sm:$0xff]  }
  0x86   : > { %v2035_v2 = vld [vmem:[%s2607_s19 + $0x114] ss:$8 sps:$4 sm:$0xff]   ;;  %v2038_v4 = vld [vmem:[%s2607_s19 + $0x110] ss:$8 sps:$4 sm:$0xff]   ;;  %v2041_v6 = vld [vmem:[%s2607_s19 + $0x104] ss:$8 sps:$4 sm:$0xff]  }
  0x87   : > { %1410 = vmatpush1.bf16.msra.mxu0 %v2013_v51  ;;  %v2043_v7 = vld [vmem:[%s2607_s19] ss:$8 sps:$4 sm:$0xff]   ;;  %v2045_v9 = vld [vmem:[%s2607_s19 + $0xf4] ss:$8 sps:$4 sm:$0xff]   ;;  %v2049_v11 = vld [vmem:[%s2607_s19 + $0xf0] ss:$8 sps:$4 sm:$0xff]  }
  0x88   : > { %1453 = vmatpush1.bf16.msra.mxu1 %v2014_v52  ;;  %1411 = vmatprep.subr.bf16.mxu0 %v2015_v53  ;;  %v2044_v8 = vld [vmem:[%s2607_s19 + $0x100] ss:$8 sps:$4 sm:$0xff]   ;;  %v2047_v10 = vld [vmem:[%s2607_s19 + $0x1f4] ss:$8 sps:$4 sm:$0xff]   ;;  %v2050_v12 = vld [vmem:[%s2607_s19 + $0x1f0] ss:$8 sps:$4 sm:$0xff]  }
  0x89   : > { %1454 = vmatprep.subr.bf16.mxu1 %v2017_v54  ;;  %v2051_v13 = vld [vmem:[%s2607_s19 + $0xe4] ss:$8 sps:$4 sm:$0xff]   ;;  %v2055_v15 = vld [vmem:[%s2607_s19 + $0xe0] ss:$8 sps:$4 sm:$0xff]   ;;  %v2057_v17 = vld [vmem:[%s2607_s19 + $0xd4] ss:$8 sps:$4 sm:$0xff]  }
  0x8a   : > { %v2053_v14 = vld [vmem:[%s2607_s19 + $0x1e4] ss:$8 sps:$4 sm:$0xff]   ;;  %v2056_v16 = vld [vmem:[%s2607_s19 + $0x1e0] ss:$8 sps:$4 sm:$0xff]   ;;  %v2059_v18 = vld [vmem:[%s2607_s19 + $0x1d4] ss:$8 sps:$4 sm:$0xff]  }
  0x8b   : > { %1412 = vmatpush1.bf16.msra.mxu0 %v2019_v55  ;;  %v2061_v19 = vld [vmem:[%s2607_s19 + $0xd0] ss:$8 sps:$4 sm:$0xff]   ;;  %v2063_v21 = vld [vmem:[%s2607_s19 + $0xc4] ss:$8 sps:$4 sm:$0xff]   ;;  %v2067_v23 = vld [vmem:[%s2607_s19 + $0xc0] ss:$8 sps:$4 sm:$0xff]  }
  0x8c   : > { %1455 = vmatpush1.bf16.msra.mxu1 %v2020_v56  ;;  %1413 = vmatprep.subr.bf16.mxu0 %v2021_v57  ;;  %v2062_v20 = vld [vmem:[%s2607_s19 + $0x1d0] ss:$8 sps:$4 sm:$0xff]   ;;  %v2065_v22 = vld [vmem:[%s2607_s19 + $0x1c4] ss:$8 sps:$4 sm:$0xff]   ;;  %v2068_v24 = vld [vmem:[%s2607_s19 + $0x1c0] ss:$8 sps:$4 sm:$0xff]  }
  0x8d   : > { %1456 = vmatprep.subr.bf16.mxu1 %v2023_v58  ;;  %v2069_v25 = vld [vmem:[%s2607_s19 + $0xb4] ss:$8 sps:$4 sm:$0xff]   ;;  %v2073_v29 = vld [vmem:[%s2607_s19 + $0xb0] ss:$8 sps:$4 sm:$0xff]   ;;  %v2075_v31 = vld [vmem:[%s2607_s19 + $0xa4] ss:$8 sps:$4 sm:$0xff]  }
  0x8e   : > { %v2095_v26 = vld [vmem:[%s2605_s6 + $0x4] ss:$24 sps:$4 sm:$0xff]   ;;  %v2074_v30 = vld [vmem:[%s2607_s19 + $0x1b0] ss:$8 sps:$4 sm:$0xff]   ;;  %v2079_v33 = vld [vmem:[%s2607_s19 + $0xa0] ss:$8 sps:$4 sm:$0xff]  }
  0x8f   : > { %1414 = vmatpush1.bf16.msra.mxu0 %v2025_v59  ;;  %v2071_v27 = vld [vmem:[%s2607_s19 + $0x1b4] ss:$8 sps:$4 sm:$0xff]   ;;  %1437 = vmatprep.mubr.bf16.mxu0 %v2095_v26  ;;  %v2077_v32 = vld [vmem:[%s2607_s19 + $0x1a4] ss:$8 sps:$4 sm:$0xff]   ;;  %v2080_v34 = vld [vmem:[%s2607_s19 + $0x1a0] ss:$8 sps:$4 sm:$0xff]  }
  0x90   : > { %1457 = vmatpush1.bf16.msra.mxu1 %v2026_v60  ;;  %1415 = vmatprep.subr.bf16.mxu0 %v2027_v61  ;;  %v2098_v28 = vld [vmem:[%s2605_s6 + $0xc] ss:$24 sps:$4 sm:$0xff]   ;;  %v2085_v37 = vld [vmem:[%s2607_s19 + $0x90] ss:$8 sps:$4 sm:$0xff]   ;;  %v2091_v41 = vld [vmem:[%s2607_s19 + $0x80] ss:$8 sps:$4 sm:$0xff]  }
  0x91   : > { %1458 = vmatprep.subr.bf16.mxu1 %v2029_v62  ;;  %1480 = vmatprep.mubr.bf16.mxu1 %v2098_v28  ;;  %v2081_v35 = vld [vmem:[%s2607_s19 + $0x94] ss:$8 sps:$4 sm:$0xff]   ;;  %v2086_v38 = vld [vmem:[%s2607_s19 + $0x190] ss:$8 sps:$4 sm:$0xff]   ;;  %v2087_v39 = vld [vmem:[%s2607_s19 + $0x84] ss:$8 sps:$4 sm:$0xff]  }
  0x92   : > { %v2083_v36 = vld [vmem:[%s2607_s19 + $0x194] ss:$8 sps:$4 sm:$0xff]   ;;  %v2089_v40 = vld [vmem:[%s2607_s19 + $0x184] ss:$8 sps:$4 sm:$0xff]   ;;  %v2092_v42 = vld [vmem:[%s2607_s19 + $0x180] ss:$8 sps:$4 sm:$0xff]  }
  0x93   : > { %1416 = vmatpush1.bf16.msra.mxu0 %v2031_v63  ;;  %v2101_v43 = vld [vmem:[%s2607_s19 + $0x274] ss:$8 sps:$4 sm:$0xff]   ;;  %v2093_v44 = vld [vmem:[%s2605_s6] ss:$24 sps:$4 sm:$0xff]   ;;  %v2104_v47 = vld [vmem:[%s2607_s19 + $0x264] ss:$8 sps:$4 sm:$0xff]  }
  0x94   : > { %1459 = vmatpush1.bf16.msra.mxu1 %v2032_v0  ;;  %1417 = vmatprep.subr.bf16.mxu0 %v2033_v1  ;;  %v2096_v45 = vld [vmem:[%s2605_s6 + $0x8] ss:$24 sps:$4 sm:$0xff]   ;;  %v2149_v48 = vld [vmem:[%s2605_s6 + $0x14] ss:$24 sps:$4 sm:$0xff]   ;;  %p1890_p6 = scmp.ne.s32.totalorder %s2220_s21, 5 }
  0x95   : > { %1460 = vmatprep.subr.bf16.mxu1 %v2035_v2  ;;  %v2099_v46 = vld [vmem:[%s2607_s19 + $0x270] ss:$8 sps:$4 sm:$0xff]   ;;  %v2102_v49 = vld [vmem:[%s2607_s19 + $0x260] ss:$8 sps:$4 sm:$0xff]   ;;  %v2107_v50 = vld [vmem:[%s2607_s19 + $0x254] ss:$8 sps:$4 sm:$0xff]  }
  0x96   : > { %v2105_v51 = vld [vmem:[%s2607_s19 + $0x250] ss:$8 sps:$4 sm:$0xff]   ;;  %v2110_v52 = vld [vmem:[%s2607_s19 + $0x244] ss:$8 sps:$4 sm:$0xff]   ;;  %v2108_v53 = vld [vmem:[%s2607_s19 + $0x240] ss:$8 sps:$4 sm:$0xff]  }
  0x97   : > { %1418 = vmatpush1.bf16.msra.mxu0 %v2037_v3  ;;  %v2113_v54 = vld [vmem:[%s2607_s19 + $0x234] ss:$8 sps:$4 sm:$0xff]   ;;  %v2111_v55 = vld [vmem:[%s2607_s19 + $0x230] ss:$8 sps:$4 sm:$0xff]   ;;  %v2116_v56 = vld [vmem:[%s2607_s19 + $0x224] ss:$8 sps:$4 sm:$0xff]  }
  0x98   : > { %1461 = vmatpush1.bf16.msra.mxu1 %v2038_v4  ;;  %1419 = vmatprep.subr.bf16.mxu0 %v2039_v5  ;;  %v2114_v57 = vld [vmem:[%s2607_s19 + $0x220] ss:$8 sps:$4 sm:$0xff]   ;;  %v2119_v58 = vld [vmem:[%s2607_s19 + $0x214] ss:$8 sps:$4 sm:$0xff]   ;;  %v2117_v59 = vld [vmem:[%s2607_s19 + $0x210] ss:$8 sps:$4 sm:$0xff]  }
  0x99   : > { %1462 = vmatprep.subr.bf16.mxu1 %v2041_v6  ;;  %v2122_v60 = vld [vmem:[%s2607_s19 + $0x204] ss:$8 sps:$4 sm:$0xff]   ;;  %v2120_v61 = vld [vmem:[%s2607_s19 + $0x200] ss:$8 sps:$4 sm:$0xff]   ;;  %v2125_v62 = vld [vmem:[%s2607_s19 + $0x2f4] ss:$8 sps:$4 sm:$0xff]  }
  0x9a   : > { %v2123_v63 = vld [vmem:[%s2607_s19 + $0x2f0] ss:$8 sps:$4 sm:$0xff]   ;;  %v2128_v0 = vld [vmem:[%s2607_s19 + $0x2e4] ss:$8 sps:$4 sm:$0xff]   ;;  %v2126_v1 = vld [vmem:[%s2607_s19 + $0x2e0] ss:$8 sps:$4 sm:$0xff]  }
  0x9b   : > { %1420 = vmatpush1.bf16.msra.mxu0 %v2043_v7  ;;  %v2131_v2 = vld [vmem:[%s2607_s19 + $0x2d4] ss:$8 sps:$4 sm:$0xff]   ;;  %v2129_v3 = vld [vmem:[%s2607_s19 + $0x2d0] ss:$8 sps:$4 sm:$0xff]   ;;  %v2134_v4 = vld [vmem:[%s2607_s19 + $0x2c4] ss:$8 sps:$4 sm:$0xff]  }
  0x9c   : > { %1463 = vmatpush1.bf16.msra.mxu1 %v2044_v8  ;;  %1421 = vmatprep.subr.bf16.mxu0 %v2045_v9  ;;  %v2132_v5 = vld [vmem:[%s2607_s19 + $0x2c0] ss:$8 sps:$4 sm:$0xff]   ;;  %v2137_v6 = vld [vmem:[%s2607_s19 + $0x2b4] ss:$8 sps:$4 sm:$0xff]   ;;  %v2135_v7 = vld [vmem:[%s2607_s19 + $0x2b0] ss:$8 sps:$4 sm:$0xff]  }
  0x9d   : > { %1464 = vmatprep.subr.bf16.mxu1 %v2047_v10  ;;  %v2140_v8 = vld [vmem:[%s2607_s19 + $0x2a4] ss:$8 sps:$4 sm:$0xff]   ;;  %v2138_v9 = vld [vmem:[%s2607_s19 + $0x2a0] ss:$8 sps:$4 sm:$0xff]   ;;  %v2143_v10 = vld [vmem:[%s2607_s19 + $0x294] ss:$8 sps:$4 sm:$0xff]  }
  0x9e   : > { %v790_v28 = vld [vmem:[#allocation2] sm:$0xff] }
  0x9f   : > { %1422 = vmatpush2.bf16.msra.mxu0 %v2049_v11  ;;  %v2141_v11 = vld [vmem:[%s2607_s19 + $0x290] ss:$8 sps:$4 sm:$0xff]  }
  0xa0   : > { %1465 = vmatpush2.bf16.msra.mxu1 %v2050_v12  ;;  %1423 = vmatprep.subr.bf16.mxu0 %v2051_v13  ;;  %v2146_v12 = vld [vmem:[%s2607_s19 + $0x284] ss:$8 sps:$4 sm:$0xff]   ;;  %v2144_v13 = vld [vmem:[%s2607_s19 + $0x280] ss:$8 sps:$4 sm:$0xff]  }
  0xa1   : > { %1466 = vmatprep.subr.bf16.mxu1 %v2053_v14  ;;  %v2147_v14 = vld [vmem:[%s2605_s6 + $0x10] ss:$24 sps:$4 sm:$0xff]  }
  0xa3   : > { %1424 = vmatpush2.bf16.msra.mxu0 %v2055_v15 }
  0xa4   : > { %1467 = vmatpush2.bf16.msra.mxu1 %v2056_v16  ;;  %1425 = vmatprep.subr.bf16.mxu0 %v2057_v17 }
  0xa5   : > { %1468 = vmatprep.subr.bf16.mxu1 %v2059_v18 }
  0xa7   : > { %1426 = vmatpush2.bf16.msra.mxu0 %v2061_v19 }
  0xa8   : > { %1469 = vmatpush2.bf16.msra.mxu1 %v2062_v20  ;;  %1427 = vmatprep.subr.bf16.mxu0 %v2063_v21 }
  0xa9   : > { %1470 = vmatprep.subr.bf16.mxu1 %v2065_v22 }
  0xab   : > { %1428 = vmatpush2.bf16.msra.mxu0 %v2067_v23  ;;  %v789_v23 = vld [vmem:[#allocation2 + $0x10] sm:$0xff] }
  0xac   : > { %1471 = vmatpush2.bf16.msra.mxu1 %v2068_v24  ;;  %1429 = vmatprep.subr.bf16.mxu0 %v2069_v25 }
  0xad   : > { %1472 = vmatprep.subr.bf16.mxu1 %v2071_v27 }
  0xaf   : > { %1430 = vmatpush2.bf16.msra.mxu0 %v2073_v29 }
  0xb0   : > { %1473 = vmatpush2.bf16.msra.mxu1 %v2074_v30  ;;  %1431 = vmatprep.subr.bf16.mxu0 %v2075_v31 }
  0xb1   : > { %1474 = vmatprep.subr.bf16.mxu1 %v2077_v32 }
  0xb3   : > { %1432 = vmatpush2.bf16.msra.mxu0 %v2079_v33  ;;  %v791_v33 = vld [vmem:[#allocation2 + $0x18] sm:$0xff] }
  0xb4   : > { %1475 = vmatpush2.bf16.msra.mxu1 %v2080_v34  ;;  %1433 = vmatprep.subr.bf16.mxu0 %v2081_v35 }
  0xb5   : > { %1476 = vmatprep.subr.bf16.mxu1 %v2083_v36 }
  0xb7   : > { %1434 = vmatpush2.bf16.msra.mxu0 %v2085_v37 }
  0xb8   : > { %1477 = vmatpush2.bf16.msra.mxu1 %v2086_v38  ;;  %1435 = vmatprep.subr.bf16.mxu0 %v2087_v39  ;;  %v792_v38 = vld [vmem:[#allocation2 + $0x8] sm:$0xff] }
  0xb9   : > { %1478 = vmatprep.subr.bf16.mxu1 %v2089_v40 }
  0xbb   : > { %1436 = vmatpush2.bf16.msra.mxu0 %v2091_v41 }
  0xbc   : > { %1479 = vmatpush2.bf16.msra.mxu1 %v2092_v42  ;;  %1491 = vmatprep.subr.bf16.mxu0 %v2101_v43 }
  0xbe   : > { %1438 = vmatmul.mubr.bf16.vlgmr.msra.gmra.mxu0 %v2093_v44 }
  0xbf   : > { %1481 = vmatmul.mubr.bf16.vlgmr.msra.gmra.mxu1 %v2096_v45  ;;  %1492 = vmatpush1.bf16.msra.mxu0 %v2099_v46 }
  0xc0   : > { %1493 = vmatprep.subr.bf16.mxu0 %v2104_v47  ;;  %1523 = vmatprep.mubr.bf16.mxu0 %v2149_v48 }
  0xc3   : > { %1494 = vmatpush1.bf16.msra.mxu0 %v2102_v49 }
  0xc4   : > { %1495 = vmatprep.subr.bf16.mxu0 %v2107_v50 }
  0xc7   : > { %1496 = vmatpush1.bf16.msra.mxu0 %v2105_v51 }
  0xc8   : > { %1497 = vmatprep.subr.bf16.mxu0 %v2110_v52 }
  0xcb   : > { %1498 = vmatpush1.bf16.msra.mxu0 %v2108_v53 }
  0xcc   : > { %1499 = vmatprep.subr.bf16.mxu0 %v2113_v54 }
  0xcf   : > { %1500 = vmatpush1.bf16.msra.mxu0 %v2111_v55 }
  0xd0   : > { %1501 = vmatprep.subr.bf16.mxu0 %v2116_v56 }
  0xd3   : > { %1502 = vmatpush1.bf16.msra.mxu0 %v2114_v57 }
  0xd4   : > { %1503 = vmatprep.subr.bf16.mxu0 %v2119_v58 }
  0xd7   : > { %1504 = vmatpush1.bf16.msra.mxu0 %v2117_v59 }
  0xd8   : > { %1505 = vmatprep.subr.bf16.mxu0 %v2122_v60 }
  0xdb   : > { %1506 = vmatpush1.bf16.msra.mxu0 %v2120_v61 }
  0xdc   : > { %1507 = vmatprep.subr.bf16.mxu0 %v2125_v62 }
  0xdf   : > { %1508 = vmatpush2.bf16.msra.mxu0 %v2123_v63 }
  0xe0   : > { %1509 = vmatprep.subr.bf16.mxu0 %v2128_v0 }
  0xe3   : > { %1510 = vmatpush2.bf16.msra.mxu0 %v2126_v1 }
  0xe4   : > { %1511 = vmatprep.subr.bf16.mxu0 %v2131_v2 }
  0xe7   : > { %1512 = vmatpush2.bf16.msra.mxu0 %v2129_v3 }
  0xe8   : > { %1513 = vmatprep.subr.bf16.mxu0 %v2134_v4 }
  0xeb   : > { %1514 = vmatpush2.bf16.msra.mxu0 %v2132_v5 }
  0xec   : > { %1515 = vmatprep.subr.bf16.mxu0 %v2137_v6 }
  0xef   : > { %1516 = vmatpush2.bf16.msra.mxu0 %v2135_v7 }
  0xf0   : > { %1517 = vmatprep.subr.bf16.mxu0 %v2140_v8 }
  0xf3   : > { %1518 = vmatpush2.bf16.msra.mxu0 %v2138_v9 }
  0xf4   : > { %1519 = vmatprep.subr.bf16.mxu0 %v2143_v10 }
  0xf7   : > { %1520 = vmatpush2.bf16.msra.mxu0 %v2141_v11 }
  0xf8   : > { %1521 = vmatprep.subr.bf16.mxu0 %v2146_v12 }
  0xfb   : > { %1522 = vmatpush2.bf16.msra.mxu0 %v2144_v13 }
  0xfe   : > { %1524 = vmatmul.mubr.bf16.vlgmr.msra.gmra.mxu0 %v2147_v14 }
 0x17e   : > { %v1439_v15 = vpop.f32.mrf.mxu0 }
 0x17f   : > { %v1482_v16 = vpop.f32.mrf.mxu1 }
 0x180   : > { %v1441_v17 = vpop.f32.mrf.mxu0  ;;  %v1483_v22 = vadd.f32 %v1482_v16, %v1439_v15 }
 0x181   : > { %v1484_v18 = vpop.f32.mrf.mxu1 }
 0x182   : > { %v1443_v19 = vpop.f32.mrf.mxu0  ;;  %v1485_v25 = vadd.f32 %v1484_v18, %v1441_v17 }
 0x183   : > { %v1486_v20 = vpop.f32.mrf.mxu1 }
 0x184   : > { %v1445_v21 = vpop.f32.mrf.mxu0  ;;  %v1487_v30 = vadd.f32 %v1486_v20, %v1443_v19 }
 0x185   : > { %v1488_v27 = vpop.f32.mrf.mxu1 }
 0x186   : > { %v1489_v35 = vadd.f32 %v1488_v27, %v1445_v21 }
 0x1be   : > { %v1525_v24 = vpop.f32.mrf.mxu0 }
 0x1bf   : > { %v1526_v26 = vadd.f32 %v1525_v24, %v1483_v22 }
 0x1c0   : > { %v1527_v29 = vpop.f32.mrf.mxu0 }
 0x1c1   : > { %v1534_v31 = vadd.f32 %v1526_v26, %v789_v23  ;;  %v1528_v32 = vadd.f32 %v1527_v29, %v1485_v25 }
 0x1c2   : > { %v1529_v34 = vpop.f32.mrf.mxu0 }
 0x1c3   : > { %1538 = vst [vmem:[#allocation2 + $0x10] sm:$0xff] %v1534_v31  ;;  %v1535_v36 = vadd.f32 %v1528_v32, %v790_v28  ;;  %v1530_v37 = vadd.f32 %v1529_v34, %v1487_v30 }
 0x1c4   : > { %v1531_v39 = vpop.f32.mrf.mxu0 }
 0x1c5   : > { %1539 = vst [vmem:[#allocation2] sm:$0xff] %v1535_v36  ;;  %v1536_v40 = vadd.f32 %v1530_v37, %v791_v33  ;;  %v1532_v41 = vadd.f32 %v1531_v39, %v1489_v35  ;;  %1545 = sbr.rel (%p1890_p6) target bundleno = 475 (0x1db), region = 143 }
 0x1c7   : > { %1540 = vst [vmem:[#allocation2 + $0x18] sm:$0xff] %v1536_v40  ;;  %v1537_v42 = vadd.f32 %v1532_v41, %v792_v38 }
 0x1c9   : > { %1541 = vst [vmem:[#allocation2 + $0x8] sm:$0xff] %v1537_v42 }
 0x1ca   : > { %v1552_v43 = vlaneseq  ;;  %v1566_v45 = vld [vmem:[%s734_s17] sm:$0xff]  ;;  %v1567_v47 = vld [vmem:[%s734_s17 + $0x8] sm:$0xff] }
 0x1cb   : > { %v1550_v46 = vld [vmem:[%s775_s30] sm:$0x3]  ;;  %v1546_v48 = vld [vmem:[#allocation2 + $0x10] sm:$0xff]  ;;  %v1568_v52 = vunpack.c.l.bf16 %v1566_v45  ;;  %v1569_v53 = vunpack.c.h.bf16 %v1566_v45  ;;  %v1570_v58 = vunpack.c.l.bf16 %v1567_v47  ;;  %v1571_v59 = vunpack.c.h.bf16 %v1567_v47 }
 0x1cc   : > { %v1553_v44 = vshrl.u32 %v1552_v43, 7  ;;  %v1547_v51 = vld [vmem:[#allocation2] sm:$0xff] }
 0x1ce   : > { %v1554_v49 = vsub.s32 0, %v1553_v44  ;;  %v1558_v50 = vsub.s32 1, %v1553_v44  ;;  %v1548_v54 = vld [vmem:[#allocation2 + $0x18] sm:$0xff] }
 0x1d0   : > { %v1549_v55 = vld [vmem:[#allocation2 + $0x8] sm:$0xff]  ;;  %v1555_v56 = vrot.slane %v1550_v46, %v1554_v49  ;;  %v1559_v57 = vrot.slane %v1550_v46, %v1558_v50 }
 0x1d2   : > { %v1562_v60 = vadd.f32 %v1555_v56, %v1546_v48  ;;  %v1563_v61 = vadd.f32 %v1559_v57, %v1547_v51  ;;  %v1564_v62 = vadd.f32 %v1555_v56, %v1548_v54  ;;  %v1565_v63 = vadd.f32 %v1559_v57, %v1549_v55 }
 0x1d4   : > { %v1572_v0 = vadd.f32 %v1568_v52, %v1562_v60  ;;  %v1573_v1 = vadd.f32 %v1569_v53, %v1563_v61  ;;  %v1574_v2 = vadd.f32 %v1570_v58, %v1564_v62  ;;  %v1575_v3 = vadd.f32 %v1571_v59, %v1565_v63 }
 0x1d6   : > { %v1576_v4 = vmax.f32 %v1572_v0, 0.0  ;;  %v1577_v5 = vmax.f32 %v1573_v1, 0.0  ;;  %v1578_v6 = vmax.f32 %v1574_v2, 0.0  ;;  %v1579_v7 = vmax.f32 %v1575_v3, 0.0 }
 0x1d8   : > { %v1901_v8 = vpack.c.bf16 %v1577_v5, %v1576_v4  ;;  %v1902_v9 = vpack.c.bf16 %v1579_v7, %v1578_v6 }
 0x1da   : > { %1592 = vst [vmem:[%s2611_s15] sm:$0xff] %v1901_v8  ;;  %1593 = vst [vmem:[%s2611_s15 + $0x8] sm:$0xff] %v1902_v9 }
 0x1db PF: > { %1600 = sbr.rel (!%p2368_p13) target bundleno = 483 (0x1e3), region = 147  ;;  %s1903_s21 = sshll.u32 (%p2368_p13), %s2224_s22, 3 }
 0x1dc   : > { %s1606_s28 = scalar_lea.vmem (%p2368_p13), %s2773_s4, %s1903_s21 }
 0x1e1   : > { %v1637_v10 = vld [vmem:[%s2611_s15] sm:$0xff]  ;;  %v1639_v11 = vld [vmem:[%s2611_s15 + $0x8] sm:$0xff] }
 0x1e2   : > { %1638 = vst [vmem:[%s1606_s28] sm:$0xff] %v1637_v10  ;;  %1640 = vst [vmem:[%s1606_s28 + $0x10] sm:$0xff] %v1639_v11 }
 0x1e3 PF: > { %s14_s25 = sadd.s32 1, %s2236_s25   ;;  %s2784_s29 = sld [smem:[#allocation7_spill]] }
 0x1e4   : > { %p11_p7 = scmp.ge.s32.totalorder %s14_s25, 14   ;;  %s2785_s10 = sld [smem:[#allocation8_spill]] }
 0x1e5   : > { %s2786_s15 = smov %s2200_s16  ;;  %s2787_s16 = smov %s2360_s13 }
 0x1e6   : > { %s2788_s17 = smov %s2208_s18  ;;  %s2789_s18 = smov %s2357_s12 }
 0x1e7   : > { %s2790_s19 = smov %s2216_s20  ;;  %s2791_s20 = smov %s2341_s7 }
 0x1e8   : > { %s2792_s21 = smov %s2228_s23  ;;  %s2793_s22 = smov %s2232_s24 }
 0x1e9   : > { %s2794_s23 = smov %s2784_s29  ;;  %13 = sbr.rel (!%p11_p7) target bundleno = 8 (0x8), region = 235 }
 0x1ea   : > { %s2795_s24 = smov %s2785_s10 }

</bundles_post_ra>
